<compile_context>
chip_gen: v7x
topology: tpu7x:2x2x1
jax: 0.10.0
libtpu: 0.0.40
codegen_flags: <defaults>
</compile_context>

<pallas_src>
import functools
import math

import jax
import jax.numpy as jnp
from jax.experimental import pallas as pl
from jax.experimental.pallas import tpu as pltpu

LN_EPS = 1e-12      # ESPnet LayerNorm eps
BN_EPS = 1e-5       # torch BatchNorm1d eps


# --------------------------------------------------------------------------
# generation-aware configuration
# --------------------------------------------------------------------------

def _tpu_vmem_capacity():
    fn = getattr(pltpu, "get_tpu_info", None)
    if fn is not None:
        try:
            cap = getattr(fn(), "vmem_capacity_bytes", None)
            if cap:
                return int(cap)
        except Exception:
            pass
    return 128 * 1024 * 1024


_VMEM_CAP = _tpu_vmem_capacity()
# ~60% of physical VMEM: ~38 MiB on v7x (64 MiB/TC), ~76 MiB on v5e/v6e (128 MiB)
_VMEM_LIMIT = min(96 * 1024 * 1024, max(24 * 1024 * 1024, (_VMEM_CAP * 3) // 5))
# mem-bound kernels reach ~85% of HBM roofline at 512-row tiles; keep 256 on v7x
_SEQ_CAP = 512 if _VMEM_CAP >= (100 << 20) else 256
_FLASH_CAP = 256


def _probe_single_buffer():
    """Probe whether pipeline_mode=pl.Buffered(1) lowers on this backend."""
    if not hasattr(pl, "Buffered"):
        return False

    def _copy(x_ref, o_ref):
        o_ref[...] = x_ref[...]

    try:
        spec = pl.BlockSpec((8, 128), lambda i: (0, 0),
                            pipeline_mode=pl.Buffered(1))
        fn = pl.pallas_call(
            _copy,
            out_shape=jax.ShapeDtypeStruct((8, 128), jnp.float32),
            grid=(1,),
            in_specs=[spec],
            out_specs=pl.BlockSpec((8, 128), lambda i: (0, 0)))
        jax.jit(fn).lower(jnp.zeros((8, 128), jnp.float32)).compile()
        return True
    except Exception:
        return False


_SINGLE_BUFFER_OK = _probe_single_buffer()


def _const_spec(block_shape):
    """BlockSpec for a grid-invariant operand (weights / biases).

    The block index never changes across the grid, so double-buffering only
    wastes VMEM — request a single buffer when the backend supports it.
    """
    zeros = (0,) * len(block_shape)
    index_map = lambda *_: zeros
    if _SINGLE_BUFFER_OK:
        return pl.BlockSpec(block_shape, index_map, pipeline_mode=pl.Buffered(1))
    return pl.BlockSpec(block_shape, index_map)


def _cparams(*sems):
    return pltpu.CompilerParams(dimension_semantics=tuple(sems),
                                vmem_limit_bytes=_VMEM_LIMIT)


def _seq_tile(T, cap=None):
    """Largest row tile <= cap that evenly divides T (whole T if it is small)."""
    cap = _SEQ_CAP if cap is None else cap
    if T <= cap:
        return T
    for t in range(cap, 7, -1):
        if T % t == 0:
            return t
    # TODO(synk): pad T to a multiple of 128 host-side (with key masking) for
    #             awkward sequence lengths instead of falling back to whole T.
    return T


def _ln(x, g, b, eps):
    mu = jnp.mean(x, axis=-1, keepdims=True)
    xc = x - mu
    var = jnp.mean(xc * xc, axis=-1, keepdims=True)
    return xc * jax.lax.rsqrt(var + eps) * g + b


# --------------------------------------------------------------------------
# Fused kernels
# --------------------------------------------------------------------------

def _embed_kernel(x_ref, w_ref, b_ref, g_ref, bb_ref, pe_ref, o_ref, *,
                  eps, xscale):
    """Linear -> LayerNorm -> sqrt(d) scale -> + positional encoding."""
    y = jnp.dot(x_ref[...], w_ref[...], preferred_element_type=jnp.float32)
    y = y + b_ref[...].astype(jnp.float32)
    y = _ln(y, g_ref[...].astype(jnp.float32), bb_ref[...].astype(jnp.float32), eps)
    o_ref[...] = (y * xscale + pe_ref[...].astype(jnp.float32)).astype(o_ref.dtype)


def _ffn_kernel(h_ref, g_ref, b_ref, w1_ref, b1_ref, w2_ref, b2_ref, *rest,
                scale, eps):
    """h + scale * W2(swish(W1(LN(h))))   [optionally followed by a LayerNorm].

    When a trailing LayerNorm is fused, two extra (1, D) operands precede the
    output ref; otherwise no dummy vectors are materialized at all.
    """
    if len(rest) == 3:
        fg_ref, fb_ref, o_ref = rest
    else:
        fg_ref = fb_ref = None
        (o_ref,) = rest
    x = h_ref[...].astype(jnp.float32)                                   # (tq, D)
    xn = _ln(x, g_ref[...].astype(jnp.float32), b_ref[...].astype(jnp.float32), eps)
    u = jnp.dot(xn.astype(w1_ref.dtype), w1_ref[...],
                preferred_element_type=jnp.float32) + b1_ref[...].astype(jnp.float32)
    u = u * jax.nn.sigmoid(u)                                            # Swish
    y = jnp.dot(u.astype(w2_ref.dtype), w2_ref[...],
                preferred_element_type=jnp.float32) + b2_ref[...].astype(jnp.float32)
    out = x + scale * y
    if fg_ref is not None:
        out = _ln(out, fg_ref[...].astype(jnp.float32),
                  fb_ref[...].astype(jnp.float32), eps)
    o_ref[...] = out.astype(o_ref.dtype)


def _ln_qkv_kernel(h_ref, g_ref, b_ref, w_ref, bqkv_ref, q_ref, k_ref, v_ref,
                   *, eps, H):
    """LayerNorm + one fused (tq,D)x(D,3D) QKV matmul, then per-head slices."""
    D = h_ref.shape[-1]
    dh = D // H
    x = h_ref[...].astype(jnp.float32)                                   # (tq, D)
    xn = _ln(x, g_ref[...].astype(jnp.float32), b_ref[...].astype(jnp.float32), eps)
    qkv = jnp.dot(xn.astype(w_ref.dtype), w_ref[...],
                  preferred_element_type=jnp.float32)                    # (tq, 3D)
    qkv = qkv + bqkv_ref[...].astype(jnp.float32)
    for hh in range(H):                                                  # static unroll
        q_ref[hh] = qkv[:, hh * dh:(hh + 1) * dh].astype(q_ref.dtype)
        k_ref[hh] = qkv[:, D + hh * dh:D + (hh + 1) * dh].astype(k_ref.dtype)
        v_ref[hh] = qkv[:, 2 * D + hh * dh:2 * D + (hh + 1) * dh].astype(v_ref.dtype)


def _flash_kernel(q_ref, k_ref, v_ref, o_ref, m_sc, l_sc, acc_sc, *, scale):
    """Flash-attention style online softmax over kv tiles (innermost axis)."""
    kv = pl.program_id(3)

    @pl.when(kv == 0)
    def _():
        m_sc[...] = jnp.full_like(m_sc, -jnp.inf)
        l_sc[...] = jnp.zeros_like(l_sc)
        acc_sc[...] = jnp.zeros_like(acc_sc)

    s = jax.lax.dot_general(q_ref[...], k_ref[...], (((1,), (1,)), ((), ())),
                            preferred_element_type=jnp.float32) * scale  # (tq, tk)
    m_prev = m_sc[...]
    m_new = jnp.maximum(m_prev, jnp.max(s, axis=-1, keepdims=True))
    alpha = jnp.exp(m_prev - m_new)
    p = jnp.exp(s - m_new)
    l_sc[...] = alpha * l_sc[...] + jnp.sum(p, axis=-1, keepdims=True)
    acc_sc[...] = alpha * acc_sc[...] + jnp.dot(p.astype(v_ref.dtype), v_ref[...],
                                                preferred_element_type=jnp.float32)
    m_sc[...] = m_new

    @pl.when(kv == pl.num_programs(3) - 1)
    def _():
        o_ref[...] = (acc_sc[...] / l_sc[...]).astype(o_ref.dtype)  # exact softmax


def _attn_out_kernel(a_ref, wo_ref, bo_ref, res_ref, o_ref, *, H):
    """Merge heads + one lane-dense (tq,D)x(D,D) output matmul + residual."""
    a_cat = jnp.concatenate([a_ref[hh] for hh in range(H)], axis=-1)     # (tq, D)
    y = jnp.dot(a_cat, wo_ref[...], preferred_element_type=jnp.float32)
    y = y + bo_ref[...].astype(jnp.float32) + res_ref[...].astype(jnp.float32)
    o_ref[...] = y.astype(o_ref.dtype)


def _ln_glu_kernel(h_ref, g_ref, b_ref, wa_ref, ba_ref, wb_ref, bb_ref, o_ref,
                   *, eps):
    """LayerNorm + pointwise-conv1 + GLU (value/gate as two lane-dense matmuls)."""
    x = h_ref[...].astype(jnp.float32)
    xn = _ln(x, g_ref[...].astype(jnp.float32), b_ref[...].astype(jnp.float32), eps)
    xb = xn.astype(wa_ref.dtype)
    val = jnp.dot(xb, wa_ref[...], preferred_element_type=jnp.float32) \
        + ba_ref[...].astype(jnp.float32)
    gate = jnp.dot(xb, wb_ref[...], preferred_element_type=jnp.float32) \
        + bb_ref[...].astype(jnp.float32)
    o_ref[...] = (val * jax.nn.sigmoid(gate)).astype(o_ref.dtype)


def _conv_kernel(yp_ref, yc_ref, yn_ref, dw_ref, scale_ref, shift_ref,
                 w2_ref, b2_ref, res_ref, o_ref, pad_sc, *, K, t):
    """Depthwise conv tiled over T with (K-1)/2 halo + folded BN + Swish +
    pointwise-conv2 + residual.  Only the halo rows are zeroed."""
    pad = (K - 1) // 2
    q = pl.program_id(1)
    nq = pl.num_programs(1)
    D = yc_ref.shape[-1]

    # interior rows (always overwritten, never zeroed)
    pad_sc[pad:pad + t, :] = yc_ref[...].astype(jnp.float32)

    # left halo: last `pad` rows of the previous tile, or zeros at the start
    @pl.when(q > 0)
    def _():
        pad_sc[0:pad, :] = yp_ref[t - pad:, :].astype(jnp.float32)

    @pl.when(q == 0)
    def _():
        pad_sc[0:pad, :] = jnp.zeros((pad, D), jnp.float32)

    # right halo: first `pad` rows of the next tile, or zeros at the end
    @pl.when(q < nq - 1)
    def _():
        pad_sc[pad + t:, :] = yn_ref[:pad, :].astype(jnp.float32)

    @pl.when(q == nq - 1)
    def _():
        pad_sc[pad + t:, :] = jnp.zeros((pad, D), jnp.float32)

    # TODO(synk): tap reads are sublane-unaligned shifted slices; a pltpu.roll
    #             based formulation would move the shifts to the XLU.
    w = dw_ref[...].astype(jnp.float32)                                  # (K, D)
    acc = jnp.zeros((t, D), jnp.float32)
    for k in range(K):                                                   # static taps
        acc = acc + pad_sc[k:k + t, :] * w[k:k + 1, :]
    y = acc * scale_ref[...] + shift_ref[...]                            # folded BN (f32)
    y = y * jax.nn.sigmoid(y)                                            # Swish
    z = jnp.dot(y.astype(w2_ref.dtype), w2_ref[...],
                preferred_element_type=jnp.float32)
    z = z + b2_ref[...].astype(jnp.float32) + res_ref[...].astype(jnp.float32)
    o_ref[...] = z.astype(o_ref.dtype)


def _ln_kernel(h_ref, g_ref, b_ref, o_ref, *, eps):
    x = h_ref[...].astype(jnp.float32)
    o_ref[...] = _ln(x, g_ref[...].astype(jnp.float32),
                     b_ref[...].astype(jnp.float32), eps).astype(o_ref.dtype)


# --------------------------------------------------------------------------
# pallas_call wrappers
# --------------------------------------------------------------------------

def embed_layer(x, p, pe):
    B, T, Cin = x.shape
    D = p["w"].shape[1]
    tq = _seq_tile(T)
    return pl.pallas_call(
        functools.partial(_embed_kernel, eps=LN_EPS, xscale=math.sqrt(D)),
        out_shape=jax.ShapeDtypeStruct((B, T, D), p["w"].dtype),
        grid=(B, T // tq),
        in_specs=[pl.BlockSpec((None, tq, Cin), lambda b, q: (b, q, 0)),
                  _const_spec((Cin, D)),
                  _const_spec((1, D)), _const_spec((1, D)), _const_spec((1, D)),
                  pl.BlockSpec((tq, D), lambda b, q: (q, 0))],
        out_specs=pl.BlockSpec((None, tq, D), lambda b, q: (b, q, 0)),
        compiler_params=_cparams("parallel", "parallel"),
    )(x, p["w"], p["b"], p["ln_g"], p["ln_b"], pe)


def ffn_block(h, p, *, scale, final_ln=None):
    B, T, D = h.shape
    F = p["w1"].shape[1]
    tq = _seq_tile(T)
    in_specs = [pl.BlockSpec((None, tq, D), lambda b, q: (b, q, 0)),
                _const_spec((1, D)), _const_spec((1, D)),
                _const_spec((D, F)), _const_spec((1, F)),
                _const_spec((F, D)), _const_spec((1, D))]
    args = [h, p["ln_g"], p["ln_b"], p["w1"], p["b1"], p["w2"], p["b2"]]
    if final_ln is not None:
        in_specs += [_const_spec((1, D)), _const_spec((1, D))]
        args += [final_ln["g"], final_ln["b"]]
    return pl.pallas_call(
        functools.partial(_ffn_kernel, scale=scale, eps=LN_EPS),
        out_shape=jax.ShapeDtypeStruct((B, T, D), h.dtype),
        grid=(B, T // tq),
        in_specs=in_specs,
        out_specs=pl.BlockSpec((None, tq, D), lambda b, q: (b, q, 0)),
        compiler_params=_cparams("parallel", "parallel"),
    )(*args)


def ln_qkv(h, p, *, H):
    B, T, D = h.shape
    dh = D // H
    tq = _seq_tile(T)
    head_out = pl.BlockSpec((None, H, tq, dh), lambda b, q: (b, 0, q, 0))
    out_sd = jax.ShapeDtypeStruct((B, H, T, dh), h.dtype)
    return pl.pallas_call(
        functools.partial(_ln_qkv_kernel, eps=LN_EPS, H=H),
        out_shape=(out_sd, out_sd, out_sd),
        grid=(B, T // tq),
        in_specs=[pl.BlockSpec((None, tq, D), lambda b, q: (b, q, 0)),
                  _const_spec((1, D)), _const_spec((1, D)),
                  _const_spec((D, 3 * D)), _const_spec((1, 3 * D))],
        out_specs=(head_out, head_out, head_out),
        compiler_params=_cparams("parallel", "parallel"),
    )(h, p["ln_g"], p["ln_b"], p["wqkv"], p["bqkv"])


def flash_attention(q, k, v):
    B, H, T, dh = q.shape
    tq = _seq_tile(T, cap=_FLASH_CAP)
    tk = _seq_tile(T, cap=_FLASH_CAP)
    q_spec = pl.BlockSpec((None, None, tq, dh), lambda b, h, qi, ki: (b, h, qi, 0))
    kv_spec = pl.BlockSpec((None, None, tk, dh), lambda b, h, qi, ki: (b, h, ki, 0))
    return pl.pallas_call(
        functools.partial(_flash_kernel, scale=1.0 / math.sqrt(dh)),
        out_shape=jax.ShapeDtypeStruct((B, H, T, dh), q.dtype),
        grid=(B, H, T // tq, T // tk),
        in_specs=[q_spec, kv_spec, kv_spec],
        out_specs=q_spec,
        scratch_shapes=[pltpu.VMEM((tq, 1), jnp.float32),
                        pltpu.VMEM((tq, 1), jnp.float32),
                        pltpu.VMEM((tq, dh), jnp.float32)],
        compiler_params=_cparams("parallel", "parallel", "parallel", "arbitrary"),
    )(q, k, v)


def attn_out_proj(a, h, p, *, H):
    B, T, D = h.shape
    dh = D // H
    tq = _seq_tile(T)
    return pl.pallas_call(
        functools.partial(_attn_out_kernel, H=H),
        out_shape=jax.ShapeDtypeStruct((B, T, D), h.dtype),
        grid=(B, T // tq),
        in_specs=[pl.BlockSpec((None, H, tq, dh), lambda b, q: (b, 0, q, 0)),
                  _const_spec((D, D)), _const_spec((1, D)),
                  pl.BlockSpec((None, tq, D), lambda b, q: (b, q, 0))],
        out_specs=pl.BlockSpec((None, tq, D), lambda b, q: (b, q, 0)),
        compiler_params=_cparams("parallel", "parallel"),
    )(a, p["wo"], p["bo"], h)


def ln_glu(h, p):
    B, T, D = h.shape
    tq = _seq_tile(T)
    return pl.pallas_call(
        functools.partial(_ln_glu_kernel, eps=LN_EPS),
        out_shape=jax.ShapeDtypeStruct((B, T, D), h.dtype),
        grid=(B, T // tq),
        in_specs=[pl.BlockSpec((None, tq, D), lambda b, q: (b, q, 0)),
                  _const_spec((1, D)), _const_spec((1, D)),
                  _const_spec((D, D)), _const_spec((1, D)),
                  _const_spec((D, D)), _const_spec((1, D))],
        out_specs=pl.BlockSpec((None, tq, D), lambda b, q: (b, q, 0)),
        compiler_params=_cparams("parallel", "parallel"),
    )(h, p["ln_g"], p["ln_b"], p["wa"], p["ba"], p["wb"], p["bb"])


def conv_dw_bn_swish_pw2(y, h, p, *, K):
    """Depthwise conv (T-tiled with halo) + folded BN + Swish + pw-conv2 + residual."""
    B, T, D = y.shape
    pad = (K - 1) // 2
    t = _seq_tile(T)
    if t < pad:                       # degenerate tiny tiles: fall back to whole T
        t = T
    nq = T // t
    # fold BatchNorm running stats and the depthwise-conv bias on the host (tiny vectors)
    inv = jax.lax.rsqrt(p["bn_var"] + BN_EPS)
    scale = p["bn_g"].astype(jnp.float32) * inv
    shift = p["bn_b"].astype(jnp.float32) \
        + (p["dw_b"].astype(jnp.float32) - p["bn_mean"]) * scale
    yblk = lambda fn: pl.BlockSpec((None, t, D), fn)
    return pl.pallas_call(
        functools.partial(_conv_kernel, K=K, t=t),
        out_shape=jax.ShapeDtypeStruct((B, T, D), h.dtype),
        grid=(B, nq),
        in_specs=[yblk(lambda b, q: (b, jnp.maximum(q - 1, 0), 0)),   # prev tile (halo)
                  yblk(lambda b, q: (b, q, 0)),                        # current tile
                  yblk(lambda b, q: (b, jnp.minimum(q + 1, nq - 1), 0)),  # next tile
                  _const_spec((K, D)),
                  _const_spec((1, D)), _const_spec((1, D)),
                  _const_spec((D, D)), _const_spec((1, D)),
                  pl.BlockSpec((None, t, D), lambda b, q: (b, q, 0))],
        out_specs=pl.BlockSpec((None, t, D), lambda b, q: (b, q, 0)),
        scratch_shapes=[pltpu.VMEM((t + K - 1, D), jnp.float32)],
        compiler_params=_cparams("parallel", "parallel"),
    )(y, y, y, p["dw_w"], scale, shift, p["pw2_w"], p["pw2_b"], h)


def layernorm(h, g, b):
    B, T, D = h.shape
    tq = _seq_tile(T)
    return pl.pallas_call(
        functools.partial(_ln_kernel, eps=LN_EPS),
        out_shape=jax.ShapeDtypeStruct((B, T, D), h.dtype),
        grid=(B, T // tq),
        in_specs=[pl.BlockSpec((None, tq, D), lambda b, q: (b, q, 0)),
                  _const_spec((1, D)), _const_spec((1, D))],
        out_specs=pl.BlockSpec((None, tq, D), lambda b, q: (b, q, 0)),
        compiler_params=_cparams("parallel", "parallel"),
    )(h, g, b)


# --------------------------------------------------------------------------
# parameters / glue
# --------------------------------------------------------------------------

def sinusoidal_pe(T, d):
    pos = jnp.arange(T, dtype=jnp.float32)[:, None]
    div = jnp.exp(jnp.arange(0, d, 2, dtype=jnp.float32) * (-math.log(10000.0) / d))
    pe = jnp.zeros((T, d), jnp.float32)
    pe = pe.at[:, 0::2].set(jnp.sin(pos * div))
    pe = pe.at[:, 1::2].set(jnp.cos(pos * div))
    return pe


def init_params(key, cfg, dtype=jnp.bfloat16):
    d, ff, K, L, H = (cfg["d_model"], cfg["ffn_dim"], cfg["conv_kernel"],
                      cfg["num_blocks"], cfg["heads"])
    keys = iter(jax.random.split(key, 1024))

    def w(shape, scale=0.02):
        return (scale * jax.random.normal(next(keys), shape,
                                          dtype=jnp.float32)).astype(dtype)

    zeros = lambda s: jnp.zeros(s, dtype)
    ones = lambda s: jnp.ones(s, dtype)

    def ffn():
        return {"ln_g": ones((1, d)), "ln_b": zeros((1, d)),
                "w1": w((d, ff)), "b1": zeros((1, ff)),
                "w2": w((ff, d)), "b2": zeros((1, d))}

    params = {
        "embed": {"w": w((cfg["input_size"], d)), "b": zeros((1, d)),
                  "ln_g": ones((1, d)), "ln_b": zeros((1, d))},
        "blocks": [],
        "after_ln": {"g": ones((1, d)), "b": zeros((1, d))},
    }
    for _ in range(L):
        params["blocks"].append({
            "ff_macaron": ffn(),
            # weight-porting: wqkv = concat([Wq.T, Wk.T, Wv.T], axis=1); head hh
            # occupies columns [hh*dh:(hh+1)*dh] of each D-wide chunk (torch head
            # split).  wo = linear_out.weight.T (rows = heads concatenated in order).
            "mhsa": {"ln_g": ones((1, d)), "ln_b": zeros((1, d)),
                     "wqkv": w((d, 3 * d)), "bqkv": zeros((1, 3 * d)),
                     "wo": w((d, d)), "bo": zeros((1, d))},
            "conv": {"ln_g": ones((1, d)), "ln_b": zeros((1, d)),
                     # pw-conv1 (d -> 2d) split into GLU value / gate halves
                     "wa": w((d, d)), "ba": zeros((1, d)),
                     "wb": w((d, d)), "bb": zeros((1, d)),
                     # dw_w is torch Conv1d (D,1,K) transposed to (K, D)
                     "dw_w": w((K, d)), "dw_b": zeros((1, d)),
                     "bn_g": ones((1, d)), "bn_b": zeros((1, d)),
                     "bn_mean": jnp.zeros((1, d), jnp.float32),
                     "bn_var": jnp.ones((1, d), jnp.float32),
                     "pw2_w": w((d, d)), "pw2_b": zeros((1, d))},
            "ff": ffn(),
            "final_ln": {"g": ones((1, d)), "b": zeros((1, d))},
        })
    return params


def conformer_forward(params, x, cfg):
    B, T, _ = x.shape
    d, H, K = cfg["d_model"], cfg["heads"], cfg["conv_kernel"]
    dt = params["embed"]["w"].dtype
    x = x.astype(dt)

    # input layer: Linear -> LayerNorm -> (dropout=id) -> sqrt(d) scale + sinusoidal PE
    pe = sinusoidal_pe(T, d).astype(dt)
    h = embed_layer(x, params["embed"], pe)

    for blk in params["blocks"]:
        # macaron feed-forward (half residual)
        h = ffn_block(h, blk["ff_macaron"], scale=0.5)
        # multi-head self-attention (lengths == T -> mask is a no-op)
        # TODO(synk): for v5e, fusing ln_qkv+flash+out_proj into one pallas_call
        #             would remove the q/k/v/a HBM round trips.
        q, k, v = ln_qkv(h, blk["mhsa"], H=H)
        a = flash_attention(q, k, v)
        h = attn_out_proj(a, h, blk["mhsa"], H=H)
        # convolution module
        y = ln_glu(h, blk["conv"])
        h = conv_dw_bn_swish_pw2(y, h, blk["conv"], K=K)
        # second feed-forward (half residual) + per-block final LayerNorm, fused
        h = ffn_block(h, blk["ff"], scale=0.5, final_ln=blk["final_ln"])

    # encoder after_norm (normalize_before=True)
    h = layernorm(h, params["after_ln"]["g"], params["after_ln"]["b"])
    return h.astype(jnp.float32)


if __name__ == "__main__":
    # Real ConformerWrapper config: d=768, heads=4, linear_units=2048, blocks=4,
    # kernel=15.  Shrunk deterministically but lane-dense (d=128) for this test.
    cfg = dict(input_size=128, d_model=128, heads=4, ffn_dim=256,
               num_blocks=4, conv_kernel=15)
    key = jax.random.PRNGKey(0)
    pkey, xkey = jax.random.split(key)
    params = init_params(pkey, cfg)

    B, T = 2, 16
    x = jax.random.normal(xkey, (B, T, cfg["input_size"]), dtype=jnp.float32)

    fwd = jax.jit(functools.partial(conformer_forward, cfg=cfg))
    out = jax.block_until_ready(fwd(params, x))
    assert out.shape == (B, T, cfg["d_model"]), out.shape
    assert bool(jnp.all(jnp.isfinite(out)))
    print("KERNEL_OK")
</pallas_src>

<mosaic_0001>
module attributes {stable_mosaic.version = 11 : i64} {
  func.func @_embed_kernel(%arg0: i32, %arg1: i32, %arg2: memref<1x16x128xbf16, #tpu.memory_space<vmem>>, %arg3: memref<128x128xbf16, #tpu.memory_space<vmem>>, %arg4: memref<1x128xbf16, #tpu.memory_space<vmem>>, %arg5: memref<1x128xbf16, #tpu.memory_space<vmem>>, %arg6: memref<1x128xbf16, #tpu.memory_space<vmem>>, %arg7: memref<16x128xbf16, #tpu.memory_space<vmem>>, %arg8: memref<1x16x128xbf16, #tpu.memory_space<vmem>>) attributes {dimension_semantics = [#tpu.dimension_semantics<parallel>, #tpu.dimension_semantics<parallel>], iteration_bounds = array<i64: 2, 1>, scalar_prefetch = 0 : i64, scratch_operands = 0 : i64, tpu.core_type = #tpu.core_type<tc>, window_params = [{transform_indices = @transform_0, window_bounds = array<i64: 1, 16, 128>}, {pipeline_mode = #tpu.pipeline_mode<synchronous>, transform_indices = @transform_1, window_bounds = array<i64: 128, 128>}, {pipeline_mode = #tpu.pipeline_mode<synchronous>, transform_indices = @transform_2, window_bounds = array<i64: 1, 128>}, {pipeline_mode = #tpu.pipeline_mode<synchronous>, transform_indices = @transform_3, window_bounds = array<i64: 1, 128>}, {pipeline_mode = #tpu.pipeline_mode<synchronous>, transform_indices = @transform_4, window_bounds = array<i64: 1, 128>}, {transform_indices = @transform_5, window_bounds = array<i64: 16, 128>}, {transform_indices = @transform_6, window_bounds = array<i64: 1, 16, 128>}]} {
    %c0 = arith.constant 0 : index
    %c0_0 = arith.constant 0 : index
    %c0_1 = arith.constant 0 : index
    %0 = vector.load %arg2[%c0, %c0_0, %c0_1] : memref<1x16x128xbf16, #tpu.memory_space<vmem>>, vector<1x16x128xbf16>
    %1 = vector.shape_cast %0 : vector<1x16x128xbf16> to vector<16x128xbf16>
    %c0_2 = arith.constant 0 : index
    %c0_3 = arith.constant 0 : index
    %2 = vector.load %arg3[%c0_2, %c0_3] : memref<128x128xbf16, #tpu.memory_space<vmem>>, vector<128x128xbf16>
    %cst = arith.constant dense<0.000000e+00> : vector<16x128xf32>
    %3 = tpu.matmul %1, %2, %cst {dimension_numbers = #tpu.dot_dimension_numbers<[1], [0], [0], [1], [0, 0, 1, 1], [], []>} : vector<16x128xbf16>, vector<128x128xbf16>, vector<16x128xf32> -> vector<16x128xf32>
    %c0_4 = arith.constant 0 : index
    %c0_5 = arith.constant 0 : index
    %4 = vector.load %arg4[%c0_4, %c0_5] : memref<1x128xbf16, #tpu.memory_space<vmem>>, vector<1x128xbf16>
    %5 = arith.extf %4 : vector<1x128xbf16> to vector<1x128xf32>
    %6 = vector.broadcast %5 : vector<1x128xf32> to vector<16x128xf32>
    %7 = arith.addf %3, %6 : vector<16x128xf32>
    %c0_6 = arith.constant 0 : index
    %c0_7 = arith.constant 0 : index
    %8 = vector.load %arg5[%c0_6, %c0_7] : memref<1x128xbf16, #tpu.memory_space<vmem>>, vector<1x128xbf16>
    %9 = arith.extf %8 : vector<1x128xbf16> to vector<1x128xf32>
    %c0_8 = arith.constant 0 : index
    %c0_9 = arith.constant 0 : index
    %10 = vector.load %arg6[%c0_8, %c0_9] : memref<1x128xbf16, #tpu.memory_space<vmem>>, vector<1x128xbf16>
    %11 = arith.extf %10 : vector<1x128xbf16> to vector<1x128xf32>
    %cst_10 = arith.constant dense<0.000000e+00> : vector<16xf32>
    %12 = vector.multi_reduction <add>, %7, %cst_10 [1] : vector<16x128xf32> to vector<16xf32>
    %13 = vector.shape_cast %12 : vector<16xf32> to vector<16x1xf32>
    %cst_11 = arith.constant 1.280000e+02 : f32
    %14 = vector.broadcast %cst_11 : f32 to vector<16x1xf32>
    %15 = arith.divf %13, %14 : vector<16x1xf32>
    %16 = vector.broadcast %15 : vector<16x1xf32> to vector<16x128xf32>
    %17 = arith.subf %7, %16 : vector<16x128xf32>
    %18 = arith.mulf %17, %17 : vector<16x128xf32>
    %cst_12 = arith.constant dense<0.000000e+00> : vector<16xf32>
    %19 = vector.multi_reduction <add>, %18, %cst_12 [1] : vector<16x128xf32> to vector<16xf32>
    %20 = vector.shape_cast %19 : vector<16xf32> to vector<16x1xf32>
    %cst_13 = arith.constant 1.280000e+02 : f32
    %21 = vector.broadcast %cst_13 : f32 to vector<16x1xf32>
    %22 = arith.divf %20, %21 : vector<16x1xf32>
    %cst_14 = arith.constant 9.99999996E-13 : f32
    %23 = vector.broadcast %cst_14 : f32 to vector<16x1xf32>
    %24 = arith.addf %22, %23 : vector<16x1xf32>
    %25 = math.rsqrt %24 : vector<16x1xf32>
    %26 = vector.broadcast %25 : vector<16x1xf32> to vector<16x128xf32>
    %27 = arith.mulf %17, %26 : vector<16x128xf32>
    %28 = vector.broadcast %9 : vector<1x128xf32> to vector<16x128xf32>
    %29 = arith.mulf %27, %28 : vector<16x128xf32>
    %30 = vector.broadcast %11 : vector<1x128xf32> to vector<16x128xf32>
    %31 = arith.addf %29, %30 : vector<16x128xf32>
    %cst_15 = arith.constant 11.3137083 : f32
    %32 = vector.broadcast %cst_15 : f32 to vector<16x128xf32>
    %33 = arith.mulf %31, %32 : vector<16x128xf32>
    %c0_16 = arith.constant 0 : index
    %c0_17 = arith.constant 0 : index
    %34 = vector.load %arg7[%c0_16, %c0_17] : memref<16x128xbf16, #tpu.memory_space<vmem>>, vector<16x128xbf16>
    %35 = arith.extf %34 : vector<16x128xbf16> to vector<16x128xf32>
    %36 = arith.addf %33, %35 : vector<16x128xf32>
    %37 = arith.truncf %36 : vector<16x128xf32> to vector<16x128xbf16>
    %c0_18 = arith.constant 0 : index
    %c0_19 = arith.constant 0 : index
    %c0_20 = arith.constant 0 : index
    %38 = vector.load %arg8[%c0_18, %c0_19, %c0_20] : memref<1x16x128xbf16, #tpu.memory_space<vmem>>, vector<1x16x128xbf16>
    %39 = vector.shape_cast %38 : vector<1x16x128xbf16> to vector<16x128xbf16>
    %40 = vector.shape_cast %37 : vector<16x128xbf16> to vector<1x16x128xbf16>
    tpu.vector_store %arg8[%c0_18, %c0_19, %c0_20], %40 {strides = array<i32>} : memref<1x16x128xbf16, #tpu.memory_space<vmem>>, vector<1x16x128xbf16>,
    return
  }
  func.func @transform_0(%arg0: i32, %arg1: i32) -> (i32, i32, i32) {
    %c0_i32 = arith.constant 0 : i32
    %c0_i32_0 = arith.constant 0 : i32
    return %arg0, %arg1, %c0_i32 : i32, i32, i32
  }
  func.func @transform_1(%arg0: i32, %arg1: i32) -> (i32, i32) {
    %c0_i32 = arith.constant 0 : i32
    %c0_i32_0 = arith.constant 0 : i32
    %c0_i32_1 = arith.constant 0 : i32
    return %c0_i32, %c0_i32_0 : i32, i32
  }
  func.func @transform_2(%arg0: i32, %arg1: i32) -> (i32, i32) {
    %c0_i32 = arith.constant 0 : i32
    %c0_i32_0 = arith.constant 0 : i32
    %c0_i32_1 = arith.constant 0 : i32
    return %c0_i32, %c0_i32_0 : i32, i32
  }
  func.func @transform_3(%arg0: i32, %arg1: i32) -> (i32, i32) {
    %c0_i32 = arith.constant 0 : i32
    %c0_i32_0 = arith.constant 0 : i32
    %c0_i32_1 = arith.constant 0 : i32
    return %c0_i32, %c0_i32_0 : i32, i32
  }
  func.func @transform_4(%arg0: i32, %arg1: i32) -> (i32, i32) {
    %c0_i32 = arith.constant 0 : i32
    %c0_i32_0 = arith.constant 0 : i32
    %c0_i32_1 = arith.constant 0 : i32
    return %c0_i32, %c0_i32_0 : i32, i32
  }
  func.func @transform_5(%arg0: i32, %arg1: i32) -> (i32, i32) {
    %c0_i32 = arith.constant 0 : i32
    %c0_i32_0 = arith.constant 0 : i32
    return %arg1, %c0_i32 : i32, i32
  }
  func.func @transform_6(%arg0: i32, %arg1: i32) -> (i32, i32, i32) {
    %c0_i32 = arith.constant 0 : i32
    %c0_i32_0 = arith.constant 0 : i32
    return %arg0, %arg1, %c0_i32 : i32, i32, i32
  }
}

module attributes {stable_mosaic.version = 11 : i64} {
  func.func @_ffn_kernel(%arg0: i32, %arg1: i32, %arg2: memref<1x16x128xbf16, #tpu.memory_space<vmem>>, %arg3: memref<1x128xbf16, #tpu.memory_space<vmem>>, %arg4: memref<1x128xbf16, #tpu.memory_space<vmem>>, %arg5: memref<128x256xbf16, #tpu.memory_space<vmem>>, %arg6: memref<1x256xbf16, #tpu.memory_space<vmem>>, %arg7: memref<256x128xbf16, #tpu.memory_space<vmem>>, %arg8: memref<1x128xbf16, #tpu.memory_space<vmem>>, %arg9: memref<1x16x128xbf16, #tpu.memory_space<vmem>>) attributes {dimension_semantics = [#tpu.dimension_semantics<parallel>, #tpu.dimension_semantics<parallel>], iteration_bounds = array<i64: 2, 1>, scalar_prefetch = 0 : i64, scratch_operands = 0 : i64, tpu.core_type = #tpu.core_type<tc>, window_params = [{transform_indices = @transform_0, window_bounds = array<i64: 1, 16, 128>}, {pipeline_mode = #tpu.pipeline_mode<synchronous>, transform_indices = @transform_1, window_bounds = array<i64: 1, 128>}, {pipeline_mode = #tpu.pipeline_mode<synchronous>, transform_indices = @transform_2, window_bounds = array<i64: 1, 128>}, {pipeline_mode = #tpu.pipeline_mode<synchronous>, transform_indices = @transform_3, window_bounds = array<i64: 128, 256>}, {pipeline_mode = #tpu.pipeline_mode<synchronous>, transform_indices = @transform_4, window_bounds = array<i64: 1, 256>}, {pipeline_mode = #tpu.pipeline_mode<synchronous>, transform_indices = @transform_5, window_bounds = array<i64: 256, 128>}, {pipeline_mode = #tpu.pipeline_mode<synchronous>, transform_indices = @transform_6, window_bounds = array<i64: 1, 128>}, {transform_indices = @transform_7, window_bounds = array<i64: 1, 16, 128>}]} {
    %c0 = arith.constant 0 : index
    %c0_0 = arith.constant 0 : index
    %c0_1 = arith.constant 0 : index
    %0 = vector.load %arg2[%c0, %c0_0, %c0_1] : memref<1x16x128xbf16, #tpu.memory_space<vmem>>, vector<1x16x128xbf16>
    %1 = vector.shape_cast %0 : vector<1x16x128xbf16> to vector<16x128xbf16>
    %2 = arith.extf %1 : vector<16x128xbf16> to vector<16x128xf32>
    %c0_2 = arith.constant 0 : index
    %c0_3 = arith.constant 0 : index
    %3 = vector.load %arg3[%c0_2, %c0_3] : memref<1x128xbf16, #tpu.memory_space<vmem>>, vector<1x128xbf16>
    %4 = arith.extf %3 : vector<1x128xbf16> to vector<1x128xf32>
    %c0_4 = arith.constant 0 : index
    %c0_5 = arith.constant 0 : index
    %5 = vector.load %arg4[%c0_4, %c0_5] : memref<1x128xbf16, #tpu.memory_space<vmem>>, vector<1x128xbf16>
    %6 = arith.extf %5 : vector<1x128xbf16> to vector<1x128xf32>
    %cst = arith.constant dense<0.000000e+00> : vector<16xf32>
    %7 = vector.multi_reduction <add>, %2, %cst [1] : vector<16x128xf32> to vector<16xf32>
    %8 = vector.shape_cast %7 : vector<16xf32> to vector<16x1xf32>
    %cst_6 = arith.constant 1.280000e+02 : f32
    %9 = vector.broadcast %cst_6 : f32 to vector<16x1xf32>
    %10 = arith.divf %8, %9 : vector<16x1xf32>
    %11 = vector.broadcast %10 : vector<16x1xf32> to vector<16x128xf32>
    %12 = arith.subf %2, %11 : vector<16x128xf32>
    %13 = arith.mulf %12, %12 : vector<16x128xf32>
    %cst_7 = arith.constant dense<0.000000e+00> : vector<16xf32>
    %14 = vector.multi_reduction <add>, %13, %cst_7 [1] : vector<16x128xf32> to vector<16xf32>
    %15 = vector.shape_cast %14 : vector<16xf32> to vector<16x1xf32>
    %cst_8 = arith.constant 1.280000e+02 : f32
    %16 = vector.broadcast %cst_8 : f32 to vector<16x1xf32>
    %17 = arith.divf %15, %16 : vector<16x1xf32>
    %cst_9 = arith.constant 9.99999996E-13 : f32
    %18 = vector.broadcast %cst_9 : f32 to vector<16x1xf32>
    %19 = arith.addf %17, %18 : vector<16x1xf32>
    %20 = math.rsqrt %19 : vector<16x1xf32>
    %21 = vector.broadcast %20 : vector<16x1xf32> to vector<16x128xf32>
    %22 = arith.mulf %12, %21 : vector<16x128xf32>
    %23 = vector.broadcast %4 : vector<1x128xf32> to vector<16x128xf32>
    %24 = arith.mulf %22, %23 : vector<16x128xf32>
    %25 = vector.broadcast %6 : vector<1x128xf32> to vector<16x128xf32>
    %26 = arith.addf %24, %25 : vector<16x128xf32>
    %27 = arith.truncf %26 : vector<16x128xf32> to vector<16x128xbf16>
    %c0_10 = arith.constant 0 : index
    %c0_11 = arith.constant 0 : index
    %28 = vector.load %arg5[%c0_10, %c0_11] : memref<128x256xbf16, #tpu.memory_space<vmem>>, vector<128x256xbf16>
    %cst_12 = arith.constant dense<0.000000e+00> : vector<16x256xf32>
    %29 = tpu.matmul %27, %28, %cst_12 {dimension_numbers = #tpu.dot_dimension_numbers<[1], [0], [0], [1], [0, 0, 1, 1], [], []>} : vector<16x128xbf16>, vector<128x256xbf16>, vector<16x256xf32> -> vector<16x256xf32>
    %c0_13 = arith.constant 0 : index
    %c0_14 = arith.constant 0 : index
    %30 = vector.load %arg6[%c0_13, %c0_14] : memref<1x256xbf16, #tpu.memory_space<vmem>>, vector<1x256xbf16>
    %31 = arith.extf %30 : vector<1x256xbf16> to vector<1x256xf32>
    %32 = vector.broadcast %31 : vector<1x256xf32> to vector<16x256xf32>
    %33 = arith.addf %29, %32 : vector<16x256xf32>
    %34 = arith.negf %33 : vector<16x256xf32>
    %35 = math.exp %34 : vector<16x256xf32>
    %cst_15 = arith.constant 1.000000e+00 : f32
    %36 = vector.broadcast %cst_15 : f32 to vector<16x256xf32>
    %37 = arith.addf %36, %35 : vector<16x256xf32>
    %38 = arith.divf %36, %37 : vector<16x256xf32>
    %39 = arith.mulf %33, %38 : vector<16x256xf32>
    %40 = arith.truncf %39 : vector<16x256xf32> to vector<16x256xbf16>
    %c0_16 = arith.constant 0 : index
    %c0_17 = arith.constant 0 : index
    %41 = vector.load %arg7[%c0_16, %c0_17] : memref<256x128xbf16, #tpu.memory_space<vmem>>, vector<256x128xbf16>
    %cst_18 = arith.constant dense<0.000000e+00> : vector<16x128xf32>
    %42 = tpu.matmul %40, %41, %cst_18 {dimension_numbers = #tpu.dot_dimension_numbers<[1], [0], [0], [1], [0, 0, 1, 1], [], []>} : vector<16x256xbf16>, vector<256x128xbf16>, vector<16x128xf32> -> vector<16x128xf32>
    %c0_19 = arith.constant 0 : index
    %c0_20 = arith.constant 0 : index
    %43 = vector.load %arg8[%c0_19, %c0_20] : memref<1x128xbf16, #tpu.memory_space<vmem>>, vector<1x128xbf16>
    %44 = arith.extf %43 : vector<1x128xbf16> to vector<1x128xf32>
    %45 = vector.broadcast %44 : vector<1x128xf32> to vector<16x128xf32>
    %46 = arith.addf %42, %45 : vector<16x128xf32>
    %cst_21 = arith.constant 5.000000e-01 : f32
    %47 = vector.broadcast %cst_21 : f32 to vector<16x128xf32>
    %48 = arith.mulf %47, %46 : vector<16x128xf32>
    %49 = arith.addf %2, %48 : vector<16x128xf32>
    %50 = arith.truncf %49 : vector<16x128xf32> to vector<16x128xbf16>
    %c0_22 = arith.constant 0 : index
    %c0_23 = arith.constant 0 : index
    %c0_24 = arith.constant 0 : index
    %51 = vector.load %arg9[%c0_22, %c0_23, %c0_24] : memref<1x16x128xbf16, #tpu.memory_space<vmem>>, vector<1x16x128xbf16>
    %52 = vector.shape_cast %51 : vector<1x16x128xbf16> to vector<16x128xbf16>
    %53 = vector.shape_cast %50 : vector<16x128xbf16> to vector<1x16x128xbf16>
    tpu.vector_store %arg9[%c0_22, %c0_23, %c0_24], %53 {strides = array<i32>} : memref<1x16x128xbf16, #tpu.memory_space<vmem>>, vector<1x16x128xbf16>,
    return
  }
  func.func @transform_0(%arg0: i32, %arg1: i32) -> (i32, i32, i32) {
    %c0_i32 = arith.constant 0 : i32
    %c0_i32_0 = arith.constant 0 : i32
    return %arg0, %arg1, %c0_i32 : i32, i32, i32
  }
  func.func @transform_1(%arg0: i32, %arg1: i32) -> (i32, i32) {
    %c0_i32 = arith.constant 0 : i32
    %c0_i32_0 = arith.constant 0 : i32
    %c0_i32_1 = arith.constant 0 : i32
    return %c0_i32, %c0_i32_0 : i32, i32
  }
  func.func @transform_2(%arg0: i32, %arg1: i32) -> (i32, i32) {
    %c0_i32 = arith.constant 0 : i32
    %c0_i32_0 = arith.constant 0 : i32
    %c0_i32_1 = arith.constant 0 : i32
    return %c0_i32, %c0_i32_0 : i32, i32
  }
  func.func @transform_3(%arg0: i32, %arg1: i32) -> (i32, i32) {
    %c0_i32 = arith.constant 0 : i32
    %c0_i32_0 = arith.constant 0 : i32
    %c0_i32_1 = arith.constant 0 : i32
    return %c0_i32, %c0_i32_0 : i32, i32
  }
  func.func @transform_4(%arg0: i32, %arg1: i32) -> (i32, i32) {
    %c0_i32 = arith.constant 0 : i32
    %c0_i32_0 = arith.constant 0 : i32
    %c0_i32_1 = arith.constant 0 : i32
    return %c0_i32, %c0_i32_0 : i32, i32
  }
  func.func @transform_5(%arg0: i32, %arg1: i32) -> (i32, i32) {
    %c0_i32 = arith.constant 0 : i32
    %c0_i32_0 = arith.constant 0 : i32
    %c0_i32_1 = arith.constant 0 : i32
    return %c0_i32, %c0_i32_0 : i32, i32
  }
  func.func @transform_6(%arg0: i32, %arg1: i32) -> (i32, i32) {
    %c0_i32 = arith.constant 0 : i32
    %c0_i32_0 = arith.constant 0 : i32
    %c0_i32_1 = arith.constant 0 : i32
    return %c0_i32, %c0_i32_0 : i32, i32
  }
  func.func @transform_7(%arg0: i32, %arg1: i32) -> (i32, i32, i32) {
    %c0_i32 = arith.constant 0 : i32
    %c0_i32_0 = arith.constant 0 : i32
    return %arg0, %arg1, %c0_i32 : i32, i32, i32
  }
}

module attributes {stable_mosaic.version = 11 : i64} {
  func.func @_ln_qkv_kernel(%arg0: i32, %arg1: i32, %arg2: memref<1x16x128xbf16, #tpu.memory_space<vmem>>, %arg3: memref<1x128xbf16, #tpu.memory_space<vmem>>, %arg4: memref<1x128xbf16, #tpu.memory_space<vmem>>, %arg5: memref<128x384xbf16, #tpu.memory_space<vmem>>, %arg6: memref<1x384xbf16, #tpu.memory_space<vmem>>, %arg7: memref<1x4x16x32xbf16, #tpu.memory_space<vmem>>, %arg8: memref<1x4x16x32xbf16, #tpu.memory_space<vmem>>, %arg9: memref<1x4x16x32xbf16, #tpu.memory_space<vmem>>) attributes {dimension_semantics = [#tpu.dimension_semantics<parallel>, #tpu.dimension_semantics<parallel>], iteration_bounds = array<i64: 2, 1>, scalar_prefetch = 0 : i64, scratch_operands = 0 : i64, tpu.core_type = #tpu.core_type<tc>, window_params = [{transform_indices = @transform_0, window_bounds = array<i64: 1, 16, 128>}, {pipeline_mode = #tpu.pipeline_mode<synchronous>, transform_indices = @transform_1, window_bounds = array<i64: 1, 128>}, {pipeline_mode = #tpu.pipeline_mode<synchronous>, transform_indices = @transform_2, window_bounds = array<i64: 1, 128>}, {pipeline_mode = #tpu.pipeline_mode<synchronous>, transform_indices = @transform_3, window_bounds = array<i64: 128, 384>}, {pipeline_mode = #tpu.pipeline_mode<synchronous>, transform_indices = @transform_4, window_bounds = array<i64: 1, 384>}, {transform_indices = @transform_5, window_bounds = array<i64: 1, 4, 16, 32>}, {transform_indices = @transform_6, window_bounds = array<i64: 1, 4, 16, 32>}, {transform_indices = @transform_7, window_bounds = array<i64: 1, 4, 16, 32>}]} {
    %c0 = arith.constant 0 : index
    %c0_0 = arith.constant 0 : index
    %c0_1 = arith.constant 0 : index
    %0 = vector.load %arg2[%c0, %c0_0, %c0_1] : memref<1x16x128xbf16, #tpu.memory_space<vmem>>, vector<1x16x128xbf16>
    %1 = vector.shape_cast %0 : vector<1x16x128xbf16> to vector<16x128xbf16>
    %2 = arith.extf %1 : vector<16x128xbf16> to vector<16x128xf32>
    %c0_2 = arith.constant 0 : index
    %c0_3 = arith.constant 0 : index
    %3 = vector.load %arg3[%c0_2, %c0_3] : memref<1x128xbf16, #tpu.memory_space<vmem>>, vector<1x128xbf16>
    %4 = arith.extf %3 : vector<1x128xbf16> to vector<1x128xf32>
    %c0_4 = arith.constant 0 : index
    %c0_5 = arith.constant 0 : index
    %5 = vector.load %arg4[%c0_4, %c0_5] : memref<1x128xbf16, #tpu.memory_space<vmem>>, vector<1x128xbf16>
    %6 = arith.extf %5 : vector<1x128xbf16> to vector<1x128xf32>
    %cst = arith.constant dense<0.000000e+00> : vector<16xf32>
    %7 = vector.multi_reduction <add>, %2, %cst [1] : vector<16x128xf32> to vector<16xf32>
    %8 = vector.shape_cast %7 : vector<16xf32> to vector<16x1xf32>
    %cst_6 = arith.constant 1.280000e+02 : f32
    %9 = vector.broadcast %cst_6 : f32 to vector<16x1xf32>
    %10 = arith.divf %8, %9 : vector<16x1xf32>
    %11 = vector.broadcast %10 : vector<16x1xf32> to vector<16x128xf32>
    %12 = arith.subf %2, %11 : vector<16x128xf32>
    %13 = arith.mulf %12, %12 : vector<16x128xf32>
    %cst_7 = arith.constant dense<0.000000e+00> : vector<16xf32>
    %14 = vector.multi_reduction <add>, %13, %cst_7 [1] : vector<16x128xf32> to vector<16xf32>
    %15 = vector.shape_cast %14 : vector<16xf32> to vector<16x1xf32>
    %cst_8 = arith.constant 1.280000e+02 : f32
    %16 = vector.broadcast %cst_8 : f32 to vector<16x1xf32>
    %17 = arith.divf %15, %16 : vector<16x1xf32>
    %cst_9 = arith.constant 9.99999996E-13 : f32
    %18 = vector.broadcast %cst_9 : f32 to vector<16x1xf32>
    %19 = arith.addf %17, %18 : vector<16x1xf32>
    %20 = math.rsqrt %19 : vector<16x1xf32>
    %21 = vector.broadcast %20 : vector<16x1xf32> to vector<16x128xf32>
    %22 = arith.mulf %12, %21 : vector<16x128xf32>
    %23 = vector.broadcast %4 : vector<1x128xf32> to vector<16x128xf32>
    %24 = arith.mulf %22, %23 : vector<16x128xf32>
    %25 = vector.broadcast %6 : vector<1x128xf32> to vector<16x128xf32>
    %26 = arith.addf %24, %25 : vector<16x128xf32>
    %27 = arith.truncf %26 : vector<16x128xf32> to vector<16x128xbf16>
    %c0_10 = arith.constant 0 : index
    %c0_11 = arith.constant 0 : index
    %28 = vector.load %arg5[%c0_10, %c0_11] : memref<128x384xbf16, #tpu.memory_space<vmem>>, vector<128x384xbf16>
    %cst_12 = arith.constant dense<0.000000e+00> : vector<16x384xf32>
    %29 = tpu.matmul %27, %28, %cst_12 {dimension_numbers = #tpu.dot_dimension_numbers<[1], [0], [0], [1], [0, 0, 1, 1], [], []>} : vector<16x128xbf16>, vector<128x384xbf16>, vector<16x384xf32> -> vector<16x384xf32>
    %c0_13 = arith.constant 0 : index
    %c0_14 = arith.constant 0 : index
    %30 = vector.load %arg6[%c0_13, %c0_14] : memref<1x384xbf16, #tpu.memory_space<vmem>>, vector<1x384xbf16>
    %31 = arith.extf %30 : vector<1x384xbf16> to vector<1x384xf32>
    %32 = vector.broadcast %31 : vector<1x384xf32> to vector<16x384xf32>
    %33 = arith.addf %29, %32 : vector<16x384xf32>
    %34 = vector.extract_strided_slice %33 {offsets = [0, 0], sizes = [16, 32], strides = [1, 1]} : vector<16x384xf32> to vector<16x32xf32>
    %35 = arith.truncf %34 : vector<16x32xf32> to vector<16x32xbf16>
    %c0_15 = arith.constant 0 : index
    %c0_16 = arith.constant 0 : index
    %c0_17 = arith.constant 0 : index
    %c0_18 = arith.constant 0 : index
    %36 = vector.load %arg7[%c0_15, %c0_16, %c0_17, %c0_18] : memref<1x4x16x32xbf16, #tpu.memory_space<vmem>>, vector<1x1x16x32xbf16>
    %37 = vector.shape_cast %36 : vector<1x1x16x32xbf16> to vector<16x32xbf16>
    %38 = vector.shape_cast %35 : vector<16x32xbf16> to vector<1x1x16x32xbf16>
    tpu.vector_store %arg7[%c0_15, %c0_16, %c0_17, %c0_18], %38 {strides = array<i32>} : memref<1x4x16x32xbf16, #tpu.memory_space<vmem>>, vector<1x1x16x32xbf16>,
    %39 = vector.extract_strided_slice %33 {offsets = [0, 128], sizes = [16, 32], strides = [1, 1]} : vector<16x384xf32> to vector<16x32xf32>
    %40 = arith.truncf %39 : vector<16x32xf32> to vector<16x32xbf16>
    %c0_19 = arith.constant 0 : index
    %c0_20 = arith.constant 0 : index
    %c0_21 = arith.constant 0 : index
    %c0_22 = arith.constant 0 : index
    %41 = vector.load %arg8[%c0_19, %c0_20, %c0_21, %c0_22] : memref<1x4x16x32xbf16, #tpu.memory_space<vmem>>, vector<1x1x16x32xbf16>
    %42 = vector.shape_cast %41 : vector<1x1x16x32xbf16> to vector<16x32xbf16>
    %43 = vector.shape_cast %40 : vector<16x32xbf16> to vector<1x1x16x32xbf16>
    tpu.vector_store %arg8[%c0_19, %c0_20, %c0_21, %c0_22], %43 {strides = array<i32>} : memref<1x4x16x32xbf16, #tpu.memory_space<vmem>>, vector<1x1x16x32xbf16>,
    %44 = vector.extract_strided_slice %33 {offsets = [0, 256], sizes = [16, 32], strides = [1, 1]} : vector<16x384xf32> to vector<16x32xf32>
    %45 = arith.truncf %44 : vector<16x32xf32> to vector<16x32xbf16>
    %c0_23 = arith.constant 0 : index
    %c0_24 = arith.constant 0 : index
    %c0_25 = arith.constant 0 : index
    %c0_26 = arith.constant 0 : index
    %46 = vector.load %arg9[%c0_23, %c0_24, %c0_25, %c0_26] : memref<1x4x16x32xbf16, #tpu.memory_space<vmem>>, vector<1x1x16x32xbf16>
    %47 = vector.shape_cast %46 : vector<1x1x16x32xbf16> to vector<16x32xbf16>
    %48 = vector.shape_cast %45 : vector<16x32xbf16> to vector<1x1x16x32xbf16>
    tpu.vector_store %arg9[%c0_23, %c0_24, %c0_25, %c0_26], %48 {strides = array<i32>} : memref<1x4x16x32xbf16, #tpu.memory_space<vmem>>, vector<1x1x16x32xbf16>,
    %49 = vector.extract_strided_slice %33 {offsets = [0, 32], sizes = [16, 32], strides = [1, 1]} : vector<16x384xf32> to vector<16x32xf32>
    %50 = arith.truncf %49 : vector<16x32xf32> to vector<16x32xbf16>
    %c0_27 = arith.constant 0 : index
    %c1 = arith.constant 1 : index
    %c0_28 = arith.constant 0 : index
    %c0_29 = arith.constant 0 : index
    %51 = vector.load %arg7[%c0_27, %c1, %c0_28, %c0_29] : memref<1x4x16x32xbf16, #tpu.memory_space<vmem>>, vector<1x1x16x32xbf16>
    %52 = vector.shape_cast %51 : vector<1x1x16x32xbf16> to vector<16x32xbf16>
    %53 = vector.shape_cast %50 : vector<16x32xbf16> to vector<1x1x16x32xbf16>
    tpu.vector_store %arg7[%c0_27, %c1, %c0_28, %c0_29], %53 {strides = array<i32>} : memref<1x4x16x32xbf16, #tpu.memory_space<vmem>>, vector<1x1x16x32xbf16>,
    %54 = vector.extract_strided_slice %33 {offsets = [0, 160], sizes = [16, 32], strides = [1, 1]} : vector<16x384xf32> to vector<16x32xf32>
    %55 = arith.truncf %54 : vector<16x32xf32> to vector<16x32xbf16>
    %c0_30 = arith.constant 0 : index
    %c1_31 = arith.constant 1 : index
    %c0_32 = arith.constant 0 : index
    %c0_33 = arith.constant 0 : index
    %56 = vector.load %arg8[%c0_30, %c1_31, %c0_32, %c0_33] : memref<1x4x16x32xbf16, #tpu.memory_space<vmem>>, vector<1x1x16x32xbf16>
    %57 = vector.shape_cast %56 : vector<1x1x16x32xbf16> to vector<16x32xbf16>
    %58 = vector.shape_cast %55 : vector<16x32xbf16> to vector<1x1x16x32xbf16>
    tpu.vector_store %arg8[%c0_30, %c1_31, %c0_32, %c0_33], %58 {strides = array<i32>} : memref<1x4x16x32xbf16, #tpu.memory_space<vmem>>, vector<1x1x16x32xbf16>,
    %59 = vector.extract_strided_slice %33 {offsets = [0, 288], sizes = [16, 32], strides = [1, 1]} : vector<16x384xf32> to vector<16x32xf32>
    %60 = arith.truncf %59 : vector<16x32xf32> to vector<16x32xbf16>
    %c0_34 = arith.constant 0 : index
    %c1_35 = arith.constant 1 : index
    %c0_36 = arith.constant 0 : index
    %c0_37 = arith.constant 0 : index
    %61 = vector.load %arg9[%c0_34, %c1_35, %c0_36, %c0_37] : memref<1x4x16x32xbf16, #tpu.memory_space<vmem>>, vector<1x1x16x32xbf16>
    %62 = vector.shape_cast %61 : vector<1x1x16x32xbf16> to vector<16x32xbf16>
    %63 = vector.shape_cast %60 : vector<16x32xbf16> to vector<1x1x16x32xbf16>
    tpu.vector_store %arg9[%c0_34, %c1_35, %c0_36, %c0_37], %63 {strides = array<i32>} : memref<1x4x16x32xbf16, #tpu.memory_space<vmem>>, vector<1x1x16x32xbf16>,
    %64 = vector.extract_strided_slice %33 {offsets = [0, 64], sizes = [16, 32], strides = [1, 1]} : vector<16x384xf32> to vector<16x32xf32>
    %65 = arith.truncf %64 : vector<16x32xf32> to vector<16x32xbf16>
    %c0_38 = arith.constant 0 : index
    %c2 = arith.constant 2 : index
    %c0_39 = arith.constant 0 : index
    %c0_40 = arith.constant 0 : index
    %66 = vector.load %arg7[%c0_38, %c2, %c0_39, %c0_40] : memref<1x4x16x32xbf16, #tpu.memory_space<vmem>>, vector<1x1x16x32xbf16>
    %67 = vector.shape_cast %66 : vector<1x1x16x32xbf16> to vector<16x32xbf16>
    %68 = vector.shape_cast %65 : vector<16x32xbf16> to vector<1x1x16x32xbf16>
    tpu.vector_store %arg7[%c0_38, %c2, %c0_39, %c0_40], %68 {strides = array<i32>} : memref<1x4x16x32xbf16, #tpu.memory_space<vmem>>, vector<1x1x16x32xbf16>,
    %69 = vector.extract_strided_slice %33 {offsets = [0, 192], sizes = [16, 32], strides = [1, 1]} : vector<16x384xf32> to vector<16x32xf32>
    %70 = arith.truncf %69 : vector<16x32xf32> to vector<16x32xbf16>
    %c0_41 = arith.constant 0 : index
    %c2_42 = arith.constant 2 : index
    %c0_43 = arith.constant 0 : index
    %c0_44 = arith.constant 0 : index
    %71 = vector.load %arg8[%c0_41, %c2_42, %c0_43, %c0_44] : memref<1x4x16x32xbf16, #tpu.memory_space<vmem>>, vector<1x1x16x32xbf16>
    %72 = vector.shape_cast %71 : vector<1x1x16x32xbf16> to vector<16x32xbf16>
    %73 = vector.shape_cast %70 : vector<16x32xbf16> to vector<1x1x16x32xbf16>
    tpu.vector_store %arg8[%c0_41, %c2_42, %c0_43, %c0_44], %73 {strides = array<i32>} : memref<1x4x16x32xbf16, #tpu.memory_space<vmem>>, vector<1x1x16x32xbf16>,
    %74 = vector.extract_strided_slice %33 {offsets = [0, 320], sizes = [16, 32], strides = [1, 1]} : vector<16x384xf32> to vector<16x32xf32>
    %75 = arith.truncf %74 : vector<16x32xf32> to vector<16x32xbf16>
    %c0_45 = arith.constant 0 : index
    %c2_46 = arith.constant 2 : index
    %c0_47 = arith.constant 0 : index
    %c0_48 = arith.constant 0 : index
    %76 = vector.load %arg9[%c0_45, %c2_46, %c0_47, %c0_48] : memref<1x4x16x32xbf16, #tpu.memory_space<vmem>>, vector<1x1x16x32xbf16>
    %77 = vector.shape_cast %76 : vector<1x1x16x32xbf16> to vector<16x32xbf16>
    %78 = vector.shape_cast %75 : vector<16x32xbf16> to vector<1x1x16x32xbf16>
    tpu.vector_store %arg9[%c0_45, %c2_46, %c0_47, %c0_48], %78 {strides = array<i32>} : memref<1x4x16x32xbf16, #tpu.memory_space<vmem>>, vector<1x1x16x32xbf16>,
    %79 = vector.extract_strided_slice %33 {offsets = [0, 96], sizes = [16, 32], strides = [1, 1]} : vector<16x384xf32> to vector<16x32xf32>
    %80 = arith.truncf %79 : vector<16x32xf32> to vector<16x32xbf16>
    %c0_49 = arith.constant 0 : index
    %c3 = arith.constant 3 : index
    %c0_50 = arith.constant 0 : index
    %c0_51 = arith.constant 0 : index
    %81 = vector.load %arg7[%c0_49, %c3, %c0_50, %c0_51] : memref<1x4x16x32xbf16, #tpu.memory_space<vmem>>, vector<1x1x16x32xbf16>
    %82 = vector.shape_cast %81 : vector<1x1x16x32xbf16> to vector<16x32xbf16>
    %83 = vector.shape_cast %80 : vector<16x32xbf16> to vector<1x1x16x32xbf16>
    tpu.vector_store %arg7[%c0_49, %c3, %c0_50, %c0_51], %83 {strides = array<i32>} : memref<1x4x16x32xbf16, #tpu.memory_space<vmem>>, vector<1x1x16x32xbf16>,
    %84 = vector.extract_strided_slice %33 {offsets = [0, 224], sizes = [16, 32], strides = [1, 1]} : vector<16x384xf32> to vector<16x32xf32>
    %85 = arith.truncf %84 : vector<16x32xf32> to vector<16x32xbf16>
    %c0_52 = arith.constant 0 : index
    %c3_53 = arith.constant 3 : index
    %c0_54 = arith.constant 0 : index
    %c0_55 = arith.constant 0 : index
    %86 = vector.load %arg8[%c0_52, %c3_53, %c0_54, %c0_55] : memref<1x4x16x32xbf16, #tpu.memory_space<vmem>>, vector<1x1x16x32xbf16>
    %87 = vector.shape_cast %86 : vector<1x1x16x32xbf16> to vector<16x32xbf16>
    %88 = vector.shape_cast %85 : vector<16x32xbf16> to vector<1x1x16x32xbf16>
    tpu.vector_store %arg8[%c0_52, %c3_53, %c0_54, %c0_55], %88 {strides = array<i32>} : memref<1x4x16x32xbf16, #tpu.memory_space<vmem>>, vector<1x1x16x32xbf16>,
    %89 = vector.extract_strided_slice %33 {offsets = [0, 352], sizes = [16, 32], strides = [1, 1]} : vector<16x384xf32> to vector<16x32xf32>
    %90 = arith.truncf %89 : vector<16x32xf32> to vector<16x32xbf16>
    %c0_56 = arith.constant 0 : index
    %c3_57 = arith.constant 3 : index
    %c0_58 = arith.constant 0 : index
    %c0_59 = arith.constant 0 : index
    %91 = vector.load %arg9[%c0_56, %c3_57, %c0_58, %c0_59] : memref<1x4x16x32xbf16, #tpu.memory_space<vmem>>, vector<1x1x16x32xbf16>
    %92 = vector.shape_cast %91 : vector<1x1x16x32xbf16> to vector<16x32xbf16>
    %93 = vector.shape_cast %90 : vector<16x32xbf16> to vector<1x1x16x32xbf16>
    tpu.vector_store %arg9[%c0_56, %c3_57, %c0_58, %c0_59], %93 {strides = array<i32>} : memref<1x4x16x32xbf16, #tpu.memory_space<vmem>>, vector<1x1x16x32xbf16>,
    return
  }
  func.func @transform_0(%arg0: i32, %arg1: i32) -> (i32, i32, i32) {
    %c0_i32 = arith.constant 0 : i32
    %c0_i32_0 = arith.constant 0 : i32
    return %arg0, %arg1, %c0_i32 : i32, i32, i32
  }
  func.func @transform_1(%arg0: i32, %arg1: i32) -> (i32, i32) {
    %c0_i32 = arith.constant 0 : i32
    %c0_i32_0 = arith.constant 0 : i32
    %c0_i32_1 = arith.constant 0 : i32
    return %c0_i32, %c0_i32_0 : i32, i32
  }
  func.func @transform_2(%arg0: i32, %arg1: i32) -> (i32, i32) {
    %c0_i32 = arith.constant 0 : i32
    %c0_i32_0 = arith.constant 0 : i32
    %c0_i32_1 = arith.constant 0 : i32
    return %c0_i32, %c0_i32_0 : i32, i32
  }
  func.func @transform_3(%arg0: i32, %arg1: i32) -> (i32, i32) {
    %c0_i32 = arith.constant 0 : i32
    %c0_i32_0 = arith.constant 0 : i32
    %c0_i32_1 = arith.constant 0 : i32
    return %c0_i32, %c0_i32_0 : i32, i32
  }
  func.func @transform_4(%arg0: i32, %arg1: i32) -> (i32, i32) {
    %c0_i32 = arith.constant 0 : i32
    %c0_i32_0 = arith.constant 0 : i32
    %c0_i32_1 = arith.constant 0 : i32
    return %c0_i32, %c0_i32_0 : i32, i32
  }
  func.func @transform_5(%arg0: i32, %arg1: i32) -> (i32, i32, i32, i32) {
    %c0_i32 = arith.constant 0 : i32
    %c0_i32_0 = arith.constant 0 : i32
    %c0_i32_1 = arith.constant 0 : i32
    return %arg0, %c0_i32, %arg1, %c0_i32_0 : i32, i32, i32, i32
  }
  func.func @transform_6(%arg0: i32, %arg1: i32) -> (i32, i32, i32, i32) {
    %c0_i32 = arith.constant 0 : i32
    %c0_i32_0 = arith.constant 0 : i32
    %c0_i32_1 = arith.constant 0 : i32
    return %arg0, %c0_i32, %arg1, %c0_i32_0 : i32, i32, i32, i32
  }
  func.func @transform_7(%arg0: i32, %arg1: i32) -> (i32, i32, i32, i32) {
    %c0_i32 = arith.constant 0 : i32
    %c0_i32_0 = arith.constant 0 : i32
    %c0_i32_1 = arith.constant 0 : i32
    return %arg0, %c0_i32, %arg1, %c0_i32_0 : i32, i32, i32, i32
  }
}

module attributes {stable_mosaic.version = 11 : i64} {
  func.func @_flash_kernel(%arg0: i32, %arg1: i32, %arg2: i32, %arg3: i32, %arg4: memref<1x1x16x32xbf16, #tpu.memory_space<vmem>>, %arg5: memref<1x1x16x32xbf16, #tpu.memory_space<vmem>>, %arg6: memref<1x1x16x32xbf16, #tpu.memory_space<vmem>>, %arg7: memref<1x1x16x32xbf16, #tpu.memory_space<vmem>>, %arg8: memref<16x1xf32, #tpu.memory_space<vmem>>, %arg9: memref<16x1xf32, #tpu.memory_space<vmem>>, %arg10: memref<16x32xf32, #tpu.memory_space<vmem>>) attributes {dimension_semantics = [#tpu.dimension_semantics<parallel>, #tpu.dimension_semantics<parallel>, #tpu.dimension_semantics<parallel>, #tpu.dimension_semantics<arbitrary>], iteration_bounds = array<i64: 2, 4, 1, 1>, scalar_prefetch = 0 : i64, scratch_operands = 3 : i64, tpu.core_type = #tpu.core_type<tc>, window_params = [{transform_indices = @transform_0, window_bounds = array<i64: 1, 1, 16, 32>}, {transform_indices = @transform_1, window_bounds = array<i64: 1, 1, 16, 32>}, {transform_indices = @transform_2, window_bounds = array<i64: 1, 1, 16, 32>}, {transform_indices = @transform_3, window_bounds = array<i64: 1, 1, 16, 32>}]} {
    %c0_i32 = arith.constant 0 : i32
    %0 = arith.cmpi eq, %arg3, %c0_i32 : i32
    %1 = arith.extui %0 : i1 to i32
    %c0_i32_0 = arith.constant 0 : i32
    %2 = arith.cmpi ne, %1, %c0_i32_0 : i32
    scf.if %2 {
      %cst_30 = arith.constant 0xFF800000 : f32
      %38 = vector.broadcast %cst_30 : f32 to vector<16x1xf32>
      %c0_31 = arith.constant 0 : index
      %c0_32 = arith.constant 0 : index
      %39 = vector.load %arg8[%c0_31, %c0_32] : memref<16x1xf32, #tpu.memory_space<vmem>>, vector<16x1xf32>
      tpu.vector_store %arg8[%c0_31, %c0_32], %38 {strides = array<i32>} : memref<16x1xf32, #tpu.memory_space<vmem>>, vector<16x1xf32>,
      %cst_33 = arith.constant 0.000000e+00 : f32
      %40 = vector.broadcast %cst_33 : f32 to vector<16x1xf32>
      %c0_34 = arith.constant 0 : index
      %c0_35 = arith.constant 0 : index
      %41 = vector.load %arg9[%c0_34, %c0_35] : memref<16x1xf32, #tpu.memory_space<vmem>>, vector<16x1xf32>
      tpu.vector_store %arg9[%c0_34, %c0_35], %40 {strides = array<i32>} : memref<16x1xf32, #tpu.memory_space<vmem>>, vector<16x1xf32>,
      %cst_36 = arith.constant 0.000000e+00 : f32
      %42 = vector.broadcast %cst_36 : f32 to vector<16x32xf32>
      %c0_37 = arith.constant 0 : index
      %c0_38 = arith.constant 0 : index
      %43 = vector.load %arg10[%c0_37, %c0_38] : memref<16x32xf32, #tpu.memory_space<vmem>>, vector<16x32xf32>
      tpu.vector_store %arg10[%c0_37, %c0_38], %42 {strides = array<i32>} : memref<16x32xf32, #tpu.memory_space<vmem>>, vector<16x32xf32>,
    } else {
    }
    %c0 = arith.constant 0 : index
    %c0_1 = arith.constant 0 : index
    %c0_2 = arith.constant 0 : index
    %c0_3 = arith.constant 0 : index
    %3 = vector.load %arg4[%c0, %c0_1, %c0_2, %c0_3] : memref<1x1x16x32xbf16, #tpu.memory_space<vmem>>, vector<1x1x16x32xbf16>
    %4 = vector.shape_cast %3 : vector<1x1x16x32xbf16> to vector<16x32xbf16>
    %c0_4 = arith.constant 0 : index
    %c0_5 = arith.constant 0 : index
    %c0_6 = arith.constant 0 : index
    %c0_7 = arith.constant 0 : index
    %5 = vector.load %arg5[%c0_4, %c0_5, %c0_6, %c0_7] : memref<1x1x16x32xbf16, #tpu.memory_space<vmem>>, vector<1x1x16x32xbf16>
    %6 = vector.shape_cast %5 : vector<1x1x16x32xbf16> to vector<16x32xbf16>
    %cst = arith.constant dense<0.000000e+00> : vector<16x16xf32>
    %7 = tpu.matmul %4, %6, %cst {dimension_numbers = #tpu.dot_dimension_numbers<[1], [1], [0], [0], [0, 0, 1, 0], [], []>} : vector<16x32xbf16>, vector<16x32xbf16>, vector<16x16xf32> -> vector<16x16xf32>
    %cst_8 = arith.constant 0.176776692 : f32
    %8 = vector.broadcast %cst_8 : f32 to vector<16x16xf32>
    %9 = arith.mulf %7, %8 : vector<16x16xf32>
    %c0_9 = arith.constant 0 : index
    %c0_10 = arith.constant 0 : index
    %10 = vector.load %arg8[%c0_9, %c0_10] : memref<16x1xf32, #tpu.memory_space<vmem>>, vector<16x1xf32>
    %cst_11 = arith.constant dense<0xFF800000> : vector<16xf32>
    %11 = vector.multi_reduction <maximumf>, %9, %cst_11 [1] : vector<16x16xf32> to vector<16xf32>
    %12 = vector.shape_cast %11 : vector<16xf32> to vector<16x1xf32>
    %13 = arith.maximumf %10, %12 : vector<16x1xf32>
    %14 = arith.subf %10, %13 : vector<16x1xf32>
    %15 = math.exp %14 : vector<16x1xf32>
    %16 = vector.broadcast %13 : vector<16x1xf32> to vector<16x16xf32>
    %17 = arith.subf %9, %16 : vector<16x16xf32>
    %18 = math.exp %17 : vector<16x16xf32>
    %c0_12 = arith.constant 0 : index
    %c0_13 = arith.constant 0 : index
    %19 = vector.load %arg9[%c0_12, %c0_13] : memref<16x1xf32, #tpu.memory_space<vmem>>, vector<16x1xf32>
    %20 = arith.mulf %15, %19 : vector<16x1xf32>
    %cst_14 = arith.constant dense<0.000000e+00> : vector<16xf32>
    %21 = vector.multi_reduction <add>, %18, %cst_14 [1] : vector<16x16xf32> to vector<16xf32>
    %22 = vector.shape_cast %21 : vector<16xf32> to vector<16x1xf32>
    %23 = arith.addf %20, %22 : vector<16x1xf32>
    %c0_15 = arith.constant 0 : index
    %c0_16 = arith.constant 0 : index
    %24 = vector.load %arg9[%c0_15, %c0_16] : memref<16x1xf32, #tpu.memory_space<vmem>>, vector<16x1xf32>
    tpu.vector_store %arg9[%c0_15, %c0_16], %23 {strides = array<i32>} : memref<16x1xf32, #tpu.memory_space<vmem>>, vector<16x1xf32>,
    %c0_17 = arith.constant 0 : index
    %c0_18 = arith.constant 0 : index
    %25 = vector.load %arg10[%c0_17, %c0_18] : memref<16x32xf32, #tpu.memory_space<vmem>>, vector<16x32xf32>
    %26 = vector.broadcast %15 : vector<16x1xf32> to vector<16x32xf32>
    %27 = arith.mulf %26, %25 : vector<16x32xf32>
    %28 = arith.truncf %18 : vector<16x16xf32> to vector<16x16xbf16>
    %c0_19 = arith.constant 0 : index
    %c0_20 = arith.constant 0 : index
    %c0_21 = arith.constant 0 : index
    %c0_22 = arith.constant 0 : index
    %29 = vector.load %arg6[%c0_19, %c0_20, %c0_21, %c0_22] : memref<1x1x16x32xbf16, #tpu.memory_space<vmem>>, vector<1x1x16x32xbf16>
    %30 = vector.shape_cast %29 : vector<1x1x16x32xbf16> to vector<16x32xbf16>
    %cst_23 = arith.constant dense<0.000000e+00> : vector<16x32xf32>
    %31 = tpu.matmul %28, %30, %cst_23 {dimension_numbers = #tpu.dot_dimension_numbers<[1], [0], [0], [1], [0, 0, 1, 1], [], []>} : vector<16x16xbf16>, vector<16x32xbf16>, vector<16x32xf32> -> vector<16x32xf32>
    %32 = arith.addf %27, %31 : vector<16x32xf32>
    %c0_24 = arith.constant 0 : index
    %c0_25 = arith.constant 0 : index
    %33 = vector.load %arg10[%c0_24, %c0_25] : memref<16x32xf32, #tpu.memory_space<vmem>>, vector<16x32xf32>
    tpu.vector_store %arg10[%c0_24, %c0_25], %32 {strides = array<i32>} : memref<16x32xf32, #tpu.memory_space<vmem>>, vector<16x32xf32>,
    %c0_26 = arith.constant 0 : index
    %c0_27 = arith.constant 0 : index
    %34 = vector.load %arg8[%c0_26, %c0_27] : memref<16x1xf32, #tpu.memory_space<vmem>>, vector<16x1xf32>
    tpu.vector_store %arg8[%c0_26, %c0_27], %13 {strides = array<i32>} : memref<16x1xf32, #tpu.memory_space<vmem>>, vector<16x1xf32>,
    %c0_i32_28 = arith.constant 0 : i32
    %35 = arith.cmpi eq, %arg3, %c0_i32_28 : i32
    %36 = arith.extui %35 : i1 to i32
    %c0_i32_29 = arith.constant 0 : i32
    %37 = arith.cmpi ne, %36, %c0_i32_29 : i32
    scf.if %37 {
      %c0_30 = arith.constant 0 : index
      %c0_31 = arith.constant 0 : index
      %38 = vector.load %arg10[%c0_30, %c0_31] : memref<16x32xf32, #tpu.memory_space<vmem>>, vector<16x32xf32>
      %c0_32 = arith.constant 0 : index
      %c0_33 = arith.constant 0 : index
      %39 = vector.load %arg9[%c0_32, %c0_33] : memref<16x1xf32, #tpu.memory_space<vmem>>, vector<16x1xf32>
      %40 = vector.broadcast %39 : vector<16x1xf32> to vector<16x32xf32>
      %41 = arith.divf %38, %40 : vector<16x32xf32>
      %42 = arith.truncf %41 : vector<16x32xf32> to vector<16x32xbf16>
      %c0_34 = arith.constant 0 : index
      %c0_35 = arith.constant 0 : index
      %c0_36 = arith.constant 0 : index
      %c0_37 = arith.constant 0 : index
      %43 = vector.load %arg7[%c0_34, %c0_35, %c0_36, %c0_37] : memref<1x1x16x32xbf16, #tpu.memory_space<vmem>>, vector<1x1x16x32xbf16>
      %44 = vector.shape_cast %43 : vector<1x1x16x32xbf16> to vector<16x32xbf16>
      %45 = vector.shape_cast %42 : vector<16x32xbf16> to vector<1x1x16x32xbf16>
      tpu.vector_store %arg7[%c0_34, %c0_35, %c0_36, %c0_37], %45 {strides = array<i32>} : memref<1x1x16x32xbf16, #tpu.memory_space<vmem>>, vector<1x1x16x32xbf16>,
    } else {
    }
    return
  }
  func.func @transform_0(%arg0: i32, %arg1: i32, %arg2: i32, %arg3: i32) -> (i32, i32, i32, i32) {
    %c0_i32 = arith.constant 0 : i32
    %c0_i32_0 = arith.constant 0 : i32
    return %arg0, %arg1, %arg2, %c0_i32 : i32, i32, i32, i32
  }
  func.func @transform_1(%arg0: i32, %arg1: i32, %arg2: i32, %arg3: i32) -> (i32, i32, i32, i32) {
    %c0_i32 = arith.constant 0 : i32
    %c0_i32_0 = arith.constant 0 : i32
    return %arg0, %arg1, %arg3, %c0_i32 : i32, i32, i32, i32
  }
  func.func @transform_2(%arg0: i32, %arg1: i32, %arg2: i32, %arg3: i32) -> (i32, i32, i32, i32) {
    %c0_i32 = arith.constant 0 : i32
    %c0_i32_0 = arith.constant 0 : i32
    return %arg0, %arg1, %arg3, %c0_i32 : i32, i32, i32, i32
  }
  func.func @transform_3(%arg0: i32, %arg1: i32, %arg2: i32, %arg3: i32) -> (i32, i32, i32, i32) {
    %c0_i32 = arith.constant 0 : i32
    %c0_i32_0 = arith.constant 0 : i32
    return %arg0, %arg1, %arg2, %c0_i32 : i32, i32, i32, i32
  }
}

module attributes {stable_mosaic.version = 11 : i64} {
  func.func @_attn_out_kernel(%arg0: i32, %arg1: i32, %arg2: memref<1x4x16x32xbf16, #tpu.memory_space<vmem>>, %arg3: memref<128x128xbf16, #tpu.memory_space<vmem>>, %arg4: memref<1x128xbf16, #tpu.memory_space<vmem>>, %arg5: memref<1x16x128xbf16, #tpu.memory_space<vmem>>, %arg6: memref<1x16x128xbf16, #tpu.memory_space<vmem>>) attributes {dimension_semantics = [#tpu.dimension_semantics<parallel>, #tpu.dimension_semantics<parallel>], iteration_bounds = array<i64: 2, 1>, scalar_prefetch = 0 : i64, scratch_operands = 0 : i64, tpu.core_type = #tpu.core_type<tc>, window_params = [{transform_indices = @transform_0, window_bounds = array<i64: 1, 4, 16, 32>}, {pipeline_mode = #tpu.pipeline_mode<synchronous>, transform_indices = @transform_1, window_bounds = array<i64: 128, 128>}, {pipeline_mode = #tpu.pipeline_mode<synchronous>, transform_indices = @transform_2, window_bounds = array<i64: 1, 128>}, {transform_indices = @transform_3, window_bounds = array<i64: 1, 16, 128>}, {transform_indices = @transform_4, window_bounds = array<i64: 1, 16, 128>}]} {
    %c0 = arith.constant 0 : index
    %c0_0 = arith.constant 0 : index
    %c0_1 = arith.constant 0 : index
    %c0_2 = arith.constant 0 : index
    %0 = vector.load %arg2[%c0, %c0_0, %c0_1, %c0_2] : memref<1x4x16x32xbf16, #tpu.memory_space<vmem>>, vector<1x1x16x32xbf16>
    %1 = vector.shape_cast %0 : vector<1x1x16x32xbf16> to vector<16x32xbf16>
    %c0_3 = arith.constant 0 : index
    %c1 = arith.constant 1 : index
    %c0_4 = arith.constant 0 : index
    %c0_5 = arith.constant 0 : index
    %2 = vector.load %arg2[%c0_3, %c1, %c0_4, %c0_5] : memref<1x4x16x32xbf16, #tpu.memory_space<vmem>>, vector<1x1x16x32xbf16>
    %3 = vector.shape_cast %2 : vector<1x1x16x32xbf16> to vector<16x32xbf16>
    %c0_6 = arith.constant 0 : index
    %c2 = arith.constant 2 : index
    %c0_7 = arith.constant 0 : index
    %c0_8 = arith.constant 0 : index
    %4 = vector.load %arg2[%c0_6, %c2, %c0_7, %c0_8] : memref<1x4x16x32xbf16, #tpu.memory_space<vmem>>, vector<1x1x16x32xbf16>
    %5 = vector.shape_cast %4 : vector<1x1x16x32xbf16> to vector<16x32xbf16>
    %c0_9 = arith.constant 0 : index
    %c3 = arith.constant 3 : index
    %c0_10 = arith.constant 0 : index
    %c0_11 = arith.constant 0 : index
    %6 = vector.load %arg2[%c0_9, %c3, %c0_10, %c0_11] : memref<1x4x16x32xbf16, #tpu.memory_space<vmem>>, vector<1x1x16x32xbf16>
    %7 = vector.shape_cast %6 : vector<1x1x16x32xbf16> to vector<16x32xbf16>
    %8 = tpu.concatenate %1, %3, %5, %7 in 1 : vector<16x32xbf16>, vector<16x32xbf16>, vector<16x32xbf16>, vector<16x32xbf16> -> vector<16x128xbf16>
    %c0_12 = arith.constant 0 : index
    %c0_13 = arith.constant 0 : index
    %9 = vector.load %arg3[%c0_12, %c0_13] : memref<128x128xbf16, #tpu.memory_space<vmem>>, vector<128x128xbf16>
    %cst = arith.constant dense<0.000000e+00> : vector<16x128xf32>
    %10 = tpu.matmul %8, %9, %cst {dimension_numbers = #tpu.dot_dimension_numbers<[1], [0], [0], [1], [0, 0, 1, 1], [], []>} : vector<16x128xbf16>, vector<128x128xbf16>, vector<16x128xf32> -> vector<16x128xf32>
    %c0_14 = arith.constant 0 : index
    %c0_15 = arith.constant 0 : index
    %11 = vector.load %arg4[%c0_14, %c0_15] : memref<1x128xbf16, #tpu.memory_space<vmem>>, vector<1x128xbf16>
    %12 = arith.extf %11 : vector<1x128xbf16> to vector<1x128xf32>
    %13 = vector.broadcast %12 : vector<1x128xf32> to vector<16x128xf32>
    %14 = arith.addf %10, %13 : vector<16x128xf32>
    %c0_16 = arith.constant 0 : index
    %c0_17 = arith.constant 0 : index
    %c0_18 = arith.constant 0 : index
    %15 = vector.load %arg5[%c0_16, %c0_17, %c0_18] : memref<1x16x128xbf16, #tpu.memory_space<vmem>>, vector<1x16x128xbf16>
    %16 = vector.shape_cast %15 : vector<1x16x128xbf16> to vector<16x128xbf16>
    %17 = arith.extf %16 : vector<16x128xbf16> to vector<16x128xf32>
    %18 = arith.addf %14, %17 : vector<16x128xf32>
    %19 = arith.truncf %18 : vector<16x128xf32> to vector<16x128xbf16>
    %c0_19 = arith.constant 0 : index
    %c0_20 = arith.constant 0 : index
    %c0_21 = arith.constant 0 : index
    %20 = vector.load %arg6[%c0_19, %c0_20, %c0_21] : memref<1x16x128xbf16, #tpu.memory_space<vmem>>, vector<1x16x128xbf16>
    %21 = vector.shape_cast %20 : vector<1x16x128xbf16> to vector<16x128xbf16>
    %22 = vector.shape_cast %19 : vector<16x128xbf16> to vector<1x16x128xbf16>
    tpu.vector_store %arg6[%c0_19, %c0_20, %c0_21], %22 {strides = array<i32>} : memref<1x16x128xbf16, #tpu.memory_space<vmem>>, vector<1x16x128xbf16>,
    return
  }
  func.func @transform_0(%arg0: i32, %arg1: i32) -> (i32, i32, i32, i32) {
    %c0_i32 = arith.constant 0 : i32
    %c0_i32_0 = arith.constant 0 : i32
    %c0_i32_1 = arith.constant 0 : i32
    return %arg0, %c0_i32, %arg1, %c0_i32_0 : i32, i32, i32, i32
  }
  func.func @transform_1(%arg0: i32, %arg1: i32) -> (i32, i32) {
    %c0_i32 = arith.constant 0 : i32
    %c0_i32_0 = arith.constant 0 : i32
    %c0_i32_1 = arith.constant 0 : i32
    return %c0_i32, %c0_i32_0 : i32, i32
  }
  func.func @transform_2(%arg0: i32, %arg1: i32) -> (i32, i32) {
    %c0_i32 = arith.constant 0 : i32
    %c0_i32_0 = arith.constant 0 : i32
    %c0_i32_1 = arith.constant 0 : i32
    return %c0_i32, %c0_i32_0 : i32, i32
  }
  func.func @transform_3(%arg0: i32, %arg1: i32) -> (i32, i32, i32) {
    %c0_i32 = arith.constant 0 : i32
    %c0_i32_0 = arith.constant 0 : i32
    return %arg0, %arg1, %c0_i32 : i32, i32, i32
  }
  func.func @transform_4(%arg0: i32, %arg1: i32) -> (i32, i32, i32) {
    %c0_i32 = arith.constant 0 : i32
    %c0_i32_0 = arith.constant 0 : i32
    return %arg0, %arg1, %c0_i32 : i32, i32, i32
  }
}

module attributes {stable_mosaic.version = 11 : i64} {
  func.func @_ln_glu_kernel(%arg0: i32, %arg1: i32, %arg2: memref<1x16x128xbf16, #tpu.memory_space<vmem>>, %arg3: memref<1x128xbf16, #tpu.memory_space<vmem>>, %arg4: memref<1x128xbf16, #tpu.memory_space<vmem>>, %arg5: memref<128x128xbf16, #tpu.memory_space<vmem>>, %arg6: memref<1x128xbf16, #tpu.memory_space<vmem>>, %arg7: memref<128x128xbf16, #tpu.memory_space<vmem>>, %arg8: memref<1x128xbf16, #tpu.memory_space<vmem>>, %arg9: memref<1x16x128xbf16, #tpu.memory_space<vmem>>) attributes {dimension_semantics = [#tpu.dimension_semantics<parallel>, #tpu.dimension_semantics<parallel>], iteration_bounds = array<i64: 2, 1>, scalar_prefetch = 0 : i64, scratch_operands = 0 : i64, tpu.core_type = #tpu.core_type<tc>, window_params = [{transform_indices = @transform_0, window_bounds = array<i64: 1, 16, 128>}, {pipeline_mode = #tpu.pipeline_mode<synchronous>, transform_indices = @transform_1, window_bounds = array<i64: 1, 128>}, {pipeline_mode = #tpu.pipeline_mode<synchronous>, transform_indices = @transform_2, window_bounds = array<i64: 1, 128>}, {pipeline_mode = #tpu.pipeline_mode<synchronous>, transform_indices = @transform_3, window_bounds = array<i64: 128, 128>}, {pipeline_mode = #tpu.pipeline_mode<synchronous>, transform_indices = @transform_4, window_bounds = array<i64: 1, 128>}, {pipeline_mode = #tpu.pipeline_mode<synchronous>, transform_indices = @transform_5, window_bounds = array<i64: 128, 128>}, {pipeline_mode = #tpu.pipeline_mode<synchronous>, transform_indices = @transform_6, window_bounds = array<i64: 1, 128>}, {transform_indices = @transform_7, window_bounds = array<i64: 1, 16, 128>}]} {
    %c0 = arith.constant 0 : index
    %c0_0 = arith.constant 0 : index
    %c0_1 = arith.constant 0 : index
    %0 = vector.load %arg2[%c0, %c0_0, %c0_1] : memref<1x16x128xbf16, #tpu.memory_space<vmem>>, vector<1x16x128xbf16>
    %1 = vector.shape_cast %0 : vector<1x16x128xbf16> to vector<16x128xbf16>
    %2 = arith.extf %1 : vector<16x128xbf16> to vector<16x128xf32>
    %c0_2 = arith.constant 0 : index
    %c0_3 = arith.constant 0 : index
    %3 = vector.load %arg3[%c0_2, %c0_3] : memref<1x128xbf16, #tpu.memory_space<vmem>>, vector<1x128xbf16>
    %4 = arith.extf %3 : vector<1x128xbf16> to vector<1x128xf32>
    %c0_4 = arith.constant 0 : index
    %c0_5 = arith.constant 0 : index
    %5 = vector.load %arg4[%c0_4, %c0_5] : memref<1x128xbf16, #tpu.memory_space<vmem>>, vector<1x128xbf16>
    %6 = arith.extf %5 : vector<1x128xbf16> to vector<1x128xf32>
    %cst = arith.constant dense<0.000000e+00> : vector<16xf32>
    %7 = vector.multi_reduction <add>, %2, %cst [1] : vector<16x128xf32> to vector<16xf32>
    %8 = vector.shape_cast %7 : vector<16xf32> to vector<16x1xf32>
    %cst_6 = arith.constant 1.280000e+02 : f32
    %9 = vector.broadcast %cst_6 : f32 to vector<16x1xf32>
    %10 = arith.divf %8, %9 : vector<16x1xf32>
    %11 = vector.broadcast %10 : vector<16x1xf32> to vector<16x128xf32>
    %12 = arith.subf %2, %11 : vector<16x128xf32>
    %13 = arith.mulf %12, %12 : vector<16x128xf32>
    %cst_7 = arith.constant dense<0.000000e+00> : vector<16xf32>
    %14 = vector.multi_reduction <add>, %13, %cst_7 [1] : vector<16x128xf32> to vector<16xf32>
    %15 = vector.shape_cast %14 : vector<16xf32> to vector<16x1xf32>
    %cst_8 = arith.constant 1.280000e+02 : f32
    %16 = vector.broadcast %cst_8 : f32 to vector<16x1xf32>
    %17 = arith.divf %15, %16 : vector<16x1xf32>
    %cst_9 = arith.constant 9.99999996E-13 : f32
    %18 = vector.broadcast %cst_9 : f32 to vector<16x1xf32>
    %19 = arith.addf %17, %18 : vector<16x1xf32>
    %20 = math.rsqrt %19 : vector<16x1xf32>
    %21 = vector.broadcast %20 : vector<16x1xf32> to vector<16x128xf32>
    %22 = arith.mulf %12, %21 : vector<16x128xf32>
    %23 = vector.broadcast %4 : vector<1x128xf32> to vector<16x128xf32>
    %24 = arith.mulf %22, %23 : vector<16x128xf32>
    %25 = vector.broadcast %6 : vector<1x128xf32> to vector<16x128xf32>
    %26 = arith.addf %24, %25 : vector<16x128xf32>
    %27 = arith.truncf %26 : vector<16x128xf32> to vector<16x128xbf16>
    %c0_10 = arith.constant 0 : index
    %c0_11 = arith.constant 0 : index
    %28 = vector.load %arg5[%c0_10, %c0_11] : memref<128x128xbf16, #tpu.memory_space<vmem>>, vector<128x128xbf16>
    %cst_12 = arith.constant dense<0.000000e+00> : vector<16x128xf32>
    %29 = tpu.matmul %27, %28, %cst_12 {dimension_numbers = #tpu.dot_dimension_numbers<[1], [0], [0], [1], [0, 0, 1, 1], [], []>} : vector<16x128xbf16>, vector<128x128xbf16>, vector<16x128xf32> -> vector<16x128xf32>
    %c0_13 = arith.constant 0 : index
    %c0_14 = arith.constant 0 : index
    %30 = vector.load %arg6[%c0_13, %c0_14] : memref<1x128xbf16, #tpu.memory_space<vmem>>, vector<1x128xbf16>
    %31 = arith.extf %30 : vector<1x128xbf16> to vector<1x128xf32>
    %32 = vector.broadcast %31 : vector<1x128xf32> to vector<16x128xf32>
    %33 = arith.addf %29, %32 : vector<16x128xf32>
    %c0_15 = arith.constant 0 : index
    %c0_16 = arith.constant 0 : index
    %34 = vector.load %arg7[%c0_15, %c0_16] : memref<128x128xbf16, #tpu.memory_space<vmem>>, vector<128x128xbf16>
    %cst_17 = arith.constant dense<0.000000e+00> : vector<16x128xf32>
    %35 = tpu.matmul %27, %34, %cst_17 {dimension_numbers = #tpu.dot_dimension_numbers<[1], [0], [0], [1], [0, 0, 1, 1], [], []>} : vector<16x128xbf16>, vector<128x128xbf16>, vector<16x128xf32> -> vector<16x128xf32>
    %c0_18 = arith.constant 0 : index
    %c0_19 = arith.constant 0 : index
    %36 = vector.load %arg8[%c0_18, %c0_19] : memref<1x128xbf16, #tpu.memory_space<vmem>>, vector<1x128xbf16>
    %37 = arith.extf %36 : vector<1x128xbf16> to vector<1x128xf32>
    %38 = vector.broadcast %37 : vector<1x128xf32> to vector<16x128xf32>
    %39 = arith.addf %35, %38 : vector<16x128xf32>
    %40 = arith.negf %39 : vector<16x128xf32>
    %41 = math.exp %40 : vector<16x128xf32>
    %cst_20 = arith.constant 1.000000e+00 : f32
    %42 = vector.broadcast %cst_20 : f32 to vector<16x128xf32>
    %43 = arith.addf %42, %41 : vector<16x128xf32>
    %44 = arith.divf %42, %43 : vector<16x128xf32>
    %45 = arith.mulf %33, %44 : vector<16x128xf32>
    %46 = arith.truncf %45 : vector<16x128xf32> to vector<16x128xbf16>
    %c0_21 = arith.constant 0 : index
    %c0_22 = arith.constant 0 : index
    %c0_23 = arith.constant 0 : index
    %47 = vector.load %arg9[%c0_21, %c0_22, %c0_23] : memref<1x16x128xbf16, #tpu.memory_space<vmem>>, vector<1x16x128xbf16>
    %48 = vector.shape_cast %47 : vector<1x16x128xbf16> to vector<16x128xbf16>
    %49 = vector.shape_cast %46 : vector<16x128xbf16> to vector<1x16x128xbf16>
    tpu.vector_store %arg9[%c0_21, %c0_22, %c0_23], %49 {strides = array<i32>} : memref<1x16x128xbf16, #tpu.memory_space<vmem>>, vector<1x16x128xbf16>,
    return
  }
  func.func @transform_0(%arg0: i32, %arg1: i32) -> (i32, i32, i32) {
    %c0_i32 = arith.constant 0 : i32
    %c0_i32_0 = arith.constant 0 : i32
    return %arg0, %arg1, %c0_i32 : i32, i32, i32
  }
  func.func @transform_1(%arg0: i32, %arg1: i32) -> (i32, i32) {
    %c0_i32 = arith.constant 0 : i32
    %c0_i32_0 = arith.constant 0 : i32
    %c0_i32_1 = arith.constant 0 : i32
    return %c0_i32, %c0_i32_0 : i32, i32
  }
  func.func @transform_2(%arg0: i32, %arg1: i32) -> (i32, i32) {
    %c0_i32 = arith.constant 0 : i32
    %c0_i32_0 = arith.constant 0 : i32
    %c0_i32_1 = arith.constant 0 : i32
    return %c0_i32, %c0_i32_0 : i32, i32
  }
  func.func @transform_3(%arg0: i32, %arg1: i32) -> (i32, i32) {
    %c0_i32 = arith.constant 0 : i32
    %c0_i32_0 = arith.constant 0 : i32
    %c0_i32_1 = arith.constant 0 : i32
    return %c0_i32, %c0_i32_0 : i32, i32
  }
  func.func @transform_4(%arg0: i32, %arg1: i32) -> (i32, i32) {
    %c0_i32 = arith.constant 0 : i32
    %c0_i32_0 = arith.constant 0 : i32
    %c0_i32_1 = arith.constant 0 : i32
    return %c0_i32, %c0_i32_0 : i32, i32
  }
  func.func @transform_5(%arg0: i32, %arg1: i32) -> (i32, i32) {
    %c0_i32 = arith.constant 0 : i32
    %c0_i32_0 = arith.constant 0 : i32
    %c0_i32_1 = arith.constant 0 : i32
    return %c0_i32, %c0_i32_0 : i32, i32
  }
  func.func @transform_6(%arg0: i32, %arg1: i32) -> (i32, i32) {
    %c0_i32 = arith.constant 0 : i32
    %c0_i32_0 = arith.constant 0 : i32
    %c0_i32_1 = arith.constant 0 : i32
    return %c0_i32, %c0_i32_0 : i32, i32
  }
  func.func @transform_7(%arg0: i32, %arg1: i32) -> (i32, i32, i32) {
    %c0_i32 = arith.constant 0 : i32
    %c0_i32_0 = arith.constant 0 : i32
    return %arg0, %arg1, %c0_i32 : i32, i32, i32
  }
}

module attributes {stable_mosaic.version = 11 : i64} {
  func.func @_conv_kernel(%arg0: i32, %arg1: i32, %arg2: memref<1x16x128xbf16, #tpu.memory_space<vmem>>, %arg3: memref<1x16x128xbf16, #tpu.memory_space<vmem>>, %arg4: memref<1x16x128xbf16, #tpu.memory_space<vmem>>, %arg5: memref<15x128xbf16, #tpu.memory_space<vmem>>, %arg6: memref<1x128xf32, #tpu.memory_space<vmem>>, %arg7: memref<1x128xf32, #tpu.memory_space<vmem>>, %arg8: memref<128x128xbf16, #tpu.memory_space<vmem>>, %arg9: memref<1x128xbf16, #tpu.memory_space<vmem>>, %arg10: memref<1x16x128xbf16, #tpu.memory_space<vmem>>, %arg11: memref<1x16x128xbf16, #tpu.memory_space<vmem>>, %arg12: memref<30x128xf32, #tpu.memory_space<vmem>>) attributes {dimension_semantics = [#tpu.dimension_semantics<parallel>, #tpu.dimension_semantics<parallel>], iteration_bounds = array<i64: 2, 1>, scalar_prefetch = 0 : i64, scratch_operands = 1 : i64, tpu.core_type = #tpu.core_type<tc>, window_params = [{transform_indices = @transform_0, window_bounds = array<i64: 1, 16, 128>}, {transform_indices = @transform_1, window_bounds = array<i64: 1, 16, 128>}, {transform_indices = @transform_2, window_bounds = array<i64: 1, 16, 128>}, {pipeline_mode = #tpu.pipeline_mode<synchronous>, transform_indices = @transform_3, window_bounds = array<i64: 15, 128>}, {pipeline_mode = #tpu.pipeline_mode<synchronous>, transform_indices = @transform_4, window_bounds = array<i64: 1, 128>}, {pipeline_mode = #tpu.pipeline_mode<synchronous>, transform_indices = @transform_5, window_bounds = array<i64: 1, 128>}, {pipeline_mode = #tpu.pipeline_mode<synchronous>, transform_indices = @transform_6, window_bounds = array<i64: 128, 128>}, {pipeline_mode = #tpu.pipeline_mode<synchronous>, transform_indices = @transform_7, window_bounds = array<i64: 1, 128>}, {transform_indices = @transform_8, window_bounds = array<i64: 1, 16, 128>}, {transform_indices = @transform_9, window_bounds = array<i64: 1, 16, 128>}]} {
    %c0 = arith.constant 0 : index
    %c0_0 = arith.constant 0 : index
    %c0_1 = arith.constant 0 : index
    %0 = vector.load %arg3[%c0, %c0_0, %c0_1] : memref<1x16x128xbf16, #tpu.memory_space<vmem>>, vector<1x16x128xbf16>
    %1 = vector.shape_cast %0 : vector<1x16x128xbf16> to vector<16x128xbf16>
    %2 = arith.extf %1 : vector<16x128xbf16> to vector<16x128xf32>
    %c7 = arith.constant 7 : index
    %c0_2 = arith.constant 0 : index
    %3 = vector.load %arg12[%c7, %c0_2] : memref<30x128xf32, #tpu.memory_space<vmem>>, vector<16x128xf32>
    tpu.vector_store %arg12[%c7, %c0_2], %2 {strides = array<i32>} : memref<30x128xf32, #tpu.memory_space<vmem>>, vector<16x128xf32>,
    %c0_i32 = arith.constant 0 : i32
    %4 = arith.cmpi sgt, %arg1, %c0_i32 : i32
    %5 = arith.extui %4 : i1 to i32
    %c0_i32_3 = arith.constant 0 : i32
    %6 = arith.cmpi ne, %5, %c0_i32_3 : i32
    scf.if %6 {
      %c0_45 = arith.constant 0 : index
      %c9_46 = arith.constant 9 : index
      %c0_47 = arith.constant 0 : index
      %121 = vector.load %arg2[%c0_45, %c9_46, %c0_47] : memref<1x16x128xbf16, #tpu.memory_space<vmem>>, vector<1x7x128xbf16>
      %122 = vector.shape_cast %121 : vector<1x7x128xbf16> to vector<7x128xbf16>
      %123 = arith.extf %122 : vector<7x128xbf16> to vector<7x128xf32>
      %c0_48 = arith.constant 0 : index
      %c0_49 = arith.constant 0 : index
      %124 = vector.load %arg12[%c0_48, %c0_49] : memref<30x128xf32, #tpu.memory_space<vmem>>, vector<7x128xf32>
      tpu.vector_store %arg12[%c0_48, %c0_49], %123 {strides = array<i32>} : memref<30x128xf32, #tpu.memory_space<vmem>>, vector<7x128xf32>,
    } else {
    }
    %c0_i32_4 = arith.constant 0 : i32
    %7 = arith.cmpi eq, %arg1, %c0_i32_4 : i32
    %8 = arith.extui %7 : i1 to i32
    %c0_i32_5 = arith.constant 0 : i32
    %9 = arith.cmpi ne, %8, %c0_i32_5 : i32
    scf.if %9 {
      %cst_45 = arith.constant 0.000000e+00 : f32
      %121 = vector.broadcast %cst_45 : f32 to vector<7x128xf32>
      %c0_46 = arith.constant 0 : index
      %c0_47 = arith.constant 0 : index
      %122 = vector.load %arg12[%c0_46, %c0_47] : memref<30x128xf32, #tpu.memory_space<vmem>>, vector<7x128xf32>
      tpu.vector_store %arg12[%c0_46, %c0_47], %121 {strides = array<i32>} : memref<30x128xf32, #tpu.memory_space<vmem>>, vector<7x128xf32>,
    } else {
    }
    %c0_i32_6 = arith.constant 0 : i32
    %10 = arith.cmpi slt, %arg1, %c0_i32_6 : i32
    %11 = arith.extui %10 : i1 to i32
    %c0_i32_7 = arith.constant 0 : i32
    %12 = arith.cmpi ne, %11, %c0_i32_7 : i32
    scf.if %12 {
      %c0_45 = arith.constant 0 : index
      %c0_46 = arith.constant 0 : index
      %c0_47 = arith.constant 0 : index
      %121 = vector.load %arg4[%c0_45, %c0_46, %c0_47] : memref<1x16x128xbf16, #tpu.memory_space<vmem>>, vector<1x7x128xbf16>
      %122 = vector.shape_cast %121 : vector<1x7x128xbf16> to vector<7x128xbf16>
      %123 = arith.extf %122 : vector<7x128xbf16> to vector<7x128xf32>
      %c23 = arith.constant 23 : index
      %c0_48 = arith.constant 0 : index
      %124 = vector.load %arg12[%c23, %c0_48] : memref<30x128xf32, #tpu.memory_space<vmem>>, vector<7x128xf32>
      tpu.vector_store %arg12[%c23, %c0_48], %123 {strides = array<i32>} : memref<30x128xf32, #tpu.memory_space<vmem>>, vector<7x128xf32>,
    } else {
    }
    %c0_i32_8 = arith.constant 0 : i32
    %13 = arith.cmpi eq, %arg1, %c0_i32_8 : i32
    %14 = arith.extui %13 : i1 to i32
    %c0_i32_9 = arith.constant 0 : i32
    %15 = arith.cmpi ne, %14, %c0_i32_9 : i32
    scf.if %15 {
      %cst_45 = arith.constant 0.000000e+00 : f32
      %121 = vector.broadcast %cst_45 : f32 to vector<7x128xf32>
      %c23 = arith.constant 23 : index
      %c0_46 = arith.constant 0 : index
      %122 = vector.load %arg12[%c23, %c0_46] : memref<30x128xf32, #tpu.memory_space<vmem>>, vector<7x128xf32>
      tpu.vector_store %arg12[%c23, %c0_46], %121 {strides = array<i32>} : memref<30x128xf32, #tpu.memory_space<vmem>>, vector<7x128xf32>,
    } else {
    }
    %c0_10 = arith.constant 0 : index
    %c0_11 = arith.constant 0 : index
    %16 = vector.load %arg5[%c0_10, %c0_11] : memref<15x128xbf16, #tpu.memory_space<vmem>>, vector<15x128xbf16>
    %17 = arith.extf %16 : vector<15x128xbf16> to vector<15x128xf32>
    %cst = arith.constant 0.000000e+00 : f32
    %18 = vector.broadcast %cst : f32 to vector<16x128xf32>
    %c0_12 = arith.constant 0 : index
    %c0_13 = arith.constant 0 : index
    %19 = vector.load %arg12[%c0_12, %c0_13] : memref<30x128xf32, #tpu.memory_space<vmem>>, vector<16x128xf32>
    %20 = vector.extract_strided_slice %17 {offsets = [0, 0], sizes = [1, 128], strides = [1, 1]} : vector<15x128xf32> to vector<1x128xf32>
    %21 = vector.broadcast %20 : vector<1x128xf32> to vector<16x128xf32>
    %22 = arith.mulf %19, %21 : vector<16x128xf32>
    %23 = arith.addf %18, %22 : vector<16x128xf32>
    %c1 = arith.constant 1 : index
    %c0_14 = arith.constant 0 : index
    %24 = vector.load %arg12[%c1, %c0_14] : memref<30x128xf32, #tpu.memory_space<vmem>>, vector<16x128xf32>
    %25 = vector.extract_strided_slice %17 {offsets = [1, 0], sizes = [1, 128], strides = [1, 1]} : vector<15x128xf32> to vector<1x128xf32>
    %26 = vector.broadcast %25 : vector<1x128xf32> to vector<16x128xf32>
    %27 = arith.mulf %24, %26 : vector<16x128xf32>
    %28 = arith.addf %23, %27 : vector<16x128xf32>
    %c2 = arith.constant 2 : index
    %c0_15 = arith.constant 0 : index
    %29 = vector.load %arg12[%c2, %c0_15] : memref<30x128xf32, #tpu.memory_space<vmem>>, vector<16x128xf32>
    %30 = vector.extract_strided_slice %17 {offsets = [2, 0], sizes = [1, 128], strides = [1, 1]} : vector<15x128xf32> to vector<1x128xf32>
    %31 = vector.broadcast %30 : vector<1x128xf32> to vector<16x128xf32>
    %32 = arith.mulf %29, %31 : vector<16x128xf32>
    %33 = arith.addf %28, %32 : vector<16x128xf32>
    %c3 = arith.constant 3 : index
    %c0_16 = arith.constant 0 : index
    %34 = vector.load %arg12[%c3, %c0_16] : memref<30x128xf32, #tpu.memory_space<vmem>>, vector<16x128xf32>
    %35 = vector.extract_strided_slice %17 {offsets = [3, 0], sizes = [1, 128], strides = [1, 1]} : vector<15x128xf32> to vector<1x128xf32>
    %36 = vector.broadcast %35 : vector<1x128xf32> to vector<16x128xf32>
    %37 = arith.mulf %34, %36 : vector<16x128xf32>
    %38 = arith.addf %33, %37 : vector<16x128xf32>
    %c4 = arith.constant 4 : index
    %c0_17 = arith.constant 0 : index
    %39 = vector.load %arg12[%c4, %c0_17] : memref<30x128xf32, #tpu.memory_space<vmem>>, vector<16x128xf32>
    %40 = vector.extract_strided_slice %17 {offsets = [4, 0], sizes = [1, 128], strides = [1, 1]} : vector<15x128xf32> to vector<1x128xf32>
    %41 = vector.broadcast %40 : vector<1x128xf32> to vector<16x128xf32>
    %42 = arith.mulf %39, %41 : vector<16x128xf32>
    %43 = arith.addf %38, %42 : vector<16x128xf32>
    %c5 = arith.constant 5 : index
    %c0_18 = arith.constant 0 : index
    %44 = vector.load %arg12[%c5, %c0_18] : memref<30x128xf32, #tpu.memory_space<vmem>>, vector<16x128xf32>
    %45 = vector.extract_strided_slice %17 {offsets = [5, 0], sizes = [1, 128], strides = [1, 1]} : vector<15x128xf32> to vector<1x128xf32>
    %46 = vector.broadcast %45 : vector<1x128xf32> to vector<16x128xf32>
    %47 = arith.mulf %44, %46 : vector<16x128xf32>
    %48 = arith.addf %43, %47 : vector<16x128xf32>
    %c6 = arith.constant 6 : index
    %c0_19 = arith.constant 0 : index
    %49 = vector.load %arg12[%c6, %c0_19] : memref<30x128xf32, #tpu.memory_space<vmem>>, vector<16x128xf32>
    %50 = vector.extract_strided_slice %17 {offsets = [6, 0], sizes = [1, 128], strides = [1, 1]} : vector<15x128xf32> to vector<1x128xf32>
    %51 = vector.broadcast %50 : vector<1x128xf32> to vector<16x128xf32>
    %52 = arith.mulf %49, %51 : vector<16x128xf32>
    %53 = arith.addf %48, %52 : vector<16x128xf32>
    %c7_20 = arith.constant 7 : index
    %c0_21 = arith.constant 0 : index
    %54 = vector.load %arg12[%c7_20, %c0_21] : memref<30x128xf32, #tpu.memory_space<vmem>>, vector<16x128xf32>
    %55 = vector.extract_strided_slice %17 {offsets = [7, 0], sizes = [1, 128], strides = [1, 1]} : vector<15x128xf32> to vector<1x128xf32>
    %56 = vector.broadcast %55 : vector<1x128xf32> to vector<16x128xf32>
    %57 = arith.mulf %54, %56 : vector<16x128xf32>
    %58 = arith.addf %53, %57 : vector<16x128xf32>
    %c8 = arith.constant 8 : index
    %c0_22 = arith.constant 0 : index
    %59 = vector.load %arg12[%c8, %c0_22] : memref<30x128xf32, #tpu.memory_space<vmem>>, vector<16x128xf32>
    %60 = vector.extract_strided_slice %17 {offsets = [8, 0], sizes = [1, 128], strides = [1, 1]} : vector<15x128xf32> to vector<1x128xf32>
    %61 = vector.broadcast %60 : vector<1x128xf32> to vector<16x128xf32>
    %62 = arith.mulf %59, %61 : vector<16x128xf32>
    %63 = arith.addf %58, %62 : vector<16x128xf32>
    %c9 = arith.constant 9 : index
    %c0_23 = arith.constant 0 : index
    %64 = vector.load %arg12[%c9, %c0_23] : memref<30x128xf32, #tpu.memory_space<vmem>>, vector<16x128xf32>
    %65 = vector.extract_strided_slice %17 {offsets = [9, 0], sizes = [1, 128], strides = [1, 1]} : vector<15x128xf32> to vector<1x128xf32>
    %66 = vector.broadcast %65 : vector<1x128xf32> to vector<16x128xf32>
    %67 = arith.mulf %64, %66 : vector<16x128xf32>
    %68 = arith.addf %63, %67 : vector<16x128xf32>
    %c10 = arith.constant 10 : index
    %c0_24 = arith.constant 0 : index
    %69 = vector.load %arg12[%c10, %c0_24] : memref<30x128xf32, #tpu.memory_space<vmem>>, vector<16x128xf32>
    %70 = vector.extract_strided_slice %17 {offsets = [10, 0], sizes = [1, 128], strides = [1, 1]} : vector<15x128xf32> to vector<1x128xf32>
    %71 = vector.broadcast %70 : vector<1x128xf32> to vector<16x128xf32>
    %72 = arith.mulf %69, %71 : vector<16x128xf32>
    %73 = arith.addf %68, %72 : vector<16x128xf32>
    %c11 = arith.constant 11 : index
    %c0_25 = arith.constant 0 : index
    %74 = vector.load %arg12[%c11, %c0_25] : memref<30x128xf32, #tpu.memory_space<vmem>>, vector<16x128xf32>
    %75 = vector.extract_strided_slice %17 {offsets = [11, 0], sizes = [1, 128], strides = [1, 1]} : vector<15x128xf32> to vector<1x128xf32>
    %76 = vector.broadcast %75 : vector<1x128xf32> to vector<16x128xf32>
    %77 = arith.mulf %74, %76 : vector<16x128xf32>
    %78 = arith.addf %73, %77 : vector<16x128xf32>
    %c12 = arith.constant 12 : index
    %c0_26 = arith.constant 0 : index
    %79 = vector.load %arg12[%c12, %c0_26] : memref<30x128xf32, #tpu.memory_space<vmem>>, vector<16x128xf32>
    %80 = vector.extract_strided_slice %17 {offsets = [12, 0], sizes = [1, 128], strides = [1, 1]} : vector<15x128xf32> to vector<1x128xf32>
    %81 = vector.broadcast %80 : vector<1x128xf32> to vector<16x128xf32>
    %82 = arith.mulf %79, %81 : vector<16x128xf32>
    %83 = arith.addf %78, %82 : vector<16x128xf32>
    %c13 = arith.constant 13 : index
    %c0_27 = arith.constant 0 : index
    %84 = vector.load %arg12[%c13, %c0_27] : memref<30x128xf32, #tpu.memory_space<vmem>>, vector<16x128xf32>
    %85 = vector.extract_strided_slice %17 {offsets = [13, 0], sizes = [1, 128], strides = [1, 1]} : vector<15x128xf32> to vector<1x128xf32>
    %86 = vector.broadcast %85 : vector<1x128xf32> to vector<16x128xf32>
    %87 = arith.mulf %84, %86 : vector<16x128xf32>
    %88 = arith.addf %83, %87 : vector<16x128xf32>
    %c14 = arith.constant 14 : index
    %c0_28 = arith.constant 0 : index
    %89 = vector.load %arg12[%c14, %c0_28] : memref<30x128xf32, #tpu.memory_space<vmem>>, vector<16x128xf32>
    %90 = vector.extract_strided_slice %17 {offsets = [14, 0], sizes = [1, 128], strides = [1, 1]} : vector<15x128xf32> to vector<1x128xf32>
    %91 = vector.broadcast %90 : vector<1x128xf32> to vector<16x128xf32>
    %92 = arith.mulf %89, %91 : vector<16x128xf32>
    %93 = arith.addf %88, %92 : vector<16x128xf32>
    %c0_29 = arith.constant 0 : index
    %c0_30 = arith.constant 0 : index
    %94 = vector.load %arg6[%c0_29, %c0_30] : memref<1x128xf32, #tpu.memory_space<vmem>>, vector<1x128xf32>
    %95 = vector.broadcast %94 : vector<1x128xf32> to vector<16x128xf32>
    %96 = arith.mulf %93, %95 : vector<16x128xf32>
    %c0_31 = arith.constant 0 : index
    %c0_32 = arith.constant 0 : index
    %97 = vector.load %arg7[%c0_31, %c0_32] : memref<1x128xf32, #tpu.memory_space<vmem>>, vector<1x128xf32>
    %98 = vector.broadcast %97 : vector<1x128xf32> to vector<16x128xf32>
    %99 = arith.addf %96, %98 : vector<16x128xf32>
    %100 = arith.negf %99 : vector<16x128xf32>
    %101 = math.exp %100 : vector<16x128xf32>
    %cst_33 = arith.constant 1.000000e+00 : f32
    %102 = vector.broadcast %cst_33 : f32 to vector<16x128xf32>
    %103 = arith.addf %102, %101 : vector<16x128xf32>
    %104 = arith.divf %102, %103 : vector<16x128xf32>
    %105 = arith.mulf %99, %104 : vector<16x128xf32>
    %106 = arith.truncf %105 : vector<16x128xf32> to vector<16x128xbf16>
    %c0_34 = arith.constant 0 : index
    %c0_35 = arith.constant 0 : index
    %107 = vector.load %arg8[%c0_34, %c0_35] : memref<128x128xbf16, #tpu.memory_space<vmem>>, vector<128x128xbf16>
    %cst_36 = arith.constant dense<0.000000e+00> : vector<16x128xf32>
    %108 = tpu.matmul %106, %107, %cst_36 {dimension_numbers = #tpu.dot_dimension_numbers<[1], [0], [0], [1], [0, 0, 1, 1], [], []>} : vector<16x128xbf16>, vector<128x128xbf16>, vector<16x128xf32> -> vector<16x128xf32>
    %c0_37 = arith.constant 0 : index
    %c0_38 = arith.constant 0 : index
    %109 = vector.load %arg9[%c0_37, %c0_38] : memref<1x128xbf16, #tpu.memory_space<vmem>>, vector<1x128xbf16>
    %110 = arith.extf %109 : vector<1x128xbf16> to vector<1x128xf32>
    %111 = vector.broadcast %110 : vector<1x128xf32> to vector<16x128xf32>
    %112 = arith.addf %108, %111 : vector<16x128xf32>
    %c0_39 = arith.constant 0 : index
    %c0_40 = arith.constant 0 : index
    %c0_41 = arith.constant 0 : index
    %113 = vector.load %arg10[%c0_39, %c0_40, %c0_41] : memref<1x16x128xbf16, #tpu.memory_space<vmem>>, vector<1x16x128xbf16>
    %114 = vector.shape_cast %113 : vector<1x16x128xbf16> to vector<16x128xbf16>
    %115 = arith.extf %114 : vector<16x128xbf16> to vector<16x128xf32>
    %116 = arith.addf %112, %115 : vector<16x128xf32>
    %117 = arith.truncf %116 : vector<16x128xf32> to vector<16x128xbf16>
    %c0_42 = arith.constant 0 : index
    %c0_43 = arith.constant 0 : index
    %c0_44 = arith.constant 0 : index
    %118 = vector.load %arg11[%c0_42, %c0_43, %c0_44] : memref<1x16x128xbf16, #tpu.memory_space<vmem>>, vector<1x16x128xbf16>
    %119 = vector.shape_cast %118 : vector<1x16x128xbf16> to vector<16x128xbf16>
    %120 = vector.shape_cast %117 : vector<16x128xbf16> to vector<1x16x128xbf16>
    tpu.vector_store %arg11[%c0_42, %c0_43, %c0_44], %120 {strides = array<i32>} : memref<1x16x128xbf16, #tpu.memory_space<vmem>>, vector<1x16x128xbf16>,
    return
  }
  func.func @transform_0(%arg0: i32, %arg1: i32) -> (i32, i32, i32) {
    %c1_i32 = arith.constant 1 : i32
    %0 = arith.subi %arg1, %c1_i32 : i32
    %c0_i32 = arith.constant 0 : i32
    %1 = arith.maxsi %0, %c0_i32 : i32
    %c0_i32_0 = arith.constant 0 : i32
    %c0_i32_1 = arith.constant 0 : i32
    return %arg0, %1, %c0_i32_0 : i32, i32, i32
  }
  func.func @transform_1(%arg0: i32, %arg1: i32) -> (i32, i32, i32) {
    %c0_i32 = arith.constant 0 : i32
    %c0_i32_0 = arith.constant 0 : i32
    return %arg0, %arg1, %c0_i32 : i32, i32, i32
  }
  func.func @transform_2(%arg0: i32, %arg1: i32) -> (i32, i32, i32) {
    %c1_i32 = arith.constant 1 : i32
    %0 = arith.addi %arg1, %c1_i32 : i32
    %c0_i32 = arith.constant 0 : i32
    %1 = arith.minsi %0, %c0_i32 : i32
    %c0_i32_0 = arith.constant 0 : i32
    %c0_i32_1 = arith.constant 0 : i32
    return %arg0, %1, %c0_i32_0 : i32, i32, i32
  }
  func.func @transform_3(%arg0: i32, %arg1: i32) -> (i32, i32) {
    %c0_i32 = arith.constant 0 : i32
    %c0_i32_0 = arith.constant 0 : i32
    %c0_i32_1 = arith.constant 0 : i32
    return %c0_i32, %c0_i32_0 : i32, i32
  }
  func.func @transform_4(%arg0: i32, %arg1: i32) -> (i32, i32) {
    %c0_i32 = arith.constant 0 : i32
    %c0_i32_0 = arith.constant 0 : i32
    %c0_i32_1 = arith.constant 0 : i32
    return %c0_i32, %c0_i32_0 : i32, i32
  }
  func.func @transform_5(%arg0: i32, %arg1: i32) -> (i32, i32) {
    %c0_i32 = arith.constant 0 : i32
    %c0_i32_0 = arith.constant 0 : i32
    %c0_i32_1 = arith.constant 0 : i32
    return %c0_i32, %c0_i32_0 : i32, i32
  }
  func.func @transform_6(%arg0: i32, %arg1: i32) -> (i32, i32) {
    %c0_i32 = arith.constant 0 : i32
    %c0_i32_0 = arith.constant 0 : i32
    %c0_i32_1 = arith.constant 0 : i32
    return %c0_i32, %c0_i32_0 : i32, i32
  }
  func.func @transform_7(%arg0: i32, %arg1: i32) -> (i32, i32) {
    %c0_i32 = arith.constant 0 : i32
    %c0_i32_0 = arith.constant 0 : i32
    %c0_i32_1 = arith.constant 0 : i32
    return %c0_i32, %c0_i32_0 : i32, i32
  }
  func.func @transform_8(%arg0: i32, %arg1: i32) -> (i32, i32, i32) {
    %c0_i32 = arith.constant 0 : i32
    %c0_i32_0 = arith.constant 0 : i32
    return %arg0, %arg1, %c0_i32 : i32, i32, i32
  }
  func.func @transform_9(%arg0: i32, %arg1: i32) -> (i32, i32, i32) {
    %c0_i32 = arith.constant 0 : i32
    %c0_i32_0 = arith.constant 0 : i32
    return %arg0, %arg1, %c0_i32 : i32, i32, i32
  }
}

module attributes {stable_mosaic.version = 11 : i64} {
  func.func @_ln_kernel(%arg0: i32, %arg1: i32, %arg2: memref<1x16x128xbf16, #tpu.memory_space<vmem>>, %arg3: memref<1x128xbf16, #tpu.memory_space<vmem>>, %arg4: memref<1x128xbf16, #tpu.memory_space<vmem>>, %arg5: memref<1x16x128xbf16, #tpu.memory_space<vmem>>) attributes {dimension_semantics = [#tpu.dimension_semantics<parallel>, #tpu.dimension_semantics<parallel>], iteration_bounds = array<i64: 2, 1>, scalar_prefetch = 0 : i64, scratch_operands = 0 : i64, tpu.core_type = #tpu.core_type<tc>, window_params = [{transform_indices = @transform_0, window_bounds = array<i64: 1, 16, 128>}, {pipeline_mode = #tpu.pipeline_mode<synchronous>, transform_indices = @transform_1, window_bounds = array<i64: 1, 128>}, {pipeline_mode = #tpu.pipeline_mode<synchronous>, transform_indices = @transform_2, window_bounds = array<i64: 1, 128>}, {transform_indices = @transform_3, window_bounds = array<i64: 1, 16, 128>}]} {
    %c0 = arith.constant 0 : index
    %c0_0 = arith.constant 0 : index
    %c0_1 = arith.constant 0 : index
    %0 = vector.load %arg2[%c0, %c0_0, %c0_1] : memref<1x16x128xbf16, #tpu.memory_space<vmem>>, vector<1x16x128xbf16>
    %1 = vector.shape_cast %0 : vector<1x16x128xbf16> to vector<16x128xbf16>
    %2 = arith.extf %1 : vector<16x128xbf16> to vector<16x128xf32>
    %c0_2 = arith.constant 0 : index
    %c0_3 = arith.constant 0 : index
    %3 = vector.load %arg3[%c0_2, %c0_3] : memref<1x128xbf16, #tpu.memory_space<vmem>>, vector<1x128xbf16>
    %4 = arith.extf %3 : vector<1x128xbf16> to vector<1x128xf32>
    %c0_4 = arith.constant 0 : index
    %c0_5 = arith.constant 0 : index
    %5 = vector.load %arg4[%c0_4, %c0_5] : memref<1x128xbf16, #tpu.memory_space<vmem>>, vector<1x128xbf16>
    %6 = arith.extf %5 : vector<1x128xbf16> to vector<1x128xf32>
    %cst = arith.constant dense<0.000000e+00> : vector<16xf32>
    %7 = vector.multi_reduction <add>, %2, %cst [1] : vector<16x128xf32> to vector<16xf32>
    %8 = vector.shape_cast %7 : vector<16xf32> to vector<16x1xf32>
    %cst_6 = arith.constant 1.280000e+02 : f32
    %9 = vector.broadcast %cst_6 : f32 to vector<16x1xf32>
    %10 = arith.divf %8, %9 : vector<16x1xf32>
    %11 = vector.broadcast %10 : vector<16x1xf32> to vector<16x128xf32>
    %12 = arith.subf %2, %11 : vector<16x128xf32>
    %13 = arith.mulf %12, %12 : vector<16x128xf32>
    %cst_7 = arith.constant dense<0.000000e+00> : vector<16xf32>
    %14 = vector.multi_reduction <add>, %13, %cst_7 [1] : vector<16x128xf32> to vector<16xf32>
    %15 = vector.shape_cast %14 : vector<16xf32> to vector<16x1xf32>
    %cst_8 = arith.constant 1.280000e+02 : f32
    %16 = vector.broadcast %cst_8 : f32 to vector<16x1xf32>
    %17 = arith.divf %15, %16 : vector<16x1xf32>
    %cst_9 = arith.constant 9.99999996E-13 : f32
    %18 = vector.broadcast %cst_9 : f32 to vector<16x1xf32>
    %19 = arith.addf %17, %18 : vector<16x1xf32>
    %20 = math.rsqrt %19 : vector<16x1xf32>
    %21 = vector.broadcast %20 : vector<16x1xf32> to vector<16x128xf32>
    %22 = arith.mulf %12, %21 : vector<16x128xf32>
    %23 = vector.broadcast %4 : vector<1x128xf32> to vector<16x128xf32>
    %24 = arith.mulf %22, %23 : vector<16x128xf32>
    %25 = vector.broadcast %6 : vector<1x128xf32> to vector<16x128xf32>
    %26 = arith.addf %24, %25 : vector<16x128xf32>
    %27 = arith.truncf %26 : vector<16x128xf32> to vector<16x128xbf16>
    %c0_10 = arith.constant 0 : index
    %c0_11 = arith.constant 0 : index
    %c0_12 = arith.constant 0 : index
    %28 = vector.load %arg5[%c0_10, %c0_11, %c0_12] : memref<1x16x128xbf16, #tpu.memory_space<vmem>>, vector<1x16x128xbf16>
    %29 = vector.shape_cast %28 : vector<1x16x128xbf16> to vector<16x128xbf16>
    %30 = vector.shape_cast %27 : vector<16x128xbf16> to vector<1x16x128xbf16>
    tpu.vector_store %arg5[%c0_10, %c0_11, %c0_12], %30 {strides = array<i32>} : memref<1x16x128xbf16, #tpu.memory_space<vmem>>, vector<1x16x128xbf16>,
    return
  }
  func.func @transform_0(%arg0: i32, %arg1: i32) -> (i32, i32, i32) {
    %c0_i32 = arith.constant 0 : i32
    %c0_i32_0 = arith.constant 0 : i32
    return %arg0, %arg1, %c0_i32 : i32, i32, i32
  }
  func.func @transform_1(%arg0: i32, %arg1: i32) -> (i32, i32) {
    %c0_i32 = arith.constant 0 : i32
    %c0_i32_0 = arith.constant 0 : i32
    %c0_i32_1 = arith.constant 0 : i32
    return %c0_i32, %c0_i32_0 : i32, i32
  }
  func.func @transform_2(%arg0: i32, %arg1: i32) -> (i32, i32) {
    %c0_i32 = arith.constant 0 : i32
    %c0_i32_0 = arith.constant 0 : i32
    %c0_i32_1 = arith.constant 0 : i32
    return %c0_i32, %c0_i32_0 : i32, i32
  }
  func.func @transform_3(%arg0: i32, %arg1: i32) -> (i32, i32, i32) {
    %c0_i32 = arith.constant 0 : i32
    %c0_i32_0 = arith.constant 0 : i32
    return %arg0, %arg1, %c0_i32 : i32, i32, i32
  }
}

module attributes {stable_mosaic.version = 11 : i64} {
  func.func @_ffn_kernel(%arg0: i32, %arg1: i32, %arg2: memref<1x16x128xbf16, #tpu.memory_space<vmem>>, %arg3: memref<1x128xbf16, #tpu.memory_space<vmem>>, %arg4: memref<1x128xbf16, #tpu.memory_space<vmem>>, %arg5: memref<128x256xbf16, #tpu.memory_space<vmem>>, %arg6: memref<1x256xbf16, #tpu.memory_space<vmem>>, %arg7: memref<256x128xbf16, #tpu.memory_space<vmem>>, %arg8: memref<1x128xbf16, #tpu.memory_space<vmem>>, %arg9: memref<1x128xbf16, #tpu.memory_space<vmem>>, %arg10: memref<1x128xbf16, #tpu.memory_space<vmem>>, %arg11: memref<1x16x128xbf16, #tpu.memory_space<vmem>>) attributes {dimension_semantics = [#tpu.dimension_semantics<parallel>, #tpu.dimension_semantics<parallel>], iteration_bounds = array<i64: 2, 1>, scalar_prefetch = 0 : i64, scratch_operands = 0 : i64, tpu.core_type = #tpu.core_type<tc>, window_params = [{transform_indices = @transform_0, window_bounds = array<i64: 1, 16, 128>}, {pipeline_mode = #tpu.pipeline_mode<synchronous>, transform_indices = @transform_1, window_bounds = array<i64: 1, 128>}, {pipeline_mode = #tpu.pipeline_mode<synchronous>, transform_indices = @transform_2, window_bounds = array<i64: 1, 128>}, {pipeline_mode = #tpu.pipeline_mode<synchronous>, transform_indices = @transform_3, window_bounds = array<i64: 128, 256>}, {pipeline_mode = #tpu.pipeline_mode<synchronous>, transform_indices = @transform_4, window_bounds = array<i64: 1, 256>}, {pipeline_mode = #tpu.pipeline_mode<synchronous>, transform_indices = @transform_5, window_bounds = array<i64: 256, 128>}, {pipeline_mode = #tpu.pipeline_mode<synchronous>, transform_indices = @transform_6, window_bounds = array<i64: 1, 128>}, {pipeline_mode = #tpu.pipeline_mode<synchronous>, transform_indices = @transform_7, window_bounds = array<i64: 1, 128>}, {pipeline_mode = #tpu.pipeline_mode<synchronous>, transform_indices = @transform_8, window_bounds = array<i64: 1, 128>}, {transform_indices = @transform_9, window_bounds = array<i64: 1, 16, 128>}]} {
    %c0 = arith.constant 0 : index
    %c0_0 = arith.constant 0 : index
    %c0_1 = arith.constant 0 : index
    %0 = vector.load %arg2[%c0, %c0_0, %c0_1] : memref<1x16x128xbf16, #tpu.memory_space<vmem>>, vector<1x16x128xbf16>
    %1 = vector.shape_cast %0 : vector<1x16x128xbf16> to vector<16x128xbf16>
    %2 = arith.extf %1 : vector<16x128xbf16> to vector<16x128xf32>
    %c0_2 = arith.constant 0 : index
    %c0_3 = arith.constant 0 : index
    %3 = vector.load %arg3[%c0_2, %c0_3] : memref<1x128xbf16, #tpu.memory_space<vmem>>, vector<1x128xbf16>
    %4 = arith.extf %3 : vector<1x128xbf16> to vector<1x128xf32>
    %c0_4 = arith.constant 0 : index
    %c0_5 = arith.constant 0 : index
    %5 = vector.load %arg4[%c0_4, %c0_5] : memref<1x128xbf16, #tpu.memory_space<vmem>>, vector<1x128xbf16>
    %6 = arith.extf %5 : vector<1x128xbf16> to vector<1x128xf32>
    %cst = arith.constant dense<0.000000e+00> : vector<16xf32>
    %7 = vector.multi_reduction <add>, %2, %cst [1] : vector<16x128xf32> to vector<16xf32>
    %8 = vector.shape_cast %7 : vector<16xf32> to vector<16x1xf32>
    %cst_6 = arith.constant 1.280000e+02 : f32
    %9 = vector.broadcast %cst_6 : f32 to vector<16x1xf32>
    %10 = arith.divf %8, %9 : vector<16x1xf32>
    %11 = vector.broadcast %10 : vector<16x1xf32> to vector<16x128xf32>
    %12 = arith.subf %2, %11 : vector<16x128xf32>
    %13 = arith.mulf %12, %12 : vector<16x128xf32>
    %cst_7 = arith.constant dense<0.000000e+00> : vector<16xf32>
    %14 = vector.multi_reduction <add>, %13, %cst_7 [1] : vector<16x128xf32> to vector<16xf32>
    %15 = vector.shape_cast %14 : vector<16xf32> to vector<16x1xf32>
    %cst_8 = arith.constant 1.280000e+02 : f32
    %16 = vector.broadcast %cst_8 : f32 to vector<16x1xf32>
    %17 = arith.divf %15, %16 : vector<16x1xf32>
    %cst_9 = arith.constant 9.99999996E-13 : f32
    %18 = vector.broadcast %cst_9 : f32 to vector<16x1xf32>
    %19 = arith.addf %17, %18 : vector<16x1xf32>
    %20 = math.rsqrt %19 : vector<16x1xf32>
    %21 = vector.broadcast %20 : vector<16x1xf32> to vector<16x128xf32>
    %22 = arith.mulf %12, %21 : vector<16x128xf32>
    %23 = vector.broadcast %4 : vector<1x128xf32> to vector<16x128xf32>
    %24 = arith.mulf %22, %23 : vector<16x128xf32>
    %25 = vector.broadcast %6 : vector<1x128xf32> to vector<16x128xf32>
    %26 = arith.addf %24, %25 : vector<16x128xf32>
    %27 = arith.truncf %26 : vector<16x128xf32> to vector<16x128xbf16>
    %c0_10 = arith.constant 0 : index
    %c0_11 = arith.constant 0 : index
    %28 = vector.load %arg5[%c0_10, %c0_11] : memref<128x256xbf16, #tpu.memory_space<vmem>>, vector<128x256xbf16>
    %cst_12 = arith.constant dense<0.000000e+00> : vector<16x256xf32>
    %29 = tpu.matmul %27, %28, %cst_12 {dimension_numbers = #tpu.dot_dimension_numbers<[1], [0], [0], [1], [0, 0, 1, 1], [], []>} : vector<16x128xbf16>, vector<128x256xbf16>, vector<16x256xf32> -> vector<16x256xf32>
    %c0_13 = arith.constant 0 : index
    %c0_14 = arith.constant 0 : index
    %30 = vector.load %arg6[%c0_13, %c0_14] : memref<1x256xbf16, #tpu.memory_space<vmem>>, vector<1x256xbf16>
    %31 = arith.extf %30 : vector<1x256xbf16> to vector<1x256xf32>
    %32 = vector.broadcast %31 : vector<1x256xf32> to vector<16x256xf32>
    %33 = arith.addf %29, %32 : vector<16x256xf32>
    %34 = arith.negf %33 : vector<16x256xf32>
    %35 = math.exp %34 : vector<16x256xf32>
    %cst_15 = arith.constant 1.000000e+00 : f32
    %36 = vector.broadcast %cst_15 : f32 to vector<16x256xf32>
    %37 = arith.addf %36, %35 : vector<16x256xf32>
    %38 = arith.divf %36, %37 : vector<16x256xf32>
    %39 = arith.mulf %33, %38 : vector<16x256xf32>
    %40 = arith.truncf %39 : vector<16x256xf32> to vector<16x256xbf16>
    %c0_16 = arith.constant 0 : index
    %c0_17 = arith.constant 0 : index
    %41 = vector.load %arg7[%c0_16, %c0_17] : memref<256x128xbf16, #tpu.memory_space<vmem>>, vector<256x128xbf16>
    %cst_18 = arith.constant dense<0.000000e+00> : vector<16x128xf32>
    %42 = tpu.matmul %40, %41, %cst_18 {dimension_numbers = #tpu.dot_dimension_numbers<[1], [0], [0], [1], [0, 0, 1, 1], [], []>} : vector<16x256xbf16>, vector<256x128xbf16>, vector<16x128xf32> -> vector<16x128xf32>
    %c0_19 = arith.constant 0 : index
    %c0_20 = arith.constant 0 : index
    %43 = vector.load %arg8[%c0_19, %c0_20] : memref<1x128xbf16, #tpu.memory_space<vmem>>, vector<1x128xbf16>
    %44 = arith.extf %43 : vector<1x128xbf16> to vector<1x128xf32>
    %45 = vector.broadcast %44 : vector<1x128xf32> to vector<16x128xf32>
    %46 = arith.addf %42, %45 : vector<16x128xf32>
    %cst_21 = arith.constant 5.000000e-01 : f32
    %47 = vector.broadcast %cst_21 : f32 to vector<16x128xf32>
    %48 = arith.mulf %47, %46 : vector<16x128xf32>
    %49 = arith.addf %2, %48 : vector<16x128xf32>
    %c0_22 = arith.constant 0 : index
    %c0_23 = arith.constant 0 : index
    %50 = vector.load %arg9[%c0_22, %c0_23] : memref<1x128xbf16, #tpu.memory_space<vmem>>, vector<1x128xbf16>
    %51 = arith.extf %50 : vector<1x128xbf16> to vector<1x128xf32>
    %c0_24 = arith.constant 0 : index
    %c0_25 = arith.constant 0 : index
    %52 = vector.load %arg10[%c0_24, %c0_25] : memref<1x128xbf16, #tpu.memory_space<vmem>>, vector<1x128xbf16>
    %53 = arith.extf %52 : vector<1x128xbf16> to vector<1x128xf32>
    %cst_26 = arith.constant dense<0.000000e+00> : vector<16xf32>
    %54 = vector.multi_reduction <add>, %49, %cst_26 [1] : vector<16x128xf32> to vector<16xf32>
    %55 = vector.shape_cast %54 : vector<16xf32> to vector<16x1xf32>
    %cst_27 = arith.constant 1.280000e+02 : f32
    %56 = vector.broadcast %cst_27 : f32 to vector<16x1xf32>
    %57 = arith.divf %55, %56 : vector<16x1xf32>
    %58 = vector.broadcast %57 : vector<16x1xf32> to vector<16x128xf32>
    %59 = arith.subf %49, %58 : vector<16x128xf32>
    %60 = arith.mulf %59, %59 : vector<16x128xf32>
    %cst_28 = arith.constant dense<0.000000e+00> : vector<16xf32>
    %61 = vector.multi_reduction <add>, %60, %cst_28 [1] : vector<16x128xf32> to vector<16xf32>
    %62 = vector.shape_cast %61 : vector<16xf32> to vector<16x1xf32>
    %cst_29 = arith.constant 1.280000e+02 : f32
    %63 = vector.broadcast %cst_29 : f32 to vector<16x1xf32>
    %64 = arith.divf %62, %63 : vector<16x1xf32>
    %cst_30 = arith.constant 9.99999996E-13 : f32
    %65 = vector.broadcast %cst_30 : f32 to vector<16x1xf32>
    %66 = arith.addf %64, %65 : vector<16x1xf32>
    %67 = math.rsqrt %66 : vector<16x1xf32>
    %68 = vector.broadcast %67 : vector<16x1xf32> to vector<16x128xf32>
    %69 = arith.mulf %59, %68 : vector<16x128xf32>
    %70 = vector.broadcast %51 : vector<1x128xf32> to vector<16x128xf32>
    %71 = arith.mulf %69, %70 : vector<16x128xf32>
    %72 = vector.broadcast %53 : vector<1x128xf32> to vector<16x128xf32>
    %73 = arith.addf %71, %72 : vector<16x128xf32>
    %74 = arith.truncf %73 : vector<16x128xf32> to vector<16x128xbf16>
    %c0_31 = arith.constant 0 : index
    %c0_32 = arith.constant 0 : index
    %c0_33 = arith.constant 0 : index
    %75 = vector.load %arg11[%c0_31, %c0_32, %c0_33] : memref<1x16x128xbf16, #tpu.memory_space<vmem>>, vector<1x16x128xbf16>
    %76 = vector.shape_cast %75 : vector<1x16x128xbf16> to vector<16x128xbf16>
    %77 = vector.shape_cast %74 : vector<16x128xbf16> to vector<1x16x128xbf16>
    tpu.vector_store %arg11[%c0_31, %c0_32, %c0_33], %77 {strides = array<i32>} : memref<1x16x128xbf16, #tpu.memory_space<vmem>>, vector<1x16x128xbf16>,
    return
  }
  func.func @transform_0(%arg0: i32, %arg1: i32) -> (i32, i32, i32) {
    %c0_i32 = arith.constant 0 : i32
    %c0_i32_0 = arith.constant 0 : i32
    return %arg0, %arg1, %c0_i32 : i32, i32, i32
  }
  func.func @transform_1(%arg0: i32, %arg1: i32) -> (i32, i32) {
    %c0_i32 = arith.constant 0 : i32
    %c0_i32_0 = arith.constant 0 : i32
    %c0_i32_1 = arith.constant 0 : i32
    return %c0_i32, %c0_i32_0 : i32, i32
  }
  func.func @transform_2(%arg0: i32, %arg1: i32) -> (i32, i32) {
    %c0_i32 = arith.constant 0 : i32
    %c0_i32_0 = arith.constant 0 : i32
    %c0_i32_1 = arith.constant 0 : i32
    return %c0_i32, %c0_i32_0 : i32, i32
  }
  func.func @transform_3(%arg0: i32, %arg1: i32) -> (i32, i32) {
    %c0_i32 = arith.constant 0 : i32
    %c0_i32_0 = arith.constant 0 : i32
    %c0_i32_1 = arith.constant 0 : i32
    return %c0_i32, %c0_i32_0 : i32, i32
  }
  func.func @transform_4(%arg0: i32, %arg1: i32) -> (i32, i32) {
    %c0_i32 = arith.constant 0 : i32
    %c0_i32_0 = arith.constant 0 : i32
    %c0_i32_1 = arith.constant 0 : i32
    return %c0_i32, %c0_i32_0 : i32, i32
  }
  func.func @transform_5(%arg0: i32, %arg1: i32) -> (i32, i32) {
    %c0_i32 = arith.constant 0 : i32
    %c0_i32_0 = arith.constant 0 : i32
    %c0_i32_1 = arith.constant 0 : i32
    return %c0_i32, %c0_i32_0 : i32, i32
  }
  func.func @transform_6(%arg0: i32, %arg1: i32) -> (i32, i32) {
    %c0_i32 = arith.constant 0 : i32
    %c0_i32_0 = arith.constant 0 : i32
    %c0_i32_1 = arith.constant 0 : i32
    return %c0_i32, %c0_i32_0 : i32, i32
  }
  func.func @transform_7(%arg0: i32, %arg1: i32) -> (i32, i32) {
    %c0_i32 = arith.constant 0 : i32
    %c0_i32_0 = arith.constant 0 : i32
    %c0_i32_1 = arith.constant 0 : i32
    return %c0_i32, %c0_i32_0 : i32, i32
  }
  func.func @transform_8(%arg0: i32, %arg1: i32) -> (i32, i32) {
    %c0_i32 = arith.constant 0 : i32
    %c0_i32_0 = arith.constant 0 : i32
    %c0_i32_1 = arith.constant 0 : i32
    return %c0_i32, %c0_i32_0 : i32, i32
  }
  func.func @transform_9(%arg0: i32, %arg1: i32) -> (i32, i32, i32) {
    %c0_i32 = arith.constant 0 : i32
    %c0_i32_0 = arith.constant 0 : i32
    return %arg0, %arg1, %c0_i32 : i32, i32, i32
  }
}

</mosaic_0001>

<bundles_post_ra>
// kernel: conformer_forward.30
= control target key start
LH: loop header
LB: loop body
LE: loop exit
PB: predicated region body
PF: predicated region fallthrough
CT: control target
= control target key end

     0   :  { %s1559_s0 = inlined_call_operand.hbm [shape: bf16[2,16,128], index: 0, kind: input, shape index: {}]   ;;  %s1560_s1 = inlined_call_operand.hbm [shape: bf16[128,128], index: 1, kind: input, shape index: {}]   ;;  %s1561_s2 = inlined_call_operand.hbm [shape: bf16[1,128], index: 2, kind: input, shape index: {}]   ;;  %s1562_s3 = inlined_call_operand.hbm [shape: bf16[1,128], index: 3, kind: input, shape index: {}]   ;;  %s1563_s4 = inlined_call_operand.hbm [shape: bf16[1,128], index: 4, kind: input, shape index: {}]   ;;  %s1564_s5 = inlined_call_operand.hbm [shape: bf16[16,128], index: 5, kind: input, shape index: {}]   ;;  %s1565_s6 = inlined_call_operand.hbm [shape: bf16[2,16,128], index: 6, kind: output, shape index: {}]  }
   0x1   :  { %1574 = sst [smem:[#allocation19_spill]] %s1560_s1 }
   0x2   :  { %11 = vsyncpa [#allocation3], 0 }
   0x3   :  { %13 = vsyncpa [#allocation3 + $0x1], 0 }
   0x4   :  { %14 = vsyncpa [#allocation6], 0 }
   0x5   :  { %15 = vsyncpa [#allocation9], 0 }
   0x6   :  { %16 = vsyncpa [#allocation12], 0 }
   0x7   :  { %17 = vsyncpa [#allocation4], 0 }
   0x8   :  { %19 = vsyncpa [#allocation4 + $0x1], 0  ;;  %s1220_s21 = smov 0   ;;  %s1222_s22 = smov 0  }
   0x9   :  { %s1224_s23 = smov 0   ;;  %s1226_s24 = smov 0  }
   0xa   :  { %s1228_s25 = smov 0   ;;  %s1230_s26 = smov 0  }
   0xb LB: > { %s1566_s27 = sadd.s32 4294967295, %s1170_s26   ;;  %p698_p0 = scmp.ge.s32.totalorder %s1170_s26, 1  ;;  %s1170_s26 = sphi %s1230_s26, %s25_s26   ;;  %s1166_s25 = sphi %s1228_s25, %s1598_s25   ;;  %s1162_s24 = sphi %s1226_s24, %s1597_s24   ;;  %s1158_s23 = sphi %s1224_s23, %s1596_s23   ;;  %s1154_s22 = sphi %s1222_s22, %s1595_s22   ;;  %s1150_s21 = sphi %s1220_s21, %s1594_s21  }
   0xc   : > { %p1254_p1 = scmp.eq.s32.totalorder %s1566_s27, 0  ;;  %p208_p2 = scmp.lt.s32.totalorder %s1170_s26, 3 }
   0xd   : > { %s1172_s30 = smov [#allocation5]   ;;  %s1173_s9 = smov [#allocation8]  }
   0xe   : > { %s1575_s28 = scalar_select %p1254_p1, 1, 0 }
   0xf   : > { %p1259_p3 = pnand %p698_p0, %p208_p2  ;;  %s220_s7 = sshll.u32 %s1172_s30, 4  ;;  %s1263_s7 = int_to_ptr.vmem [resolvable:$true] %s220_s7 }
  0x10   : > { %s245_s10 = sshll.u32 %s1173_s9, 4  ;;  %s1174_s11 = smov [#allocation7]   ;;  %s1274_s10 = int_to_ptr.vmem [resolvable:$true] %s245_s10 }
  0x11   : > { %s1576_s29 = scalar_select %p1259_p3, 1, 0 }
  0x12   : > { %p798_p4 = pneg %p1259_p3  ;;  %s1276_s12 = sshll.u32 %s1174_s11, 4  ;;  %s235_s12 = int_to_ptr.vmem [resolvable:$true] %s1276_s12 }
  0x13   : > { %s1578_s1 = sld [smem:[#allocation19_spill]] }
  0x14   : > { %p1270_p6 = pnand %p798_p4, %p1254_p1 }
  0x16   : > { %p1286_p8 = pneg %p1270_p6 }
  0x19   : > { %s906_s15 = scalar_lea.hbm %s1578_s1, 1024 }
  0x1a   : > { %p907_p7 = scmp.ne.s32.totalorder %s1578_s1, %s906_s15  ;;  %p913_p11 = scmp.lt.u32.totalorder %s906_s15, %s1578_s1 }
  0x1c   : > { %p909_p9 = pnand %p1286_p8, %p907_p7 }
  0x1e   : > { %p910_p10 = pneg %p909_p9 }
  0x20   : > { %p915_p12 = pnand %p913_p11, %p910_p10 }
  0x22   : > { %918 = shalt.err (!%p915_p12)
}
  0x23   : > { %s919_s30 = scalar_lea.vmem %s1263_s7, 1024  ;;  %p927_p4 = scmp.lt.s32.totalorder %s1263_s7, %s1263_s7 }
  0x24   : > { %p920_p13 = scmp.ne.s32.totalorder %s1263_s7, %s919_s30  ;;  %p928_p5 = scmp.lt.s32.totalorder %s919_s30, %s919_s30 }
  0x26   : > { %p922_p0 = pnand %p920_p13, %p1286_p8  ;;  %p929_p7 = por %p928_p5, %p927_p4 }
  0x28   : > { %p923_p2 = pneg %p922_p0 }
  0x2a   : > { %p930_p9 = pnand %p929_p7, %p923_p2 }
  0x2c   : > { %933 = shalt.err (!%p930_p9)
}
  0x2d   : > { %s1570_s9 = smov 64   ;;  %s1572_s11 = smov 4  }
  0x2e   : > { %801 = dma.hbm_to_vmem [thread:$0]  (!%p1270_p6), %s1578_s1, 1024, %s1263_s7, [#allocation6], %s1570_s9, %s1570_s9, %s1572_s11  }
  0x2f   : > { %s934_s17 = scalar_lea.hbm %s1562_s3, 16 }
  0x30   : > { %p935_p5 = scmp.ne.s32.totalorder %s1562_s3, %s934_s17  ;;  %p941_p12 = scmp.lt.u32.totalorder %s934_s17, %s1562_s3 }
  0x32   : > { %p937_p10 = pnand %p935_p5, %p1286_p8 }
  0x34   : > { %p938_p11 = pneg %p937_p10 }
  0x36   : > { %p943_p13 = pnand %p941_p12, %p938_p11 }
  0x38   : > { %946 = shalt.err (!%p943_p13)
}
  0x39   : > { %s947_s7 = scalar_lea.vmem %s1274_s10, 16  ;;  %s954_s13 = scalar_lea.vmem %s1274_s10, 32 }
  0x3a   : > { %p948_p0 = scmp.ne.s32.totalorder %s1274_s10, %s947_s7  ;;  %p955_p7 = scmp.lt.s32.totalorder %s1274_s10, %s1274_s10 }
  0x3b   : > { %p956_p9 = scmp.lt.s32.totalorder %s954_s13, %s947_s7 }
  0x3c   : > { %p950_p2 = pnand %p948_p0, %p1286_p8 }
  0x3d   : > { %p957_p5 = por %p956_p9, %p955_p7 }
  0x3e   : > { %p951_p4 = pneg %p950_p2 }
  0x40   : > { %p958_p10 = pnand %p957_p5, %p951_p4 }
  0x42   : > { %961 = shalt.err (!%p958_p10)
}
  0x43   : > { %807 = dma.hbm_to_vmem [thread:$0]  (!%p1270_p6), %s1562_s3, 16, %s1274_s10, [#allocation9]  }
  0x44   : > { %s962_s17 = scalar_lea.hbm %s1561_s2, 16 }
  0x45   : > { %p963_p11 = scmp.ne.s32.totalorder %s1561_s2, %s962_s17  ;;  %p969_p0 = scmp.lt.u32.totalorder %s962_s17, %s1561_s2 }
  0x47   : > { %p965_p12 = pnand %p963_p11, %p1286_p8 }
  0x49   : > { %p966_p13 = pneg %p965_p12 }
  0x4b   : > { %p971_p2 = pnand %p969_p0, %p966_p13 }
  0x4d   : > { %974 = shalt.err (!%p971_p2)
}
  0x4e   : > { %s975_s13 = scalar_lea.vmem %s235_s12, 16  ;;  %s982_s10 = scalar_lea.vmem %s235_s12, 32 }
  0x4f   : > { %p976_p4 = scmp.ne.s32.totalorder %s235_s12, %s975_s13  ;;  %p983_p5 = scmp.lt.s32.totalorder %s235_s12, %s235_s12 }
  0x50   : > { %p984_p10 = scmp.lt.s32.totalorder %s982_s10, %s975_s13 }
  0x51   : > { %p978_p7 = pnand %p976_p4, %p1286_p8 }
  0x52   : > { %p985_p3 = por %p984_p10, %p983_p5 }
  0x53   : > { %p979_p9 = pneg %p978_p7 }
  0x55   : > { %p986_p1 = pnand %p985_p3, %p979_p9 }
  0x57   : > { %989 = shalt.err (!%p986_p1)
}
  0x58   : > { %804 = dma.hbm_to_vmem [thread:$0]  (!%p1270_p6), %s1561_s2, 16, %s235_s12, [#allocation6]  }
  0x59   : > { %s1177_s15 = smov [#allocation10]   ;;  %s1178_s17 = smov [#allocation11]  }
  0x5a   : > { %s256_s16 = sshll.u32 %s1177_s15, 4  ;;  %s269_s19 = sshll.u32 %s1178_s17, 4  ;;  %s257_s16 = int_to_ptr.vmem [resolvable:$true] %s256_s16  ;;  %s270_s19 = int_to_ptr.vmem [resolvable:$true] %s269_s19 }
  0x5b   : > { %s990_s7 = scalar_lea.hbm %s1563_s4, 16 }
  0x5c   : > { %p991_p1 = scmp.ne.s32.totalorder %s1563_s4, %s990_s7  ;;  %p997_p12 = scmp.lt.u32.totalorder %s990_s7, %s1563_s4 }
  0x5e   : > { %p993_p3 = pnand %p991_p1, %p1286_p8 }
  0x60   : > { %p994_p11 = pneg %p993_p3 }
  0x62   : > { %p999_p13 = pnand %p997_p12, %p994_p11 }
  0x64   : > { %1002 = shalt.err (!%p999_p13)
}
  0x65   : > { %s1003_s12 = scalar_lea.vmem %s257_s16, 16  ;;  %s1010_s14 = scalar_lea.vmem %s257_s16, 32 }
  0x66   : > { %p1004_p0 = scmp.ne.s32.totalorder %s257_s16, %s1003_s12  ;;  %p1011_p7 = scmp.lt.s32.totalorder %s257_s16, %s257_s16 }
  0x67   : > { %p1012_p9 = scmp.lt.s32.totalorder %s1010_s14, %s1003_s12 }
  0x68   : > { %p1006_p2 = pnand %p1004_p0, %p1286_p8 }
  0x69   : > { %p1013_p5 = por %p1012_p9, %p1011_p7 }
  0x6a   : > { %p1007_p4 = pneg %p1006_p2 }
  0x6c   : > { %p1014_p10 = pnand %p1013_p5, %p1007_p4 }
  0x6e   : > { %1017 = shalt.err (!%p1014_p10)
}
  0x6f   : > { %810 = dma.hbm_to_vmem [thread:$0]  (!%p1270_p6), %s1563_s4, 16, %s257_s16, [#allocation9]  }
  0x70   : > { %s1018_s30 = scalar_lea.hbm %s1564_s5, 128 }
  0x71   : > { %p1019_p1 = scmp.ne.s32.totalorder %s1564_s5, %s1018_s30  ;;  %p1025_p12 = scmp.lt.u32.totalorder %s1018_s30, %s1564_s5 }
  0x73   : > { %p1021_p3 = pnand %p1019_p1, %p1286_p8 }
  0x75   : > { %p1022_p11 = pneg %p1021_p3 }
  0x77   : > { %p1027_p13 = pnand %p1025_p12, %p1022_p11 }
  0x79   : > { %1030 = shalt.err (!%p1027_p13)
}
  0x7a   : > { %s1031_s12 = scalar_lea.vmem %s270_s19, 128  ;;  %p1039_p7 = scmp.lt.s32.totalorder %s270_s19, %s270_s19 }
  0x7b   : > { %p1032_p0 = scmp.ne.s32.totalorder %s270_s19, %s1031_s12  ;;  %p1040_p9 = scmp.lt.s32.totalorder %s1031_s12, %s1031_s12 }
  0x7d   : > { %p1034_p2 = pnand %p1032_p0, %p1286_p8  ;;  %p1041_p5 = por %p1040_p9, %p1039_p7 }
  0x7f   : > { %p1035_p4 = pneg %p1034_p2 }
  0x81   : > { %p1042_p10 = pnand %p1041_p5, %p1035_p4 }
  0x83   : > { %1045 = shalt.err (!%p1042_p10)
}
  0x84   : > { %s1580_s16 = smov 64   ;;  %s697_s8 = sadd.s32 4294967294, %s1170_s26  }
  0x85   : > { %813 = dma.hbm_to_vmem [thread:$0]  (!%p1270_p6), %s1564_s5, 128, %s270_s19, [#allocation12], %s1580_s16, %s1580_s16, %s1572_s11  }
  0x86   : > { %s37_s18 = sadd.s32 1, %s1166_s25  ;;  %s46_s17 = sadd.s32 1, %s1158_s23 }
  0x87   : > { %p39_p8 = scmp.ge.s32.totalorder %s37_s18, 2  ;;  %p53_p1 = scmp.ne.s32.totalorder %s1158_s23, %s1154_s22 }
  0x88   : > { %p54_p3 = scmp.eq.s32.totalorder %s1170_s26, 0  ;;  %p59_p11 = scmp.ne.s32.totalorder %s1154_s22, %s1150_s21 }
  0x89   : > { %s1600_s18 = smov (%p39_p8, %s37_s18), 0  ;;  %p1582_p13 = scmp.ne.s32.totalorder %s1575_s28, 0 }
  0x8a   : > { %p1402_p12 = por %p54_p3, %p53_p1  ;;  %s41_s20 = ssub.s32 %s1166_s25, %s1600_s18 }
  0x8b   : > { %p1408_p6 = por %p1582_p13, %p59_p11  ;;  %s1584_s30 = sadd.s32 4294967295, %s1170_s26  }
  0x8c   : > { %p195_p0 = scmp.eq.s32.totalorder %s1584_s30, 1  ;;  %p44_p2 = scmp.eq.s32.totalorder %s41_s20, 0 }
  0x8d   : > { %p201_p4 = scmp.eq.s32.totalorder %s697_s8, 1  ;;  %p827_p9 = scmp.lt.s32.totalorder %s1170_s26, 2 }
  0x8e   : > { %p1416_p7 = por %p195_p0, %p53_p1  ;;  %s283_s27 = sand.u32 1, %s1158_s23  }
  0x8f   : > { %s1422_s13 = scalar_select %p44_p2, %s1158_s23, %s46_s17  }
  0x90   : > { %s1585_s7 = scalar_select %p1416_p7, 1, 0 }
  0x91   : > { %p1424_p5 = por %p201_p4, %p59_p11  ;;  %s705_s12 = sshll.u32 %s283_s27, 3 }
  0x92   : > { %s732_s14 = sshll.u32 %s1166_s25, 7  ;;  %s287_s8 = scalar_lea.vmem [#allocation2], %s705_s12 }
  0x93   : > { %s1586_s10 = scalar_select %p1424_p5, 1, 0 }
  0x94   : > { %s1433_s30 = scalar_lea.hbm %s1559_s0, %s732_s14  ;;  %s296_s20 = sshll.u32 %s287_s8, 4  ;;  %s1435_s20 = int_to_ptr.vmem [resolvable:$true] %s296_s20 }
  0x95   : > { %p1439_p10 = pnand %p827_p9, %p1402_p12  ;;  %s1443_s1 = scalar_lea.sflag [#allocation3], %s283_s27 }
  0x96   : > { %s1046_s11 = scalar_lea.hbm %s1433_s30, 128  ;;  %s1051_s9 = scalar_lea.hbm %s1559_s0, 256 }
  0x97   : > { %p1047_p8 = scmp.ne.s32.totalorder %s1433_s30, %s1046_s11  ;;  %p1048_p1 = pneg %p1439_p10 }
  0x98   : > { %p1052_p12 = scmp.lt.u32.totalorder %s1433_s30, %s1559_s0  ;;  %p1053_p13 = scmp.lt.u32.totalorder %s1051_s9, %s1046_s11 }
  0x99   : > { %p1049_p3 = pnand %p1048_p1, %p1047_p8  ;;  %p1055_p2 = scmp.lt.u32.totalorder %s1046_s11, %s1433_s30 }
  0x9a   : > { %p1054_p0 = por %p1053_p13, %p1052_p12 }
  0x9b   : > { %p1050_p11 = pneg %p1049_p3 }
  0x9c   : > { %p1056_p4 = por %p1055_p2, %p1054_p0 }
  0x9e   : > { %p1057_p9 = pnand %p1056_p4, %p1050_p11 }
  0xa0   : > { %1060 = shalt.err (!%p1057_p9)
}
  0xa1   : > { %s1061_s27 = scalar_lea.vmem %s1435_s20, 128  ;;  %s1179_s12 = smov [#allocation2]  }
  0xa2   : > { %p1062_p8 = scmp.ne.s32.totalorder %s1435_s20, %s1061_s27  ;;  %s1066_s14 = sshll.u32 %s1179_s12, 4  ;;  %s1067_s14 = int_to_ptr.vmem [resolvable:$false] %s1066_s14 }
  0xa3   : > { %s1068_s15 = scalar_lea.vmem %s1067_s14, 256  ;;  %p1069_p7 = scmp.lt.s32.totalorder %s1435_s20, %s1067_s14 }
  0xa4   : > { %p1064_p3 = pnand %p1062_p8, %p1048_p1  ;;  %p1070_p12 = scmp.lt.s32.totalorder %s1068_s15, %s1061_s27 }
  0xa6   : > { %p1065_p5 = pneg %p1064_p3  ;;  %p1071_p13 = por %p1070_p12, %p1069_p7 }
  0xa8   : > { %p1072_p0 = pnand %p1071_p13, %p1065_p5 }
  0xaa   : > { %1075 = shalt.err (!%p1072_p0)
}
  0xab   : > { %s1588_s11 = smov 4   ;;  %p1589_p1 = scmp.ne.s32.totalorder %s1576_s29, 0 }
  0xac   : > { %817 = dma.hbm_to_vmem [thread:$0]  (!%p1439_p10), %s1433_s30, 128, %s1435_s20, %s1443_s1, %s1580_s16, %s1580_s16, %s1588_s11  }
  0xad   : > { %308 = sbr.rel (%p1589_p1) target bundleno = 771 (0x303), region = 44  ;;  %s1477_s9 = sand.u32 (!%p1589_p1), 1, %s1154_s22  }
  0xae   : > { %s709_s8 = sshll.u32 (!%p1589_p1), %s1477_s9, 3  ;;  %s311_s27 = scalar_lea.sflag (!%p1589_p1), [#allocation3], %s1477_s9 }
  0xaf   : > { %s1483_s17 = scalar_lea.vmem (!%p1589_p1), [#allocation2], %s709_s8 }
  0xb4   : > { %1129 = dma.done.wait (%p1408_p6), %s311_s27, 128  }
  0xb5   : > { %1131 = vsyncadd (%p1408_p6), %s311_s27, 4294967168  ;;  %p1590_p7 = scmp.ne.s32.totalorder %s1575_s28, 0 }
  0xb7   : > { %1133 = dma.done.wait (%p1590_p7), [#allocation6], 1040  }
  0xb8   : > { %1135 = vsyncadd (%p1590_p7), [#allocation6], 4294966256 }
  0xb9   : > { %1137 = dma.done.wait (%p1590_p7), [#allocation9], 32  }
  0xba   : > { %1139 = vsyncadd (%p1590_p7), [#allocation9], 4294967264 }
  0xbb   : > { %1141 = dma.done.wait (%p1590_p7), [#allocation12], 128  }
  0xbc   : > { %1143 = vsyncadd (%p1590_p7), [#allocation12], 4294967168  ;;  %v1180_v0 = vmov 0.0   ;;  %vm1181_vm0 = vmmov 0   ;;  %v893_v1 = vld [vmem:[#allocation5] sm:$0xff]   ;;  %v894_v2 = vld [vmem:[#allocation5 + $0x8] sm:$0xff]   ;;  %v387_v10 = vlaneseq }
  0xbd   : > { %754 = vmatprep.subr.bf16.mxu0 %v1180_v0  ;;  %770 = vmatprep.mubr.msk.bf16.mxu0 %vm1181_vm0, %v1180_v0  ;;  %v895_v3 = vld [vmem:[#allocation5 + $0x10] sm:$0xff]   ;;  %v896_v4 = vld [vmem:[#allocation5 + $0x18] sm:$0xff]   ;;  %v897_v5 = vld [vmem:[#allocation5 + $0x20] sm:$0xff]   ;;  %s735_s1 = sshll.u32 %s1162_s24, 7  ;;  %s362_s28 = scalar_lea.vmem [#allocation13], %s709_s8 }
  0xbe   : > { %755 = vmatpush3.bf16.msra.mxu0 %v893_v1  ;;  %v898_v6 = vld [vmem:[#allocation5 + $0x28] sm:$0xff]   ;;  %v899_v7 = vld [vmem:[#allocation5 + $0x30] sm:$0xff]   ;;  %v900_v8 = vld [vmem:[#allocation5 + $0x38] sm:$0xff]   ;;  %v388_v11 = vshrl.u32 %v387_v10, 7  ;;  %s559_s29 = sshll.u32 %s362_s28, 4  ;;  %s1508_s30 = scalar_lea.hbm %s1565_s6, %s735_s1  ;;  %s1510_s29 = int_to_ptr.vmem [resolvable:$true] %s559_s29 }
  0xbf   : > { %756 = vmatprep.subr.bf16.mxu0 %v1180_v0  ;;  %v901_v9 = vld [vmem:[%s1483_s17] sm:$0xff]   ;;  %v385_v12 = vld [vmem:[#allocation7] sm:$0x1]  ;;  %v486_v35 = vld [vmem:[#allocation8] sm:$0x1]  ;;  %s544_s20 = scalar_lea.sflag [#allocation4], %s1477_s9 }
  0xc0   : > { %v386_v13 = vunpack.c.l.bf16 %v385_v12  ;;  %v389_v14 = vsub.s32 0, %v388_v11  ;;  %v488_v37 = vld [vmem:[#allocation10] sm:$0x1]  ;;  %v487_v38 = vunpack.c.l.bf16 %v486_v35  ;;  %v737_v48 = vld [vmem:[#allocation11] sm:$0xff]   ;;  %s1076_s12 = scalar_lea.vmem %s1510_s29, 128  ;;  %p1591_p5 = scmp.ne.s32.totalorder %s1585_s7, 0 }
  0xc1   : > { %v489_v39 = vunpack.c.l.bf16 %v488_v37  ;;  %v738_v52 = vunpack.c.l.bf16 %v737_v48  ;;  %v739_v53 = vunpack.c.h.bf16 %v737_v48  ;;  %p1077_p6 = scmp.ne.s32.totalorder %s1510_s29, %s1076_s12  ;;  %s1182_s24 = smov [#allocation13]  }
  0xc2   : > { %757 = vmatpush3.bf16.msra.mxu0 %v894_v2  ;;  %v390_v15 = vrot.slane %v386_v13, %v389_v14  ;;  %v516_v40 = vrot.slane %v487_v38, %v389_v14  ;;  %s1080_s14 = sshll.u32 %s1182_s24, 4  ;;  %s1081_s14 = int_to_ptr.vmem [resolvable:$false] %s1080_s14 }
  0xc3   : > { %758 = vmatprep.subr.bf16.mxu0 %v1180_v0  ;;  %v522_v42 = vrot.slane %v489_v39, %v389_v14  ;;  %p1078_p10 = pnand %p1077_p6, %p1591_p5  ;;  %s1082_s15 = scalar_lea.vmem %s1081_s14, 256 }
  0xc4   : > { %p1083_p2 = scmp.lt.s32.totalorder %s1510_s29, %s1081_s14  ;;  %p1084_p4 = scmp.lt.s32.totalorder %s1082_s15, %s1076_s12 }
  0xc5   : > { %p1079_p11 = pneg %p1078_p10 }
  0xc6   : > { %759 = vmatpush3.bf16.msra.mxu0 %v895_v3  ;;  %p1085_p9 = por %p1084_p4, %p1083_p2 }
  0xc7   : > { %760 = vmatprep.subr.bf16.mxu0 %v1180_v0 }
  0xc8   : > { %p1086_p8 = pnand %p1085_p9, %p1079_p11 }
  0xca   : > { %761 = vmatpush3.bf16.msra.mxu0 %v896_v4 }
  0xcb   : > { %762 = vmatprep.subr.bf16.mxu0 %v1180_v0 }
  0xce   : > { %763 = vmatpush3.bf16.msra.mxu0 %v897_v5 }
  0xcf   : > { %764 = vmatprep.subr.bf16.mxu0 %v1180_v0 }
  0xd2   : > { %765 = vmatpush3.bf16.msra.mxu0 %v898_v6 }
  0xd3   : > { %766 = vmatprep.subr.bf16.mxu0 %v1180_v0 }
  0xd6   : > { %767 = vmatpush3.bf16.msra.mxu0 %v899_v7 }
  0xd7   : > { %768 = vmatprep.subr.bf16.mxu0 %v1180_v0 }
  0xda   : > { %769 = vmatpush3.bf16.msra.mxu0 %v900_v8 }
  0xdd   : > { %771 = vmatmul.mubr.bf16.vlgmr.msra.gmra.mrb[0].mxu0 %v901_v9 }
 0x1b0   : > { %v479_v16 = vpop.f32.mrb[0].mxu0 }
 0x1b1   : > { %v480_v17 = vadd.f32 %v479_v16, %v390_v15  ;;  %v772_v18 = vpop.f32.mrb[1].mxu0 }
 0x1b2   : > { %v482_v19 = vpop.f32.mrb[2].mxu0 }
 0x1b3   : > { %490 = vadd.xlane.f32.xlu0 %v480_v17  ;;  %v773_v20 = vpop.f32.mrb[3].mxu0  ;;  %v483_v21 = vadd.f32 %v482_v19, %v390_v15 }
 0x1b7   : > { %492 = vadd.xlane.f32.xlu0 %v483_v21 }
 0x240   : > { %v491_v22 = vpop.xlane.xlu0 %490 }
 0x241   : > { %v495_v23 = vmul.f32 0.0078125, %v491_v22 }
 0x243   : > { %v497_v24 = vsub.f32 %v480_v17, %v495_v23 }
 0x244   : > { %v493_v25 = vpop.xlane.xlu0 %492 }
 0x245   : > { %v496_v26 = vmul.f32 0.0078125, %v493_v25  ;;  %v499_v27 = vmul.f32 %v497_v24, %v497_v24 }
 0x247   : > { %v498_v28 = vsub.f32 %v483_v21, %v496_v26  ;;  %501 = vadd.xlane.f32.xlu1 %v499_v27 }
 0x249   : > { %v500_v29 = vmul.f32 %v498_v28, %v498_v28 }
 0x24b   : > { %503 = vadd.xlane.f32.xlu1 %v500_v29 }
 0x2d4   : > { %v502_v30 = vpop.xlane.xlu1 %501 }
 0x2d5   : > { %v505_v31 = vmul.f32 0.0078125, %v502_v30 }
 0x2d7   : > { %v507_v32 = vadd.f32 1e-12, %v505_v31 }
 0x2d8   : > { %v504_v33 = vpop.xlane.xlu1 %503 }
 0x2d9   : > { %902 = vrsqrt.f32 %v507_v32  ;;  %v506_v34 = vmul.f32 0.0078125, %v504_v33 }
 0x2db   : > { %v508_v36 = vadd.f32 1e-12, %v506_v34 }
 0x2dd   : > { %904 = vrsqrt.f32 %v508_v36 }
 0x2e3   : > { %v903_v41 = vpop.eup %902 }
 0x2e4   : > { %v511_v43 = vmul.f32 %v903_v41, %v497_v24 }
 0x2e6   : > { %v517_v44 = vmul.f32 %v516_v40, %v511_v43 }
 0x2e7   : > { %v905_v45 = vpop.eup %904 }
 0x2e8   : > { %v523_v46 = vadd.f32 %v522_v42, %v517_v44  ;;  %v512_v47 = vmul.f32 %v905_v45, %v498_v28 }
 0x2ea   : > { %v518_v49 = vmul.f32 %v516_v40, %v512_v47  ;;  %v525_v50 = vmul.f32 11.313708, %v523_v46 }
 0x2ec   : > { %v524_v51 = vadd.f32 %v522_v42, %v518_v49  ;;  %v531_v55 = vadd.f32 %v738_v52, %v525_v50 }
 0x2ee   : > { %v526_v54 = vmul.f32 11.313708, %v524_v51 }
 0x2f0   : > { %v532_v56 = vadd.f32 %v739_v53, %v526_v54 }
 0x2f2   : > { %v743_v57 = vpack.c.bf16 %v532_v56, %v531_v55 }
 0x2f4   : > { %744 = vst [vmem:[%s362_s28] sm:$0xff] %v743_v57  }
 0x2f5   : > { %1089 = shalt.err (!%p1086_p8)
}
 0x2f6   : > { %s1090_s11 = scalar_lea.hbm %s1508_s30, 128  ;;  %s1094_s17 = scalar_lea.hbm %s1565_s6, 256 }
 0x2f7   : > { %p1091_p3 = scmp.ne.s32.totalorder %s1508_s30, %s1090_s11  ;;  %p1095_p0 = scmp.lt.u32.totalorder %s1508_s30, %s1565_s6 }
 0x2f8   : > { %p1096_p1 = scmp.lt.u32.totalorder %s1094_s17, %s1090_s11  ;;  %p1098_p6 = scmp.lt.u32.totalorder %s1090_s11, %s1508_s30 }
 0x2f9   : > { %p1092_p12 = pnand %p1091_p3, %p1591_p5 }
 0x2fa   : > { %p1097_p7 = por %p1096_p1, %p1095_p0 }
 0x2fb   : > { %p1093_p13 = pneg %p1092_p12 }
 0x2fc   : > { %p1099_p10 = por %p1098_p6, %p1097_p7 }
 0x2fe   : > { %p1100_p11 = pnand %p1099_p10, %p1093_p13 }
 0x300   : > { %1103 = shalt.err (!%p1100_p11)
}
 0x301   : > { %s1183_s16 = smov 64   ;;  %s1184_s19 = smov 4  }
 0x302   : > { %796 = dma.vmem_to_hbm [thread:$0]  (%p1591_p5), %s1510_s29, 128, %s1508_s30, %s544_s20, %s1183_s16, %s1183_s16, %s1184_s19  }
 0x303 PF: > { %s574_s12 = sand.u32 1, %s1150_s21   ;;  %p1592_p2 = scmp.ne.s32.totalorder %s1586_s10, 0 }
 0x304   : > { %p1593_p4 = scmp.ge.s32.totalorder %s1170_s26, 2  ;;  %s575_s24 = scalar_lea.sflag [#allocation4], %s574_s12 }
 0x306   : > { %p819_p9 = pnand %p1593_p4, %p1592_p2 }
 0x308   : > { %1145 = dma.done.wait (!%p819_p9), %s575_s24, 128  }
 0x309   : > { %1147 = vsyncadd (!%p819_p9), %s575_s24, 4294967168  ;;  %s25_s26 = sadd.s32 1, %s1170_s26   ;;  %s1594_s21 = smov %s1154_s22 }
 0x30a   : > { %p22_p8 = scmp.ge.s32.totalorder %s25_s26, 4   ;;  %s1595_s22 = smov %s1158_s23 }
 0x30b   : > { %s1596_s23 = smov %s1422_s13  ;;  %s1597_s24 = smov %s1166_s25 }
 0x30c   : > { %s1598_s25 = smov %s1600_s18  ;;  %24 = sbr.rel (!%p22_p8) target bundleno = 11 (0xb), region = 110 }
 0x313   :  { %580 = vsyncpa [#allocation3], 1 }
 0x314   :  { %582 = vsyncpa [#allocation3 + $0x1], 1 }
 0x315   :  { %583 = vsyncpa [#allocation6], 1 }
 0x316   :  { %584 = vsyncpa [#allocation9], 1 }
 0x317   :  { %585 = vsyncpa [#allocation12], 1 }
 0x318   :  { %586 = vsyncpa [#allocation4], 1 }
 0x319   :  { %588 = vsyncpa [#allocation4 + $0x1], 1 }

// kernel: conformer_forward.31
= control target key start
LH: loop header
LB: loop body
LE: loop exit
PB: predicated region body
PF: predicated region fallthrough
CT: control target
= control target key end

     0   :  { %s1980_s0 = inlined_call_operand.hbm [shape: bf16[2,16,128], index: 0, kind: input, shape index: {}]   ;;  %s1981_s1 = inlined_call_operand.hbm [shape: bf16[1,128], index: 1, kind: input, shape index: {}]   ;;  %s1982_s2 = inlined_call_operand.hbm [shape: bf16[1,128], index: 2, kind: input, shape index: {}]   ;;  %s1983_s3 = inlined_call_operand.hbm [shape: bf16[128,256], index: 3, kind: input, shape index: {}]   ;;  %s1984_s4 = inlined_call_operand.hbm [shape: bf16[1,256], index: 4, kind: input, shape index: {}]   ;;  %s1985_s5 = inlined_call_operand.hbm [shape: bf16[256,128], index: 5, kind: input, shape index: {}]   ;;  %s1986_s6 = inlined_call_operand.hbm [shape: bf16[1,128], index: 6, kind: input, shape index: {}]   ;;  %s1987_s7 = inlined_call_operand.hbm [shape: bf16[2,16,128], index: 7, kind: output, shape index: {}]  }
   0x1   :  { %1994 = sst [smem:[#allocation20_spill]] %s1981_s1 }
   0x2   :  { %1995 = sst [smem:[#allocation21_spill]] %s1983_s3 }
   0x3   :  { %1996 = sst [smem:[#allocation22_spill]] %s1987_s7 }
   0x4   :  { %12 = vsyncpa [#allocation3], 0 }
   0x5   :  { %14 = vsyncpa [#allocation3 + $0x1], 0 }
   0x6   :  { %15 = vsyncpa [#allocation6], 0 }
   0x7   :  { %16 = vsyncpa [#allocation9], 0 }
   0x8   :  { %17 = vsyncpa [#allocation12], 0 }
   0x9   :  { %18 = vsyncpa [#allocation4], 0 }
   0xa   :  { %20 = vsyncpa [#allocation4 + $0x1], 0  ;;  %s1619_s24 = smov 0   ;;  %s1621_s25 = smov 0  }
   0xb   :  { %s1623_s26 = smov 0   ;;  %s1625_s27 = smov 0  }
   0xc   :  { %s1627_s28 = smov 0   ;;  %s1629_s29 = smov 0  }
   0xd LB: > { %s1991_s30 = sadd.s32 4294967295, %s1562_s29   ;;  %p982_p0 = scmp.ge.s32.totalorder %s1562_s29, 1  ;;  %s1562_s29 = sphi %s1629_s29, %s26_s29   ;;  %s1558_s28 = sphi %s1627_s28, %s2020_s28   ;;  %s1554_s27 = sphi %s1625_s27, %s2019_s27   ;;  %s1550_s26 = sphi %s1623_s26, %s2018_s26   ;;  %s1546_s25 = sphi %s1621_s25, %s2017_s25   ;;  %s1542_s24 = sphi %s1619_s24, %s2016_s24  }
   0xe   : > { %p1653_p1 = scmp.eq.s32.totalorder %s1991_s30, 0  ;;  %p225_p2 = scmp.lt.s32.totalorder %s1562_s29, 3 }
   0xf   : > { %s1564_s10 = smov [#allocation5]   ;;  %s1565_s12 = smov [#allocation8]  }
  0x10   : > { %s1997_s8 = scalar_select %p1653_p1, 1, 0 }
  0x11   : > { %p1658_p3 = pnand %p982_p0, %p225_p2  ;;  %s238_s11 = sshll.u32 %s1564_s10, 4  ;;  %s239_s11 = int_to_ptr.vmem [resolvable:$true] %s238_s11 }
  0x12   : > { %s259_s13 = sshll.u32 %s1565_s12, 4  ;;  %s1566_s15 = smov [#allocation11]   ;;  %s1671_s13 = int_to_ptr.vmem [resolvable:$true] %s259_s13 }
  0x13   : > { %s1998_s9 = scalar_select %p1658_p3, 1, 0 }
  0x14   : > { %p1108_p5 = pneg %p1658_p3  ;;  %s1673_s16 = sshll.u32 %s1566_s15, 4  ;;  %s284_s16 = int_to_ptr.vmem [resolvable:$true] %s1673_s16 }
  0x15   : > { %s2000_s1 = sld [smem:[#allocation20_spill]] }
  0x16   : > { %p1667_p6 = pnand %p1108_p5, %p1653_p1 }
  0x18   : > { %p1683_p8 = pneg %p1667_p6 }
  0x1b   : > { %s1270_s19 = scalar_lea.hbm %s2000_s1, 16 }
  0x1c   : > { %p1271_p7 = scmp.ne.s32.totalorder %s2000_s1, %s1270_s19  ;;  %p1277_p11 = scmp.lt.u32.totalorder %s1270_s19, %s2000_s1 }
  0x1e   : > { %p1273_p9 = pnand %p1683_p8, %p1271_p7 }
  0x20   : > { %p1274_p10 = pneg %p1273_p9 }
  0x22   : > { %p1279_p12 = pnand %p1277_p11, %p1274_p10 }
  0x24   : > { %1282 = shalt.err (!%p1279_p12)
}
  0x25   : > { %s1283_s12 = scalar_lea.vmem %s239_s11, 16  ;;  %s1290_s15 = scalar_lea.vmem %s239_s11, 32 }
  0x26   : > { %p1284_p13 = scmp.ne.s32.totalorder %s239_s11, %s1283_s12  ;;  %p1291_p5 = scmp.lt.s32.totalorder %s239_s11, %s239_s11 }
  0x27   : > { %p1292_p4 = scmp.lt.s32.totalorder %s1290_s15, %s1283_s12 }
  0x28   : > { %p1286_p0 = pnand %p1284_p13, %p1683_p8 }
  0x29   : > { %p1293_p3 = por %p1292_p4, %p1291_p5 }
  0x2a   : > { %p1287_p2 = pneg %p1286_p0 }
  0x2c   : > { %p1294_p1 = pnand %p1293_p3, %p1287_p2 }
  0x2e   : > { %1297 = shalt.err (!%p1294_p1)
}
  0x2f   : > { %1111 = dma.hbm_to_vmem [thread:$0]  (!%p1667_p6), %s2000_s1, 16, %s239_s11, [#allocation6]  }
  0x30   : > { %s2002_s3 = sld [smem:[#allocation21_spill]] }
  0x36   : > { %s1298_s21 = scalar_lea.hbm %s2002_s3, 2048 }
  0x37   : > { %p1299_p7 = scmp.ne.s32.totalorder %s2002_s3, %s1298_s21  ;;  %p1305_p1 = scmp.lt.u32.totalorder %s1298_s21, %s2002_s3 }
  0x39   : > { %p1301_p9 = pnand %p1299_p7, %p1683_p8 }
  0x3b   : > { %p1302_p4 = pneg %p1301_p9 }
  0x3d   : > { %p1307_p3 = pnand %p1305_p1, %p1302_p4 }
  0x3f   : > { %1310 = shalt.err (!%p1307_p3)
}
  0x40   : > { %s1311_s11 = scalar_lea.vmem %s1671_s13, 2048  ;;  %p1319_p13 = scmp.lt.s32.totalorder %s1671_s13, %s1671_s13 }
  0x41   : > { %p1312_p10 = scmp.ne.s32.totalorder %s1671_s13, %s1311_s11  ;;  %p1320_p0 = scmp.lt.s32.totalorder %s1311_s11, %s1311_s11 }
  0x43   : > { %p1314_p11 = pnand %p1312_p10, %p1683_p8  ;;  %p1321_p2 = por %p1320_p0, %p1319_p13 }
  0x45   : > { %p1315_p12 = pneg %p1314_p11 }
  0x47   : > { %p1322_p5 = pnand %p1321_p2, %p1315_p12 }
  0x49   : > { %1325 = shalt.err (!%p1322_p5)
}
  0x4a   : > { %s1567_s17 = smov 128   ;;  %s1568_s18 = smov 8  }
  0x4b   : > { %1117 = dma.hbm_to_vmem [thread:$0]  (!%p1667_p6), %s2002_s3, 2048, %s1671_s13, [#allocation9], %s1567_s17, %s1567_s17, %s1568_s18  }
  0x4c   : > { %s1326_s10 = scalar_lea.hbm %s1985_s5, 2048 }
  0x4d   : > { %p1327_p7 = scmp.ne.s32.totalorder %s1985_s5, %s1326_s10  ;;  %p1333_p1 = scmp.lt.u32.totalorder %s1326_s10, %s1985_s5 }
  0x4f   : > { %p1329_p9 = pnand %p1327_p7, %p1683_p8 }
  0x51   : > { %p1330_p4 = pneg %p1329_p9 }
  0x53   : > { %p1335_p3 = pnand %p1333_p1, %p1330_p4 }
  0x55   : > { %1338 = shalt.err (!%p1335_p3)
}
  0x56   : > { %s1339_s19 = scalar_lea.vmem %s284_s16, 2048  ;;  %p1347_p13 = scmp.lt.s32.totalorder %s284_s16, %s284_s16 }
  0x57   : > { %p1340_p10 = scmp.ne.s32.totalorder %s284_s16, %s1339_s19  ;;  %p1348_p0 = scmp.lt.s32.totalorder %s1339_s19, %s1339_s19 }
  0x59   : > { %p1342_p11 = pnand %p1340_p10, %p1683_p8  ;;  %p1349_p2 = por %p1348_p0, %p1347_p13 }
  0x5b   : > { %p1343_p12 = pneg %p1342_p11 }
  0x5d   : > { %p1350_p5 = pnand %p1349_p2, %p1343_p12 }
  0x5f   : > { %1353 = shalt.err (!%p1350_p5)
}
  0x60   : > { %s1569_s13 = smov 64   ;;  %s1570_s17 = smov 4  }
  0x61   : > { %1123 = dma.hbm_to_vmem [thread:$0]  (!%p1667_p6), %s1985_s5, 2048, %s284_s16, [#allocation12], %s1569_s13, %s1569_s13, %s1570_s17  }
  0x62   : > { %s1571_s20 = smov [#allocation7]   ;;  %s1572_s23 = smov [#allocation10]  }
  0x63   : > { %s249_s21 = sshll.u32 %s1571_s20, 4  ;;  %s273_s10 = sshll.u32 %s1572_s23, 4  ;;  %s250_s21 = int_to_ptr.vmem [resolvable:$true] %s249_s21  ;;  %s274_s10 = int_to_ptr.vmem [resolvable:$true] %s273_s10 }
  0x64   : > { %s1354_s11 = scalar_lea.hbm %s1982_s2, 16 }
  0x65   : > { %p1355_p7 = scmp.ne.s32.totalorder %s1982_s2, %s1354_s11  ;;  %p1361_p1 = scmp.lt.u32.totalorder %s1354_s11, %s1982_s2 }
  0x67   : > { %p1357_p9 = pnand %p1355_p7, %p1683_p8 }
  0x69   : > { %p1358_p4 = pneg %p1357_p9 }
  0x6b   : > { %p1363_p3 = pnand %p1361_p1, %p1358_p4 }
  0x6d   : > { %1366 = shalt.err (!%p1363_p3)
}
  0x6e   : > { %s1367_s16 = scalar_lea.vmem %s250_s21, 16  ;;  %s1374_s30 = scalar_lea.vmem %s250_s21, 32 }
  0x6f   : > { %p1368_p10 = scmp.ne.s32.totalorder %s250_s21, %s1367_s16  ;;  %p1375_p13 = scmp.lt.s32.totalorder %s250_s21, %s250_s21 }
  0x70   : > { %p1376_p0 = scmp.lt.s32.totalorder %s1374_s30, %s1367_s16 }
  0x71   : > { %p1370_p11 = pnand %p1368_p10, %p1683_p8 }
  0x72   : > { %p1377_p2 = por %p1376_p0, %p1375_p13 }
  0x73   : > { %p1371_p12 = pneg %p1370_p11 }
  0x75   : > { %p1378_p5 = pnand %p1377_p2, %p1371_p12 }
  0x77   : > { %1381 = shalt.err (!%p1378_p5)
}
  0x78   : > { %1114 = dma.hbm_to_vmem [thread:$0]  (!%p1667_p6), %s1982_s2, 16, %s250_s21, [#allocation6]  }
  0x79   : > { %s1382_s20 = scalar_lea.hbm %s1984_s4, 32 }
  0x7a   : > { %p1383_p7 = scmp.ne.s32.totalorder %s1984_s4, %s1382_s20  ;;  %p1389_p1 = scmp.lt.u32.totalorder %s1382_s20, %s1984_s4 }
  0x7c   : > { %p1385_p9 = pnand %p1383_p7, %p1683_p8 }
  0x7e   : > { %p1386_p4 = pneg %p1385_p9 }
  0x80   : > { %p1391_p3 = pnand %p1389_p1, %p1386_p4 }
  0x82   : > { %1394 = shalt.err (!%p1391_p3)
}
  0x83   : > { %s1395_s19 = scalar_lea.vmem %s274_s10, 32  ;;  %p1403_p13 = scmp.lt.s32.totalorder %s274_s10, %s274_s10 }
  0x84   : > { %p1396_p10 = scmp.ne.s32.totalorder %s274_s10, %s1395_s19  ;;  %p1404_p0 = scmp.lt.s32.totalorder %s1395_s19, %s1395_s19 }
  0x86   : > { %p1398_p11 = pnand %p1396_p10, %p1683_p8  ;;  %p1405_p2 = por %p1404_p0, %p1403_p13 }
  0x88   : > { %p1399_p12 = pneg %p1398_p11 }
  0x8a   : > { %p1406_p5 = pnand %p1405_p2, %p1399_p12 }
  0x8c   : > { %1409 = shalt.err (!%p1406_p5)
}
  0x8d   : > { %1120 = dma.hbm_to_vmem [thread:$0]  (!%p1667_p6), %s1984_s4, 32, %s274_s10, [#allocation9]  }
  0x8e   : > { %s1573_s30 = smov [#allocation13]   ;;  %s1410_s7 = scalar_lea.hbm %s1986_s6, 16 }
  0x8f   : > { %s297_s1 = sshll.u32 %s1573_s30, 4  ;;  %p1411_p7 = scmp.ne.s32.totalorder %s1986_s6, %s1410_s7  ;;  %s298_s1 = int_to_ptr.vmem [resolvable:$true] %s297_s1 }
  0x90   : > { %p1417_p1 = scmp.lt.u32.totalorder %s1410_s7, %s1986_s6 }
  0x91   : > { %p1413_p9 = pnand %p1411_p7, %p1683_p8 }
  0x93   : > { %p1414_p4 = pneg %p1413_p9 }
  0x95   : > { %p1419_p3 = pnand %p1417_p1, %p1414_p4 }
  0x97   : > { %1422 = shalt.err (!%p1419_p3)
}
  0x98   : > { %s1423_s10 = scalar_lea.vmem %s298_s1, 16  ;;  %s1430_s11 = scalar_lea.vmem %s298_s1, 32 }
  0x99   : > { %p1424_p10 = scmp.ne.s32.totalorder %s298_s1, %s1423_s10  ;;  %p1431_p13 = scmp.lt.s32.totalorder %s298_s1, %s298_s1 }
  0x9a   : > { %p1432_p0 = scmp.lt.s32.totalorder %s1430_s11, %s1423_s10 }
  0x9b   : > { %p1426_p11 = pnand %p1424_p10, %p1683_p8 }
  0x9c   : > { %p1433_p2 = por %p1432_p0, %p1431_p13 }
  0x9d   : > { %p1427_p12 = pneg %p1426_p11 }
  0x9f   : > { %p1434_p5 = pnand %p1433_p2, %p1427_p12 }
  0xa1   : > { %1437 = shalt.err (!%p1434_p5)
}
  0xa2   : > { %1126 = dma.hbm_to_vmem [thread:$0]  (!%p1667_p6), %s1986_s6, 16, %s298_s1, [#allocation12]  }
  0xa3   : > { %s981_s22 = sadd.s32 4294967294, %s1562_s29   ;;  %s38_s16 = sadd.s32 1, %s1558_s28 }
  0xa4   : > { %p40_p8 = scmp.ge.s32.totalorder %s38_s16, 2  ;;  %s47_s14 = sadd.s32 1, %s1550_s26 }
  0xa5   : > { %p54_p7 = scmp.ne.s32.totalorder %s1550_s26, %s1546_s25  ;;  %p55_p9 = scmp.eq.s32.totalorder %s1562_s29, 0 }
  0xa6   : > { %s2022_s16 = smov (%p40_p8, %s38_s16), 0  ;;  %p60_p1 = scmp.ne.s32.totalorder %s1546_s25, %s1542_s24 }
  0xa7   : > { %p1806_p4 = por %p55_p9, %p54_p7  ;;  %s42_s1 = ssub.s32 %s1558_s28, %s2022_s16 }
  0xa8   : > { %s2004_s18 = sadd.s32 4294967295, %s1562_s29   ;;  %p45_p3 = scmp.eq.s32.totalorder %s42_s1, 0 }
  0xa9   : > { %p212_p6 = scmp.eq.s32.totalorder %s2004_s18, 1  ;;  %p2005_p10 = scmp.ne.s32.totalorder %s1997_s8, 0 }
  0xaa   : > { %p218_p13 = scmp.eq.s32.totalorder %s981_s22, 1  ;;  %p1141_p2 = scmp.lt.s32.totalorder %s1562_s29, 2 }
  0xab   : > { %p1818_p11 = por %p2005_p10, %p60_p1  ;;  %p1822_p12 = por %p212_p6, %p54_p7 }
  0xac   : > { %s1827_s20 = scalar_select %p45_p3, %s1550_s26, %s47_s14  }
  0xad   : > { %s2007_s7 = scalar_select %p1822_p12, 1, 0 }
  0xae   : > { %p1829_p0 = por %p218_p13, %p60_p1  ;;  %s308_s12 = sand.u32 1, %s1550_s26  }
  0xaf   : > { %s1045_s15 = sshll.u32 %s1558_s28, 7  ;;  %s990_s10 = sshll.u32 %s308_s12, 3 }
  0xb0   : > { %s2008_s23 = scalar_select %p1829_p0, 1, 0 }
  0xb1   : > { %s1839_s21 = scalar_lea.hbm %s1980_s0, %s1045_s15  ;;  %s312_s22 = scalar_lea.vmem [#allocation2], %s990_s10 }
  0xb2   : > { %s321_s14 = sshll.u32 %s312_s22, 4  ;;  %p1843_p5 = pnand %p1141_p2, %p1806_p4  ;;  %s1847_s14 = int_to_ptr.vmem [resolvable:$true] %s321_s14 }
  0xb3   : > { %s1849_s18 = scalar_lea.sflag [#allocation3], %s308_s12  ;;  %s1438_s11 = scalar_lea.hbm %s1839_s21, 128 }
  0xb4   : > { %p1439_p8 = scmp.ne.s32.totalorder %s1839_s21, %s1438_s11  ;;  %p1440_p7 = pneg %p1843_p5 }
  0xb5   : > { %s1443_s10 = scalar_lea.hbm %s1980_s0, 256  ;;  %p1444_p4 = scmp.lt.u32.totalorder %s1839_s21, %s1980_s0 }
  0xb6   : > { %p1441_p9 = pnand %p1440_p7, %p1439_p8  ;;  %p1445_p6 = scmp.lt.u32.totalorder %s1443_s10, %s1438_s11 }
  0xb7   : > { %p1447_p10 = scmp.lt.u32.totalorder %s1438_s11, %s1839_s21 }
  0xb8   : > { %p1442_p1 = pneg %p1441_p9  ;;  %p1446_p3 = por %p1445_p6, %p1444_p4 }
  0xba   : > { %p1448_p13 = por %p1447_p10, %p1446_p3 }
  0xbc   : > { %p1449_p2 = pnand %p1448_p13, %p1442_p1 }
  0xbe   : > { %1452 = shalt.err (!%p1449_p2)
}
  0xbf   : > { %s1453_s12 = scalar_lea.vmem %s1847_s14, 128  ;;  %s1574_s15 = smov [#allocation2]  }
  0xc0   : > { %p1454_p8 = scmp.ne.s32.totalorder %s1847_s14, %s1453_s12  ;;  %s1458_s30 = sshll.u32 %s1574_s15, 4  ;;  %s1459_s30 = int_to_ptr.vmem [resolvable:$false] %s1458_s30 }
  0xc1   : > { %s1460_s19 = scalar_lea.vmem %s1459_s30, 256  ;;  %p1461_p12 = scmp.lt.s32.totalorder %s1847_s14, %s1459_s30 }
  0xc2   : > { %p1456_p9 = pnand %p1454_p8, %p1440_p7  ;;  %p1462_p4 = scmp.lt.s32.totalorder %s1460_s19, %s1453_s12 }
  0xc4   : > { %p1457_p0 = pneg %p1456_p9  ;;  %p1463_p6 = por %p1462_p4, %p1461_p12 }
  0xc6   : > { %p1464_p3 = pnand %p1463_p6, %p1457_p0 }
  0xc8   : > { %1467 = shalt.err (!%p1464_p3)
}
  0xc9   : > { %1130 = dma.hbm_to_vmem [thread:$0]  (!%p1843_p5), %s1839_s21, 128, %s1847_s14, %s1849_s18, %s1569_s13, %s1569_s13, %s1570_s17  }
  0xca   : > { %p2010_p7 = scmp.ne.s32.totalorder %s1998_s9, 0 }
  0xcb   : > { %s1883_s11 = sand.u32 (!%p2010_p7), 1, %s1546_s25  }
  0xcc   : > { %333 = sbr.rel (%p2010_p7) target bundleno = 1027 (0x403), region = 48  ;;  %s994_s10 = sshll.u32 (!%p2010_p7), %s1883_s11, 3 }
  0xcd   : > { %s336_s22 = scalar_lea.sflag (!%p2010_p7), [#allocation3], %s1883_s11  ;;  %s339_s1 = scalar_lea.vmem (!%p2010_p7), [#allocation2], %s994_s10 }
  0xd3   : > { %1521 = dma.done.wait (%p1818_p11), %s336_s22, 128  }
  0xd4   : > { %1523 = vsyncadd (%p1818_p11), %s336_s22, 4294967168  ;;  %p2011_p12 = scmp.ne.s32.totalorder %s1997_s8, 0 }
  0xd6   : > { %1525 = dma.done.wait (%p2011_p12), [#allocation6], 32  }
  0xd7   : > { %1527 = vsyncadd (%p2011_p12), [#allocation6], 4294967264 }
  0xd8   : > { %1529 = dma.done.wait (%p2011_p12), [#allocation9], 2080  }
  0xd9   : > { %1531 = vsyncadd (%p2011_p12), [#allocation9], 4294965216 }
  0xda   : > { %1533 = dma.done.wait (%p2011_p12), [#allocation12], 2064  }
  0xdb   : > { %1535 = vsyncadd (%p2011_p12), [#allocation12], 4294965232  ;;  %v1050_v0 = vld [vmem:[%s339_s1] sm:$0xff]   ;;  %v1212_v4 = vld [vmem:[#allocation8] ss:$8 sps:$4 sm:$0xff]   ;;  %v1575_v22 = vmov 0   ;;  %v428_v32 = vlaneseq }
  0xdc   : > { %v1905_v1 = vunpack.c.l.bf16 %v1050_v0  ;;  %v1908_v2 = vunpack.c.h.bf16 %v1050_v0  ;;  %v1210_v3 = vld [vmem:[#allocation8 + $0x4] ss:$8 sps:$4 sm:$0xff]   ;;  %v1213_v5 = vld [vmem:[#allocation8 + $0x14] ss:$8 sps:$4 sm:$0xff]   ;;  %v1215_v14 = vld [vmem:[#allocation8 + $0x10] ss:$8 sps:$4 sm:$0xff]   ;;  %590 = vmatprep.mubr.bf16.mxu0 %v1575_v22 }
  0xdd   : > { %558 = vmatprep.subr.bf16.mxu0 %v1210_v3  ;;  %v1216_v15 = vld [vmem:[#allocation8 + $0x24] ss:$8 sps:$4 sm:$0xff]   ;;  %v1218_v16 = vld [vmem:[#allocation8 + $0x20] ss:$8 sps:$4 sm:$0xff]   ;;  %v1219_v17 = vld [vmem:[#allocation8 + $0x34] ss:$8 sps:$4 sm:$0xff]  }
  0xde   : > { %405 = vadd.xlane.f32.xlu0 %v1905_v1  ;;  %559 = vmatpush1.bf16.msra.mxu0 %v1212_v4  ;;  %v1221_v18 = vld [vmem:[#allocation8 + $0x30] ss:$8 sps:$4 sm:$0xff]   ;;  %v1222_v19 = vld [vmem:[#allocation8 + $0x44] ss:$8 sps:$4 sm:$0xff]   ;;  %v1224_v20 = vld [vmem:[#allocation8 + $0x40] ss:$8 sps:$4 sm:$0xff]  }
  0xdf   : > { %560 = vmatprep.subr.bf16.mxu0 %v1213_v5  ;;  %v1225_v21 = vld [vmem:[#allocation8 + $0x54] ss:$8 sps:$4 sm:$0xff]   ;;  %v1227_v23 = vld [vmem:[#allocation8 + $0x50] ss:$8 sps:$4 sm:$0xff]   ;;  %v1228_v24 = vld [vmem:[#allocation8 + $0x64] ss:$8 sps:$4 sm:$0xff]  }
  0xe0   : > { %v1230_v25 = vld [vmem:[#allocation8 + $0x60] ss:$8 sps:$4 sm:$0xff]   ;;  %v1231_v26 = vld [vmem:[#allocation8 + $0x74] ss:$8 sps:$4 sm:$0xff]   ;;  %v1233_v27 = vld [vmem:[#allocation8 + $0x70] ss:$8 sps:$4 sm:$0xff]  }
  0xe1   : > { %v429_v35 = vshrl.u32 %v428_v32, 7  ;;  %v401_v36 = vld [vmem:[#allocation5] sm:$0x1]  ;;  %v403_v39 = vld [vmem:[#allocation7] sm:$0x1]  ;;  %v1234_v52 = vld [vmem:[#allocation11 + $0x40] sm:$0xff]  }
  0xe2   : > { %407 = vadd.xlane.f32.xlu0 %v1908_v2  ;;  %561 = vmatpush1.bf16.msra.mxu0 %v1215_v14  ;;  %v402_v37 = vunpack.c.l.bf16 %v401_v36  ;;  %v404_v41 = vunpack.c.l.bf16 %v403_v39  ;;  %v1235_v53 = vld [vmem:[#allocation11] sm:$0xff]   ;;  %v1236_v54 = vld [vmem:[#allocation11 + $0x48] sm:$0xff]   ;;  %v1238_v56 = vld [vmem:[#allocation11 + $0x50] sm:$0xff]   ;;  %s1048_s8 = sshll.u32 %s1554_s27, 7  ;;  %s393_s9 = scalar_lea.vmem [#allocation14], %s994_s10 }
  0xe3   : > { %562 = vmatprep.subr.bf16.mxu0 %v1216_v15  ;;  %v1913_v38 = vsub.s32 0, %v429_v35  ;;  %1058 = vmatprep.subr.bf16.mxu1 %v1234_v52  ;;  %v1237_v55 = vld [vmem:[#allocation11 + $0x8] sm:$0xff]   ;;  %v1239_v57 = vld [vmem:[#allocation11 + $0x10] sm:$0xff]   ;;  %v1240_v58 = vld [vmem:[#allocation11 + $0x58] sm:$0xff]   ;;  %s836_s13 = sshll.u32 %s393_s9, 4  ;;  %s2012_s21 = sld [smem:[#allocation22_spill]]  ;;  %s1931_s13 = int_to_ptr.vmem [resolvable:$true] %s836_s13 }
  0xe4   : > { %1059 = vmatpush3.bf16.msra.mxu1 %v1235_v53  ;;  %v1241_v59 = vld [vmem:[#allocation11 + $0x18] sm:$0xff]   ;;  %v1242_v60 = vld [vmem:[#allocation11 + $0x60] sm:$0xff]   ;;  %v1244_v62 = vld [vmem:[#allocation11 + $0x68] sm:$0xff]   ;;  %s821_s27 = scalar_lea.sflag [#allocation4], %s1883_s11  ;;  %s1468_s18 = scalar_lea.vmem %s1931_s13, 128 }
  0xe5   : > { %v431_v43 = vrot.slane %v402_v37, %v1913_v38  ;;  %v437_v47 = vrot.slane %v404_v41, %v1913_v38  ;;  %1060 = vmatprep.subr.bf16.mxu1 %v1236_v54  ;;  %v1243_v61 = vld [vmem:[#allocation11 + $0x20] sm:$0xff]   ;;  %v1245_v63 = vld [vmem:[#allocation11 + $0x28] sm:$0xff]   ;;  %v1246_v0 = vld [vmem:[#allocation11 + $0x70] sm:$0xff]   ;;  %p1469_p11 = scmp.ne.s32.totalorder %s1931_s13, %s1468_s18  ;;  %p2013_p0 = scmp.ne.s32.totalorder %s2007_s7, 0 }
  0xe6   : > { %563 = vmatpush1.bf16.msra.mxu0 %v1218_v16  ;;  %v1247_v3 = vld [vmem:[#allocation11 + $0x30] sm:$0xff]   ;;  %v1248_v4 = vld [vmem:[#allocation11 + $0x78] sm:$0xff]   ;;  %s1576_s12 = smov [#allocation14]  }
  0xe7   : > { %564 = vmatprep.subr.bf16.mxu0 %v1219_v17  ;;  %v1249_v5 = vld [vmem:[#allocation11 + $0x38] sm:$0xff]   ;;  %p1470_p5 = pnand %p1469_p11, %p2013_p0  ;;  %s1472_s15 = sshll.u32 %s1576_s12, 4  ;;  %s1473_s15 = int_to_ptr.vmem [resolvable:$false] %s1472_s15 }
  0xe8   : > { %1061 = vmatpush3.bf16.msra.mxu1 %v1237_v55  ;;  %s1474_s30 = scalar_lea.vmem %s1473_s15, 256  ;;  %p1475_p10 = scmp.lt.s32.totalorder %s1931_s13, %s1473_s15 }
  0xe9   : > { %1062 = vmatprep.subr.bf16.mxu1 %v1238_v56  ;;  %s1929_s14 = scalar_lea.hbm %s2012_s21, %s1048_s8  ;;  %p1471_p1 = pneg %p1470_p5 }
  0xea   : > { %565 = vmatpush1.bf16.msra.mxu0 %v1221_v18  ;;  %p1476_p13 = scmp.lt.s32.totalorder %s1474_s30, %s1468_s18 }
  0xeb   : > { %566 = vmatprep.subr.bf16.mxu0 %v1222_v19 }
  0xec   : > { %1063 = vmatpush3.bf16.msra.mxu1 %v1239_v57  ;;  %p1477_p2 = por %p1476_p13, %p1475_p10 }
  0xed   : > { %1064 = vmatprep.subr.bf16.mxu1 %v1240_v58 }
  0xee   : > { %567 = vmatpush1.bf16.msra.mxu0 %v1224_v20  ;;  %p1478_p8 = pnand %p1477_p2, %p1471_p1 }
  0xef   : > { %568 = vmatprep.subr.bf16.mxu0 %v1225_v21 }
  0xf0   : > { %1065 = vmatpush3.bf16.msra.mxu1 %v1241_v59 }
  0xf1   : > { %1066 = vmatprep.subr.bf16.mxu1 %v1242_v60 }
  0xf2   : > { %569 = vmatpush1.bf16.msra.mxu0 %v1227_v23 }
  0xf3   : > { %570 = vmatprep.subr.bf16.mxu0 %v1228_v24 }
  0xf4   : > { %1067 = vmatpush3.bf16.msra.mxu1 %v1243_v61 }
  0xf5   : > { %1068 = vmatprep.subr.bf16.mxu1 %v1244_v62 }
  0xf6   : > { %571 = vmatpush1.bf16.msra.mxu0 %v1230_v25 }
  0xf7   : > { %572 = vmatprep.subr.bf16.mxu0 %v1231_v26 }
  0xf8   : > { %1069 = vmatpush3.bf16.msra.mxu1 %v1245_v63 }
  0xf9   : > { %1070 = vmatprep.subr.bf16.mxu1 %v1246_v0 }
  0xfa   : > { %573 = vmatpush1.bf16.msra.mxu0 %v1233_v27 }
  0xfc   : > { %1071 = vmatpush3.bf16.msra.mxu1 %v1247_v3 }
  0xfd   : > { %1072 = vmatprep.subr.bf16.mxu1 %v1248_v4 }
 0x100   : > { %1073 = vmatpush3.bf16.msra.mxu1 %v1249_v5 }
 0x16b   : > { %v406_v6 = vpop.xlane.xlu0 %405 }
 0x16c   : > { %v410_v7 = vmul.f32 0.0078125, %v406_v6  ;;  %v457_v6 = vld [vmem:[#allocation10] sm:$0x3] }
 0x16e   : > { %v412_v8 = vsub.f32 %v1905_v1, %v410_v7  ;;  %v458_v7 = vunpack.c.l.bf16 %v457_v6 }
 0x16f   : > { %v408_v9 = vpop.xlane.xlu0 %407 }
 0x170   : > { %v411_v10 = vmul.f32 0.0078125, %v408_v9  ;;  %v414_v11 = vmul.f32 %v412_v8, %v412_v8  ;;  %v463_v9 = vrot.slane %v458_v7, %v1913_v38 }
 0x172   : > { %v413_v12 = vsub.f32 %v1908_v2, %v411_v10  ;;  %416 = vadd.xlane.f32.xlu1 %v414_v11  ;;  %v473_v11 = vrot.slane %v463_v9, %v1913_v38 }
 0x174   : > { %v415_v13 = vmul.f32 %v413_v12, %v413_v12 }
 0x176   : > { %418 = vadd.xlane.f32.xlu1 %v415_v13 }
 0x1ff   : > { %v417_v28 = vpop.xlane.xlu1 %416 }
 0x200   : > { %v420_v29 = vmul.f32 0.0078125, %v417_v28 }
 0x202   : > { %v422_v30 = vadd.f32 1e-12, %v420_v29 }
 0x203   : > { %v419_v31 = vpop.xlane.xlu1 %418 }
 0x204   : > { %1250 = vrsqrt.f32 %v422_v30  ;;  %v421_v33 = vmul.f32 0.0078125, %v419_v31 }
 0x206   : > { %v423_v34 = vadd.f32 1e-12, %v421_v33 }
 0x208   : > { %1252 = vrsqrt.f32 %v423_v34 }
 0x20e   : > { %v1251_v40 = vpop.eup %1250 }
 0x20f   : > { %v426_v42 = vmul.f32 %v1251_v40, %v412_v8  ;;  %v466_v8 = vsub.s32 2, %v429_v35 }
 0x211   : > { %v432_v46 = vmul.f32 %v431_v43, %v426_v42  ;;  %v467_v10 = vrot.slane %v458_v7, %v466_v8 }
 0x212   : > { %v1253_v44 = vpop.eup %1252 }
 0x213   : > { %v427_v45 = vmul.f32 %v1253_v44, %v413_v12  ;;  %v438_v49 = vadd.f32 %v437_v47, %v432_v46  ;;  %v477_v12 = vrot.slane %v467_v10, %v1913_v38  ;;  %v663_v44 = vld [vmem:[#allocation13] sm:$0x1] }
 0x215   : > { %v433_v48 = vmul.f32 %v431_v43, %v427_v45  ;;  %v664_v45 = vunpack.c.l.bf16 %v663_v44 }
 0x217   : > { %v439_v50 = vadd.f32 %v437_v47, %v433_v48  ;;  %v668_v47 = vrot.slane %v664_v45, %v1913_v38 }
 0x219   : > { %v440_v51 = vpack.c.bf16 %v439_v50, %v438_v49 }
 0x21b   : > { %591 = vmatmul.mubr.bf16.vlgmr.msra.gmra.mrb[0].mxu0 %v440_v51 }
 0x2ee   : > { %v592_v13 = vpop.f32.mrb[0].mxu0 }
 0x2ef   : > { %v593_v14 = vadd.f32 %v592_v13, %v473_v11  ;;  %v594_v15 = vpop.f32.mrb[1].mxu0 }
 0x2f0   : > { %v595_v16 = vadd.f32 %v594_v15, %v477_v12  ;;  %v596_v17 = vpop.f32.mrb[2].mxu0 }
 0x2f1   : > { %v1018_v18 = vmul.f32 -1.442695, %v593_v14  ;;  %v597_v19 = vadd.f32 %v596_v17, %v473_v11  ;;  %v598_v20 = vpop.f32.mrb[3].mxu0 }
 0x2f2   : > { %v1019_v21 = vmul.f32 -1.442695, %v595_v16  ;;  %v599_v22 = vadd.f32 %v598_v20, %v477_v12 }
 0x2f3   : > { %1254 = vpow2.f32 %v1018_v18  ;;  %v1020_v23 = vmul.f32 -1.442695, %v597_v19 }
 0x2f4   : > { %1256 = vpow2.f32 %v1019_v21  ;;  %v1021_v24 = vmul.f32 -1.442695, %v599_v22 }
 0x2f5   : > { %1258 = vpow2.f32 %v1020_v23 }
 0x2f6   : > { %1260 = vpow2.f32 %v1021_v24 }
 0x2fd   : > { %v1255_v25 = vpop.eup %1254 }
 0x2fe   : > { %v1257_v26 = vpop.eup %1256  ;;  %v613_v27 = vadd.f32 1.0, %v1255_v25 }
 0x2ff   : > { %v1259_v28 = vpop.eup %1258  ;;  %v614_v29 = vadd.f32 1.0, %v1257_v26 }
 0x300   : > { %v1261_v30 = vpop.eup %1260  ;;  %1262 = vrcp.f32 %v613_v27  ;;  %v615_v31 = vadd.f32 1.0, %v1259_v28 }
 0x301   : > { %1264 = vrcp.f32 %v614_v29  ;;  %v616_v32 = vadd.f32 1.0, %v1261_v30 }
 0x302   : > { %1266 = vrcp.f32 %v615_v31 }
 0x303   : > { %1268 = vrcp.f32 %v616_v32 }
 0x30a   : > { %v1263_v33 = vpop.eup %1262 }
 0x30b   : > { %v1265_v34 = vpop.eup %1264  ;;  %v625_v37 = vmul.f32 %v1263_v33, %v593_v14 }
 0x30c   : > { %v1267_v35 = vpop.eup %1266  ;;  %v626_v40 = vmul.f32 %v1265_v34, %v595_v16 }
 0x30d   : > { %v1269_v36 = vpop.eup %1268  ;;  %v627_v39 = vmul.f32 %v1267_v35, %v597_v19 }
 0x30e   : > { %v628_v41 = vmul.f32 %v1269_v36, %v599_v22 }
 0x30f   : > { %v629_v42 = vpack.c.bf16 %v627_v39, %v625_v37 }
 0x310   : > { %v630_v43 = vpack.c.bf16 %v628_v41, %v626_v40 }
 0x312   : > { %797 = vmatprep.mubr.bf16.mxu1 %v630_v43 }
 0x313   : > { %798 = vmatmul.mubr.bf16.vlgmr.msra.gmra.mrb[0].mxu1 %v629_v42 }
 0x3e6   : > { %v1074_v46 = vpop.f32.mrb[0].mxu1 }
 0x3e7   : > { %v1075_v48 = vpop.f32.mrb[1].mxu1 }
 0x3e8   : > { %v1076_v49 = vadd.f32 %v1075_v48, %v1074_v46  ;;  %v1077_v50 = vpop.f32.mrb[2].mxu1 }
 0x3e9   : > { %v1078_v51 = vpop.f32.mrb[3].mxu1 }
 0x3ea   : > { %v800_v52 = vadd.f32 %v1076_v49, %v668_v47  ;;  %v1079_v53 = vadd.f32 %v1078_v51, %v1077_v50 }
 0x3ec   : > { %v806_v54 = vmul.f32 0.5, %v800_v52  ;;  %v803_v55 = vadd.f32 %v1079_v53, %v668_v47 }
 0x3ee   : > { %v807_v56 = vmul.f32 0.5, %v803_v55  ;;  %v808_v57 = vadd.f32 %v1905_v1, %v806_v54 }
 0x3f0   : > { %v809_v58 = vadd.f32 %v1908_v2, %v807_v56 }
 0x3f2   : > { %v1056_v38 = vpack.c.bf16 %v809_v58, %v808_v57 }
 0x3f4   : > { %1057 = vst [vmem:[%s393_s9] sm:$0xff] %v1056_v38  }
 0x3f5   : > { %1481 = shalt.err (!%p1478_p8)
}
 0x3f6   : > { %s1482_s19 = scalar_lea.hbm %s1929_s14, 128  ;;  %s1486_s1 = scalar_lea.hbm %s2012_s21, 256 }
 0x3f7   : > { %p1483_p9 = scmp.ne.s32.totalorder %s1929_s14, %s1482_s19  ;;  %p1487_p3 = scmp.lt.u32.totalorder %s1929_s14, %s2012_s21 }
 0x3f8   : > { %p1488_p7 = scmp.lt.u32.totalorder %s1486_s1, %s1482_s19  ;;  %p1490_p11 = scmp.lt.u32.totalorder %s1482_s19, %s1929_s14 }
 0x3f9   : > { %p1484_p4 = pnand %p1483_p9, %p2013_p0 }
 0x3fa   : > { %p1489_p12 = por %p1488_p7, %p1487_p3 }
 0x3fb   : > { %p1485_p6 = pneg %p1484_p4 }
 0x3fc   : > { %p1491_p5 = por %p1490_p11, %p1489_p12 }
 0x3fe   : > { %p1492_p1 = pnand %p1491_p5, %p1485_p6 }
 0x400   : > { %1495 = shalt.err (!%p1492_p1)
}
 0x401   : > { %s1577_s17 = smov 64   ;;  %s1578_s3 = smov 4  }
 0x402   : > { %1106 = dma.vmem_to_hbm [thread:$0]  (%p2013_p0), %s1931_s13, 128, %s1929_s14, %s821_s27, %s1577_s17, %s1577_s17, %s1578_s3  }
 0x403 PF: > { %s851_s18 = sand.u32 1, %s1542_s24   ;;  %p2014_p10 = scmp.ne.s32.totalorder %s2008_s23, 0 }
 0x404   : > { %p2015_p13 = scmp.ge.s32.totalorder %s1562_s29, 2  ;;  %s852_s12 = scalar_lea.sflag [#allocation4], %s851_s18 }
 0x406   : > { %p1132_p2 = pnand %p2015_p13, %p2014_p10 }
 0x408   : > { %1537 = dma.done.wait (!%p1132_p2), %s852_s12, 128  }
 0x409   : > { %1539 = vsyncadd (!%p1132_p2), %s852_s12, 4294967168  ;;  %s26_s29 = sadd.s32 1, %s1562_s29   ;;  %s2016_s24 = smov %s1546_s25 }
 0x40a   : > { %p23_p8 = scmp.ge.s32.totalorder %s26_s29, 4   ;;  %s2017_s25 = smov %s1550_s26 }
 0x40b   : > { %s2018_s26 = smov %s1827_s20  ;;  %s2019_s27 = smov %s1558_s28 }
 0x40c   : > { %s2020_s28 = smov %s2022_s16  ;;  %25 = sbr.rel (!%p23_p8) target bundleno = 13 (0xd), region = 117 }
 0x413   :  { %857 = vsyncpa [#allocation3], 1 }
 0x414   :  { %859 = vsyncpa [#allocation3 + $0x1], 1 }
 0x415   :  { %860 = vsyncpa [#allocation6], 1 }
 0x416   :  { %861 = vsyncpa [#allocation9], 1 }
 0x417   :  { %862 = vsyncpa [#allocation12], 1 }
 0x418   :  { %863 = vsyncpa [#allocation4], 1 }
 0x419   :  { %865 = vsyncpa [#allocation4 + $0x1], 1 }

// kernel: conformer_forward.32
= control target key start
LH: loop header
LB: loop body
LE: loop exit
PB: predicated region body
PF: predicated region fallthrough
CT: control target
= control target key end

     0   :  { %s2164_s0 = inlined_call_operand.hbm [shape: bf16[2,16,128], index: 0, kind: input, shape index: {}]   ;;  %s2165_s1 = inlined_call_operand.hbm [shape: bf16[1,128], index: 1, kind: input, shape index: {}]   ;;  %s2166_s2 = inlined_call_operand.hbm [shape: bf16[1,128], index: 2, kind: input, shape index: {}]   ;;  %s2167_s3 = inlined_call_operand.hbm [shape: bf16[128,384], index: 3, kind: input, shape index: {}]   ;;  %s2168_s4 = inlined_call_operand.hbm [shape: bf16[1,384], index: 4, kind: input, shape index: {}]   ;;  %s2169_s5 = inlined_call_operand.hbm [shape: bf16[2,4,16,32], index: 5, kind: output, shape index: {0}]   ;;  %s2170_s6 = inlined_call_operand.hbm [shape: bf16[2,4,16,32], index: 6, kind: output, shape index: {1}]   ;;  %s2171_s7 = inlined_call_operand.hbm [shape: bf16[2,4,16,32], index: 7, kind: output, shape index: {2}]  }
   0x1   :  { %2177 = sst [smem:[#allocation21_spill]] %s2165_s1 }
   0x2   :  { %13 = vsyncpa [#allocation3], 0 }
   0x3   :  { %15 = vsyncpa [#allocation3 + $0x1], 0 }
   0x4   :  { %16 = vsyncpa [#allocation6], 0 }
   0x5   :  { %17 = vsyncpa [#allocation9], 0 }
   0x6   :  { %18 = vsyncpa [#allocation4], 0 }
   0x7   :  { %20 = vsyncpa [#allocation4 + $0x1], 0 }
   0x8   :  { %21 = vsyncpa [#allocation13], 0 }
   0x9   :  { %23 = vsyncpa [#allocation13 + $0x1], 0  ;;  %s1713_s24 = smov 0   ;;  %s1715_s25 = smov 0  }
   0xa   :  { %s1717_s26 = smov 0   ;;  %s1719_s27 = smov 0  }
   0xb   :  { %s1721_s28 = smov 0   ;;  %s1723_s29 = smov 0  }
   0xc LB: > { %s1744_s30 = sadd.s32 4294967295, %s1652_s29   ;;  %s2175_s8 = sadd.s32 4294967294, %s1652_s29   ;;  %s1652_s29 = sphi %s1723_s29, %s29_s29   ;;  %s1648_s28 = sphi %s1721_s28, %s2203_s28   ;;  %s1644_s27 = sphi %s1719_s27, %s2202_s27   ;;  %s1640_s26 = sphi %s1717_s26, %s2201_s26   ;;  %s1636_s25 = sphi %s1715_s25, %s2200_s25   ;;  %s1632_s24 = sphi %s1713_s24, %s2199_s24  }
   0xd   : > { %p63_p0 = scmp.ne.s32.totalorder %s1636_s25, %s1632_s24  ;;  %p2172_p1 = scmp.eq.s32.totalorder %s1744_s30, 0 }
   0xe   : > { %p179_p3 = scmp.eq.s32.totalorder %s2175_s8, 1  ;;  %p1080_p5 = scmp.ge.s32.totalorder %s1652_s29, 1 }
   0xf   : > { %p1755_p4 = por %p2172_p1, %p63_p0  ;;  %p242_p7 = scmp.lt.s32.totalorder %s1652_s29, 3 }
  0x10   : > { %p1760_p6 = por %p179_p3, %p63_p0  ;;  %s1654_s12 = smov [#allocation5]  }
  0x11   : > { %s2178_s9 = scalar_select %p1755_p4, 1, 0 }
  0x12   : > { %s2179_s10 = scalar_select %p1760_p6, 1, 0 }
  0x13   : > { %p1765_p8 = pnand %p1080_p5, %p242_p7  ;;  %s255_s13 = sshll.u32 %s1654_s12, 4  ;;  %s256_s13 = int_to_ptr.vmem [resolvable:$true] %s255_s13 }
  0x14   : > { %2180 = sst [smem:[#allocation20_spill]] %s2179_s10  ;;  %s1655_s14 = smov [#allocation8]  }
  0x15   : > { %s2181_s11 = scalar_select %p1765_p8, 1, 0 }
  0x16   : > { %p1224_p10 = pneg %p1765_p8  ;;  %s276_s15 = sshll.u32 %s1655_s14, 4  ;;  %s1778_s15 = int_to_ptr.vmem [resolvable:$true] %s276_s15 }
  0x17   : > { %s1656_s17 = smov [#allocation7]   ;;  %s2183_s1 = sld [smem:[#allocation21_spill]] }
  0x18   : > { %p1774_p11 = pnand %p1224_p10, %p2172_p1  ;;  %s1780_s18 = sshll.u32 %s1656_s17, 4  ;;  %s267_s18 = int_to_ptr.vmem [resolvable:$true] %s1780_s18 }
  0x1a   : > { %p1790_p13 = pneg %p1774_p11 }
  0x1d   : > { %s1360_s21 = scalar_lea.hbm %s2183_s1, 16 }
  0x1e   : > { %p1361_p12 = scmp.ne.s32.totalorder %s2183_s1, %s1360_s21  ;;  %p1367_p5 = scmp.lt.u32.totalorder %s1360_s21, %s2183_s1 }
  0x20   : > { %p1363_p0 = pnand %p1790_p13, %p1361_p12 }
  0x22   : > { %p1364_p3 = pneg %p1363_p0 }
  0x24   : > { %p1369_p7 = pnand %p1367_p5, %p1364_p3 }
  0x26   : > { %1372 = shalt.err (!%p1369_p7)
}
  0x27   : > { %s1373_s19 = scalar_lea.vmem %s256_s13, 16  ;;  %s1380_s20 = scalar_lea.vmem %s256_s13, 32 }
  0x28   : > { %p1374_p10 = scmp.ne.s32.totalorder %s256_s13, %s1373_s19  ;;  %p1381_p2 = scmp.lt.s32.totalorder %s256_s13, %s256_s13 }
  0x29   : > { %p1382_p6 = scmp.lt.s32.totalorder %s1380_s20, %s1373_s19 }
  0x2a   : > { %p1376_p9 = pnand %p1374_p10, %p1790_p13 }
  0x2b   : > { %p1383_p4 = por %p1382_p6, %p1381_p2 }
  0x2c   : > { %p1377_p1 = pneg %p1376_p9 }
  0x2e   : > { %p1384_p8 = pnand %p1383_p4, %p1377_p1 }
  0x30   : > { %1387 = shalt.err (!%p1384_p8)
}
  0x31   : > { %1227 = dma.hbm_to_vmem [thread:$0]  (!%p1774_p11), %s2183_s1, 16, %s256_s13, [#allocation6]  }
  0x32   : > { %s1388_s17 = scalar_lea.hbm %s2167_s3, 3072 }
  0x33   : > { %p1389_p9 = scmp.ne.s32.totalorder %s2167_s3, %s1388_s17  ;;  %p1395_p1 = scmp.lt.u32.totalorder %s1388_s17, %s2167_s3 }
  0x35   : > { %p1391_p12 = pnand %p1389_p9, %p1790_p13 }
  0x37   : > { %p1392_p2 = pneg %p1391_p12 }
  0x39   : > { %p1397_p4 = pnand %p1395_p1, %p1392_p2 }
  0x3b   : > { %1400 = shalt.err (!%p1397_p4)
}
  0x3c   : > { %s1401_s13 = scalar_lea.vmem %s1778_s15, 3072  ;;  %p1409_p3 = scmp.lt.s32.totalorder %s1778_s15, %s1778_s15 }
  0x3d   : > { %p1402_p6 = scmp.ne.s32.totalorder %s1778_s15, %s1401_s13  ;;  %p1410_p5 = scmp.lt.s32.totalorder %s1401_s13, %s1401_s13 }
  0x3f   : > { %p1404_p8 = pnand %p1402_p6, %p1790_p13  ;;  %p1411_p7 = por %p1410_p5, %p1409_p3 }
  0x41   : > { %p1405_p0 = pneg %p1404_p8 }
  0x43   : > { %p1412_p10 = pnand %p1411_p7, %p1405_p0 }
  0x45   : > { %1415 = shalt.err (!%p1412_p10)
}
  0x46   : > { %s1657_s8 = smov 192   ;;  %s1658_s10 = smov 12  }
  0x47   : > { %1233 = dma.hbm_to_vmem [thread:$0]  (!%p1774_p11), %s2167_s3, 3072, %s1778_s15, [#allocation9], %s1657_s8, %s1657_s8, %s1658_s10  }
  0x48   : > { %s1416_s17 = scalar_lea.hbm %s2166_s2, 16 }
  0x49   : > { %p1417_p9 = scmp.ne.s32.totalorder %s2166_s2, %s1416_s17  ;;  %p1423_p1 = scmp.lt.u32.totalorder %s1416_s17, %s2166_s2 }
  0x4b   : > { %p1419_p12 = pnand %p1417_p9, %p1790_p13 }
  0x4d   : > { %p1420_p2 = pneg %p1419_p12 }
  0x4f   : > { %p1425_p4 = pnand %p1423_p1, %p1420_p2 }
  0x51   : > { %1428 = shalt.err (!%p1425_p4)
}
  0x52   : > { %s1429_s22 = scalar_lea.vmem %s267_s18, 16  ;;  %s1436_s15 = scalar_lea.vmem %s267_s18, 32 }
  0x53   : > { %p1430_p6 = scmp.ne.s32.totalorder %s267_s18, %s1429_s22  ;;  %p1437_p3 = scmp.lt.s32.totalorder %s267_s18, %s267_s18 }
  0x54   : > { %p1438_p5 = scmp.lt.s32.totalorder %s1436_s15, %s1429_s22 }
  0x55   : > { %p1432_p8 = pnand %p1430_p6, %p1790_p13 }
  0x56   : > { %p1439_p7 = por %p1438_p5, %p1437_p3 }
  0x57   : > { %p1433_p0 = pneg %p1432_p8 }
  0x59   : > { %p1440_p10 = pnand %p1439_p7, %p1433_p0 }
  0x5b   : > { %1443 = shalt.err (!%p1440_p10)
}
  0x5c   : > { %1230 = dma.hbm_to_vmem [thread:$0]  (!%p1774_p11), %s2166_s2, 16, %s267_s18, [#allocation6]  }
  0x5d   : > { %s1659_s1 = smov [#allocation10]   ;;  %s1444_s17 = scalar_lea.hbm %s2168_s4, 48 }
  0x5e   : > { %s290_s23 = sshll.u32 %s1659_s1, 4  ;;  %p1445_p9 = scmp.ne.s32.totalorder %s2168_s4, %s1444_s17  ;;  %s291_s23 = int_to_ptr.vmem [resolvable:$true] %s290_s23 }
  0x5f   : > { %p1451_p1 = scmp.lt.u32.totalorder %s1444_s17, %s2168_s4 }
  0x60   : > { %p1447_p12 = pnand %p1445_p9, %p1790_p13 }
  0x62   : > { %p1448_p2 = pneg %p1447_p12 }
  0x64   : > { %p1453_p4 = pnand %p1451_p1, %p1448_p2 }
  0x66   : > { %1456 = shalt.err (!%p1453_p4)
}
  0x67   : > { %s1457_s18 = scalar_lea.vmem %s291_s23, 48  ;;  %s1464_s15 = scalar_lea.vmem %s291_s23, 64 }
  0x68   : > { %p1458_p6 = scmp.ne.s32.totalorder %s291_s23, %s1457_s18  ;;  %p1465_p3 = scmp.lt.s32.totalorder %s291_s23, %s291_s23 }
  0x69   : > { %p1466_p5 = scmp.lt.s32.totalorder %s1464_s15, %s1457_s18 }
  0x6a   : > { %p1460_p8 = pnand %p1458_p6, %p1790_p13 }
  0x6b   : > { %p1467_p7 = por %p1466_p5, %p1465_p3 }
  0x6c   : > { %p1461_p0 = pneg %p1460_p8 }
  0x6e   : > { %p1468_p10 = pnand %p1467_p7, %p1461_p0 }
  0x70   : > { %1471 = shalt.err (!%p1468_p10)
}
  0x71   : > { %1236 = dma.hbm_to_vmem [thread:$0]  (!%p1774_p11), %s2168_s4, 48, %s291_s23, [#allocation9]  }
  0x72   : > { %s41_s12 = sadd.s32 1, %s1648_s28  ;;  %s50_s1 = sadd.s32 1, %s1640_s26 }
  0x73   : > { %p43_p13 = scmp.ge.s32.totalorder %s41_s12, 2  ;;  %p57_p9 = scmp.ne.s32.totalorder %s1640_s26, %s1636_s25 }
  0x74   : > { %p58_p12 = scmp.eq.s32.totalorder %s1652_s29, 0  ;;  %p1255_p2 = scmp.lt.s32.totalorder %s1652_s29, 2 }
  0x75   : > { %s2205_s12 = smov (%p43_p13, %s41_s12), 0  ;;  %p2185_p4 = scmp.eq.s32.totalorder %s1744_s30, 1 }
  0x76   : > { %p59_p1 = por %p58_p12, %p57_p9  ;;  %s45_s21 = ssub.s32 %s1648_s28, %s2205_s12 }
  0x77   : > { %p1876_p6 = por %p2185_p4, %p57_p9  ;;  %s301_s14 = sand.u32 1, %s1640_s26  }
  0x78   : > { %p48_p8 = scmp.eq.s32.totalorder %s45_s21, 0  ;;  %s1086_s23 = sshll.u32 %s301_s14, 3 }
  0x79   : > { %s1157_s17 = sshll.u32 %s1648_s28, 7  ;;  %s305_s18 = scalar_lea.vmem [#allocation2], %s1086_s23 }
  0x7a   : > { %s1885_s19 = scalar_select %p48_p8, %s1640_s26, %s50_s1  }
  0x7b   : > { %s1890_s22 = scalar_lea.hbm %s2164_s0, %s1157_s17  ;;  %s314_s15 = sshll.u32 %s305_s18, 4  ;;  %s1898_s15 = int_to_ptr.vmem [resolvable:$true] %s314_s15 }
  0x7c   : > { %p1894_p11 = pnand %p1255_p2, %p59_p1  ;;  %s1900_s10 = scalar_lea.sflag [#allocation3], %s301_s14 }
  0x7d   : > { %s1472_s1 = scalar_lea.hbm %s1890_s22, 128  ;;  %s1477_s17 = scalar_lea.hbm %s2164_s0, 256 }
  0x7e   : > { %p1473_p0 = scmp.ne.s32.totalorder %s1890_s22, %s1472_s1  ;;  %p1474_p3 = pneg %p1894_p11 }
  0x7f   : > { %p1478_p10 = scmp.lt.u32.totalorder %s1890_s22, %s2164_s0  ;;  %p1479_p13 = scmp.lt.u32.totalorder %s1477_s17, %s1472_s1 }
  0x80   : > { %p1475_p5 = pnand %p1474_p3, %p1473_p0  ;;  %p1481_p12 = scmp.lt.u32.totalorder %s1472_s1, %s1890_s22 }
  0x81   : > { %p1480_p9 = por %p1479_p13, %p1478_p10 }
  0x82   : > { %p1476_p7 = pneg %p1475_p5 }
  0x83   : > { %p1482_p2 = por %p1481_p12, %p1480_p9 }
  0x85   : > { %p1483_p1 = pnand %p1482_p2, %p1476_p7 }
  0x87   : > { %1486 = shalt.err (!%p1483_p1)
}
  0x88   : > { %s1487_s14 = scalar_lea.vmem %s1898_s15, 128  ;;  %s1660_s18 = smov [#allocation2]  }
  0x89   : > { %p1488_p4 = scmp.ne.s32.totalorder %s1898_s15, %s1487_s14  ;;  %s1492_s21 = sshll.u32 %s1660_s18, 4  ;;  %s1493_s21 = int_to_ptr.vmem [resolvable:$false] %s1492_s21 }
  0x8a   : > { %s1494_s23 = scalar_lea.vmem %s1493_s21, 256  ;;  %p1495_p5 = scmp.lt.s32.totalorder %s1898_s15, %s1493_s21 }
  0x8b   : > { %p1490_p8 = pnand %p1488_p4, %p1474_p3  ;;  %p1496_p10 = scmp.lt.s32.totalorder %s1494_s23, %s1487_s14 }
  0x8d   : > { %p1491_p0 = pneg %p1490_p8  ;;  %p1497_p13 = por %p1496_p10, %p1495_p5 }
  0x8f   : > { %p1498_p9 = pnand %p1497_p13, %p1491_p0 }
  0x91   : > { %1501 = shalt.err (!%p1498_p9)
}
  0x92   : > { %s1661_s1 = smov 64   ;;  %s1662_s17 = smov 4  }
  0x93   : > { %1240 = dma.hbm_to_vmem [thread:$0]  (!%p1894_p11), %s1890_s22, 128, %s1898_s15, %s1900_s10, %s1661_s1, %s1661_s1, %s1662_s17  }
  0x94   : > { %p2188_p3 = scmp.ne.s32.totalorder %s2181_s11, 0 }
  0x95   : > { %s1931_s20 = sand.u32 (!%p2188_p3), 1, %s1636_s25   ;;  %p2189_p7 = scmp.ne.s32.totalorder (!%p2188_p3), %s2178_s9, 0 }
  0x96   : > { %326 = sbr.rel (%p2188_p3) target bundleno = 900 (0x384), region = 40  ;;  %s1090_s13 = sshll.u32 (!%p2188_p3), %s1931_s20, 3 }
  0x97   : > { %s329_s14 = scalar_lea.sflag (!%p2188_p3), [#allocation3], %s1931_s20  ;;  %s332_s18 = scalar_lea.vmem (!%p2188_p3), [#allocation2], %s1090_s13 }
  0x9d   : > { %1611 = dma.done.wait (%p2189_p7), %s329_s14, 128  }
  0x9e   : > { %1613 = vsyncadd (%p2189_p7), %s329_s14, 4294967168  ;;  %p2190_p12 = scmp.eq.s32.totalorder %s1744_s30, 0 }
  0xa0   : > { %1615 = dma.done.wait (%p2190_p12), [#allocation6], 32   ;;  %p2191_p11 = pmov %p2190_p12 }
  0xa2   : > { %1617 = vsyncadd (%p2191_p11), [#allocation6], 4294967264  ;;  %p2192_p2 = pmov %p2191_p11 }
  0xa4   : > { %1619 = dma.done.wait (%p2192_p2), [#allocation9], 3120   ;;  %p2193_p1 = pmov %p2192_p2 }
  0xa5   : > { %v1168_v0 = vld [vmem:[%s332_s18] sm:$0xff]   ;;  %v1663_v5 = vmov 0.0   ;;  %v1328_v7 = vld [vmem:[#allocation8 + $0x1c] ss:$12 sps:$4 sm:$0xff]   ;;  %v1664_v31 = vmov 0   ;;  %vm1665_vm0 = vmmov 0   ;;  %v425_v41 = vlaneseq }
  0xa6   : > { %1621 = vsyncadd (%p2193_p1), [#allocation9], 4294964176  ;;  %v1169_v1 = vunpack.c.l.bf16 %v1168_v0  ;;  %v1170_v2 = vunpack.c.h.bf16 %v1168_v0  ;;  %v1324_v3 = vld [vmem:[#allocation8 + $0x4] ss:$12 sps:$4 sm:$0xff]   ;;  %v1326_v4 = vld [vmem:[#allocation8] ss:$12 sps:$4 sm:$0xff]   ;;  %1180 = vmatprep.subr.bf16.mxu1 %v1663_v5  ;;  %660 = vmatprep.mubr.bf16.mxu0 %v1664_v31 }
  0xa7   : > { %v1327_v6 = vld [vmem:[#allocation8 + $0x8] ss:$12 sps:$4 sm:$0xff]   ;;  %628 = vmatprep.subr.bf16.mxu0 %v1324_v3  ;;  %v1330_v16 = vld [vmem:[#allocation8 + $0x18] ss:$12 sps:$4 sm:$0xff]   ;;  %v1331_v17 = vld [vmem:[#allocation8 + $0x20] ss:$12 sps:$4 sm:$0xff]   ;;  %1196 = vmatprep.mubr.msk.bf16.mxu1 %vm1665_vm0, %v1663_v5 }
  0xa8   : > { %402 = vadd.xlane.f32.xlu0 %v1169_v1  ;;  %629 = vmatpush1.bf16.msra.mxu0 %v1326_v4  ;;  %v1332_v18 = vld [vmem:[#allocation8 + $0x34] ss:$12 sps:$4 sm:$0xff]   ;;  %v1334_v19 = vld [vmem:[#allocation8 + $0x30] ss:$12 sps:$4 sm:$0xff]   ;;  %v1335_v20 = vld [vmem:[#allocation8 + $0x38] ss:$12 sps:$4 sm:$0xff]  }
  0xa9   : > { %1181 = vmatpush3.bf16.msra.mxu1 %v1327_v6  ;;  %630 = vmatprep.subr.bf16.mxu0 %v1328_v7  ;;  %v1336_v21 = vld [vmem:[#allocation8 + $0x4c] ss:$12 sps:$4 sm:$0xff]   ;;  %v1338_v22 = vld [vmem:[#allocation8 + $0x48] ss:$12 sps:$4 sm:$0xff]   ;;  %v1339_v23 = vld [vmem:[#allocation8 + $0x50] ss:$12 sps:$4 sm:$0xff]  }
  0xaa   : > { %1182 = vmatprep.subr.bf16.mxu1 %v1663_v5  ;;  %v1340_v24 = vld [vmem:[#allocation8 + $0x64] ss:$12 sps:$4 sm:$0xff]   ;;  %v1342_v25 = vld [vmem:[#allocation8 + $0x60] ss:$12 sps:$4 sm:$0xff]   ;;  %v1343_v26 = vld [vmem:[#allocation8 + $0x68] ss:$12 sps:$4 sm:$0xff]  }
  0xab   : > { %v1344_v27 = vld [vmem:[#allocation8 + $0x7c] ss:$12 sps:$4 sm:$0xff]   ;;  %v1346_v28 = vld [vmem:[#allocation8 + $0x78] ss:$12 sps:$4 sm:$0xff]   ;;  %v1347_v29 = vld [vmem:[#allocation8 + $0x80] ss:$12 sps:$4 sm:$0xff]  }
  0xac   : > { %404 = vadd.xlane.f32.xlu0 %v1170_v2  ;;  %631 = vmatpush1.bf16.msra.mxu0 %v1330_v16  ;;  %v1348_v30 = vld [vmem:[#allocation8 + $0x94] ss:$12 sps:$4 sm:$0xff]   ;;  %v1350_v32 = vld [vmem:[#allocation8 + $0x90] ss:$12 sps:$4 sm:$0xff]   ;;  %v1351_v33 = vld [vmem:[#allocation8 + $0x98] ss:$12 sps:$4 sm:$0xff]  }
  0xad   : > { %1183 = vmatpush3.bf16.msra.mxu1 %v1331_v17  ;;  %632 = vmatprep.subr.bf16.mxu0 %v1332_v18  ;;  %v1352_v34 = vld [vmem:[#allocation8 + $0xac] ss:$12 sps:$4 sm:$0xff]   ;;  %v1354_v35 = vld [vmem:[#allocation8 + $0xa8] ss:$12 sps:$4 sm:$0xff]   ;;  %v1355_v36 = vld [vmem:[#allocation8 + $0xb0] ss:$12 sps:$4 sm:$0xff]  }
  0xae   : > { %1184 = vmatprep.subr.bf16.mxu1 %v1663_v5  ;;  %v426_v44 = vshrl.u32 %v425_v41, 7  ;;  %v398_v45 = vld [vmem:[#allocation5] sm:$0x1]  ;;  %v400_v48 = vld [vmem:[#allocation7] sm:$0x1]  ;;  %s1095_s9 = sshll.u32 %s1931_s20, 5 }
  0xaf   : > { %v399_v46 = vunpack.c.l.bf16 %v398_v45  ;;  %v401_v50 = vunpack.c.l.bf16 %v400_v48  ;;  %v470_v61 = vld [vmem:[#allocation10] sm:$0x7]  ;;  %vm720_vm1 = vcmask 257024   ;;  %s1967_s11 = scalar_lea.vmem [#allocation11], %s1095_s9  ;;  %s1971_s22 = scalar_lea.vmem [#allocation14], %s1095_s9 }
  0xb0   : > { %633 = vmatpush1.bf16.msra.mxu0 %v1334_v19  ;;  %v427_v47 = vsub.s32 0, %v426_v44  ;;  %v471_v62 = vunpack.c.l.bf16 %v470_v61  ;;  %v483_v63 = vsub.s32 4, %v426_v44  ;;  %v479_v0 = vsub.s32 2, %v426_v44  ;;  %s1666_s15 = smov 96   ;;  %s1975_s8 = scalar_lea.vmem [#allocation12], %s1095_s9 }
  0xb1   : > { %1185 = vmatpush3.bf16.msra.mxu1 %v1335_v20  ;;  %634 = vmatprep.subr.bf16.mxu0 %v1336_v21  ;;  %s1667_s10 = smov 64   ;;  %s1668_s21 = smov 32  }
  0xb2   : > { %1186 = vmatprep.subr.bf16.mxu1 %v1663_v5  ;;  %v428_v52 = vrot.slane %v399_v46, %v427_v47  ;;  %v434_v56 = vrot.slane %v401_v50, %v427_v47  ;;  %v480_v3 = vrot.slane %v471_v62, %v479_v0  ;;  %s2010_s23 = sshll.u32 %s1644_s27, 9  ;;  %s850_s1 = sshll.u32 %s1967_s11, 4  ;;  %s2021_s1 = int_to_ptr.vmem [resolvable:$true] %s850_s1 }
  0xb3   : > { %s2019_s14 = scalar_lea.hbm %s2169_s5, %s2010_s23  ;;  %s1502_s18 = scalar_lea.vmem %s2021_s1, 512 }
  0xb4   : > { %635 = vmatpush1.bf16.msra.mxu0 %v1338_v22  ;;  %v495_v6 = vrot.slane %v480_v3, %v427_v47  ;;  %p1503_p4 = scmp.ne.s32.totalorder %s2021_s1, %s1502_s18  ;;  %s1669_s9 = smov [#allocation11]  }
  0xb5   : > { %1187 = vmatpush3.bf16.msra.mxu1 %v1339_v23  ;;  %636 = vmatprep.subr.bf16.mxu0 %v1340_v24 }
  0xb6   : > { %1188 = vmatprep.subr.bf16.mxu1 %v1663_v5  ;;  %p1504_p8 = pnand %p1503_p4, %p1876_p6 }
  0xb8   : > { %637 = vmatpush1.bf16.msra.mxu0 %v1342_v25  ;;  %p1505_p0 = pneg %p1504_p8 }
  0xb9   : > { %1189 = vmatpush3.bf16.msra.mxu1 %v1343_v26  ;;  %638 = vmatprep.subr.bf16.mxu0 %v1344_v27 }
  0xba   : > { %1190 = vmatprep.subr.bf16.mxu1 %v1663_v5 }
  0xbc   : > { %639 = vmatpush1.bf16.msra.mxu0 %v1346_v28 }
  0xbd   : > { %1191 = vmatpush3.bf16.msra.mxu1 %v1347_v29  ;;  %640 = vmatprep.subr.bf16.mxu0 %v1348_v30 }
  0xbe   : > { %1192 = vmatprep.subr.bf16.mxu1 %v1663_v5 }
  0xc0   : > { %641 = vmatpush1.bf16.msra.mxu0 %v1350_v32 }
  0xc1   : > { %1193 = vmatpush3.bf16.msra.mxu1 %v1351_v33  ;;  %642 = vmatprep.subr.bf16.mxu0 %v1352_v34 }
  0xc2   : > { %1194 = vmatprep.subr.bf16.mxu1 %v1663_v5 }
  0xc4   : > { %643 = vmatpush1.bf16.msra.mxu0 %v1354_v35 }
  0xc5   : > { %1195 = vmatpush3.bf16.msra.mxu1 %v1355_v36 }
 0x135   : > { %v403_v8 = vpop.xlane.xlu0 %402 }
 0x136   : > { %v407_v9 = vmul.f32 0.0078125, %v403_v8 }
 0x138   : > { %v1949_v10 = vsub.f32 %v1169_v1, %v407_v9  ;;  %v476_v1 = vrot.slane %v471_v62, %v427_v47 }
 0x139   : > { %v405_v11 = vpop.xlane.xlu0 %404 }
 0x13a   : > { %v408_v12 = vmul.f32 0.0078125, %v405_v11  ;;  %v411_v13 = vmul.f32 %v1949_v10, %v1949_v10  ;;  %v491_v4 = vrot.slane %v476_v1, %v427_v47 }
 0x13c   : > { %v1953_v14 = vsub.f32 %v1170_v2, %v408_v12  ;;  %413 = vadd.xlane.f32.xlu1 %v411_v13  ;;  %v484_v2 = vrot.slane %v471_v62, %v483_v63 }
 0x13e   : > { %v412_v15 = vmul.f32 %v1953_v14, %v1953_v14  ;;  %v499_v5 = vrot.slane %v484_v2, %v427_v47 }
 0x140   : > { %415 = vadd.xlane.f32.xlu1 %v412_v15 }
 0x1c9   : > { %v414_v37 = vpop.xlane.xlu1 %413 }
 0x1ca   : > { %v417_v38 = vmul.f32 0.0078125, %v414_v37 }
 0x1cc   : > { %v419_v39 = vadd.f32 1e-12, %v417_v38 }
 0x1cd   : > { %v416_v40 = vpop.xlane.xlu1 %415 }
 0x1ce   : > { %1356 = vrsqrt.f32 %v419_v39  ;;  %v418_v42 = vmul.f32 0.0078125, %v416_v40 }
 0x1d0   : > { %v420_v43 = vadd.f32 1e-12, %v418_v42 }
 0x1d2   : > { %1358 = vrsqrt.f32 %v420_v43 }
 0x1d8   : > { %v1357_v49 = vpop.eup %1356 }
 0x1d9   : > { %v423_v51 = vmul.f32 %v1357_v49, %v1949_v10 }
 0x1db   : > { %v429_v55 = vmul.f32 %v428_v52, %v423_v51 }
 0x1dc   : > { %v1359_v53 = vpop.eup %1358 }
 0x1dd   : > { %v424_v54 = vmul.f32 %v1359_v53, %v1953_v14  ;;  %v435_v58 = vadd.f32 %v434_v56, %v429_v55 }
 0x1df   : > { %v430_v57 = vmul.f32 %v428_v52, %v424_v54 }
 0x1e1   : > { %v436_v59 = vadd.f32 %v434_v56, %v430_v57 }
 0x1e3   : > { %v437_v60 = vpack.c.bf16 %v436_v59, %v435_v58 }
 0x1e5   : > { %661 = vmatmul.mubr.bf16.vlgmr.msra.gmra.mrb[0].mxu0 %v437_v60  ;;  %1197 = vmatmul.mubr.bf16.vlgmr.msra.gmra.mrb[0].mxu1 %v437_v60 }
 0x2b8   : > { %v662_v7 = vpop.f32.mrb[0].mxu0  ;;  %v705_v8 = vpop.f32.mrb[0].mxu1 }
 0x2b9   : > { %v663_v9 = vadd.f32 %v662_v7, %v491_v4  ;;  %v706_v10 = vadd.f32 %v705_v8, %v499_v5  ;;  %v664_v11 = vpop.f32.mrb[1].mxu0  ;;  %v1198_v12 = vpop.f32.mrb[1].mxu1 }
 0x2ba   : > { %v665_v13 = vadd.f32 %v664_v11, %v495_v6  ;;  %v666_v14 = vpop.f32.mrb[2].mxu0  ;;  %v708_v15 = vpop.f32.mrb[2].mxu1 }
 0x2bb   : > { %v1158_v16 = vpack.c.bf16 %v663_v9, %v663_v9  ;;  %v1162_v17 = vpack.c.bf16 %v706_v10, %v706_v10  ;;  %v667_v18 = vadd.f32 %v666_v14, %v491_v4  ;;  %v709_v19 = vadd.f32 %v708_v15, %v499_v5  ;;  %v668_v20 = vpop.f32.mrb[3].mxu0  ;;  %v1199_v21 = vpop.f32.mrb[3].mxu1 }
 0x2bc   : > { %v1160_v22 = vpack.c.bf16 %v665_v13, %v665_v13  ;;  %v669_v23 = vadd.f32 %v668_v20, %v495_v6 }
 0x2bd   : > { %721 = vst.msk [vmem:[%s1967_s11] sm:$0xf] %vm720_vm1, %v1158_v16  ;;  %741 = vst.msk [vmem:[%s1971_s22] sm:$0xf] %vm720_vm1, %v1162_v17  ;;  %v1159_v24 = vpack.c.bf16 %v667_v18, %v667_v18  ;;  %v1163_v25 = vpack.c.bf16 %v709_v19, %v709_v19  ;;  %743 = vrot.lane.b32.xlu0 %v1158_v16, %s1666_s15 }
 0x2be   : > { %731 = vst.msk [vmem:[%s1975_s8] sm:$0xf] %vm720_vm1, %v1160_v22  ;;  %v1161_v26 = vpack.c.bf16 %v669_v23, %v669_v23  ;;  %779 = vrot.lane.b32.xlu1 %v1160_v22, %s1667_s10 }
 0x2bf   : > { %722 = vst.msk [vmem:[%s1967_s11 + $0x4] sm:$0xf] %vm720_vm1, %v1159_v24  ;;  %742 = vst.msk [vmem:[%s1971_s22 + $0x4] sm:$0xf] %vm720_vm1, %v1163_v25 }
 0x2c0   : > { %732 = vst.msk [vmem:[%s1975_s8 + $0x4] sm:$0xf] %vm720_vm1, %v1161_v26 }
 0x2c1   : > { %761 = vrot.lane.b32.xlu0 %v1162_v17, %s1666_s15 }
 0x2c2   : > { %745 = vrot.lane.b32.xlu1 %v1159_v24, %s1666_s15 }
 0x2c5   : > { %770 = vrot.lane.b32.xlu0 %v1158_v16, %s1667_s10 }
 0x2c6   : > { %763 = vrot.lane.b32.xlu1 %v1163_v25, %s1666_s15 }
 0x2c9   : > { %788 = vrot.lane.b32.xlu0 %v1162_v17, %s1667_s10 }
 0x2ca   : > { %772 = vrot.lane.b32.xlu1 %v1159_v24, %s1667_s10 }
 0x2cd   : > { %797 = vrot.lane.b32.xlu0 %v1158_v16, %s1668_s21 }
 0x2ce   : > { %790 = vrot.lane.b32.xlu1 %v1163_v25, %s1667_s10 }
 0x2d1   : > { %752 = vrot.lane.b32.xlu0 %v1160_v22, %s1666_s15 }
 0x2d2   : > { %799 = vrot.lane.b32.xlu1 %v1159_v24, %s1668_s21 }
 0x2d5   : > { %806 = vrot.lane.b32.xlu0 %v1160_v22, %s1668_s21 }
 0x2d6   : > { %754 = vrot.lane.b32.xlu1 %v1161_v26, %s1666_s15  ;;  %s1506_s15 = sshll.u32 %s1669_s9, 4  ;;  %s1507_s15 = int_to_ptr.vmem [resolvable:$false] %s1506_s15 }
 0x2d7   : > { %p1509_p5 = scmp.lt.s32.totalorder %s2021_s1, %s1507_s15 }
 0x2d9   : > { %815 = vrot.lane.b32.xlu0 %v1162_v17, %s1668_s21 }
 0x2da   : > { %781 = vrot.lane.b32.xlu1 %v1161_v26, %s1667_s10 }
 0x2de   : > { %808 = vrot.lane.b32.xlu1 %v1161_v26, %s1668_s21 }
 0x2e2   : > { %817 = vrot.lane.b32.xlu1 %v1163_v25, %s1668_s21  ;;  %s1508_s21 = scalar_lea.vmem %s1507_s15, 1024 }
 0x2e3   : > { %p1510_p10 = scmp.lt.s32.totalorder %s1508_s21, %s1502_s18 }
 0x2e5   : > { %p1511_p13 = por %p1510_p10, %p1509_p5 }
 0x2e7   : > { %p1512_p9 = pnand %p1511_p13, %p1505_p0 }
 0x32f   : > { %v744_v27 = vpop.permute.xlu0 %743 }
 0x330   : > { %1128 = vst.msk [vmem:[%s1967_s11 + $0x8] sm:$0xf] %vm720_vm1, %v744_v27  ;;  %v780_v28 = vpop.permute.xlu1 %779 }
 0x331   : > { %1136 = vst.msk [vmem:[%s1975_s8 + $0x10] sm:$0xf] %vm720_vm1, %v780_v28 }
 0x333   : > { %v762_v29 = vpop.permute.xlu0 %761 }
 0x334   : > { %1132 = vst.msk [vmem:[%s1971_s22 + $0x8] sm:$0xf] %vm720_vm1, %v762_v29  ;;  %v746_v30 = vpop.permute.xlu1 %745 }
 0x335   : > { %1129 = vst.msk [vmem:[%s1967_s11 + $0xc] sm:$0xf] %vm720_vm1, %v746_v30 }
 0x337   : > { %v771_v31 = vpop.permute.xlu0 %770 }
 0x338   : > { %1134 = vst.msk [vmem:[%s1967_s11 + $0x10] sm:$0xf] %vm720_vm1, %v771_v31  ;;  %v764_v32 = vpop.permute.xlu1 %763 }
 0x339   : > { %1133 = vst.msk [vmem:[%s1971_s22 + $0xc] sm:$0xf] %vm720_vm1, %v764_v32 }
 0x33b   : > { %v789_v33 = vpop.permute.xlu0 %788 }
 0x33c   : > { %1138 = vst.msk [vmem:[%s1971_s22 + $0x10] sm:$0xf] %vm720_vm1, %v789_v33  ;;  %v773_v34 = vpop.permute.xlu1 %772 }
 0x33d   : > { %1135 = vst.msk [vmem:[%s1967_s11 + $0x14] sm:$0xf] %vm720_vm1, %v773_v34 }
 0x33f   : > { %v798_v35 = vpop.permute.xlu0 %797 }
 0x340   : > { %1140 = vst.msk [vmem:[%s1967_s11 + $0x18] sm:$0xf] %vm720_vm1, %v798_v35  ;;  %v791_v36 = vpop.permute.xlu1 %790 }
 0x341   : > { %1139 = vst.msk [vmem:[%s1971_s22 + $0x14] sm:$0xf] %vm720_vm1, %v791_v36 }
 0x343   : > { %v753_v37 = vpop.permute.xlu0 %752 }
 0x344   : > { %1130 = vst.msk [vmem:[%s1975_s8 + $0x8] sm:$0xf] %vm720_vm1, %v753_v37  ;;  %v800_v38 = vpop.permute.xlu1 %799 }
 0x345   : > { %1141 = vst.msk [vmem:[%s1967_s11 + $0x1c] sm:$0xf] %vm720_vm1, %v800_v38 }
 0x346   : > { %1515 = shalt.err (!%p1512_p9)
}
 0x347   : > { %s1516_s11 = scalar_lea.hbm %s2019_s14, 512  ;;  %s1520_s9 = scalar_lea.hbm %s2169_s5, 1024 }
 0x348   : > { %p1517_p3 = scmp.ne.s32.totalorder %s2019_s14, %s1516_s11  ;;  %p1521_p11 = scmp.lt.u32.totalorder %s2019_s14, %s2169_s5 }
 0x349   : > { %p1522_p2 = scmp.lt.u32.totalorder %s1520_s9, %s1516_s11  ;;  %p1524_p4 = scmp.lt.u32.totalorder %s1516_s11, %s2019_s14 }
 0x34a   : > { %p1518_p7 = pnand %p1517_p3, %p1876_p6 }
 0x34b   : > { %p1523_p1 = por %p1522_p2, %p1521_p11 }
 0x34c   : > { %p1519_p12 = pneg %p1518_p7 }
 0x34d   : > { %p1525_p8 = por %p1524_p4, %p1523_p1 }
 0x34f   : > { %p1526_p0 = pnand %p1525_p8, %p1519_p12 }
 0x351   : > { %1529 = shalt.err (!%p1526_p0)
}
 0x352   : > { %s1670_s18 = smov 4   ;;  %s2194_s21 = scalar_lea.sflag [#allocation4], %s1931_s20  ;;  %v807_v39 = vpop.permute.xlu0 %806  ;;  %v755_v40 = vpop.permute.xlu1 %754 }
 0x353   : > { %1218 = dma.vmem_to_hbm [thread:$0]  (%p1876_p6), %s2021_s1, 512, %s2019_s14, %s2194_s21, %s1667_s10, %s1667_s10, %s1670_s18  }
 0x354   : > { %1142 = vst.msk [vmem:[%s1975_s8 + $0x18] sm:$0xf] %vm720_vm1, %v807_v39  ;;  %1131 = vst.msk [vmem:[%s1975_s8 + $0xc] sm:$0xf] %vm720_vm1, %v755_v40  ;;  %s829_s20 = sand.u32 1, %s1744_s30   ;;  %s868_s27 = sshll.u32 %s1975_s8, 4  ;;  %s2070_s27 = int_to_ptr.vmem [resolvable:$true] %s868_s27 }
 0x355   : > { %s2068_s13 = scalar_lea.hbm %s2170_s6, %s2010_s23  ;;  %s886_s1 = sshll.u32 %s1971_s22, 4  ;;  %s2104_s1 = int_to_ptr.vmem [resolvable:$true] %s886_s1 }
 0x356   : > { %v816_v41 = vpop.permute.xlu0 %815  ;;  %v782_v42 = vpop.permute.xlu1 %781  ;;  %s2075_s30 = scalar_lea.sflag [#allocation13], %s829_s20  ;;  %s1530_s14 = scalar_lea.vmem %s2070_s27, 512 }
 0x357   : > { %1144 = vst.msk [vmem:[%s1971_s22 + $0x18] sm:$0xf] %vm720_vm1, %v816_v41  ;;  %1137 = vst.msk [vmem:[%s1975_s8 + $0x14] sm:$0xf] %vm720_vm1, %v782_v42  ;;  %p1531_p5 = scmp.ne.s32.totalorder %s2070_s27, %s1530_s14  ;;  %s1671_s9 = smov [#allocation12]  }
 0x358   : > { %s1534_s15 = sshll.u32 %s1671_s9, 4  ;;  %s1535_s15 = int_to_ptr.vmem [resolvable:$false] %s1534_s15 }
 0x359   : > { %p1532_p10 = pnand %p1531_p5, %p1876_p6  ;;  %s1536_s21 = scalar_lea.vmem %s1535_s15, 1024 }
 0x35a   : > { %v809_v43 = vpop.permute.xlu1 %808  ;;  %p1537_p9 = scmp.lt.s32.totalorder %s2070_s27, %s1535_s15  ;;  %p1538_p3 = scmp.lt.s32.totalorder %s1536_s21, %s1530_s14 }
 0x35b   : > { %1143 = vst.msk [vmem:[%s1975_s8 + $0x1c] sm:$0xf] %vm720_vm1, %v809_v43  ;;  %p1533_p13 = pneg %p1532_p10 }
 0x35c   : > { %p1539_p7 = por %p1538_p3, %p1537_p9 }
 0x35e   : > { %p1540_p12 = pnand %p1539_p7, %p1533_p13 }
 0x360   : > { %1543 = shalt.err (!%p1540_p12)
}
 0x361   : > { %s1544_s8 = scalar_lea.hbm %s2068_s13, 512  ;;  %s1548_s17 = scalar_lea.hbm %s2170_s6, 1024 }
 0x362   : > { %p1545_p11 = scmp.ne.s32.totalorder %s2068_s13, %s1544_s8  ;;  %p1549_p4 = scmp.lt.u32.totalorder %s2068_s13, %s2170_s6 }
 0x363   : > { %p1550_p8 = scmp.lt.u32.totalorder %s1548_s17, %s1544_s8  ;;  %p1552_p5 = scmp.lt.u32.totalorder %s1544_s8, %s2068_s13 }
 0x364   : > { %p1546_p2 = pnand %p1545_p11, %p1876_p6 }
 0x365   : > { %p1551_p0 = por %p1550_p8, %p1549_p4 }
 0x366   : > { %p1547_p1 = pneg %p1546_p2 }
 0x367   : > { %p1553_p10 = por %p1552_p5, %p1551_p0 }
 0x369   : > { %p1554_p13 = pnand %p1553_p10, %p1547_p1 }
 0x36b   : > { %1557 = shalt.err (!%p1554_p13)
}
 0x36c   : > { %1219 = dma.vmem_to_hbm [thread:$0]  (%p1876_p6), %s2070_s27, 512, %s2068_s13, %s2075_s30, %s1667_s10, %s1667_s10, %s1670_s18   ;;  %v818_v44 = vpop.permute.xlu1 %817 }
 0x36d   : > { %s2110_s8 = scalar_lea.hbm %s2171_s7, %s2010_s23  ;;  %1145 = vst.msk [vmem:[%s1971_s22 + $0x1c] sm:$0xf] %vm720_vm1, %v818_v44  ;;  %s1558_s20 = scalar_lea.vmem %s2104_s1, 512 }
 0x36e   : > { %p1559_p9 = scmp.ne.s32.totalorder %s2104_s1, %s1558_s20  ;;  %s1672_s27 = smov [#allocation14]  }
 0x36f   : > { %s1562_s13 = sshll.u32 %s1672_s27, 4  ;;  %s1563_s13 = int_to_ptr.vmem [resolvable:$false] %s1562_s13 }
 0x370   : > { %p1560_p3 = pnand %p1559_p9, %p1876_p6  ;;  %s1564_s11 = scalar_lea.vmem %s1563_s13, 1024 }
 0x371   : > { %p1565_p12 = scmp.lt.s32.totalorder %s2104_s1, %s1563_s13  ;;  %p1566_p11 = scmp.lt.s32.totalorder %s1564_s11, %s1558_s20 }
 0x372   : > { %p1561_p7 = pneg %p1560_p3 }
 0x373   : > { %p1567_p2 = por %p1566_p11, %p1565_p12 }
 0x375   : > { %p1568_p1 = pnand %p1567_p2, %p1561_p7 }
 0x377   : > { %1571 = shalt.err (!%p1568_p1)
}
 0x378   : > { %s1572_s22 = scalar_lea.hbm %s2110_s8, 512  ;;  %s1576_s9 = scalar_lea.hbm %s2171_s7, 1024 }
 0x379   : > { %p1573_p4 = scmp.ne.s32.totalorder %s2110_s8, %s1572_s22  ;;  %p1577_p5 = scmp.lt.u32.totalorder %s2110_s8, %s2171_s7 }
 0x37a   : > { %p1578_p10 = scmp.lt.u32.totalorder %s1576_s9, %s1572_s22  ;;  %p1580_p9 = scmp.lt.u32.totalorder %s1572_s22, %s2110_s8 }
 0x37b   : > { %p1574_p8 = pnand %p1573_p4, %p1876_p6 }
 0x37c   : > { %p1579_p13 = por %p1578_p10, %p1577_p5 }
 0x37d   : > { %p1575_p0 = pneg %p1574_p8 }
 0x37e   : > { %p1581_p3 = por %p1580_p9, %p1579_p13 }
 0x380   : > { %p1582_p7 = pnand %p1581_p3, %p1575_p0 }
 0x382   : > { %1585 = shalt.err (!%p1582_p7)
}
 0x383   : > { %1220 = dma.vmem_to_hbm [thread:$0]  (%p1876_p6), %s2104_s1, 512, %s2110_s8, %s2075_s30, %s1667_s10, %s1667_s10, %s1670_s18  }
 0x384 PF: > { %s2195_s21 = sld [smem:[#allocation20_spill]]  ;;  %s901_s20 = sand.u32 1, %s1632_s24  }
 0x385   : > { %p2197_p11 = scmp.ge.s32.totalorder %s1652_s29, 2  ;;  %s902_s27 = scalar_lea.sflag [#allocation4], %s901_s20 }
 0x38a   : > { %p2196_p12 = scmp.ne.s32.totalorder %s2195_s21, 0 }
 0x38c   : > { %p1242_p2 = pnand %p2197_p11, %p2196_p12 }
 0x38e   : > { %1623 = dma.done.wait (!%p1242_p2), %s902_s27, 512  }
 0x38f   : > { %1625 = vsyncadd (!%p1242_p2), %s902_s27, 4294966784  ;;  %s2198_s16 = sadd.s32 4294967294, %s1652_s29  }
 0x390   : > { %s910_s13 = sand.u32 1, %s2198_s16  }
 0x391   : > { %s911_s11 = scalar_lea.sflag [#allocation13], %s910_s13 }
 0x392   : > { %1627 = dma.done.wait (!%p1242_p2), %s911_s11, 1024  }
 0x393   : > { %1629 = vsyncadd (!%p1242_p2), %s911_s11, 4294966272  ;;  %s29_s29 = sadd.s32 1, %s1652_s29   ;;  %s2199_s24 = smov %s1636_s25 }
 0x394   : > { %p26_p6 = scmp.ge.s32.totalorder %s29_s29, 4   ;;  %s2200_s25 = smov %s1640_s26 }
 0x395   : > { %s2201_s26 = smov %s1885_s19  ;;  %s2202_s27 = smov %s1648_s28 }
 0x396   : > { %s2203_s28 = smov %s2205_s12  ;;  %28 = sbr.rel (!%p26_p6) target bundleno = 12 (0xc), region = 142 }
 0x39d   :  { %925 = vsyncpa [#allocation3], 1 }
 0x39e   :  { %927 = vsyncpa [#allocation3 + $0x1], 1 }
 0x39f   :  { %928 = vsyncpa [#allocation6], 1 }
 0x3a0   :  { %929 = vsyncpa [#allocation9], 1 }
 0x3a1   :  { %930 = vsyncpa [#allocation4], 1 }
 0x3a2   :  { %932 = vsyncpa [#allocation4 + $0x1], 1 }
 0x3a3   :  { %933 = vsyncpa [#allocation13], 1 }
 0x3a4   :  { %935 = vsyncpa [#allocation13 + $0x1], 1 }

// kernel: conformer_forward.33
= control target key start
LH: loop header
LB: loop body
LE: loop exit
PB: predicated region body
PF: predicated region fallthrough
CT: control target
= control target key end

     0   :  { %s1439_s0 = inlined_call_operand.hbm [shape: bf16[2,4,16,32], index: 0, kind: input, shape index: {}]   ;;  %s1440_s1 = inlined_call_operand.hbm [shape: bf16[2,4,16,32], index: 1, kind: input, shape index: {}]   ;;  %s1441_s2 = inlined_call_operand.hbm [shape: bf16[2,4,16,32], index: 2, kind: input, shape index: {}]   ;;  %s1442_s3 = inlined_call_operand.hbm [shape: bf16[2,4,16,32], index: 3, kind: output, shape index: {}]  }
   0x1   :  { %1454 = sst [smem:[#allocation19_spill]] %s1439_s0 }
   0x2   :  { %1455 = sst [smem:[#allocation20_spill]] %s1440_s1 }
   0x3   :  { %8 = vsyncpa [#allocation6], 0 }
   0x4   :  { %10 = vsyncpa [#allocation6 + $0x1], 0 }
   0x5   :  { %11 = vsyncpa [#allocation9], 0 }
   0x6   :  { %13 = vsyncpa [#allocation9 + $0x1], 0 }
   0x7   :  { %14 = vsyncpa [#allocation7], 0 }
   0x8   :  { %16 = vsyncpa [#allocation7 + $0x1], 0  ;;  %s1116_s12 = smov 0   ;;  %s1118_s13 = smov 0  }
   0x9   :  { %s1120_s14 = smov 0   ;;  %s1122_s15 = smov 0  }
   0xa   :  { %s1124_s16 = smov 0   ;;  %s1126_s17 = smov 0  }
   0xb   :  { %s1128_s18 = smov 0   ;;  %s1130_s19 = smov 0  }
   0xc LB: > { %1456 = sst [smem:[#allocation15_spill]] %s1074_s17  ;;  %s1157_s20 = sadd.s32 4294967295, %s1082_s19   ;;  %s1082_s19 = sphi %s1130_s19, %s22_s19   ;;  %s1078_s18 = sphi %s1128_s18, %s1480_s18   ;;  %s1074_s17 = sphi %s1126_s17, %s1479_s17   ;;  %s1070_s16 = sphi %s1124_s16, %s1478_s16   ;;  %s1066_s15 = sphi %s1122_s15, %s1477_s15   ;;  %s1062_s14 = sphi %s1120_s14, %s1483_s14   ;;  %s1058_s13 = sphi %s1118_s13, %s1482_s13   ;;  %s1054_s12 = sphi %s1116_s12, %s1481_s12  }
   0xd   : > { %1457 = sst [smem:[#allocation16_spill]] %s1078_s18  ;;  %s726_s21 = sadd.s32 4294967294, %s1082_s19  }
   0xe   : > { %s44_s22 = sadd.s32 1, %s1074_s17  ;;  %s48_s23 = sadd.s32 1, %s1078_s18 }
   0xf   : > { %p46_p0 = scmp.ge.s32.totalorder %s44_s22, 4  ;;  %s59_s24 = sadd.s32 1, %s1062_s14 }
  0x10   : > { %p66_p1 = scmp.ne.s32.totalorder %s1062_s14, %s1058_s13  ;;  %p67_p2 = scmp.eq.s32.totalorder %s1082_s19, 0 }
  0x11   : > { %s1485_s22 = smov (%p46_p0, %s44_s22), 0  ;;  %s1487_s23 = smov (!%p46_p0, %s48_s23), %s1078_s18 }
  0x12   : > { %1458 = sst [smem:[#allocation17_spill]] %s1485_s22  ;;  %s53_s25 = ssub.s32 %s1074_s17, %s1485_s22 }
  0x13   : > { %p1171_p3 = por %p67_p2, %p66_p1  ;;  %p50_p4 = scmp.ge.s32.totalorder %s1487_s23, 2 }
  0x14   : > { %p72_p5 = scmp.ne.s32.totalorder %s1058_s13, %s1054_s12  ;;  %p73_p6 = scmp.eq.s32.totalorder %s1157_s20, 0 }
  0x15   : > { %p160_p7 = scmp.eq.s32.totalorder %s1157_s20, 7  ;;  %s1489_s23 = smov (%p50_p4, %s1487_s23), 0 }
  0x16   : > { %1460 = sst [smem:[#allocation18_spill]] %s1489_s23  ;;  %p1181_p8 = por %p73_p6, %p72_p5 }
  0x17   : > { %p1185_p9 = por %p160_p7, %p66_p1  ;;  %s52_s29 = ssub.s32 %s1078_s18, %s1489_s23 }
  0x18   : > { %s1461_s27 = scalar_select %p1181_p8, 1, 0 }
  0x19   : > { %s1462_s28 = scalar_select %p1185_p9, 1, 0 }
  0x1a   : > { %p166_p10 = scmp.eq.s32.totalorder %s726_s21, 7  ;;  %s54_s30 = sor.u32 %s53_s25, %s52_s29 }
  0x1b   : > { %p57_p11 = scmp.eq.s32.totalorder %s54_s30, 0  ;;  %p799_p13 = scmp.lt.s32.totalorder %s1082_s19, 8 }
  0x1c   : > { %p1191_p12 = por %p166_p10, %p72_p5  ;;  %s1443_s5 = sand.u32 1, %s1062_s14  }
  0x1d   : > { %s1198_s6 = scalar_select %p57_p11, %s1062_s14, %s59_s24  }
  0x1e   : > { %s1463_s4 = scalar_select %p1191_p12, 1, 0 }
  0x1f   : > { %s1202_s7 = sshll.u32 %s1443_s5, 3  ;;  %s730_s8 = sshll.u32 %s1074_s17, 1 }
  0x20   : > { %s731_s9 = sshll.u32 %s1078_s18, 3  ;;  %p1208_p0 = pnand %p799_p13, %p1171_p3 }
  0x21   : > { %s198_s11 = sadd.s32 %s731_s9, %s730_s8  ;;  %s211_s25 = sand.u32 1, %s1082_s19  }
  0x22   : > { %s1212_s21 = sshll.u32 %s198_s11, 6  ;;  %s1465_s1 = sld [smem:[#allocation20_spill]] }
  0x23   : > { %s215_s26 = scalar_lea.vmem [#allocation8], %s1202_s7  ;;  %s1225_s23 = scalar_lea.sflag [#allocation9], %s211_s25 }
  0x24   : > { %s226_s5 = sshll.u32 %s215_s26, 4  ;;  %p1231_p3 = pneg %p1208_p0  ;;  %s1222_s5 = int_to_ptr.vmem [resolvable:$true] %s226_s5 }
  0x28   : > { %s1219_s30 = scalar_lea.hbm %s1465_s1, %s1212_s21  ;;  %s895_s24 = scalar_lea.hbm %s1465_s1, 1024 }
  0x29   : > { %s890_s8 = scalar_lea.hbm %s1219_s30, 128  ;;  %p896_p6 = scmp.lt.u32.totalorder %s1219_s30, %s1465_s1 }
  0x2a   : > { %p891_p2 = scmp.ne.s32.totalorder %s1219_s30, %s890_s8  ;;  %p897_p7 = scmp.lt.u32.totalorder %s895_s24, %s890_s8 }
  0x2b   : > { %p899_p11 = scmp.lt.u32.totalorder %s890_s8, %s1219_s30 }
  0x2c   : > { %p893_p4 = pnand %p1231_p3, %p891_p2  ;;  %p898_p10 = por %p897_p7, %p896_p6 }
  0x2e   : > { %p894_p5 = pneg %p893_p4  ;;  %p900_p13 = por %p899_p11, %p898_p10 }
  0x30   : > { %p901_p1 = pnand %p900_p13, %p894_p5 }
  0x32   : > { %904 = shalt.err (!%p901_p1)
}
  0x33   : > { %s905_s25 = scalar_lea.vmem %s1222_s5, 128  ;;  %s1084_s11 = smov [#allocation8]  }
  0x34   : > { %p906_p2 = scmp.ne.s32.totalorder %s1222_s5, %s905_s25  ;;  %s910_s29 = sshll.u32 %s1084_s11, 4  ;;  %s911_s29 = int_to_ptr.vmem [resolvable:$false] %s910_s29 }
  0x35   : > { %s912_s22 = scalar_lea.vmem %s911_s29, 256  ;;  %p913_p9 = scmp.lt.s32.totalorder %s1222_s5, %s911_s29 }
  0x36   : > { %p908_p4 = pnand %p906_p2, %p1231_p3  ;;  %p914_p8 = scmp.lt.s32.totalorder %s912_s22, %s905_s25 }
  0x38   : > { %p909_p12 = pneg %p908_p4  ;;  %p915_p6 = por %p914_p8, %p913_p9 }
  0x3a   : > { %p916_p7 = pnand %p915_p6, %p909_p12 }
  0x3c   : > { %919 = shalt.err (!%p916_p7)
}
  0x3d   : > { %s1448_s8 = smov 64   ;;  %s1450_s24 = smov 4  }
  0x3e   : > { %791 = dma.hbm_to_vmem [thread:$0]  (!%p1208_p0), %s1219_s30, 128, %s1222_s5, %s1225_s23, %s1448_s8, %s1448_s8, %s1450_s24  }
  0x3f   : > { %p259_p8 = scmp.lt.s32.totalorder %s1082_s19, 9  ;;  %p1467_p9 = scmp.ge.s32.totalorder %s1082_s19, 1 }
  0x40   : > { %s1469_s0 = sld [smem:[#allocation19_spill]]  ;;  %s190_s22 = scalar_lea.vmem [#allocation5], %s1202_s7 }
  0x41   : > { %p1261_p12 = pnand %p1467_p9, %p259_p8  ;;  %s201_s1 = sshll.u32 %s190_s22, 4  ;;  %s1272_s1 = int_to_ptr.vmem [resolvable:$true] %s201_s1 }
  0x42   : > { %s1470_s5 = sand.u32 1, %s1062_s14  }
  0x43   : > { %s1468_s26 = scalar_select %p1261_p12, 1, 0 }
  0x44   : > { %s1276_s30 = scalar_lea.sflag [#allocation6], %s1470_s5 }
  0x46   : > { %s1269_s29 = scalar_lea.hbm %s1469_s0, %s1212_s21  ;;  %s925_s11 = scalar_lea.hbm %s1469_s0, 1024 }
  0x47   : > { %s920_s8 = scalar_lea.hbm %s1269_s29, 128  ;;  %p926_p11 = scmp.lt.u32.totalorder %s1269_s29, %s1469_s0 }
  0x48   : > { %p921_p1 = scmp.ne.s32.totalorder %s1269_s29, %s920_s8  ;;  %p927_p13 = scmp.lt.u32.totalorder %s925_s11, %s920_s8 }
  0x49   : > { %p929_p4 = scmp.lt.u32.totalorder %s920_s8, %s1269_s29 }
  0x4a   : > { %p923_p5 = pnand %p921_p1, %p1231_p3  ;;  %p928_p2 = por %p927_p13, %p926_p11 }
  0x4c   : > { %p924_p10 = pneg %p923_p5  ;;  %p930_p6 = por %p929_p4, %p928_p2 }
  0x4e   : > { %p931_p7 = pnand %p930_p6, %p924_p10 }
  0x50   : > { %934 = shalt.err (!%p931_p7)
}
  0x51   : > { %s935_s22 = scalar_lea.vmem %s1272_s1, 128  ;;  %s1087_s24 = smov [#allocation5]  }
  0x52   : > { %p936_p8 = scmp.ne.s32.totalorder %s1272_s1, %s935_s22  ;;  %s940_s5 = sshll.u32 %s1087_s24, 4  ;;  %s941_s5 = int_to_ptr.vmem [resolvable:$false] %s940_s5 }
  0x53   : > { %s942_s17 = scalar_lea.vmem %s941_s5, 256  ;;  %p943_p5 = scmp.lt.s32.totalorder %s1272_s1, %s941_s5 }
  0x54   : > { %p938_p9 = pnand %p936_p8, %p1231_p3  ;;  %p944_p12 = scmp.lt.s32.totalorder %s942_s17, %s935_s22 }
  0x56   : > { %p939_p1 = pneg %p938_p9  ;;  %p945_p11 = por %p944_p12, %p943_p5 }
  0x58   : > { %p946_p13 = pnand %p945_p11, %p939_p1 }
  0x5a   : > { %949 = shalt.err (!%p946_p13)
}
  0x5b   : > { %s1471_s18 = smov 4   ;;  %s1472_s8 = smov 64  }
  0x5c   : > { %788 = dma.hbm_to_vmem [thread:$0]  (!%p1208_p0), %s1269_s29, 128, %s1272_s1, %s1276_s30, %s1472_s8, %s1472_s8, %s1471_s18  }
  0x5d   : > { %s1307_s24 = scalar_lea.hbm %s1441_s2, %s1212_s21  ;;  %s240_s22 = scalar_lea.vmem [#allocation10], %s1202_s7 }
  0x5e   : > { %s251_s5 = sshll.u32 %s240_s22, 4  ;;  %s950_s17 = scalar_lea.hbm %s1307_s24, 128  ;;  %s1310_s5 = int_to_ptr.vmem [resolvable:$true] %s251_s5 }
  0x5f   : > { %p951_p12 = scmp.ne.s32.totalorder %s1307_s24, %s950_s17  ;;  %s955_s29 = scalar_lea.hbm %s1441_s2, 1024 }
  0x60   : > { %p956_p4 = scmp.lt.u32.totalorder %s1307_s24, %s1441_s2  ;;  %p957_p6 = scmp.lt.u32.totalorder %s955_s29, %s950_s17 }
  0x61   : > { %p953_p10 = pnand %p951_p12, %p1231_p3  ;;  %p959_p8 = scmp.lt.u32.totalorder %s950_s17, %s1307_s24 }
  0x62   : > { %p958_p7 = por %p957_p6, %p956_p4 }
  0x63   : > { %p954_p2 = pneg %p953_p10 }
  0x64   : > { %p960_p9 = por %p959_p8, %p958_p7 }
  0x66   : > { %p961_p1 = pnand %p960_p9, %p954_p2 }
  0x68   : > { %964 = shalt.err (!%p961_p1)
}
  0x69   : > { %s965_s7 = scalar_lea.vmem %s1310_s5, 128  ;;  %s1088_s0 = smov [#allocation10]  }
  0x6a   : > { %p966_p5 = scmp.ne.s32.totalorder %s1310_s5, %s965_s7  ;;  %s970_s25 = sshll.u32 %s1088_s0, 4  ;;  %s971_s25 = int_to_ptr.vmem [resolvable:$false] %s970_s25 }
  0x6b   : > { %s972_s11 = scalar_lea.vmem %s971_s25, 256  ;;  %p973_p12 = scmp.lt.s32.totalorder %s1310_s5, %s971_s25 }
  0x6c   : > { %p968_p11 = pnand %p966_p5, %p1231_p3  ;;  %p974_p10 = scmp.lt.s32.totalorder %s972_s11, %s965_s7 }
  0x6e   : > { %p969_p13 = pneg %p968_p11  ;;  %p975_p4 = por %p974_p10, %p973_p12 }
  0x70   : > { %p976_p6 = pnand %p975_p4, %p969_p13 }
  0x72   : > { %979 = shalt.err (!%p976_p6)
}
  0x73   : > { %794 = dma.hbm_to_vmem [thread:$0]  (!%p1208_p0), %s1307_s24, 128, %s1310_s5, %s1225_s23, %s1472_s8, %s1472_s8, %s1471_s18  }
  0x74   : > { %p1473_p3 = scmp.ne.s32.totalorder %s1468_s26, 0 }
  0x75   : > { %s1340_s9 = sand.u32 (!%p1473_p3), 1, %s1058_s13   ;;  %p1474_p2 = scmp.ne.s32.totalorder (!%p1473_p3), %s1461_s27, 0 }
  0x76   : > { %263 = sbr.rel (%p1473_p3) target bundleno = 956 (0x3bc), region = 32  ;;  %s1343_s22 = sshll.u32 (!%p1473_p3), %s1340_s9, 3 }
  0x77   : > { %s266_s10 = scalar_lea.sflag (!%p1473_p3), [#allocation6], %s1340_s9  ;;  %s269_s17 = scalar_lea.vmem (!%p1473_p3), [#allocation5], %s1343_s22 }
  0x7d   : > { %1041 = dma.done.wait (%p1474_p2), %s266_s10, 128  }
  0x7e   : > { %1043 = vsyncadd (%p1474_p2), %s266_s10, 4294967168  ;;  %s274_s23 = sand.u32 1, %s1157_s20   ;;  %s278_s18 = scalar_lea.vmem [#allocation8], %s1343_s22 }
  0x7f   : > { %s275_s26 = scalar_lea.sflag [#allocation9], %s274_s23 }
  0x80   : > { %1045 = dma.done.wait (%p1474_p2), %s275_s26, 256  }
  0x81   : > { %1047 = vsyncadd (%p1474_p2), %s275_s26, 4294967040  ;;  %vm334_vm0 = vcmask 261120   ;;  %v1089_v0 = vmov 0.0   ;;  %vm1090_vm1 = vmmov 0   ;;  %v875_v1 = vld [vmem:[%s278_s18] sm:$0xff]   ;;  %v876_v3 = vld [vmem:[%s269_s17] sm:$0xff]  }
  0x82   : > { %765 = vmatprep.subr.bf16.mxu0 %v1089_v0  ;;  %335 = vst.msk [vmem:[#allocation4] sm:$0xff] %vm334_vm0, %v1089_v0  ;;  %336 = vst.msk [vmem:[#allocation4 + $0x8] sm:$0xff] %vm334_vm0, %v1089_v0  ;;  %767 = vmatprep.mubr.msk.bf16.mxu0 %vm1090_vm1, %v1089_v0  ;;  %v356_v2 = vsel %vm334_vm0, %v875_v1, 0  ;;  %vm329_vm2 = vcmask 7168   ;;  %v1091_v4 = vmov -inf   ;;  %vm403_vm3 = vcmask 130048  }
  0x83   : > { %771 = vmatprep.subr.bf16.mxu1 %v1089_v0  ;;  %773 = vmatprep.mubr.msk.bf16.mxu1 %vm1090_vm1, %v1089_v0  ;;  %330 = vst.msk [vmem:[#allocation2] sm:$0xff] %vm329_vm2, %v1091_v4  ;;  %331 = vst.msk [vmem:[#allocation2 + $0x8] sm:$0xff] %vm329_vm2, %v1091_v4  ;;  %v1092_v13 = vmov 0   ;;  %s287_s20 = scalar_lea.vmem [#allocation10], %s1343_s22  ;;  %s754_s27 = sshll.u32 %s1066_s15, 1  ;;  %vm551_vm4 = vcmask 257024  }
  0x84   : > { %766 = vmatpush3.bf16.xpose.msra.mxu0 %v356_v2  ;;  %332 = vst.msk [vmem:[#allocation3] sm:$0xff] %vm329_vm2, %v1089_v0  ;;  %333 = vst.msk [vmem:[#allocation3 + $0x8] sm:$0xff] %vm329_vm2, %v1089_v0  ;;  %873 = vset.pattern.permute.xlu1 %v1092_v13  ;;  %v877_v22 = vld [vmem:[%s287_s20] sm:$0xff]   ;;  %s755_s8 = sshll.u32 %s1070_s16, 3  ;;  %s319_s1 = scalar_lea.vmem [#allocation11], %s1343_s22 }
  0x85   : > { %874 = vset.pattern.permute.xlu0 %v1092_v13  ;;  %772 = vmatpush3.bf16.msra.mxu1 %v877_v22  ;;  %s569_s24 = sadd.s32 %s755_s8, %s754_s27  ;;  %s572_s29 = sshll.u32 %s319_s1, 4  ;;  %s1385_s29 = int_to_ptr.vmem [resolvable:$true] %s572_s29 }
  0x86   : > { %s756_s5 = sshll.u32 %s569_s24, 6  ;;  %s555_s16 = scalar_lea.sflag [#allocation7], %s1340_s9 }
  0x87   : > { %s1383_s15 = scalar_lea.hbm %s1442_s3, %s756_s5  ;;  %s980_s7 = scalar_lea.vmem %s1385_s29, 128 }
  0x88   : > { %p981_p0 = scmp.ne.s32.totalorder %s1385_s29, %s980_s7  ;;  %p1475_p7 = scmp.ne.s32.totalorder %s1462_s28, 0 }
  0x89   : > { %v449_v48 = vld [vmem:[#allocation4] sm:$0xff]  ;;  %v450_v50 = vld [vmem:[#allocation4 + $0x8] sm:$0xff]  ;;  %s1093_s0 = smov [#allocation11]  }
  0x8a   : > { %v401_v14 = vld [vmem:[#allocation2] sm:$0xff]  ;;  %v402_v17 = vld [vmem:[#allocation2 + $0x8] sm:$0xff]  ;;  %p982_p8 = pnand %p981_p0, %p1475_p7  ;;  %s984_s25 = sshll.u32 %s1093_s0, 4  ;;  %s985_s25 = int_to_ptr.vmem [resolvable:$false] %s984_s25 }
  0x8b   : > { %768 = vmatmul.mubr.msk.bf16.vlgmr.msra.gmra.mrb[0].mxu0 %vm334_vm0, %v876_v3  ;;  %v434_v38 = vld [vmem:[#allocation3] sm:$0xff]  ;;  %v435_v41 = vld [vmem:[#allocation3 + $0x8] sm:$0xff]  ;;  %s986_s11 = scalar_lea.vmem %s985_s25, 256  ;;  %p987_p1 = scmp.lt.s32.totalorder %s1385_s29, %s985_s25 }
  0x8c   : > { %p983_p9 = pneg %p982_p8  ;;  %p988_p5 = scmp.lt.s32.totalorder %s986_s11, %s980_s7 }
  0x8e   : > { %p989_p11 = por %p988_p5, %p987_p1 }
  0x90   : > { %p990_p13 = pnand %p989_p11, %p983_p9 }
 0x15e   : > { %v392_v5 = vpop.f32.mrb[0].mxu0 }
 0x15f   : > { %v399_v6 = vmul.f32 0.17677669, %v392_v5  ;;  %v769_v7 = vpop.f32.mrb[1].mxu0 }
 0x160   : > { %v395_v8 = vpop.f32.mrb[2].mxu0 }
 0x161   : > { %v400_v9 = vmul.f32 0.17677669, %v395_v8  ;;  %v770_v10 = vpop.f32.mrb[3].mxu0  ;;  %v404_v11 = vsel %vm403_vm3, %v399_v6, -inf }
 0x162   : > { %405 = vmax.xlane.f32.xlu0 %v404_v11 }
 0x163   : > { %v407_v12 = vsel %vm403_vm3, %v400_v9, -inf }
 0x166   : > { %408 = vmax.xlane.f32.xlu0 %v407_v12 }
 0x1ef   : > { %v406_v15 = vpop.xlane.xlu0 %405 }
 0x1f0   : > { %v410_v16 = vmax.f32 %v401_v14, %v406_v15 }
 0x1f2   : > { %v412_v18 = vsub.f32 %v401_v14, %v410_v16  ;;  %520 = vst.msk [vmem:[#allocation2] sm:$0xff] %vm329_vm2, %v410_v16  ;;  %420 = vperm.xlu1 %873, %v410_v16  }
 0x1f3   : > { %v409_v19 = vpop.xlane.xlu0 %408 }
 0x1f4   : > { %v411_v20 = vmax.f32 %v402_v17, %v409_v19  ;;  %v414_v35 = vmul.f32 1.442695, %v412_v18 }
 0x1f6   : > { %v413_v21 = vsub.f32 %v402_v17, %v411_v20  ;;  %521 = vst.msk [vmem:[#allocation2 + $0x8] sm:$0xff] %vm329_vm2, %v411_v20  ;;  %425 = vperm.xlu1 %873, %v411_v20  }
 0x1f8   : > { %v416_v34 = vmul.f32 1.442695, %v413_v21 }
 0x271   : > { %v421_v23 = vpop.permute.xlu1 %420 }
 0x272   : > { %v428_v24 = vsub.f32 %v399_v6, %v421_v23 }
 0x274   : > { %v430_v25 = vmul.f32 1.442695, %v428_v24 }
 0x275   : > { %v426_v26 = vpop.permute.xlu1 %425 }
 0x276   : > { %878 = vpow2.f32 %v430_v25  ;;  %v429_v27 = vsub.f32 %v400_v9, %v426_v26 }
 0x278   : > { %v432_v28 = vmul.f32 1.442695, %v429_v27 }
 0x27a   : > { %880 = vpow2.f32 %v432_v28 }
 0x27b   : > { %882 = vpow2.f32 %v416_v34 }
 0x27c   : > { %884 = vpow2.f32 %v414_v35 }
 0x280   : > { %v879_v29 = vpop.eup %878 }
 0x281   : > { %v438_v30 = vsel %vm403_vm3, %v879_v29, 0.0 }
 0x282   : > { %439 = vadd.xlane.f32.xlu0 %v438_v30 }
 0x284   : > { %v881_v31 = vpop.eup %880 }
 0x285   : > { %v441_v32 = vsel %vm403_vm3, %v881_v31, 0.0  ;;  %v463_v33 = vpack.c.bf16 %v881_v31, %v879_v29  ;;  %v883_v36 = vpop.eup %882 }
 0x286   : > { %442 = vadd.xlane.f32.xlu1 %v441_v32  ;;  %v885_v37 = vpop.eup %884  ;;  %v437_v43 = vmul.f32 %v883_v36, %v435_v41 }
 0x287   : > { %774 = vmatmul.mubr.msk.bf16.vlgmr.msra.gmra.mrb[0].mxu1 %vm403_vm3, %v463_v33  ;;  %v436_v39 = vmul.f32 %v885_v37, %v434_v38 }
 0x297   : > { %458 = vperm.xlu1 %873, %v883_v36  }
 0x298   : > { %453 = vperm.xlu0 %874, %v885_v37  }
 0x30f   : > { %v440_v40 = vpop.xlane.xlu0 %439 }
 0x310   : > { %v444_v42 = vadd.f32 %v440_v40, %v436_v39 }
 0x312   : > { %447 = vst.msk [vmem:[#allocation3] sm:$0xff] %vm329_vm2, %v444_v42 }
 0x313   : > { %v443_v44 = vpop.xlane.xlu1 %442 }
 0x314   : > { %v445_v45 = vadd.f32 %v443_v44, %v437_v43 }
 0x316   : > { %448 = vst.msk [vmem:[#allocation3 + $0x8] sm:$0xff] %vm329_vm2, %v445_v45 }
 0x317   : > { %v454_v49 = vpop.permute.xlu0 %453  ;;  %v459_v51 = vpop.permute.xlu1 %458 }
 0x318   : > { %v461_v52 = vmul.f32 %v454_v49, %v449_v48  ;;  %v462_v54 = vmul.f32 %v459_v51, %v450_v50 }
 0x319   : > { %v527_v46 = vld [vmem:[#allocation3] sm:$0xff] }
 0x31a   : > { %531 = vperm.xlu0 %874, %v527_v46  }
 0x31d   : > { %v528_v47 = vld [vmem:[#allocation3 + $0x8] sm:$0xff] }
 0x31e   : > { %536 = vperm.xlu0 %874, %v528_v47  }
 0x35a   : > { %v509_v53 = vpop.f32.mrb[0].mxu1 }
 0x35b   : > { %v516_v55 = vadd.f32 %v509_v53, %v461_v52  ;;  %v775_v56 = vpop.f32.mrb[1].mxu1 }
 0x35c   : > { %v512_v57 = vpop.f32.mrb[2].mxu1 }
 0x35d   : > { %518 = vst.msk [vmem:[#allocation4] sm:$0xff] %vm334_vm0, %v516_v55  ;;  %v517_v58 = vadd.f32 %v512_v57, %v462_v54  ;;  %v776_v59 = vpop.f32.mrb[3].mxu1 }
 0x35f   : > { %519 = vst.msk [vmem:[#allocation4 + $0x8] sm:$0xff] %vm334_vm0, %v517_v58 }
 0x364   : > { %v525_v63 = vld [vmem:[#allocation4] sm:$0xff] }
 0x366   : > { %v526_v3 = vld [vmem:[#allocation4 + $0x8] sm:$0xff] }
 0x399   : > { %v532_v60 = vpop.permute.xlu0 %531 }
 0x39a   : > { %886 = vrcp.f32 %v532_v60 }
 0x39d   : > { %v537_v61 = vpop.permute.xlu0 %536 }
 0x39e   : > { %888 = vrcp.f32 %v537_v61 }
 0x3a4   : > { %v887_v62 = vpop.eup %886 }
 0x3a5   : > { %v540_v0 = vmul.f32 %v887_v62, %v525_v63 }
 0x3a7   : > { %v759_v1 = vpack.c.bf16 %v540_v0, %v540_v0 }
 0x3a8   : > { %v889_v2 = vpop.eup %888 }
 0x3a9   : > { %v542_v4 = vmul.f32 %v889_v2, %v526_v3  ;;  %552 = vst.msk [vmem:[%s319_s1] sm:$0xf] %vm551_vm4, %v759_v1 }
 0x3ab   : > { %v760_v5 = vpack.c.bf16 %v542_v4, %v542_v4 }
 0x3ad   : > { %553 = vst.msk [vmem:[%s319_s1 + $0x4] sm:$0xf] %vm551_vm4, %v760_v5 }
 0x3ae   : > { %993 = shalt.err (!%p990_p13)
}
 0x3af   : > { %s994_s22 = scalar_lea.hbm %s1383_s15, 128  ;;  %s998_s23 = scalar_lea.hbm %s1442_s3, 1024 }
 0x3b0   : > { %p995_p12 = scmp.ne.s32.totalorder %s1383_s15, %s994_s22  ;;  %p999_p6 = scmp.lt.u32.totalorder %s1383_s15, %s1442_s3 }
 0x3b1   : > { %p1000_p3 = scmp.lt.u32.totalorder %s998_s23, %s994_s22  ;;  %p1002_p0 = scmp.lt.u32.totalorder %s994_s22, %s1383_s15 }
 0x3b2   : > { %p996_p10 = pnand %p995_p12, %p1475_p7 }
 0x3b3   : > { %p1001_p2 = por %p1000_p3, %p999_p6 }
 0x3b4   : > { %p997_p4 = pneg %p996_p10 }
 0x3b5   : > { %p1003_p8 = por %p1002_p0, %p1001_p2 }
 0x3b7   : > { %p1004_p9 = pnand %p1003_p8, %p997_p4 }
 0x3b9   : > { %1007 = shalt.err (!%p1004_p9)
}
 0x3ba   : > { %s1094_s20 = smov 64   ;;  %s1095_s27 = smov 4  }
 0x3bb   : > { %783 = dma.vmem_to_hbm [thread:$0]  (%p1475_p7), %s1385_s29, 128, %s1383_s15, %s555_s16, %s1094_s20, %s1094_s20, %s1095_s27  }
 0x3bc PF: > { %p800_p1 = scmp.ge.s32.totalorder %s1082_s19, 2  ;;  %s587_s8 = sand.u32 1, %s1054_s12  }
 0x3bd   : > { %p1476_p5 = scmp.ne.s32.totalorder %s1463_s4, 0  ;;  %s588_s24 = scalar_lea.sflag [#allocation7], %s587_s8 }
 0x3bf   : > { %p796_p11 = pnand %p800_p1, %p1476_p5 }
 0x3c1   : > { %1049 = dma.done.wait (!%p796_p11), %s588_s24, 128  }
 0x3c2   : > { %1051 = vsyncadd (!%p796_p11), %s588_s24, 4294967168  ;;  %s22_s19 = sadd.s32 1, %s1082_s19   ;;  %s1477_s15 = sld [smem:[#allocation15_spill]] }
 0x3c3   : > { %p19_p13 = scmp.ge.s32.totalorder %s22_s19, 10   ;;  %s1478_s16 = sld [smem:[#allocation16_spill]] }
 0x3c4   : > { %s1479_s17 = sld [smem:[#allocation17_spill]]  ;;  %s1480_s18 = sld [smem:[#allocation18_spill]] }
 0x3c5   : > { %s1481_s12 = smov %s1058_s13  ;;  %s1482_s13 = smov %s1062_s14 }
 0x3c6   : > { %s1483_s14 = smov %s1198_s6  ;;  %21 = sbr.rel (!%p19_p13) target bundleno = 12 (0xc), region = 109 }
 0x3cd   :  { %593 = vsyncpa [#allocation6], 1 }
 0x3ce   :  { %595 = vsyncpa [#allocation6 + $0x1], 1 }
 0x3cf   :  { %596 = vsyncpa [#allocation9], 1 }
 0x3d0   :  { %598 = vsyncpa [#allocation9 + $0x1], 1 }
 0x3d1   :  { %599 = vsyncpa [#allocation7], 1 }
 0x3d2   :  { %601 = vsyncpa [#allocation7 + $0x1], 1 }

// kernel: conformer_forward.34
= control target key start
LH: loop header
LB: loop body
LE: loop exit
PB: predicated region body
PF: predicated region fallthrough
CT: control target
= control target key end

     0   :  { %s1401_s0 = inlined_call_operand.hbm [shape: bf16[2,4,16,32], index: 0, kind: input, shape index: {}]   ;;  %s1402_s1 = inlined_call_operand.hbm [shape: bf16[128,128], index: 1, kind: input, shape index: {}]   ;;  %s1403_s2 = inlined_call_operand.hbm [shape: bf16[1,128], index: 2, kind: input, shape index: {}]   ;;  %s1404_s3 = inlined_call_operand.hbm [shape: bf16[2,16,128], index: 3, kind: input, shape index: {}]   ;;  %s1405_s4 = inlined_call_operand.hbm [shape: bf16[2,16,128], index: 4, kind: output, shape index: {}]  }
   0x1   :  { %1412 = sst [smem:[#allocation15_spill]] %s1401_s0 }
   0x2   :  { %1413 = sst [smem:[#allocation16_spill]] %s1402_s1 }
   0x3   :  { %1414 = sst [smem:[#allocation17_spill]] %s1403_s2 }
   0x4   :  { %9 = vsyncpa [#allocation3], 0 }
   0x5   :  { %11 = vsyncpa [#allocation3 + $0x1], 0 }
   0x6   :  { %12 = vsyncpa [#allocation6], 0 }
   0x7   :  { %13 = vsyncpa [#allocation9], 0 }
   0x8   :  { %15 = vsyncpa [#allocation9 + $0x1], 0 }
   0x9   :  { %16 = vsyncpa [#allocation4], 0 }
   0xa   :  { %18 = vsyncpa [#allocation4 + $0x1], 0  ;;  %s1072_s15 = smov 0   ;;  %s1074_s16 = smov 0  }
   0xb   :  { %s1076_s17 = smov 0   ;;  %s1078_s18 = smov 0  }
   0xc   :  { %s1080_s19 = smov 0   ;;  %s1082_s20 = smov 0  }
   0xd LB: > { %s632_s21 = sadd.s32 4294967295, %s1032_s20   ;;  %s633_s22 = sadd.s32 4294967294, %s1032_s20   ;;  %s1032_s20 = sphi %s1082_s20, %s24_s20   ;;  %s1028_s19 = sphi %s1080_s19, %s1439_s19   ;;  %s1024_s18 = sphi %s1078_s18, %s1438_s18   ;;  %s1020_s17 = sphi %s1076_s17, %s1437_s17   ;;  %s1016_s16 = sphi %s1074_s16, %s1436_s16   ;;  %s1012_s15 = sphi %s1072_s15, %s1435_s15  }
   0xe   : > { %p52_p0 = scmp.ne.s32.totalorder %s1020_s17, %s1016_s16  ;;  %p53_p1 = scmp.eq.s32.totalorder %s1032_s20, 0 }
   0xf   : > { %p58_p2 = scmp.ne.s32.totalorder %s1016_s16, %s1012_s15  ;;  %p1110_p3 = scmp.eq.s32.totalorder %s632_s21, 0 }
  0x10   : > { %p154_p4 = scmp.eq.s32.totalorder %s632_s21, 1  ;;  %p1114_p5 = por %p53_p1, %p52_p0 }
  0x11   : > { %s1415_s24 = scalar_select %p1110_p3, 1, 0 }
  0x12   : > { %p160_p6 = scmp.eq.s32.totalorder %s633_s22, 1  ;;  %p1120_p7 = por %p1110_p3, %p58_p2 }
  0x13   : > { %p1124_p8 = por %p154_p4, %p52_p0  ;;  %p634_p10 = scmp.ge.s32.totalorder %s1032_s20, 1 }
  0x14   : > { %s1417_s26 = scalar_select %p1120_p7, 1, 0 }
  0x15   : > { %s1418_s27 = scalar_select %p1124_p8, 1, 0 }
  0x16   : > { %p1128_p9 = por %p160_p6, %p58_p2  ;;  %p167_p11 = scmp.lt.s32.totalorder %s1032_s20, 3 }
  0x17   : > { %s1034_s30 = smov [#allocation5]   ;;  %s1035_s7 = smov [#allocation7]  }
  0x18   : > { %s1419_s28 = scalar_select %p1128_p9, 1, 0 }
  0x19   : > { %p1134_p12 = pnand %p634_p10, %p167_p11  ;;  %s179_s5 = sshll.u32 %s1034_s30, 4  ;;  %s1138_s5 = int_to_ptr.vmem [resolvable:$true] %s179_s5 }
  0x1a   : > { %s193_s8 = sshll.u32 %s1035_s7, 4  ;;  %s1422_s1 = sld [smem:[#allocation16_spill]]  ;;  %s1149_s8 = int_to_ptr.vmem [resolvable:$true] %s193_s8 }
  0x1b   : > { %p732_p13 = pneg %p1134_p12 }
  0x1d   : > { %p1145_p1 = pnand %p732_p13, %p1110_p3 }
  0x1f   : > { %p828_p4 = pneg %p1145_p1 }
  0x20   : > { %s826_s12 = scalar_lea.hbm %s1422_s1, 1024 }
  0x21   : > { %p827_p2 = scmp.ne.s32.totalorder %s1422_s1, %s826_s12  ;;  %p833_p11 = scmp.lt.u32.totalorder %s826_s12, %s1422_s1 }
  0x23   : > { %p829_p6 = pnand %p828_p4, %p827_p2 }
  0x25   : > { %p830_p10 = pneg %p829_p6 }
  0x27   : > { %p835_p13 = pnand %p833_p11, %p830_p10 }
  0x29   : > { %838 = shalt.err (!%p835_p13)
}
  0x2a   : > { %s839_s30 = scalar_lea.vmem %s1138_s5, 1024  ;;  %p847_p3 = scmp.lt.s32.totalorder %s1138_s5, %s1138_s5 }
  0x2b   : > { %p840_p0 = scmp.ne.s32.totalorder %s1138_s5, %s839_s30  ;;  %p848_p2 = scmp.lt.s32.totalorder %s839_s30, %s839_s30 }
  0x2d   : > { %p842_p9 = pnand %p840_p0, %p828_p4  ;;  %p849_p6 = por %p848_p2, %p847_p3 }
  0x2f   : > { %p843_p8 = pneg %p842_p9 }
  0x31   : > { %p850_p7 = pnand %p849_p6, %p843_p8 }
  0x33   : > { %853 = shalt.err (!%p850_p7)
}
  0x34   : > { %s1410_s7 = smov 64   ;;  %s1037_s10 = smov 4  }
  0x35   : > { %735 = dma.hbm_to_vmem [thread:$0]  (!%p1145_p1), %s1422_s1, 1024, %s1138_s5, [#allocation6], %s1410_s7, %s1410_s7, %s1037_s10  }
  0x36   : > { %s1423_s2 = sld [smem:[#allocation17_spill]] }
  0x3c   : > { %s854_s21 = scalar_lea.hbm %s1423_s2, 16 }
  0x3d   : > { %p855_p3 = scmp.ne.s32.totalorder %s1423_s2, %s854_s21  ;;  %p861_p9 = scmp.lt.u32.totalorder %s854_s21, %s1423_s2 }
  0x3f   : > { %p857_p7 = pnand %p855_p3, %p828_p4 }
  0x41   : > { %p858_p8 = pneg %p857_p7 }
  0x43   : > { %p863_p0 = pnand %p861_p9, %p858_p8 }
  0x45   : > { %866 = shalt.err (!%p863_p0)
}
  0x46   : > { %s867_s5 = scalar_lea.vmem %s1149_s8, 16  ;;  %s874_s11 = scalar_lea.vmem %s1149_s8, 32 }
  0x47   : > { %p868_p10 = scmp.ne.s32.totalorder %s1149_s8, %s867_s5  ;;  %p875_p2 = scmp.lt.s32.totalorder %s1149_s8, %s1149_s8 }
  0x48   : > { %p876_p6 = scmp.lt.s32.totalorder %s874_s11, %s867_s5 }
  0x49   : > { %p870_p11 = pnand %p868_p10, %p828_p4 }
  0x4a   : > { %p877_p3 = por %p876_p6, %p875_p2 }
  0x4b   : > { %p871_p13 = pneg %p870_p11 }
  0x4d   : > { %p878_p7 = pnand %p877_p3, %p871_p13 }
  0x4f   : > { %881 = shalt.err (!%p878_p7)
}
  0x50   : > { %738 = dma.hbm_to_vmem [thread:$0]  (!%p1145_p1), %s1423_s2, 16, %s1149_s8, [#allocation6]  }
  0x51   : > { %s1424_s12 = sadd.s32 1, %s1028_s19  ;;  %p752_p8 = scmp.lt.s32.totalorder %s1032_s20, 2 }
  0x52   : > { %p38_p4 = scmp.ge.s32.totalorder %s1424_s12, 2  ;;  %s1212_s13 = sand.u32 1, %s1020_s17  }
  0x53   : > { %s675_s6 = sshll.u32 %s1028_s19, 9  ;;  %s1425_s14 = smov %s1424_s12 }
  0x54   : > { %s1441_s14 = smov (%p38_p4, %s1425_s14), 0  ;;  %s638_s21 = sshll.u32 %s1212_s13, 5 }
  0x55   : > { %s40_s22 = ssub.s32 %s1028_s19, %s1441_s14  ;;  %s1426_s0 = sld [smem:[#allocation15_spill]] }
  0x56   : > { %p43_p9 = scmp.eq.s32.totalorder %s40_s22, 0  ;;  %s208_s8 = scalar_lea.vmem [#allocation2], %s638_s21 }
  0x57   : > { %s217_s23 = sshll.u32 %s208_s8, 4  ;;  %p1229_p1 = pnand %p752_p8, %p1114_p5  ;;  %s1238_s23 = int_to_ptr.vmem [resolvable:$true] %s217_s23 }
  0x58   : > { %s1428_s12 = sadd.s32 1, %s1020_s17 }
  0x59   : > { %s1236_s22 = scalar_select %p43_p9, %s1020_s17, %s1428_s12  }
  0x5a   : > { %p884_p10 = pneg %p1229_p1 }
  0x5b   : > { %s1225_s11 = scalar_lea.hbm %s1426_s0, %s675_s6  ;;  %s205_s6 = scalar_lea.sflag [#allocation3], %s1212_s13 }
  0x5c   : > { %s882_s30 = scalar_lea.hbm %s1225_s11, 512  ;;  %s887_s5 = scalar_lea.hbm %s1426_s0, 1024 }
  0x5d   : > { %p883_p0 = scmp.ne.s32.totalorder %s1225_s11, %s882_s30  ;;  %p888_p5 = scmp.lt.u32.totalorder %s1225_s11, %s1426_s0 }
  0x5e   : > { %p889_p2 = scmp.lt.u32.totalorder %s887_s5, %s882_s30  ;;  %p891_p3 = scmp.lt.u32.totalorder %s882_s30, %s1225_s11 }
  0x5f   : > { %p885_p11 = pnand %p884_p10, %p883_p0 }
  0x60   : > { %p890_p6 = por %p889_p2, %p888_p5 }
  0x61   : > { %p886_p13 = pneg %p885_p11 }
  0x62   : > { %p892_p7 = por %p891_p3, %p890_p6 }
  0x64   : > { %p893_p4 = pnand %p892_p7, %p886_p13 }
  0x66   : > { %896 = shalt.err (!%p893_p4)
}
  0x67   : > { %s897_s12 = scalar_lea.vmem %s1238_s23, 512  ;;  %s1038_s25 = smov [#allocation2]  }
  0x68   : > { %p898_p8 = scmp.ne.s32.totalorder %s1238_s23, %s897_s12  ;;  %s902_s21 = sshll.u32 %s1038_s25, 4  ;;  %s903_s21 = int_to_ptr.vmem [resolvable:$false] %s902_s21 }
  0x69   : > { %s904_s7 = scalar_lea.vmem %s903_s21, 1024  ;;  %p905_p11 = scmp.lt.s32.totalorder %s1238_s23, %s903_s21 }
  0x6a   : > { %p900_p9 = pnand %p898_p8, %p884_p10  ;;  %p906_p5 = scmp.lt.s32.totalorder %s904_s7, %s897_s12 }
  0x6c   : > { %p901_p0 = pneg %p900_p9  ;;  %p907_p2 = por %p906_p5, %p905_p11 }
  0x6e   : > { %p908_p6 = pnand %p907_p2, %p901_p0 }
  0x70   : > { %911 = shalt.err (!%p908_p6)
}
  0x71   : > { %s1429_s30 = smov 64   ;;  %s641_s5 = sshll.u32 %s1212_s13, 3 }
  0x72   : > { %742 = dma.hbm_to_vmem [thread:$0]  (!%p1229_p1), %s1225_s11, 512, %s1238_s23, %s205_s6, %s1429_s30, %s1429_s30, %s1037_s10  }
  0x73   : > { %s676_s8 = sshll.u32 %s1028_s19, 7  ;;  %s231_s7 = scalar_lea.vmem [#allocation8], %s641_s5 }
  0x74   : > { %s1276_s21 = scalar_lea.hbm %s1404_s3, %s676_s8  ;;  %s240_s0 = sshll.u32 %s231_s7, 4  ;;  %s1278_s0 = int_to_ptr.vmem [resolvable:$true] %s240_s0 }
  0x75   : > { %s228_s1 = scalar_lea.sflag [#allocation9], %s1212_s13  ;;  %s912_s2 = scalar_lea.hbm %s1276_s21, 128 }
  0x76   : > { %p913_p13 = scmp.ne.s32.totalorder %s1276_s21, %s912_s2  ;;  %s917_s6 = scalar_lea.hbm %s1404_s3, 256 }
  0x77   : > { %p918_p4 = scmp.lt.u32.totalorder %s1276_s21, %s1404_s3  ;;  %p919_p8 = scmp.lt.u32.totalorder %s917_s6, %s912_s2 }
  0x78   : > { %p915_p3 = pnand %p913_p13, %p884_p10  ;;  %p921_p0 = scmp.lt.u32.totalorder %s912_s2, %s1276_s21 }
  0x79   : > { %p920_p9 = por %p919_p8, %p918_p4 }
  0x7a   : > { %p916_p7 = pneg %p915_p3 }
  0x7b   : > { %p922_p11 = por %p921_p0, %p920_p9 }
  0x7d   : > { %p923_p5 = pnand %p922_p11, %p916_p7 }
  0x7f   : > { %926 = shalt.err (!%p923_p5)
}
  0x80   : > { %s927_s5 = scalar_lea.vmem %s1278_s0, 128  ;;  %s1039_s25 = smov [#allocation8]  }
  0x81   : > { %p928_p2 = scmp.ne.s32.totalorder %s1278_s0, %s927_s5  ;;  %s932_s7 = sshll.u32 %s1039_s25, 4  ;;  %s933_s7 = int_to_ptr.vmem [resolvable:$false] %s932_s7 }
  0x82   : > { %s934_s11 = scalar_lea.vmem %s933_s7, 256  ;;  %p935_p3 = scmp.lt.s32.totalorder %s1278_s0, %s933_s7 }
  0x83   : > { %p930_p6 = pnand %p928_p2, %p884_p10  ;;  %p936_p4 = scmp.lt.s32.totalorder %s934_s11, %s927_s5 }
  0x85   : > { %p931_p13 = pneg %p930_p6  ;;  %p937_p8 = por %p936_p4, %p935_p3 }
  0x87   : > { %p938_p9 = pnand %p937_p8, %p931_p13 }
  0x89   : > { %941 = shalt.err (!%p938_p9)
}
  0x8a   : > { %745 = dma.hbm_to_vmem [thread:$0]  (!%p1229_p1), %s1276_s21, 128, %s1278_s0, %s228_s1, %s1429_s30, %s1429_s30, %s1037_s10  }
  0x8b   : > { %252 = sbr.rel (%p1134_p12) target bundleno = 511 (0x1ff), region = 36  ;;  %s1312_s2 = sand.u32 (!%p1134_p12), 1, %s1016_s16  }
  0x8c   : > { %s645_s23 = sshll.u32 (!%p1134_p12), %s1312_s2, 5  ;;  %s255_s6 = scalar_lea.sflag (!%p1134_p12), [#allocation3], %s1312_s2 }
  0x8d   : > { %s1316_s9 = scalar_lea.vmem (!%p1134_p12), [#allocation2], %s645_s23  ;;  %p1430_p10 = scmp.ne.s32.totalorder (!%p1134_p12), %s1417_s26, 0 }
  0x92   : > { %995 = dma.done.wait (%p1430_p10), %s255_s6, 512  }
  0x93   : > { %997 = vsyncadd (%p1430_p10), %s255_s6, 4294966784  ;;  %p1431_p1 = scmp.ne.s32.totalorder %s1415_s24, 0 }
  0x95   : > { %999 = dma.done.wait (%p1431_p1), [#allocation6], 1040  }
  0x96   : > { %1001 = vsyncadd (%p1431_p1), [#allocation6], 4294966256  ;;  %s648_s0 = sshll.u32 %s1312_s2, 3  ;;  %s272_s1 = scalar_lea.sflag [#allocation9], %s1312_s2 }
  0x97   : > { %s1330_s29 = scalar_lea.vmem [#allocation8], %s648_s0 }
  0x98   : > { %1003 = dma.done.wait (%p1430_p10), %s272_s1, 128  }
  0x99   : > { %1005 = vsyncadd (%p1430_p10), %s272_s1, 4294967168  ;;  %v1040_v0 = vmov 0.0   ;;  %vm1041_vm0 = vmmov 0   ;;  %v814_v1 = vld [vmem:[%s1316_s9 + $0x8] sm:$0xff]   ;;  %v815_v2 = vld [vmem:[%s1316_s9 + $0x10] sm:$0xff]   ;;  %s1042_s24 = smov 32   ;;  %v375_v19 = vlaneseq }
  0x9a   : > { %698 = vmatprep.subr.bf16.mxu0 %v1040_v0  ;;  %714 = vmatprep.mubr.msk.bf16.mxu0 %vm1041_vm0, %v1040_v0  ;;  %v816_v3 = vld [vmem:[%s1316_s9 + $0x18] sm:$0xff]   ;;  %v817_v4 = vld [vmem:[#allocation5] sm:$0xff]   ;;  %s1043_s10 = smov 96   ;;  %v818_v5 = vld [vmem:[#allocation5 + $0x8] sm:$0xff]   ;;  %s1044_s13 = smov 64   ;;  %vm346_vm1 = vcmask 261120  }
  0x9b   : > { %330 = vrot.lane.b32.xlu0 %v814_v1, %s1042_s24  ;;  %344 = vrot.lane.b32.xlu1 %v816_v3, %s1043_s10  ;;  %v819_v6 = vld [vmem:[#allocation5 + $0x10] sm:$0xff]   ;;  %v820_v7 = vld [vmem:[#allocation5 + $0x18] sm:$0xff]   ;;  %v821_v8 = vld [vmem:[#allocation5 + $0x20] sm:$0xff]   ;;  %vm350_vm2 = vcmask 523264   ;;  %vm353_vm3 = vcmask 785408   ;;  %v376_v20 = vshrl.u32 %v375_v19, 7 }
  0x9c   : > { %699 = vmatpush3.bf16.msra.mxu0 %v817_v4  ;;  %v822_v9 = vld [vmem:[#allocation5 + $0x28] sm:$0xff]   ;;  %v823_v10 = vld [vmem:[#allocation5 + $0x30] sm:$0xff]   ;;  %v825_v11 = vld [vmem:[#allocation5 + $0x38] sm:$0xff]   ;;  %s679_s26 = sshll.u32 %s1024_s18, 7  ;;  %s304_s30 = scalar_lea.vmem [#allocation10], %s648_s0 }
  0x9d   : > { %700 = vmatprep.subr.bf16.mxu0 %v1040_v0  ;;  %v824_v13 = vld [vmem:[%s1316_s9] sm:$0xff]   ;;  %v377_v23 = vsub.s32 0, %v376_v20  ;;  %s500_s21 = sshll.u32 %s304_s30, 4  ;;  %s1348_s5 = scalar_lea.hbm %s1405_s4, %s679_s26  ;;  %s1350_s21 = int_to_ptr.vmem [resolvable:$true] %s500_s21 }
  0x9e   : > { %v373_v21 = vld [vmem:[#allocation7] sm:$0x1]  ;;  %v681_v25 = vld [vmem:[%s1330_s29] sm:$0xff]   ;;  %s485_s25 = scalar_lea.sflag [#allocation4], %s1312_s2  ;;  %s942_s7 = scalar_lea.vmem %s1350_s21, 128 }
  0x9f   : > { %337 = vrot.lane.b32.xlu0 %v815_v2, %s1044_s13  ;;  %v374_v22 = vunpack.c.l.bf16 %v373_v21  ;;  %v682_v28 = vunpack.c.l.bf16 %v681_v25  ;;  %v683_v30 = vunpack.c.h.bf16 %v681_v25  ;;  %p943_p12 = scmp.ne.s32.totalorder %s1350_s21, %s942_s7  ;;  %p1432_p7 = scmp.ne.s32.totalorder %s1418_s27, 0 }
  0xa0   : > { %701 = vmatpush3.bf16.msra.mxu0 %v818_v5  ;;  %s1045_s18 = smov [#allocation10]  }
  0xa1   : > { %702 = vmatprep.subr.bf16.mxu0 %v1040_v0  ;;  %v378_v24 = vrot.slane %v374_v22, %v377_v23  ;;  %p944_p0 = pnand %p943_p12, %p1432_p7  ;;  %s946_s11 = sshll.u32 %s1045_s18, 4  ;;  %s947_s11 = int_to_ptr.vmem [resolvable:$false] %s946_s11 }
  0xa2   : > { %s948_s23 = scalar_lea.vmem %s947_s11, 256  ;;  %p949_p5 = scmp.lt.s32.totalorder %s1350_s21, %s947_s11 }
  0xa3   : > { %p945_p11 = pneg %p944_p0  ;;  %p950_p2 = scmp.lt.s32.totalorder %s948_s23, %s942_s7 }
  0xa4   : > { %703 = vmatpush3.bf16.msra.mxu0 %v819_v6 }
  0xa5   : > { %704 = vmatprep.subr.bf16.mxu0 %v1040_v0  ;;  %p951_p6 = por %p950_p2, %p949_p5 }
  0xa7   : > { %p952_p13 = pnand %p951_p6, %p945_p11 }
  0xa8   : > { %705 = vmatpush3.bf16.msra.mxu0 %v820_v7 }
  0xa9   : > { %706 = vmatprep.subr.bf16.mxu0 %v1040_v0 }
  0xac   : > { %707 = vmatpush3.bf16.msra.mxu0 %v821_v8 }
  0xad   : > { %708 = vmatprep.subr.bf16.mxu0 %v1040_v0 }
  0xb0   : > { %709 = vmatpush3.bf16.msra.mxu0 %v822_v9 }
  0xb1   : > { %710 = vmatprep.subr.bf16.mxu0 %v1040_v0 }
  0xb4   : > { %711 = vmatpush3.bf16.msra.mxu0 %v823_v10 }
  0xb5   : > { %712 = vmatprep.subr.bf16.mxu0 %v1040_v0 }
  0xb8   : > { %713 = vmatpush3.bf16.msra.mxu0 %v825_v11 }
 0x10d   : > { %v331_v12 = vpop.permute.xlu0 %330  ;;  %v345_v14 = vpop.permute.xlu1 %344 }
 0x10e   : > { %v349_v15 = vsel %vm346_vm1, %v824_v13, %v331_v12 }
 0x111   : > { %v338_v16 = vpop.permute.xlu0 %337 }
 0x112   : > { %v352_v17 = vsel %vm350_vm2, %v349_v15, %v338_v16 }
 0x113   : > { %v355_v18 = vsel %vm353_vm3, %v352_v17, %v345_v14 }
 0x114   : > { %715 = vmatmul.mubr.bf16.vlgmr.msra.gmra.mrb[0].mxu0 %v355_v18 }
 0x1e7   : > { %v461_v26 = vpop.f32.mrb[0].mxu0 }
 0x1e8   : > { %v462_v27 = vadd.f32 %v461_v26, %v378_v24  ;;  %v716_v29 = vpop.f32.mrb[1].mxu0 }
 0x1e9   : > { %v464_v31 = vpop.f32.mrb[2].mxu0 }
 0x1ea   : > { %v465_v32 = vadd.f32 %v464_v31, %v378_v24  ;;  %v717_v33 = vpop.f32.mrb[3].mxu0  ;;  %v472_v34 = vadd.f32 %v682_v28, %v462_v27 }
 0x1ec   : > { %v473_v35 = vadd.f32 %v683_v30, %v465_v32 }
 0x1ee   : > { %v687_v36 = vpack.c.bf16 %v473_v35, %v472_v34 }
 0x1f0   : > { %688 = vst [vmem:[%s304_s30] sm:$0xff] %v687_v36  }
 0x1f1   : > { %955 = shalt.err (!%p952_p13)
}
 0x1f2   : > { %s956_s6 = scalar_lea.hbm %s1348_s5, 128  ;;  %s960_s1 = scalar_lea.hbm %s1405_s4, 256 }
 0x1f3   : > { %p957_p3 = scmp.ne.s32.totalorder %s1348_s5, %s956_s6  ;;  %p961_p9 = scmp.lt.u32.totalorder %s1348_s5, %s1405_s4 }
 0x1f4   : > { %p962_p10 = scmp.lt.u32.totalorder %s960_s1, %s956_s6  ;;  %p964_p12 = scmp.lt.u32.totalorder %s956_s6, %s1348_s5 }
 0x1f5   : > { %p958_p4 = pnand %p957_p3, %p1432_p7 }
 0x1f6   : > { %p963_p1 = por %p962_p10, %p961_p9 }
 0x1f7   : > { %p959_p8 = pneg %p958_p4 }
 0x1f8   : > { %p965_p0 = por %p964_p12, %p963_p1 }
 0x1fa   : > { %p966_p11 = pnand %p965_p0, %p959_p8 }
 0x1fc   : > { %969 = shalt.err (!%p966_p11)
}
 0x1fd   : > { %s1046_s10 = smov 4  }
 0x1fe   : > { %730 = dma.vmem_to_hbm [thread:$0]  (%p1432_p7), %s1350_s21, 128, %s1348_s5, %s485_s25, %s1044_s13, %s1044_s13, %s1046_s10  }
 0x1ff PF: > { %s515_s26 = sand.u32 1, %s1012_s15   ;;  %p1433_p5 = scmp.ne.s32.totalorder %s1419_s28, 0 }
 0x200   : > { %p1434_p2 = scmp.ge.s32.totalorder %s1032_s20, 2  ;;  %s516_s30 = scalar_lea.sflag [#allocation4], %s515_s26 }
 0x202   : > { %p747_p6 = pnand %p1434_p2, %p1433_p5 }
 0x204   : > { %1007 = dma.done.wait (!%p747_p6), %s516_s30, 128  }
 0x205   : > { %1009 = vsyncadd (!%p747_p6), %s516_s30, 4294967168  ;;  %s24_s20 = sadd.s32 1, %s1032_s20   ;;  %s1435_s15 = smov %s1016_s16 }
 0x206   : > { %p21_p13 = scmp.ge.s32.totalorder %s24_s20, 4   ;;  %s1436_s16 = smov %s1020_s17 }
 0x207   : > { %s1437_s17 = smov %s1236_s22  ;;  %s1438_s18 = smov %s1028_s19 }
 0x208   : > { %s1439_s19 = smov %s1441_s14  ;;  %23 = sbr.rel (!%p21_p13) target bundleno = 13 (0xd), region = 105 }
 0x20f   :  { %521 = vsyncpa [#allocation3], 1 }
 0x210   :  { %523 = vsyncpa [#allocation3 + $0x1], 1 }
 0x211   :  { %524 = vsyncpa [#allocation6], 1 }
 0x212   :  { %525 = vsyncpa [#allocation9], 1 }
 0x213   :  { %527 = vsyncpa [#allocation9 + $0x1], 1 }
 0x214   :  { %528 = vsyncpa [#allocation4], 1 }
 0x215   :  { %530 = vsyncpa [#allocation4 + $0x1], 1 }

// kernel: conformer_forward.35
= control target key start
LH: loop header
LB: loop body
LE: loop exit
PB: predicated region body
PF: predicated region fallthrough
CT: control target
= control target key end

     0   :  { %s1826_s0 = inlined_call_operand.hbm [shape: bf16[2,16,128], index: 0, kind: input, shape index: {}]   ;;  %s1827_s1 = inlined_call_operand.hbm [shape: bf16[1,128], index: 1, kind: input, shape index: {}]   ;;  %s1828_s2 = inlined_call_operand.hbm [shape: bf16[1,128], index: 2, kind: input, shape index: {}]   ;;  %s1829_s3 = inlined_call_operand.hbm [shape: bf16[128,128], index: 3, kind: input, shape index: {}]   ;;  %s1830_s4 = inlined_call_operand.hbm [shape: bf16[1,128], index: 4, kind: input, shape index: {}]   ;;  %s1831_s5 = inlined_call_operand.hbm [shape: bf16[128,128], index: 5, kind: input, shape index: {}]   ;;  %s1832_s6 = inlined_call_operand.hbm [shape: bf16[1,128], index: 6, kind: input, shape index: {}]   ;;  %s1833_s7 = inlined_call_operand.hbm [shape: bf16[2,16,128], index: 7, kind: output, shape index: {}]  }
   0x1   :  { %1840 = sst [smem:[#allocation20_spill]] %s1827_s1 }
   0x2   :  { %1841 = sst [smem:[#allocation21_spill]] %s1829_s3 }
   0x3   :  { %12 = vsyncpa [#allocation3], 0 }
   0x4   :  { %14 = vsyncpa [#allocation3 + $0x1], 0 }
   0x5   :  { %15 = vsyncpa [#allocation6], 0 }
   0x6   :  { %16 = vsyncpa [#allocation9], 0 }
   0x7   :  { %17 = vsyncpa [#allocation12], 0 }
   0x8   :  { %18 = vsyncpa [#allocation4], 0 }
   0x9   :  { %20 = vsyncpa [#allocation4 + $0x1], 0  ;;  %s1470_s24 = smov 0   ;;  %s1472_s25 = smov 0  }
   0xa   :  { %s1474_s26 = smov 0   ;;  %s1476_s27 = smov 0  }
   0xb   :  { %s1478_s28 = smov 0   ;;  %s1480_s29 = smov 0  }
   0xc LB: > { %s1837_s30 = sadd.s32 4294967295, %s1414_s29   ;;  %p849_p0 = scmp.ge.s32.totalorder %s1414_s29, 1  ;;  %s1414_s29 = sphi %s1480_s29, %s26_s29   ;;  %s1410_s28 = sphi %s1478_s28, %s1865_s28   ;;  %s1406_s27 = sphi %s1476_s27, %s1864_s27   ;;  %s1402_s26 = sphi %s1474_s26, %s1863_s26   ;;  %s1398_s25 = sphi %s1472_s25, %s1862_s25   ;;  %s1394_s24 = sphi %s1470_s24, %s1861_s24  }
   0xd   : > { %p1504_p1 = scmp.eq.s32.totalorder %s1837_s30, 0  ;;  %p225_p2 = scmp.lt.s32.totalorder %s1414_s29, 3 }
   0xe   : > { %s1416_s10 = smov [#allocation5]   ;;  %s1417_s12 = smov [#allocation8]  }
   0xf   : > { %s1842_s8 = scalar_select %p1504_p1, 1, 0 }
  0x10   : > { %p1509_p3 = pnand %p849_p0, %p225_p2  ;;  %s238_s11 = sshll.u32 %s1416_s10, 4  ;;  %s239_s11 = int_to_ptr.vmem [resolvable:$true] %s238_s11 }
  0x11   : > { %s259_s13 = sshll.u32 %s1417_s12, 4  ;;  %s1418_s15 = smov [#allocation11]   ;;  %s1522_s13 = int_to_ptr.vmem [resolvable:$true] %s259_s13 }
  0x12   : > { %s1843_s9 = scalar_select %p1509_p3, 1, 0 }
  0x13   : > { %p993_p5 = pneg %p1509_p3  ;;  %s1524_s16 = sshll.u32 %s1418_s15, 4  ;;  %s284_s16 = int_to_ptr.vmem [resolvable:$true] %s1524_s16 }
  0x14   : > { %s1845_s1 = sld [smem:[#allocation20_spill]] }
  0x15   : > { %p1518_p6 = pnand %p993_p5, %p1504_p1 }
  0x17   : > { %p1534_p8 = pneg %p1518_p6 }
  0x1a   : > { %s1122_s19 = scalar_lea.hbm %s1845_s1, 16 }
  0x1b   : > { %p1123_p7 = scmp.ne.s32.totalorder %s1845_s1, %s1122_s19  ;;  %p1129_p11 = scmp.lt.u32.totalorder %s1122_s19, %s1845_s1 }
  0x1d   : > { %p1125_p9 = pnand %p1534_p8, %p1123_p7 }
  0x1f   : > { %p1126_p10 = pneg %p1125_p9 }
  0x21   : > { %p1131_p12 = pnand %p1129_p11, %p1126_p10 }
  0x23   : > { %1134 = shalt.err (!%p1131_p12)
}
  0x24   : > { %s1135_s12 = scalar_lea.vmem %s239_s11, 16  ;;  %s1142_s15 = scalar_lea.vmem %s239_s11, 32 }
  0x25   : > { %p1136_p13 = scmp.ne.s32.totalorder %s239_s11, %s1135_s12  ;;  %p1143_p5 = scmp.lt.s32.totalorder %s239_s11, %s239_s11 }
  0x26   : > { %p1144_p4 = scmp.lt.s32.totalorder %s1142_s15, %s1135_s12 }
  0x27   : > { %p1138_p0 = pnand %p1136_p13, %p1534_p8 }
  0x28   : > { %p1145_p3 = por %p1144_p4, %p1143_p5 }
  0x29   : > { %p1139_p2 = pneg %p1138_p0 }
  0x2b   : > { %p1146_p1 = pnand %p1145_p3, %p1139_p2 }
  0x2d   : > { %1149 = shalt.err (!%p1146_p1)
}
  0x2e   : > { %996 = dma.hbm_to_vmem [thread:$0]  (!%p1518_p6), %s1845_s1, 16, %s239_s11, [#allocation6]  }
  0x2f   : > { %s1847_s3 = sld [smem:[#allocation21_spill]] }
  0x35   : > { %s1150_s21 = scalar_lea.hbm %s1847_s3, 1024 }
  0x36   : > { %p1151_p7 = scmp.ne.s32.totalorder %s1847_s3, %s1150_s21  ;;  %p1157_p1 = scmp.lt.u32.totalorder %s1150_s21, %s1847_s3 }
  0x38   : > { %p1153_p9 = pnand %p1151_p7, %p1534_p8 }
  0x3a   : > { %p1154_p4 = pneg %p1153_p9 }
  0x3c   : > { %p1159_p3 = pnand %p1157_p1, %p1154_p4 }
  0x3e   : > { %1162 = shalt.err (!%p1159_p3)
}
  0x3f   : > { %s1163_s11 = scalar_lea.vmem %s1522_s13, 1024  ;;  %p1171_p13 = scmp.lt.s32.totalorder %s1522_s13, %s1522_s13 }
  0x40   : > { %p1164_p10 = scmp.ne.s32.totalorder %s1522_s13, %s1163_s11  ;;  %p1172_p0 = scmp.lt.s32.totalorder %s1163_s11, %s1163_s11 }
  0x42   : > { %p1166_p11 = pnand %p1164_p10, %p1534_p8  ;;  %p1173_p2 = por %p1172_p0, %p1171_p13 }
  0x44   : > { %p1167_p12 = pneg %p1166_p11 }
  0x46   : > { %p1174_p5 = pnand %p1173_p2, %p1167_p12 }
  0x48   : > { %1177 = shalt.err (!%p1174_p5)
}
  0x49   : > { %s1838_s17 = smov 64   ;;  %s1420_s18 = smov 4  }
  0x4a   : > { %1002 = dma.hbm_to_vmem [thread:$0]  (!%p1518_p6), %s1847_s3, 1024, %s1522_s13, [#allocation9], %s1838_s17, %s1838_s17, %s1420_s18  }
  0x4b   : > { %s1178_s10 = scalar_lea.hbm %s1831_s5, 1024 }
  0x4c   : > { %p1179_p7 = scmp.ne.s32.totalorder %s1831_s5, %s1178_s10  ;;  %p1185_p1 = scmp.lt.u32.totalorder %s1178_s10, %s1831_s5 }
  0x4e   : > { %p1181_p9 = pnand %p1179_p7, %p1534_p8 }
  0x50   : > { %p1182_p4 = pneg %p1181_p9 }
  0x52   : > { %p1187_p3 = pnand %p1185_p1, %p1182_p4 }
  0x54   : > { %1190 = shalt.err (!%p1187_p3)
}
  0x55   : > { %s1191_s19 = scalar_lea.vmem %s284_s16, 1024  ;;  %p1199_p13 = scmp.lt.s32.totalorder %s284_s16, %s284_s16 }
  0x56   : > { %p1192_p10 = scmp.ne.s32.totalorder %s284_s16, %s1191_s19  ;;  %p1200_p0 = scmp.lt.s32.totalorder %s1191_s19, %s1191_s19 }
  0x58   : > { %p1194_p11 = pnand %p1192_p10, %p1534_p8  ;;  %p1201_p2 = por %p1200_p0, %p1199_p13 }
  0x5a   : > { %p1195_p12 = pneg %p1194_p11 }
  0x5c   : > { %p1202_p5 = pnand %p1201_p2, %p1195_p12 }
  0x5e   : > { %1205 = shalt.err (!%p1202_p5)
}
  0x5f   : > { %1008 = dma.hbm_to_vmem [thread:$0]  (!%p1518_p6), %s1831_s5, 1024, %s284_s16, [#allocation12], %s1838_s17, %s1838_s17, %s1420_s18  }
  0x60   : > { %s1421_s20 = smov [#allocation7]   ;;  %s1422_s23 = smov [#allocation10]  }
  0x61   : > { %s249_s21 = sshll.u32 %s1421_s20, 4  ;;  %s273_s10 = sshll.u32 %s1422_s23, 4  ;;  %s250_s21 = int_to_ptr.vmem [resolvable:$true] %s249_s21  ;;  %s274_s10 = int_to_ptr.vmem [resolvable:$true] %s273_s10 }
  0x62   : > { %s1206_s11 = scalar_lea.hbm %s1828_s2, 16 }
  0x63   : > { %p1207_p7 = scmp.ne.s32.totalorder %s1828_s2, %s1206_s11  ;;  %p1213_p1 = scmp.lt.u32.totalorder %s1206_s11, %s1828_s2 }
  0x65   : > { %p1209_p9 = pnand %p1207_p7, %p1534_p8 }
  0x67   : > { %p1210_p4 = pneg %p1209_p9 }
  0x69   : > { %p1215_p3 = pnand %p1213_p1, %p1210_p4 }
  0x6b   : > { %1218 = shalt.err (!%p1215_p3)
}
  0x6c   : > { %s1219_s16 = scalar_lea.vmem %s250_s21, 16  ;;  %s1226_s13 = scalar_lea.vmem %s250_s21, 32 }
  0x6d   : > { %p1220_p10 = scmp.ne.s32.totalorder %s250_s21, %s1219_s16  ;;  %p1227_p13 = scmp.lt.s32.totalorder %s250_s21, %s250_s21 }
  0x6e   : > { %p1228_p0 = scmp.lt.s32.totalorder %s1226_s13, %s1219_s16 }
  0x6f   : > { %p1222_p11 = pnand %p1220_p10, %p1534_p8 }
  0x70   : > { %p1229_p2 = por %p1228_p0, %p1227_p13 }
  0x71   : > { %p1223_p12 = pneg %p1222_p11 }
  0x73   : > { %p1230_p5 = pnand %p1229_p2, %p1223_p12 }
  0x75   : > { %1233 = shalt.err (!%p1230_p5)
}
  0x76   : > { %999 = dma.hbm_to_vmem [thread:$0]  (!%p1518_p6), %s1828_s2, 16, %s250_s21, [#allocation6]  }
  0x77   : > { %s1234_s12 = scalar_lea.hbm %s1830_s4, 16 }
  0x78   : > { %p1235_p7 = scmp.ne.s32.totalorder %s1830_s4, %s1234_s12  ;;  %p1241_p1 = scmp.lt.u32.totalorder %s1234_s12, %s1830_s4 }
  0x7a   : > { %p1237_p9 = pnand %p1235_p7, %p1534_p8 }
  0x7c   : > { %p1238_p4 = pneg %p1237_p9 }
  0x7e   : > { %p1243_p3 = pnand %p1241_p1, %p1238_p4 }
  0x80   : > { %1246 = shalt.err (!%p1243_p3)
}
  0x81   : > { %s1247_s16 = scalar_lea.vmem %s274_s10, 16  ;;  %s1254_s21 = scalar_lea.vmem %s274_s10, 32 }
  0x82   : > { %p1248_p10 = scmp.ne.s32.totalorder %s274_s10, %s1247_s16  ;;  %p1255_p13 = scmp.lt.s32.totalorder %s274_s10, %s274_s10 }
  0x83   : > { %p1256_p0 = scmp.lt.s32.totalorder %s1254_s21, %s1247_s16 }
  0x84   : > { %p1250_p11 = pnand %p1248_p10, %p1534_p8 }
  0x85   : > { %p1257_p2 = por %p1256_p0, %p1255_p13 }
  0x86   : > { %p1251_p12 = pneg %p1250_p11 }
  0x88   : > { %p1258_p5 = pnand %p1257_p2, %p1251_p12 }
  0x8a   : > { %1261 = shalt.err (!%p1258_p5)
}
  0x8b   : > { %1005 = dma.hbm_to_vmem [thread:$0]  (!%p1518_p6), %s1830_s4, 16, %s274_s10, [#allocation9]  }
  0x8c   : > { %s1423_s20 = smov [#allocation13]   ;;  %s1262_s15 = scalar_lea.hbm %s1832_s6, 16 }
  0x8d   : > { %s297_s3 = sshll.u32 %s1423_s20, 4  ;;  %p1263_p7 = scmp.ne.s32.totalorder %s1832_s6, %s1262_s15  ;;  %s298_s3 = int_to_ptr.vmem [resolvable:$true] %s297_s3 }
  0x8e   : > { %p1269_p1 = scmp.lt.u32.totalorder %s1262_s15, %s1832_s6 }
  0x8f   : > { %p1265_p9 = pnand %p1263_p7, %p1534_p8 }
  0x91   : > { %p1266_p4 = pneg %p1265_p9 }
  0x93   : > { %p1271_p3 = pnand %p1269_p1, %p1266_p4 }
  0x95   : > { %1274 = shalt.err (!%p1271_p3)
}
  0x96   : > { %s1275_s10 = scalar_lea.vmem %s298_s3, 16  ;;  %s1282_s21 = scalar_lea.vmem %s298_s3, 32 }
  0x97   : > { %p1276_p10 = scmp.ne.s32.totalorder %s298_s3, %s1275_s10  ;;  %p1283_p13 = scmp.lt.s32.totalorder %s298_s3, %s298_s3 }
  0x98   : > { %p1284_p0 = scmp.lt.s32.totalorder %s1282_s21, %s1275_s10 }
  0x99   : > { %p1278_p11 = pnand %p1276_p10, %p1534_p8 }
  0x9a   : > { %p1285_p2 = por %p1284_p0, %p1283_p13 }
  0x9b   : > { %p1279_p12 = pneg %p1278_p11 }
  0x9d   : > { %p1286_p5 = pnand %p1285_p2, %p1279_p12 }
  0x9f   : > { %1289 = shalt.err (!%p1286_p5)
}
  0xa0   : > { %1011 = dma.hbm_to_vmem [thread:$0]  (!%p1518_p6), %s1832_s6, 16, %s298_s3, [#allocation12]  }
  0xa1   : > { %s848_s22 = sadd.s32 4294967294, %s1414_s29   ;;  %s38_s20 = sadd.s32 1, %s1410_s28 }
  0xa2   : > { %p40_p8 = scmp.ge.s32.totalorder %s38_s20, 2  ;;  %s47_s14 = sadd.s32 1, %s1402_s26 }
  0xa3   : > { %p54_p7 = scmp.ne.s32.totalorder %s1402_s26, %s1398_s25  ;;  %p55_p9 = scmp.eq.s32.totalorder %s1414_s29, 0 }
  0xa4   : > { %s1867_s20 = smov (%p40_p8, %s38_s20), 0  ;;  %p60_p1 = scmp.ne.s32.totalorder %s1398_s25, %s1394_s24 }
  0xa5   : > { %p1660_p4 = por %p55_p9, %p54_p7  ;;  %s42_s3 = ssub.s32 %s1410_s28, %s1867_s20 }
  0xa6   : > { %s1849_s12 = sadd.s32 4294967295, %s1414_s29   ;;  %p45_p3 = scmp.eq.s32.totalorder %s42_s3, 0 }
  0xa7   : > { %p212_p6 = scmp.eq.s32.totalorder %s1849_s12, 1  ;;  %p1850_p10 = scmp.ne.s32.totalorder %s1842_s8, 0 }
  0xa8   : > { %p218_p13 = scmp.eq.s32.totalorder %s848_s22, 1  ;;  %p1026_p2 = scmp.lt.s32.totalorder %s1414_s29, 2 }
  0xa9   : > { %p1672_p11 = por %p1850_p10, %p60_p1  ;;  %p1676_p12 = por %p212_p6, %p54_p7 }
  0xaa   : > { %s1681_s19 = scalar_select %p45_p3, %s1402_s26, %s47_s14  }
  0xab   : > { %s1852_s11 = scalar_select %p1676_p12, 1, 0 }
  0xac   : > { %p1683_p0 = por %p218_p13, %p60_p1  ;;  %s308_s16 = sand.u32 1, %s1402_s26  }
  0xad   : > { %s894_s10 = sshll.u32 %s1410_s28, 7  ;;  %s857_s21 = sshll.u32 %s308_s16, 3 }
  0xae   : > { %s1853_s30 = scalar_select %p1683_p0, 1, 0 }
  0xaf   : > { %s1693_s3 = scalar_lea.hbm %s1826_s0, %s894_s10  ;;  %s312_s22 = scalar_lea.vmem [#allocation2], %s857_s21 }
  0xb0   : > { %s321_s14 = sshll.u32 %s312_s22, 4  ;;  %p1697_p5 = pnand %p1026_p2, %p1660_p4  ;;  %s1701_s14 = int_to_ptr.vmem [resolvable:$true] %s321_s14 }
  0xb1   : > { %s1703_s17 = scalar_lea.sflag [#allocation3], %s308_s16  ;;  %s1290_s13 = scalar_lea.hbm %s1693_s3, 128 }
  0xb2   : > { %p1291_p8 = scmp.ne.s32.totalorder %s1693_s3, %s1290_s13  ;;  %p1292_p7 = pneg %p1697_p5 }
  0xb3   : > { %s1295_s21 = scalar_lea.hbm %s1826_s0, 256  ;;  %p1296_p4 = scmp.lt.u32.totalorder %s1693_s3, %s1826_s0 }
  0xb4   : > { %p1293_p9 = pnand %p1292_p7, %p1291_p8  ;;  %p1297_p6 = scmp.lt.u32.totalorder %s1295_s21, %s1290_s13 }
  0xb5   : > { %p1299_p10 = scmp.lt.u32.totalorder %s1290_s13, %s1693_s3 }
  0xb6   : > { %p1294_p1 = pneg %p1293_p9  ;;  %p1298_p3 = por %p1297_p6, %p1296_p4 }
  0xb8   : > { %p1300_p13 = por %p1299_p10, %p1298_p3 }
  0xba   : > { %p1301_p2 = pnand %p1300_p13, %p1294_p1 }
  0xbc   : > { %1304 = shalt.err (!%p1301_p2)
}
  0xbd   : > { %s1305_s16 = scalar_lea.vmem %s1701_s14, 128  ;;  %s1424_s10 = smov [#allocation2]  }
  0xbe   : > { %p1306_p8 = scmp.ne.s32.totalorder %s1701_s14, %s1305_s16  ;;  %s1310_s23 = sshll.u32 %s1424_s10, 4  ;;  %s1311_s23 = int_to_ptr.vmem [resolvable:$false] %s1310_s23 }
  0xbf   : > { %s1312_s1 = scalar_lea.vmem %s1311_s23, 256  ;;  %p1313_p12 = scmp.lt.s32.totalorder %s1701_s14, %s1311_s23 }
  0xc0   : > { %p1308_p9 = pnand %p1306_p8, %p1292_p7  ;;  %p1314_p4 = scmp.lt.s32.totalorder %s1312_s1, %s1305_s16 }
  0xc2   : > { %p1309_p0 = pneg %p1308_p9  ;;  %p1315_p6 = por %p1314_p4, %p1313_p12 }
  0xc4   : > { %p1316_p3 = pnand %p1315_p6, %p1309_p0 }
  0xc6   : > { %1319 = shalt.err (!%p1316_p3)
}
  0xc7   : > { %s1855_s13 = smov 64   ;;  %p1856_p7 = scmp.ne.s32.totalorder %s1843_s9, 0 }
  0xc8   : > { %1015 = dma.hbm_to_vmem [thread:$0]  (!%p1697_p5), %s1693_s3, 128, %s1701_s14, %s1703_s17, %s1855_s13, %s1855_s13, %s1420_s18  }
  0xc9   : > { %333 = sbr.rel (%p1856_p7) target bundleno = 797 (0x31d), region = 48  ;;  %s1737_s21 = sand.u32 (!%p1856_p7), 1, %s1398_s25  }
  0xca   : > { %s861_s22 = sshll.u32 (!%p1856_p7), %s1737_s21, 3  ;;  %s336_s16 = scalar_lea.sflag (!%p1856_p7), [#allocation3], %s1737_s21 }
  0xcb   : > { %s339_s12 = scalar_lea.vmem (!%p1856_p7), [#allocation2], %s861_s22 }
  0xd0   : > { %1373 = dma.done.wait (%p1672_p11), %s336_s16, 128  }
  0xd1   : > { %1375 = vsyncadd (%p1672_p11), %s336_s16, 4294967168  ;;  %p1857_p12 = scmp.ne.s32.totalorder %s1842_s8, 0 }
  0xd3   : > { %1377 = dma.done.wait (%p1857_p12), [#allocation6], 32  }
  0xd4   : > { %1379 = vsyncadd (%p1857_p12), [#allocation6], 4294967264 }
  0xd5   : > { %1381 = dma.done.wait (%p1857_p12), [#allocation9], 1040  }
  0xd6   : > { %1383 = vsyncadd (%p1857_p12), [#allocation9], 4294966256 }
  0xd7   : > { %1385 = dma.done.wait (%p1857_p12), [#allocation12], 1040  }
  0xd8   : > { %1387 = vsyncadd (%p1857_p12), [#allocation12], 4294966256  ;;  %v899_v0 = vld [vmem:[%s339_s12] sm:$0xff]   ;;  %v1094_v3 = vld [vmem:[#allocation8] sm:$0xff]   ;;  %v1425_v5 = vmov 0.0   ;;  %vm1426_vm0 = vmmov 0   ;;  %v428_v32 = vlaneseq }
  0xd9   : > { %v900_v1 = vunpack.c.l.bf16 %v899_v0  ;;  %v901_v2 = vunpack.c.h.bf16 %v899_v0  ;;  %v1095_v4 = vld [vmem:[#allocation11] sm:$0xff]   ;;  %925 = vmatprep.subr.bf16.mxu0 %v1425_v5  ;;  %945 = vmatprep.subr.bf16.mxu1 %v1425_v5  ;;  %v1097_v15 = vld [vmem:[#allocation11 + $0x8] sm:$0xff]   ;;  %v1099_v17 = vld [vmem:[#allocation11 + $0x10] sm:$0xff]   ;;  %s897_s8 = sshll.u32 %s1406_s27, 7  ;;  %s393_s9 = scalar_lea.vmem [#allocation14], %s861_s22 }
  0xda   : > { %926 = vmatpush3.bf16.msra.mxu0 %v1094_v3  ;;  %946 = vmatpush3.bf16.msra.mxu1 %v1095_v4  ;;  %v1096_v14 = vld [vmem:[#allocation8 + $0x8] sm:$0xff]   ;;  %v1098_v16 = vld [vmem:[#allocation8 + $0x10] sm:$0xff]   ;;  %v1100_v18 = vld [vmem:[#allocation8 + $0x18] sm:$0xff]   ;;  %v429_v35 = vshrl.u32 %v428_v32, 7  ;;  %s703_s17 = sshll.u32 %s393_s9, 4  ;;  %s1775_s3 = scalar_lea.hbm %s1833_s7, %s897_s8  ;;  %s1777_s17 = int_to_ptr.vmem [resolvable:$true] %s703_s17 }
  0xdb   : > { %405 = vadd.xlane.f32.xlu0 %v900_v1  ;;  %927 = vmatprep.subr.bf16.mxu0 %v1425_v5  ;;  %v1101_v19 = vld [vmem:[#allocation11 + $0x18] sm:$0xff]   ;;  %v1103_v21 = vld [vmem:[#allocation11 + $0x20] sm:$0xff]   ;;  %v1105_v23 = vld [vmem:[#allocation11 + $0x28] sm:$0xff]   ;;  %s688_s14 = scalar_lea.sflag [#allocation4], %s1737_s21  ;;  %s1320_s10 = scalar_lea.vmem %s1777_s17, 128 }
  0xdc   : > { %947 = vmatprep.subr.bf16.mxu1 %v1425_v5  ;;  %v1102_v20 = vld [vmem:[#allocation8 + $0x20] sm:$0xff]   ;;  %941 = vmatprep.mubr.msk.bf16.mxu0 %vm1426_vm0, %v1425_v5  ;;  %v1104_v22 = vld [vmem:[#allocation8 + $0x28] sm:$0xff]   ;;  %v1106_v24 = vld [vmem:[#allocation8 + $0x30] sm:$0xff]   ;;  %v430_v38 = vsub.s32 0, %v429_v35  ;;  %p1321_p11 = scmp.ne.s32.totalorder %s1777_s17, %s1320_s10  ;;  %p1858_p0 = scmp.ne.s32.totalorder %s1852_s11, 0 }
  0xdd   : > { %961 = vmatprep.mubr.msk.bf16.mxu1 %vm1426_vm0, %v1425_v5  ;;  %v1107_v25 = vld [vmem:[#allocation11 + $0x30] sm:$0xff]   ;;  %v1109_v27 = vld [vmem:[#allocation11 + $0x38] sm:$0xff]   ;;  %v568_v52 = vld [vmem:[#allocation13] sm:$0x1]  ;;  %s1427_s27 = smov [#allocation14]  }
  0xde   : > { %928 = vmatpush3.bf16.msra.mxu0 %v1096_v14  ;;  %948 = vmatpush3.bf16.msra.mxu1 %v1097_v15  ;;  %v1108_v26 = vld [vmem:[#allocation8 + $0x38] sm:$0xff]   ;;  %v569_v53 = vunpack.c.l.bf16 %v568_v52  ;;  %v457_v4 = vld [vmem:[#allocation10] sm:$0x1]  ;;  %p1322_p5 = pnand %p1321_p11, %p1858_p0  ;;  %s1324_s23 = sshll.u32 %s1427_s27, 4  ;;  %s1325_s23 = int_to_ptr.vmem [resolvable:$false] %s1324_s23 }
  0xdf   : > { %407 = vadd.xlane.f32.xlu0 %v901_v2  ;;  %929 = vmatprep.subr.bf16.mxu0 %v1425_v5  ;;  %v401_v36 = vld [vmem:[#allocation5] sm:$0x1]  ;;  %v403_v39 = vld [vmem:[#allocation7] sm:$0x1]  ;;  %s1326_s1 = scalar_lea.vmem %s1325_s23, 256  ;;  %p1327_p10 = scmp.lt.s32.totalorder %s1777_s17, %s1325_s23 }
  0xe0   : > { %949 = vmatprep.subr.bf16.mxu1 %v1425_v5  ;;  %v402_v37 = vunpack.c.l.bf16 %v401_v36  ;;  %v404_v41 = vunpack.c.l.bf16 %v403_v39  ;;  %v573_v54 = vrot.slane %v569_v53, %v430_v38  ;;  %p1323_p1 = pneg %p1322_p5  ;;  %p1328_p13 = scmp.lt.s32.totalorder %s1326_s1, %s1320_s10 }
  0xe2   : > { %930 = vmatpush3.bf16.msra.mxu0 %v1098_v16  ;;  %950 = vmatpush3.bf16.msra.mxu1 %v1099_v17  ;;  %v431_v43 = vrot.slane %v402_v37, %v430_v38  ;;  %v437_v47 = vrot.slane %v404_v41, %v430_v38  ;;  %p1329_p2 = por %p1328_p13, %p1327_p10 }
  0xe3   : > { %931 = vmatprep.subr.bf16.mxu0 %v1425_v5  ;;  %951 = vmatprep.subr.bf16.mxu1 %v1425_v5 }
  0xe4   : > { %p1330_p8 = pnand %p1329_p2, %p1323_p1 }
  0xe6   : > { %932 = vmatpush3.bf16.msra.mxu0 %v1100_v18  ;;  %952 = vmatpush3.bf16.msra.mxu1 %v1101_v19 }
  0xe7   : > { %933 = vmatprep.subr.bf16.mxu0 %v1425_v5  ;;  %953 = vmatprep.subr.bf16.mxu1 %v1425_v5 }
  0xea   : > { %934 = vmatpush3.bf16.msra.mxu0 %v1102_v20  ;;  %954 = vmatpush3.bf16.msra.mxu1 %v1103_v21 }
  0xeb   : > { %935 = vmatprep.subr.bf16.mxu0 %v1425_v5  ;;  %955 = vmatprep.subr.bf16.mxu1 %v1425_v5 }
  0xee   : > { %936 = vmatpush3.bf16.msra.mxu0 %v1104_v22  ;;  %956 = vmatpush3.bf16.msra.mxu1 %v1105_v23 }
  0xef   : > { %937 = vmatprep.subr.bf16.mxu0 %v1425_v5  ;;  %957 = vmatprep.subr.bf16.mxu1 %v1425_v5 }
  0xf2   : > { %938 = vmatpush3.bf16.msra.mxu0 %v1106_v24  ;;  %958 = vmatpush3.bf16.msra.mxu1 %v1107_v25 }
  0xf3   : > { %939 = vmatprep.subr.bf16.mxu0 %v1425_v5  ;;  %959 = vmatprep.subr.bf16.mxu1 %v1425_v5 }
  0xf6   : > { %940 = vmatpush3.bf16.msra.mxu0 %v1108_v26  ;;  %960 = vmatpush3.bf16.msra.mxu1 %v1109_v27 }
 0x168   : > { %v406_v6 = vpop.xlane.xlu0 %405 }
 0x169   : > { %v410_v7 = vmul.f32 0.0078125, %v406_v6 }
 0x16b   : > { %v1759_v8 = vsub.f32 %v900_v1, %v410_v7 }
 0x16c   : > { %v408_v9 = vpop.xlane.xlu0 %407 }
 0x16d   : > { %v411_v10 = vmul.f32 0.0078125, %v408_v9  ;;  %v414_v11 = vmul.f32 %v1759_v8, %v1759_v8 }
 0x16f   : > { %v1763_v12 = vsub.f32 %v901_v2, %v411_v10  ;;  %416 = vadd.xlane.f32.xlu1 %v414_v11 }
 0x171   : > { %v415_v13 = vmul.f32 %v1763_v12, %v1763_v12 }
 0x173   : > { %418 = vadd.xlane.f32.xlu1 %v415_v13 }
 0x1fc   : > { %v417_v28 = vpop.xlane.xlu1 %416 }
 0x1fd   : > { %v420_v29 = vmul.f32 0.0078125, %v417_v28 }
 0x1ff   : > { %v422_v30 = vadd.f32 1e-12, %v420_v29 }
 0x200   : > { %v419_v31 = vpop.xlane.xlu1 %418 }
 0x201   : > { %1110 = vrsqrt.f32 %v422_v30  ;;  %v421_v33 = vmul.f32 0.0078125, %v419_v31 }
 0x203   : > { %v423_v34 = vadd.f32 1e-12, %v421_v33 }
 0x205   : > { %1112 = vrsqrt.f32 %v423_v34 }
 0x20b   : > { %v1111_v40 = vpop.eup %1110 }
 0x20c   : > { %v426_v42 = vmul.f32 %v1111_v40, %v1759_v8  ;;  %v458_v8 = vunpack.c.l.bf16 %v457_v4 }
 0x20e   : > { %v432_v46 = vmul.f32 %v431_v43, %v426_v42  ;;  %v462_v9 = vrot.slane %v458_v8, %v430_v38 }
 0x20f   : > { %v1113_v44 = vpop.eup %1112 }
 0x210   : > { %v427_v45 = vmul.f32 %v1113_v44, %v1763_v12  ;;  %v438_v49 = vadd.f32 %v437_v47, %v432_v46 }
 0x212   : > { %v433_v48 = vmul.f32 %v431_v43, %v427_v45 }
 0x214   : > { %v439_v50 = vadd.f32 %v437_v47, %v433_v48 }
 0x216   : > { %v440_v51 = vpack.c.bf16 %v439_v50, %v438_v49 }
 0x218   : > { %942 = vmatmul.mubr.bf16.vlgmr.msra.gmra.mrb[0].mxu0 %v440_v51  ;;  %962 = vmatmul.mubr.bf16.vlgmr.msra.gmra.mrb[0].mxu1 %v440_v51 }
 0x2eb   : > { %v545_v55 = vpop.f32.mrb[0].mxu0  ;;  %v656_v56 = vpop.f32.mrb[0].mxu1 }
 0x2ec   : > { %v657_v57 = vadd.f32 %v656_v56, %v573_v54  ;;  %v943_v58 = vpop.f32.mrb[1].mxu0  ;;  %v963_v59 = vpop.f32.mrb[1].mxu1  ;;  %v546_v10 = vadd.f32 %v545_v55, %v462_v9 }
 0x2ed   : > { %v548_v60 = vpop.f32.mrb[2].mxu0  ;;  %v659_v61 = vpop.f32.mrb[2].mxu1 }
 0x2ee   : > { %v885_v62 = vmul.f32 -1.442695, %v657_v57  ;;  %v660_v63 = vadd.f32 %v659_v61, %v573_v54  ;;  %v944_v0 = vpop.f32.mrb[3].mxu0  ;;  %v964_v1 = vpop.f32.mrb[3].mxu1  ;;  %v549_v13 = vadd.f32 %v548_v60, %v462_v9 }
 0x2f0   : > { %1114 = vpow2.f32 %v885_v62  ;;  %v886_v2 = vmul.f32 -1.442695, %v660_v63 }
 0x2f2   : > { %1116 = vpow2.f32 %v886_v2 }
 0x2fa   : > { %v1115_v3 = vpop.eup %1114 }
 0x2fb   : > { %v669_v5 = vadd.f32 1.0, %v1115_v3 }
 0x2fc   : > { %v1117_v6 = vpop.eup %1116 }
 0x2fd   : > { %1118 = vrcp.f32 %v669_v5  ;;  %v670_v7 = vadd.f32 1.0, %v1117_v6 }
 0x2ff   : > { %1120 = vrcp.f32 %v670_v7 }
 0x307   : > { %v1119_v11 = vpop.eup %1118 }
 0x308   : > { %v675_v12 = vmul.f32 %v1119_v11, %v546_v10 }
 0x309   : > { %v1121_v14 = vpop.eup %1120 }
 0x30a   : > { %v676_v15 = vmul.f32 %v1121_v14, %v549_v13 }
 0x30c   : > { %v905_v16 = vpack.c.bf16 %v676_v15, %v675_v12 }
 0x30e   : > { %906 = vst [vmem:[%s393_s9] sm:$0xff] %v905_v16  }
 0x30f   : > { %1333 = shalt.err (!%p1330_p8)
}
 0x310   : > { %s1334_s13 = scalar_lea.hbm %s1775_s3, 128  ;;  %s1338_s12 = scalar_lea.hbm %s1833_s7, 256 }
 0x311   : > { %p1335_p9 = scmp.ne.s32.totalorder %s1775_s3, %s1334_s13  ;;  %p1339_p3 = scmp.lt.u32.totalorder %s1775_s3, %s1833_s7 }
 0x312   : > { %p1340_p7 = scmp.lt.u32.totalorder %s1338_s12, %s1334_s13  ;;  %p1342_p11 = scmp.lt.u32.totalorder %s1334_s13, %s1775_s3 }
 0x313   : > { %p1336_p4 = pnand %p1335_p9, %p1858_p0 }
 0x314   : > { %p1341_p12 = por %p1340_p7, %p1339_p3 }
 0x315   : > { %p1337_p6 = pneg %p1336_p4 }
 0x316   : > { %p1343_p5 = por %p1342_p11, %p1341_p12 }
 0x318   : > { %p1344_p1 = pnand %p1343_p5, %p1337_p6 }
 0x31a   : > { %1347 = shalt.err (!%p1344_p1)
}
 0x31b   : > { %s1428_s18 = smov 64   ;;  %s1429_s15 = smov 4  }
 0x31c   : > { %991 = dma.vmem_to_hbm [thread:$0]  (%p1858_p0), %s1777_s17, 128, %s1775_s3, %s688_s14, %s1428_s18, %s1428_s18, %s1429_s15  }
 0x31d PF: > { %s718_s10 = sand.u32 1, %s1394_s24   ;;  %p1859_p10 = scmp.ne.s32.totalorder %s1853_s30, 0 }
 0x31e   : > { %p1860_p13 = scmp.ge.s32.totalorder %s1414_s29, 2  ;;  %s719_s27 = scalar_lea.sflag [#allocation4], %s718_s10 }
 0x320   : > { %p1017_p2 = pnand %p1860_p13, %p1859_p10 }
 0x322   : > { %1389 = dma.done.wait (!%p1017_p2), %s719_s27, 128  }
 0x323   : > { %1391 = vsyncadd (!%p1017_p2), %s719_s27, 4294967168  ;;  %s26_s29 = sadd.s32 1, %s1414_s29   ;;  %s1861_s24 = smov %s1398_s25 }
 0x324   : > { %p23_p8 = scmp.ge.s32.totalorder %s26_s29, 4   ;;  %s1862_s25 = smov %s1402_s26 }
 0x325   : > { %s1863_s26 = smov %s1681_s19  ;;  %s1864_s27 = smov %s1410_s28 }
 0x326   : > { %s1865_s28 = smov %s1867_s20  ;;  %25 = sbr.rel (!%p23_p8) target bundleno = 12 (0xc), region = 117 }
 0x32d   :  { %724 = vsyncpa [#allocation3], 1 }
 0x32e   :  { %726 = vsyncpa [#allocation3 + $0x1], 1 }
 0x32f   :  { %727 = vsyncpa [#allocation6], 1 }
 0x330   :  { %728 = vsyncpa [#allocation9], 1 }
 0x331   :  { %729 = vsyncpa [#allocation12], 1 }
 0x332   :  { %730 = vsyncpa [#allocation4], 1 }
 0x333   :  { %732 = vsyncpa [#allocation4 + $0x1], 1 }

// kernel: conformer_forward.36
= control target key start
LH: loop header
LB: loop body
LE: loop exit
PB: predicated region body
PF: predicated region fallthrough
CT: control target
= control target key end

     0   :  { %s2359_s0 = inlined_call_operand.hbm [shape: bf16[2,16,128], index: 0, kind: input, shape index: {}, may-alias: {0,1,2}]   ;;  %s2360_s1 = inlined_call_operand.hbm [shape: bf16[2,16,128], index: 1, kind: input, shape index: {}, may-alias: {0,1,2}]   ;;  %s2361_s2 = inlined_call_operand.hbm [shape: bf16[2,16,128], index: 2, kind: input, shape index: {}, may-alias: {0,1,2}]   ;;  %s2362_s3 = inlined_call_operand.hbm [shape: bf16[15,128], index: 3, kind: input, shape index: {}]   ;;  %s2363_s4 = inlined_call_operand.hbm [shape: f32[1,128], index: 4, kind: input, shape index: {}]   ;;  %s2364_s5 = inlined_call_operand.hbm [shape: f32[1,128], index: 5, kind: input, shape index: {}]   ;;  %s2365_s6 = inlined_call_operand.hbm [shape: bf16[128,128], index: 6, kind: input, shape index: {}]   ;;  %s2366_s7 = inlined_call_operand.hbm [shape: bf16[1,128], index: 7, kind: input, shape index: {}]   ;;  %s2367_s8 = inlined_call_operand.hbm [shape: bf16[2,16,128], index: 8, kind: input, shape index: {}]   ;;  %s2368_s9 = inlined_call_operand.hbm [shape: bf16[2,16,128], index: 9, kind: output, shape index: {}]  }
   0x1   :  { %2398 = sst [smem:[#allocation36_spill]] %s2359_s0 }
   0x2   :  { %2399 = sst [smem:[#allocation37_spill]] %s2360_s1 }
   0x3   :  { %2400 = sst [smem:[#allocation38_spill]] %s2362_s3 }
   0x4   :  { %2401 = sst [smem:[#allocation39_spill]] %s2364_s5 }
   0x5   :  { %2402 = sst [smem:[#allocation40_spill]] %s2368_s9 }
   0x6   :  { %14 = vsyncpa [#allocation4], 0 }
   0x7   :  { %16 = vsyncpa [#allocation4 + $0x1], 0 }
   0x8   :  { %17 = vsyncpa [#allocation7], 0 }
   0x9   :  { %19 = vsyncpa [#allocation7 + $0x1], 0 }
   0xa   :  { %20 = vsyncpa [#allocation10], 0 }
   0xb   :  { %21 = vsyncpa [#allocation13], 0 }
   0xc   :  { %22 = vsyncpa [#allocation16], 0 }
   0xd   :  { %23 = vsyncpa [#allocation5], 0 }
   0xe   :  { %25 = vsyncpa [#allocation5 + $0x1], 0  ;;  %s1836_s30 = smov 0   ;;  %s1838_s10 = smov 0  }
   0xf   :  { %s1840_s11 = smov 0   ;;  %s1842_s12 = smov 0  }
  0x10   :  { %s1844_s13 = smov 0   ;;  %s1846_s14 = smov 0  }
  0x11 LB: > { %2403 = sst [smem:[#allocation26_spill]] %s1748_s30  ;;  %s1867_s15 = sadd.s32 4294967295, %s1768_s14   ;;  %s1768_s14 = sphi %s1846_s14, %s31_s14   ;;  %s1764_s13 = sphi %s1844_s13, %s2456_s13   ;;  %s1760_s12 = sphi %s1842_s12, %s2455_s12   ;;  %s1756_s11 = sphi %s1840_s11, %s2454_s11   ;;  %s1752_s10 = sphi %s1838_s10, %s2453_s10   ;;  %s1748_s30 = sphi %s1836_s30, %s2452_s30  }
  0x12   : > { %2404 = sst [smem:[#allocation27_spill]] %s1752_s10  ;;  %s1153_s16 = sadd.s32 4294967294, %s1768_s14  }
  0x13   : > { %2405 = sst [smem:[#allocation28_spill]] %s1756_s11  ;;  %p71_p0 = scmp.ne.s32.totalorder %s1752_s10, %s1748_s30 }
  0x14   : > { %2406 = sst [smem:[#allocation29_spill]] %s1760_s12  ;;  %p2369_p1 = scmp.eq.s32.totalorder %s1867_s15, 0 }
  0x15   : > { %2407 = sst [smem:[#allocation30_spill]] %s1764_s13  ;;  %p298_p3 = scmp.eq.s32.totalorder %s1153_s16, 1 }
  0x16   : > { %p1876_p4 = por %p2369_p1, %p71_p0  ;;  %p1154_p5 = scmp.ge.s32.totalorder %s1768_s14, 1 }
  0x17   : > { %p1881_p6 = por %p298_p3, %p71_p0  ;;  %p305_p7 = scmp.lt.s32.totalorder %s1768_s14, 3 }
  0x18   : > { %s2408_s17 = scalar_select %p1876_p4, 1, 0 }
  0x19   : > { %s2410_s18 = scalar_select %p1881_p6, 1, 0 }
  0x1a   : > { %2409 = sst [smem:[#allocation31_spill]] %s2408_s17  ;;  %p1886_p8 = pnand %p1154_p5, %p305_p7 }
  0x1b   : > { %2411 = sst [smem:[#allocation32_spill]] %s2410_s18  ;;  %s1770_s20 = smov [#allocation9]  }
  0x1c   : > { %s2412_s19 = scalar_select %p1886_p8, 1, 0 }
  0x1d   : > { %s317_s21 = sshll.u32 %s1770_s20, 4  ;;  %p1286_p9 = pneg %p1886_p8  ;;  %s1890_s21 = int_to_ptr.vmem [resolvable:$true] %s317_s21 }
  0x1e   : > { %s1771_s23 = smov [#allocation12]   ;;  %s2414_s3 = sld [smem:[#allocation38_spill]] }
  0x1f   : > { %p1897_p11 = pnand %p1286_p9, %p2369_p1  ;;  %s342_s24 = sshll.u32 %s1771_s23, 4  ;;  %s1901_s24 = int_to_ptr.vmem [resolvable:$true] %s342_s24 }
  0x21   : > { %s2413_s22 = scalar_select %p1897_p11, 1, 0 }
  0x22   : > { %p1911_p13 = pneg %p1897_p11 }
  0x24   : > { %s1406_s27 = scalar_lea.hbm %s2414_s3, 128 }
  0x25   : > { %p1407_p12 = scmp.ne.s32.totalorder %s2414_s3, %s1406_s27  ;;  %p1413_p5 = scmp.lt.u32.totalorder %s1406_s27, %s2414_s3 }
  0x26   : > { %s2415_s16 = scalar_select %p1911_p13, 1, 0 }
  0x27   : > { %p1409_p0 = pnand %p1911_p13, %p1407_p12 }
  0x29   : > { %p1410_p3 = pneg %p1409_p0 }
  0x2b   : > { %p1415_p7 = pnand %p1413_p5, %p1410_p3 }
  0x2d   : > { %1418 = shalt.err (!%p1415_p7)
}
  0x2e   : > { %s1419_s25 = scalar_lea.vmem %s1890_s21, 128  ;;  %p1427_p2 = scmp.lt.s32.totalorder %s1890_s21, %s1890_s21 }
  0x2f   : > { %p1420_p9 = scmp.ne.s32.totalorder %s1890_s21, %s1419_s25  ;;  %p1428_p6 = scmp.lt.s32.totalorder %s1419_s25, %s1419_s25 }
  0x31   : > { %p1422_p10 = pnand %p1420_p9, %p1911_p13  ;;  %p1429_p12 = por %p1428_p6, %p1427_p2 }
  0x33   : > { %p1423_p1 = pneg %p1422_p10 }
  0x35   : > { %p1430_p0 = pnand %p1429_p12, %p1423_p1 }
  0x37   : > { %1433 = shalt.err (!%p1430_p0)
}
  0x38   : > { %s2373_s26 = smov 64   ;;  %s2375_s27 = smov 4  }
  0x39   : > { %1289 = dma.hbm_to_vmem [thread:$0]  (!%p1897_p11), %s2414_s3, 128, %s1890_s21, [#allocation10], %s2373_s26, %s2373_s26, %s2375_s27  }
  0x3a   : > { %s2416_s5 = sld [smem:[#allocation39_spill]] }
  0x40   : > { %s1434_s25 = scalar_lea.hbm %s2416_s5, 16 }
  0x41   : > { %p1435_p1 = scmp.ne.s32.totalorder %s2416_s5, %s1434_s25  ;;  %p1441_p10 = scmp.lt.u32.totalorder %s1434_s25, %s2416_s5 }
  0x43   : > { %p1437_p2 = pnand %p1435_p1, %p1911_p13 }
  0x45   : > { %p1438_p6 = pneg %p1437_p2 }
  0x47   : > { %p1443_p3 = pnand %p1441_p10, %p1438_p6 }
  0x49   : > { %1446 = shalt.err (!%p1443_p3)
}
  0x4a   : > { %s1447_s21 = scalar_lea.vmem %s1901_s24, 16  ;;  %s1454_s30 = scalar_lea.vmem %s1901_s24, 32 }
  0x4b   : > { %p1448_p5 = scmp.ne.s32.totalorder %s1901_s24, %s1447_s21  ;;  %p1455_p12 = scmp.lt.s32.totalorder %s1901_s24, %s1901_s24 }
  0x4c   : > { %p1456_p0 = scmp.lt.s32.totalorder %s1454_s30, %s1447_s21 }
  0x4d   : > { %p1450_p7 = pnand %p1448_p5, %p1911_p13 }
  0x4e   : > { %p1457_p1 = por %p1456_p0, %p1455_p12 }
  0x4f   : > { %p1451_p9 = pneg %p1450_p7 }
  0x51   : > { %p1458_p2 = pnand %p1457_p1, %p1451_p9 }
  0x53   : > { %1461 = shalt.err (!%p1458_p2)
}
  0x54   : > { %1295 = dma.hbm_to_vmem [thread:$0]  (!%p1897_p11), %s2416_s5, 16, %s1901_s24, [#allocation13]  }
  0x55   : > { %s43_s18 = sadd.s32 1, %s1764_s13  ;;  %s58_s28 = sadd.s32 1, %s1756_s11 }
  0x56   : > { %p45_p6 = scmp.ge.s32.totalorder %s43_s18, 2  ;;  %p65_p10 = scmp.ne.s32.totalorder %s1756_s11, %s1752_s10 }
  0x57   : > { %p66_p3 = scmp.eq.s32.totalorder %s1768_s14, 0  ;;  %p1324_p5 = scmp.lt.s32.totalorder %s1768_s14, 2 }
  0x58   : > { %s2458_s18 = smov (%p45_p6, %s43_s18), 0  ;;  %p2418_p9 = scmp.eq.s32.totalorder %s1867_s15, 1 }
  0x59   : > { %2417 = sst [smem:[#allocation33_spill]] %s2458_s18  ;;  %p67_p7 = por %p66_p3, %p65_p10 }
  0x5a   : > { %p1969_p12 = por %p2418_p9, %p65_p10  ;;  %s53_s20 = ssub.s32 %s1764_s13, %s2458_s18 }
  0x5b   : > { %s2381_s23 = sand.u32 1, %s1768_s14   ;;  %p56_p0 = scmp.eq.s32.totalorder %s53_s20, 0 }
  0x5c   : > { %s2419_s29 = scalar_select %p1969_p12, 1, 0 }
  0x5d   : > { %s379_s24 = sand.u32 1, %s1756_s11   ;;  %s1978_s25 = sshll.u32 %s1764_s13, 7 }
  0x5e   : > { %2420 = sst [smem:[#allocation34_spill]] %s2419_s29  ;;  %s1983_s30 = sshll.u32 %s379_s24, 3 }
  0x5f   : > { %s1981_s21 = scalar_select %p56_p0, %s1756_s11, %s58_s28  }
  0x60   : > { %s2422_s0 = sld [smem:[#allocation36_spill]]  ;;  %p1991_p1 = pnand %p1324_p5, %p67_p7 }
  0x61   : > { %2421 = sst [smem:[#allocation35_spill]] %s1981_s21  ;;  %s381_s27 = scalar_lea.vmem [#allocation3], %s1983_s30 }
  0x62   : > { %s2423_s20 = scalar_select %p1991_p1, 1, 0 }
  0x63   : > { %s393_s28 = sshll.u32 %s381_s27, 4  ;;  %s2000_s24 = scalar_lea.sflag [#allocation4], %s2381_s23  ;;  %s1996_s28 = int_to_ptr.vmem [resolvable:$true] %s393_s28 }
  0x64   : > { %p2006_p6 = pneg %p1991_p1 }
  0x66   : > { %s1989_s26 = scalar_lea.hbm %s2422_s0, %s1978_s25  ;;  %s1467_s27 = scalar_lea.hbm %s2422_s0, 256 }
  0x67   : > { %s1462_s9 = scalar_lea.hbm %s1989_s26, 128  ;;  %p1468_p5 = scmp.lt.u32.totalorder %s1989_s26, %s2422_s0 }
  0x68   : > { %p1463_p2 = scmp.ne.s32.totalorder %s1989_s26, %s1462_s9  ;;  %p1469_p7 = scmp.lt.u32.totalorder %s1467_s27, %s1462_s9 }
  0x69   : > { %s2424_s12 = scalar_select %p2006_p6, 1, 0 }
  0x6a   : > { %p1465_p10 = pnand %p2006_p6, %p1463_p2  ;;  %p1470_p9 = por %p1469_p7, %p1468_p5 }
  0x6b   : > { %p1471_p0 = scmp.lt.u32.totalorder %s1462_s9, %s1989_s26 }
  0x6c   : > { %p1466_p3 = pneg %p1465_p10 }
  0x6d   : > { %p1472_p12 = por %p1471_p0, %p1470_p9 }
  0x6f   : > { %p1473_p4 = pnand %p1472_p12, %p1466_p3 }
  0x71   : > { %1476 = shalt.err (!%p1473_p4)
}
  0x72   : > { %s1477_s23 = scalar_lea.vmem %s1996_s28, 128  ;;  %s1774_s3 = smov [#allocation3]  }
  0x73   : > { %p1478_p2 = scmp.ne.s32.totalorder %s1996_s28, %s1477_s23  ;;  %s1482_s5 = sshll.u32 %s1774_s3, 4  ;;  %s1483_s5 = int_to_ptr.vmem [resolvable:$false] %s1482_s5 }
  0x74   : > { %s1484_s13 = scalar_lea.vmem %s1483_s5, 256  ;;  %p1485_p11 = scmp.lt.s32.totalorder %s1996_s28, %s1483_s5 }
  0x75   : > { %p1480_p10 = pnand %p1478_p2, %p2006_p6  ;;  %p1486_p13 = scmp.lt.s32.totalorder %s1484_s13, %s1477_s23 }
  0x77   : > { %p1481_p8 = pneg %p1480_p10  ;;  %p1487_p5 = por %p1486_p13, %p1485_p11 }
  0x79   : > { %p1488_p7 = pnand %p1487_p5, %p1481_p8 }
  0x7b   : > { %1491 = shalt.err (!%p1488_p7)
}
  0x7c   : > { %s2425_s18 = smov 4   ;;  %s2426_s9 = smov 64  }
  0x7d   : > { %1305 = dma.hbm_to_vmem [thread:$0]  (!%p1991_p1), %s1989_s26, 128, %s1996_s28, %s2000_s24, %s2426_s9, %s2426_s9, %s2425_s18  }
  0x7e   : > { %s2427_s1 = sld [smem:[#allocation37_spill]]  ;;  %s407_s5 = scalar_lea.vmem [#allocation6], %s1983_s30 }
  0x7f   : > { %s416_s13 = sshll.u32 %s407_s5, 4  ;;  %s1775_s0 = smov [#allocation11]   ;;  %s2040_s13 = int_to_ptr.vmem [resolvable:$true] %s416_s13 }
  0x80   : > { %s2042_s21 = sshll.u32 %s1775_s0, 4  ;;  %s2428_s11 = sand.u32 1, %s1768_s14   ;;  %s332_s21 = int_to_ptr.vmem [resolvable:$true] %s2042_s21 }
  0x81   : > { %s2046_s29 = scalar_lea.sflag [#allocation7], %s2428_s11 }
  0x84   : > { %s2037_s23 = scalar_lea.hbm %s2427_s1, %s1978_s25  ;;  %s1497_s3 = scalar_lea.hbm %s2427_s1, 256 }
  0x85   : > { %s1492_s26 = scalar_lea.hbm %s2037_s23, 128  ;;  %p1498_p13 = scmp.lt.u32.totalorder %s2037_s23, %s2427_s1 }
  0x86   : > { %p1493_p4 = scmp.ne.s32.totalorder %s2037_s23, %s1492_s26  ;;  %p1499_p12 = scmp.lt.u32.totalorder %s1497_s3, %s1492_s26 }
  0x87   : > { %p1501_p9 = scmp.lt.u32.totalorder %s1492_s26, %s2037_s23 }
  0x88   : > { %p1495_p8 = pnand %p1493_p4, %p2006_p6  ;;  %p1500_p3 = por %p1499_p12, %p1498_p13 }
  0x8a   : > { %p1496_p11 = pneg %p1495_p8  ;;  %p1502_p0 = por %p1501_p9, %p1500_p3 }
  0x8c   : > { %p1503_p2 = pnand %p1502_p0, %p1496_p11 }
  0x8e   : > { %1506 = shalt.err (!%p1503_p2)
}
  0x8f   : > { %s1507_s0 = scalar_lea.vmem %s2040_s13, 128  ;;  %s1776_s11 = smov [#allocation6]  }
  0x90   : > { %p1508_p10 = scmp.ne.s32.totalorder %s2040_s13, %s1507_s0  ;;  %s1512_s5 = sshll.u32 %s1776_s11, 4  ;;  %s1513_s5 = int_to_ptr.vmem [resolvable:$false] %s1512_s5 }
  0x91   : > { %s1514_s10 = scalar_lea.vmem %s1513_s5, 256  ;;  %p1515_p4 = scmp.lt.s32.totalorder %s2040_s13, %s1513_s5 }
  0x92   : > { %p1510_p5 = pnand %p1508_p10, %p2006_p6  ;;  %p1516_p8 = scmp.lt.s32.totalorder %s1514_s10, %s1507_s0 }
  0x94   : > { %p1511_p7 = pneg %p1510_p5  ;;  %p1517_p13 = por %p1516_p8, %p1515_p4 }
  0x96   : > { %p1518_p12 = pnand %p1517_p13, %p1511_p7 }
  0x98   : > { %1521 = shalt.err (!%p1518_p12)
}
  0x99   : > { %1308 = dma.hbm_to_vmem [thread:$0]  (!%p1991_p1), %s2037_s23, 128, %s2040_s13, %s2046_s29, %s2426_s9, %s2426_s9, %s2425_s18  }
  0x9a   : > { %s1522_s28 = scalar_lea.hbm %s2363_s4, 16  ;;  %p2429_p3 = scmp.ne.s32.totalorder %s2415_s16, 0 }
  0x9b   : > { %p1523_p11 = scmp.ne.s32.totalorder %s2363_s4, %s1522_s28  ;;  %p1529_p2 = scmp.lt.u32.totalorder %s1522_s28, %s2363_s4 }
  0x9d   : > { %p1525_p9 = pnand %p1523_p11, %p2429_p3 }
  0x9f   : > { %p1526_p0 = pneg %p1525_p9 }
  0xa1   : > { %p1531_p10 = pnand %p1529_p2, %p1526_p0 }
  0xa3   : > { %1534 = shalt.err (!%p1531_p10)
}
  0xa4   : > { %s1535_s5 = scalar_lea.vmem %s332_s21, 16  ;;  %s1542_s23 = scalar_lea.vmem %s332_s21, 32 }
  0xa5   : > { %p1536_p5 = scmp.ne.s32.totalorder %s332_s21, %s1535_s5  ;;  %p1543_p8 = scmp.lt.s32.totalorder %s332_s21, %s332_s21 }
  0xa6   : > { %p1544_p13 = scmp.lt.s32.totalorder %s1542_s23, %s1535_s5 }
  0xa7   : > { %p1538_p7 = pnand %p1536_p5, %p2429_p3 }
  0xa8   : > { %p1545_p12 = por %p1544_p13, %p1543_p8 }
  0xa9   : > { %p1539_p4 = pneg %p1538_p7 }
  0xab   : > { %p1546_p1 = pnand %p1545_p12, %p1539_p4 }
  0xad   : > { %1549 = shalt.err (!%p1546_p1)
}
  0xae   : > { %p2430_p11 = scmp.ne.s32.totalorder %s2413_s22, 0  ;;  %s1777_s17 = smov [#allocation14]  }
  0xaf   : > { %s352_s26 = sshll.u32 %s1777_s17, 4  ;;  %s1778_s28 = smov [#allocation15]   ;;  %s353_s26 = int_to_ptr.vmem [resolvable:$true] %s352_s26 }
  0xb0   : > { %1292 = dma.hbm_to_vmem [thread:$0]  (!%p2430_p11), %s2363_s4, 16, %s332_s21, [#allocation10]  }
  0xb1   : > { %s366_s27 = sshll.u32 %s1778_s28, 4  ;;  %s1550_s11 = scalar_lea.hbm %s2365_s6, 1024  ;;  %s367_s27 = int_to_ptr.vmem [resolvable:$true] %s366_s27 }
  0xb2   : > { %p1551_p1 = scmp.ne.s32.totalorder %s2365_s6, %s1550_s11  ;;  %p1557_p2 = scmp.lt.u32.totalorder %s1550_s11, %s2365_s6 }
  0xb4   : > { %p1553_p9 = pnand %p1551_p1, %p2429_p3 }
  0xb6   : > { %p1554_p0 = pneg %p1553_p9 }
  0xb8   : > { %p1559_p10 = pnand %p1557_p2, %p1554_p0 }
  0xba   : > { %1562 = shalt.err (!%p1559_p10)
}
  0xbb   : > { %s1563_s21 = scalar_lea.vmem %s353_s26, 1024  ;;  %p1571_p8 = scmp.lt.s32.totalorder %s353_s26, %s353_s26 }
  0xbc   : > { %p1564_p5 = scmp.ne.s32.totalorder %s353_s26, %s1563_s21  ;;  %p1572_p13 = scmp.lt.s32.totalorder %s1563_s21, %s1563_s21 }
  0xbe   : > { %p1566_p7 = pnand %p1564_p5, %p2429_p3  ;;  %p1573_p12 = por %p1572_p13, %p1571_p8 }
  0xc0   : > { %p1567_p4 = pneg %p1566_p7 }
  0xc2   : > { %p1574_p6 = pnand %p1573_p12, %p1567_p4 }
  0xc4   : > { %1577 = shalt.err (!%p1574_p6)
}
  0xc5   : > { %1298 = dma.hbm_to_vmem [thread:$0]  (!%p2430_p11), %s2365_s6, 1024, %s353_s26, [#allocation13], %s2426_s9, %s2426_s9, %s2425_s18  }
  0xc6   : > { %s1578_s3 = scalar_lea.hbm %s2366_s7, 16 }
  0xc7   : > { %p1579_p1 = scmp.ne.s32.totalorder %s2366_s7, %s1578_s3  ;;  %p1585_p0 = scmp.lt.u32.totalorder %s1578_s3, %s2366_s7 }
  0xc9   : > { %p1581_p6 = pnand %p1579_p1, %p2429_p3 }
  0xcb   : > { %p1582_p9 = pneg %p1581_p6 }
  0xcd   : > { %p1587_p2 = pnand %p1585_p0, %p1582_p9 }
  0xcf   : > { %1590 = shalt.err (!%p1587_p2)
}
  0xd0   : > { %s1591_s13 = scalar_lea.vmem %s367_s27, 16  ;;  %s1598_s26 = scalar_lea.vmem %s367_s27, 32 }
  0xd1   : > { %p1592_p10 = scmp.ne.s32.totalorder %s367_s27, %s1591_s13  ;;  %p1599_p4 = scmp.lt.s32.totalorder %s367_s27, %s367_s27 }
  0xd2   : > { %p1600_p8 = scmp.lt.s32.totalorder %s1598_s26, %s1591_s13 }
  0xd3   : > { %p1594_p5 = pnand %p1592_p10, %p2429_p3 }
  0xd4   : > { %p1601_p13 = por %p1600_p8, %p1599_p4 }
  0xd5   : > { %p1595_p7 = pneg %p1594_p5 }
  0xd7   : > { %p1602_p12 = pnand %p1601_p13, %p1595_p7 }
  0xd9   : > { %1605 = shalt.err (!%p1602_p12)
}
  0xda   : > { %1301 = dma.hbm_to_vmem [thread:$0]  (!%p2430_p11), %s2366_s7, 16, %s367_s27, [#allocation16]  }
  0xdb   : > { %s2135_s16 = scalar_lea.hbm %s2361_s2, %s1978_s25  ;;  %s430_s28 = scalar_lea.vmem [#allocation8], %s1983_s30 }
  0xdc   : > { %s442_s3 = sshll.u32 %s430_s28, 4  ;;  %s1606_s22 = scalar_lea.hbm %s2135_s16, 128  ;;  %s2138_s3 = int_to_ptr.vmem [resolvable:$true] %s442_s3 }
  0xdd   : > { %p1607_p3 = scmp.ne.s32.totalorder %s2135_s16, %s1606_s22  ;;  %p2431_p1 = scmp.ne.s32.totalorder %s2424_s12, 0 }
  0xde   : > { %s1611_s11 = scalar_lea.hbm %s2361_s2, 256  ;;  %p1612_p11 = scmp.lt.u32.totalorder %s2135_s16, %s2361_s2 }
  0xdf   : > { %p1609_p6 = pnand %p1607_p3, %p2431_p1  ;;  %p1613_p0 = scmp.lt.u32.totalorder %s1611_s11, %s1606_s22 }
  0xe0   : > { %p1615_p10 = scmp.lt.u32.totalorder %s1606_s22, %s2135_s16 }
  0xe1   : > { %p1610_p9 = pneg %p1609_p6  ;;  %p1614_p2 = por %p1613_p0, %p1612_p11 }
  0xe3   : > { %p1616_p5 = por %p1615_p10, %p1614_p2 }
  0xe5   : > { %p1617_p7 = pnand %p1616_p5, %p1610_p9 }
  0xe7   : > { %1620 = shalt.err (!%p1617_p7)
}
  0xe8   : > { %s1621_s13 = scalar_lea.vmem %s2138_s3, 128  ;;  %s1779_s26 = smov [#allocation8]  }
  0xe9   : > { %p1622_p4 = scmp.ne.s32.totalorder %s2138_s3, %s1621_s13  ;;  %s1626_s21 = sshll.u32 %s1779_s26, 4  ;;  %s1627_s21 = int_to_ptr.vmem [resolvable:$false] %s1626_s21 }
  0xea   : > { %s1628_s1 = scalar_lea.vmem %s1627_s21, 256  ;;  %p1629_p12 = scmp.lt.s32.totalorder %s2138_s3, %s1627_s21 }
  0xeb   : > { %p1624_p8 = pnand %p1622_p4, %p2431_p1  ;;  %p1630_p3 = scmp.lt.s32.totalorder %s1628_s1, %s1621_s13 }
  0xed   : > { %p1625_p13 = pneg %p1624_p8  ;;  %p1631_p6 = por %p1630_p3, %p1629_p12 }
  0xef   : > { %p1632_p11 = pnand %p1631_p6, %p1625_p13 }
  0xf1   : > { %1635 = shalt.err (!%p1632_p11)
}
  0xf2   : > { %p2432_p9 = scmp.ne.s32.totalorder %s2423_s20, 0  ;;  %s2169_s28 = scalar_lea.hbm %s2367_s8, %s1978_s25 }
  0xf3   : > { %s456_s22 = scalar_lea.vmem [#allocation17], %s1983_s30  ;;  %s1636_s27 = scalar_lea.hbm %s2169_s28, 128 }
  0xf4   : > { %1311 = dma.hbm_to_vmem [thread:$0]  (!%p2432_p9), %s2135_s16, 128, %s2138_s3, %s2046_s29, %s2426_s9, %s2426_s9, %s2425_s18  }
  0xf5   : > { %s465_s0 = sshll.u32 %s456_s22, 4  ;;  %p1637_p0 = scmp.ne.s32.totalorder %s2169_s28, %s1636_s27  ;;  %s2172_s0 = int_to_ptr.vmem [resolvable:$true] %s465_s0 }
  0xf6   : > { %s1641_s16 = scalar_lea.hbm %s2367_s8, 256  ;;  %p1642_p5 = scmp.lt.u32.totalorder %s2169_s28, %s2367_s8 }
  0xf7   : > { %p1639_p2 = pnand %p1637_p0, %p2431_p1  ;;  %p1643_p7 = scmp.lt.u32.totalorder %s1641_s16, %s1636_s27 }
  0xf8   : > { %p1645_p8 = scmp.lt.u32.totalorder %s1636_s27, %s2169_s28 }
  0xf9   : > { %p1640_p10 = pneg %p1639_p2  ;;  %p1644_p4 = por %p1643_p7, %p1642_p5 }
  0xfb   : > { %p1646_p13 = por %p1645_p8, %p1644_p4 }
  0xfd   : > { %p1647_p12 = pnand %p1646_p13, %p1640_p10 }
  0xff   : > { %1650 = shalt.err (!%p1647_p12)
}
 0x100   : > { %s1651_s30 = scalar_lea.vmem %s2172_s0, 128  ;;  %s1780_s5 = smov [#allocation17]  }
 0x101   : > { %p1652_p3 = scmp.ne.s32.totalorder %s2172_s0, %s1651_s30  ;;  %s1656_s23 = sshll.u32 %s1780_s5, 4  ;;  %s1657_s23 = int_to_ptr.vmem [resolvable:$false] %s1656_s23 }
 0x102   : > { %s1658_s13 = scalar_lea.vmem %s1657_s23, 256  ;;  %p1659_p0 = scmp.lt.s32.totalorder %s2172_s0, %s1657_s23 }
 0x103   : > { %p1654_p6 = pnand %p1652_p3, %p2431_p1  ;;  %p1660_p2 = scmp.lt.s32.totalorder %s1658_s13, %s1651_s30 }
 0x105   : > { %p1655_p11 = pneg %p1654_p6  ;;  %p1661_p5 = por %p1660_p2, %p1659_p0 }
 0x107   : > { %p1662_p7 = pnand %p1661_p5, %p1655_p11 }
 0x109   : > { %1665 = shalt.err (!%p1662_p7)
}
 0x10a   : > { %1314 = dma.hbm_to_vmem [thread:$0]  (!%p2432_p9), %s2169_s28, 128, %s2172_s0, %s2000_s24, %s2426_s9, %s2426_s9, %s2425_s18  }
 0x10b   : > { %p2433_p1 = scmp.ne.s32.totalorder %s2412_s19, 0 }
 0x10c   : > { %s2434_s12 = sld [smem:[#allocation31_spill]] (!%p2433_p1)  ;;  %s479_s26 = sand.u32 (!%p2433_p1), 1, %s1867_s15  }
 0x10d   : > { %477 = sbr.rel (%p2433_p1) target bundleno = 614 (0x266), region = 56  ;;  %s480_s21 = scalar_lea.sflag (!%p2433_p1), [#allocation4], %s479_s26 }
 0x112   : > { %p2435_p10 = scmp.ne.s32.totalorder (!%p2433_p1), %s2434_s12, 0 }
 0x114   : > { %1719 = dma.done.wait (%p2435_p10), %s480_s21, 128  }
 0x115   : > { %1721 = vsyncadd (%p2435_p10), %s480_s21, 4294967168  ;;  %s2436_s20 = sld [smem:[#allocation27_spill]]  ;;  %s489_s24 = scalar_lea.sflag [#allocation7], %s479_s26 }
 0x11b   : > { %s490_s1 = sand.u32 1, %s2436_s20  }
 0x11c   : > { %s2209_s10 = sshll.u32 %s490_s1, 3 }
 0x11d   : > { %s492_s19 = scalar_lea.vmem [#allocation6], %s2209_s10 }
 0x11e   : > { %1723 = dma.done.wait (%p2435_p10), %s489_s24, 256  }
 0x11f   : > { %1725 = vsyncadd (%p2435_p10), %s489_s24, 4294967040  ;;  %p2437_p9 = scmp.eq.s32.totalorder %s1867_s15, 0 }
 0x121   : > { %1727 = dma.done.wait (%p2437_p9), [#allocation10], 144   ;;  %p2438_p4 = pmov %p2437_p9 }
 0x123   : > { %1729 = vsyncadd (%p2438_p4), [#allocation10], 4294967152  ;;  %p2439_p8 = pmov %p2438_p4 }
 0x124   : > { %p2440_p13 = pmov %p2438_p4 }
 0x125   : > { %1731 = dma.done.wait (%p2439_p8), [#allocation13], 1040  }
 0x126   : > { %1733 = vsyncadd (%p2440_p13), [#allocation13], 4294966256  ;;  %p2441_p12 = pmov %p2438_p4 }
 0x127   : > { %p2442_p3 = pmov %p2438_p4 }
 0x128   : > { %1735 = dma.done.wait (%p2441_p12), [#allocation16], 16  }
 0x129   : > { %1737 = vsyncadd (%p2442_p3), [#allocation16], 4294967280  ;;  %s530_s18 = scalar_lea.vmem [#allocation17], %s2209_s10 }
 0x12a   : > { %1739 = dma.done.wait (%p2435_p10), %s480_s21, 128  }
 0x12b   : > { %1741 = vsyncadd (%p2435_p10), %s480_s21, 4294967168  ;;  %v1781_v0 = vmov 0.0   ;;  %vm1782_vm0 = vmmov 0   ;;  %v1390_v1 = vld [vmem:[#allocation14] sm:$0xff]   ;;  %v1391_v2 = vld [vmem:[#allocation14 + $0x8] sm:$0xff]   ;;  %v627_v3 = vlaneseq  ;;  %s2443_s15 = sld [smem:[#allocation29_spill]] }
 0x12c   : > { %1236 = vmatprep.subr.bf16.mxu0 %v1781_v0  ;;  %609 = vst [vmem:[#allocation2] sm:$0x7f] %v1781_v0  ;;  %620 = vst [vmem:[#allocation2 + $0x17] sm:$0x7f] %v1781_v0  ;;  %1252 = vmatprep.mubr.msk.bf16.mxu0 %vm1782_vm0, %v1781_v0  ;;  %v1392_v4 = vld [vmem:[#allocation14 + $0x10] sm:$0xff]   ;;  %v1393_v10 = vld [vmem:[#allocation14 + $0x18] sm:$0xff]  }
 0x12d   : > { %1237 = vmatpush3.bf16.msra.mxu0 %v1390_v1  ;;  %v2239_v5 = vshrl.u32 %v627_v3, 7  ;;  %v2241_v6 = vld [vmem:[%s492_s19] sm:$0xff]   ;;  %v1395_v21 = vld [vmem:[#allocation14 + $0x28] sm:$0xff]   ;;  %s2444_s9 = sld [smem:[#allocation34_spill]]  ;;  %s579_s28 = scalar_lea.vmem [#allocation18], %s2209_s10 }
 0x12e   : > { %1238 = vmatprep.subr.bf16.mxu0 %v1781_v0  ;;  %v1215_v7 = vld [vmem:[#allocation9] sm:$0xff]   ;;  %v1212_v8 = vunpack.c.l.bf16 %v2241_v6  ;;  %v1213_v9 = vunpack.c.h.bf16 %v2241_v6  ;;  %v1394_v16 = vld [vmem:[#allocation14 + $0x20] sm:$0xff]   ;;  %s945_s22 = sshll.u32 %s579_s28, 4  ;;  %s2445_s11 = sld [smem:[#allocation40_spill]]  ;;  %s2308_s22 = int_to_ptr.vmem [resolvable:$true] %s945_s22 }
 0x12f   : > { %v1216_v11 = vunpack.c.l.bf16 %v1215_v7  ;;  %v2251_v12 = vsub.s32 0, %v2239_v5  ;;  %v639_v13 = vsub.s32 1, %v2239_v5  ;;  %v649_v14 = vsub.s32 2, %v2239_v5  ;;  %v1396_v46 = vld [vmem:[#allocation14 + $0x30] sm:$0xff]   ;;  %v1397_v62 = vld [vmem:[#allocation14 + $0x38] sm:$0xff]   ;;  %s2312_s3 = scalar_lea.sflag [#allocation5], %s490_s1 }
 0x130   : > { %596 = vst [vmem:[#allocation2 + $0x7] sm:$0xff] %v1212_v8  ;;  %597 = vst [vmem:[#allocation2 + $0xf] sm:$0xff] %v1213_v9  ;;  %v659_v15 = vsub.s32 3, %v2239_v5  ;;  %v669_v19 = vsub.s32 4, %v2239_v5  ;;  %v679_v23 = vsub.s32 5, %v2239_v5  ;;  %v689_v27 = vsub.s32 6, %v2239_v5 }
 0x131   : > { %1239 = vmatpush3.bf16.msra.mxu0 %v1391_v2  ;;  %v630_v17 = vrot.slane %v1216_v11, %v2251_v12  ;;  %v640_v18 = vrot.slane %v1216_v11, %v639_v13  ;;  %v650_v20 = vrot.slane %v1216_v11, %v649_v14  ;;  %v699_v45 = vsub.s32 7, %v2239_v5  ;;  %s1209_s17 = sshll.u32 %s2443_s15, 7  ;;  %s1666_s25 = scalar_lea.vmem %s2308_s22, 128 }
 0x132   : > { %1240 = vmatprep.subr.bf16.mxu0 %v1781_v0  ;;  %v660_v22 = vrot.slane %v1216_v11, %v659_v15  ;;  %v670_v34 = vrot.slane %v1216_v11, %v669_v19  ;;  %v680_v44 = vrot.slane %v1216_v11, %v679_v23  ;;  %v1217_v50 = vunpack.c.h.bf16 %v1215_v7  ;;  %p1667_p6 = scmp.ne.s32.totalorder %s2308_s22, %s1666_s25  ;;  %s1783_s30 = smov [#allocation18]  }
 0x133   : > { %v690_v54 = vrot.slane %v1216_v11, %v689_v27  ;;  %v700_v61 = vrot.slane %v1216_v11, %v699_v45  ;;  %p2447_p11 = scmp.ne.s32.totalorder %s2444_s9, 0  ;;  %s1670_s5 = sshll.u32 %s1783_s30, 4  ;;  %s1671_s5 = int_to_ptr.vmem [resolvable:$false] %s1670_s5 }
 0x134   : > { %v718_v11 = vrot.slane %v1217_v50, %v639_v13  ;;  %s2446_s29 = smov %s2445_s11  ;;  %s2306_s16 = scalar_lea.hbm %s2445_s11, %s1209_s17 }
 0x135   : > { %1241 = vmatpush3.bf16.msra.mxu0 %v1392_v4  ;;  %v709_v4 = vrot.slane %v1217_v50, %v2251_v12  ;;  %p1668_p0 = pnand %p1667_p6, %p2447_p11  ;;  %s1672_s23 = scalar_lea.vmem %s1671_s5, 256 }
 0x136   : > { %1242 = vmatprep.subr.bf16.mxu0 %v1781_v0  ;;  %p1673_p5 = scmp.lt.s32.totalorder %s2308_s22, %s1671_s5  ;;  %p1674_p7 = scmp.lt.s32.totalorder %s1672_s23, %s1666_s25 }
 0x137   : > { %v625_v24 = vld [vmem:[#allocation2] sm:$0xff]  ;;  %v626_v25 = vld [vmem:[#allocation2 + $0x8] sm:$0xff]  ;;  %v732_v6 = vld [vmem:[#allocation2 + $0x13] sm:$0xff]  ;;  %p1669_p2 = pneg %p1668_p0 }
 0x138   : > { %v635_v26 = vld [vmem:[#allocation2 + $0x1] sm:$0xff]  ;;  %v631_v28 = vmul.f32 %v630_v17, %v625_v24  ;;  %v632_v29 = vmul.f32 %v630_v17, %v626_v25  ;;  %v636_v30 = vld [vmem:[#allocation2 + $0x9] sm:$0xff]  ;;  %v701_v17 = vmul.f32 %v1212_v8, %v700_v61  ;;  %v714_v24 = vld [vmem:[#allocation2 + $0x11] sm:$0xff]  ;;  %p1675_p1 = por %p1674_p7, %p1673_p5 }
 0x139   : > { %1243 = vmatpush3.bf16.msra.mxu0 %v1393_v10  ;;  %v641_v31 = vmul.f32 %v640_v18, %v635_v26  ;;  %v645_v32 = vld [vmem:[#allocation2 + $0x2] sm:$0xff]  ;;  %v646_v33 = vld [vmem:[#allocation2 + $0xa] sm:$0xff]  ;;  %v642_v35 = vmul.f32 %v640_v18, %v636_v30  ;;  %v727_v26 = vrot.slane %v1217_v50, %v649_v14  ;;  %v723_v8 = vld [vmem:[#allocation2 + $0x12] sm:$0xff] }
 0x13a   : > { %1244 = vmatprep.subr.bf16.mxu0 %v1781_v0  ;;  %v651_v36 = vmul.f32 %v650_v20, %v645_v32  ;;  %v652_v37 = vmul.f32 %v650_v20, %v646_v33  ;;  %v655_v38 = vld [vmem:[#allocation2 + $0x3] sm:$0xff]  ;;  %v656_v39 = vld [vmem:[#allocation2 + $0xb] sm:$0xff]  ;;  %v719_v32 = vmul.f32 %v718_v11, %v636_v30  ;;  %v754_v30 = vrot.slane %v1217_v50, %v679_v23  ;;  %p1676_p10 = pnand %p1675_p1, %p1669_p2 }
 0x13b   : > { %v665_v40 = vld [vmem:[#allocation2 + $0x4] sm:$0xff]  ;;  %v643_v41 = vadd.f32 %v641_v31, %v631_v28  ;;  %v661_v42 = vmul.f32 %v660_v22, %v655_v38  ;;  %v2270_v43 = vld [vmem:[#allocation2 + $0xc] sm:$0xff]  ;;  %v644_v47 = vadd.f32 %v642_v35, %v632_v29  ;;  %v662_v48 = vmul.f32 %v660_v22, %v656_v39 }
 0x13c   : > { %v675_v49 = vld [vmem:[#allocation2 + $0x5] sm:$0xff]  ;;  %v671_v52 = vmul.f32 %v670_v34, %v665_v40  ;;  %v676_v53 = vld [vmem:[#allocation2 + $0xd] sm:$0xff]  ;;  %v672_v56 = vmul.f32 %v670_v34, %v2270_v43  ;;  %v710_v22 = vmul.f32 %v709_v4, %v626_v25  ;;  %v736_v34 = vrot.slane %v1217_v50, %v659_v15 }
 0x13d   : > { %1245 = vmatpush3.bf16.msra.mxu0 %v1394_v16  ;;  %v653_v51 = vadd.f32 %v651_v36, %v643_v41  ;;  %v654_v55 = vadd.f32 %v652_v37, %v644_v47  ;;  %v685_v57 = vld [vmem:[#allocation2 + $0x6] sm:$0xff]  ;;  %v681_v59 = vmul.f32 %v680_v44, %v675_v49  ;;  %v686_v60 = vld [vmem:[#allocation2 + $0xe] sm:$0xff]  ;;  %v682_v1 = vmul.f32 %v680_v44, %v676_v53 }
 0x13e   : > { %1246 = vmatprep.subr.bf16.mxu0 %v1781_v0  ;;  %v691_v3 = vmul.f32 %v690_v54, %v685_v57  ;;  %v692_v10 = vmul.f32 %v690_v54, %v686_v60  ;;  %v705_v18 = vld [vmem:[#allocation2 + $0x10] sm:$0xff]  ;;  %v720_v35 = vmul.f32 %v718_v11, %v714_v24  ;;  %v728_v37 = vmul.f32 %v727_v26, %v646_v33  ;;  %v818_v11 = vld [vmem:[#allocation15] sm:$0x1] }
 0x13f   : > { %v663_v58 = vadd.f32 %v661_v42, %v653_v51  ;;  %v664_v63 = vadd.f32 %v662_v48, %v654_v55  ;;  %v711_v29 = vmul.f32 %v709_v4, %v705_v18  ;;  %v729_v38 = vmul.f32 %v727_v26, %v723_v8  ;;  %v741_v41 = vld [vmem:[#allocation2 + $0x14] sm:$0xff] }
 0x140   : > { %v737_v14 = vmul.f32 %v736_v34, %v656_v39  ;;  %v738_v44 = vmul.f32 %v736_v34, %v732_v6  ;;  %v764_v33 = vrot.slane %v1217_v50, %v689_v27  ;;  %v755_v49 = vmul.f32 %v754_v30, %v676_v53  ;;  %v760_v51 = vld [vmem:[#allocation2 + $0x16] sm:$0xff] }
 0x141   : > { %1247 = vmatpush3.bf16.msra.mxu0 %v1395_v21  ;;  %v673_v2 = vadd.f32 %v671_v52, %v663_v58  ;;  %v674_v7 = vadd.f32 %v672_v56, %v664_v63  ;;  %v702_v21 = vmul.f32 %v1213_v9, %v700_v61  ;;  %v745_v9 = vrot.slane %v1217_v50, %v669_v19 }
 0x142   : > { %1248 = vmatprep.subr.bf16.mxu0 %v1781_v0  ;;  %v765_v55 = vmul.f32 %v764_v33, %v686_v60  ;;  %v766_v23 = vmul.f32 %v764_v33, %v760_v51 }
 0x143   : > { %v683_v16 = vadd.f32 %v681_v59, %v673_v2  ;;  %v684_v20 = vadd.f32 %v682_v1, %v674_v7  ;;  %v746_v15 = vmul.f32 %v745_v9, %v2270_v43  ;;  %v747_v48 = vmul.f32 %v745_v9, %v741_v41  ;;  %v1184_v59 = vld [vmem:[#allocation11] ss:$0 sm:$0xff] }
 0x145   : > { %1249 = vmatpush3.bf16.msra.mxu0 %v1396_v46  ;;  %v694_v28 = vadd.f32 %v692_v10, %v684_v20  ;;  %v750_v46 = vld [vmem:[#allocation2 + $0x15] sm:$0xff]  ;;  %v819_v20 = vunpack.c.l.bf16 %v818_v11 }
 0x146   : > { %1250 = vmatprep.subr.bf16.mxu0 %v1781_v0  ;;  %v693_v0 = vadd.f32 %v691_v3, %v683_v16  ;;  %v756_v39 = vmul.f32 %v754_v30, %v750_v46 }
 0x147   : > { %v704_v13 = vadd.f32 %v702_v21, %v694_v28  ;;  %v823_v21 = vrot.slane %v819_v20, %v2251_v12 }
 0x148   : > { %v703_v31 = vadd.f32 %v701_v17, %v693_v0  ;;  %v1219_v0 = vld [vmem:[%s530_s18] sm:$0xff]  }
 0x149   : > { %1251 = vmatpush3.bf16.msra.mxu0 %v1397_v62  ;;  %v713_v25 = vadd.f32 %v711_v29, %v704_v13  ;;  %v1185_v62 = vld [vmem:[#allocation12] ss:$0 sm:$0xff]  ;;  %v1220_v26 = vunpack.c.l.bf16 %v1219_v0  ;;  %v1221_v29 = vunpack.c.h.bf16 %v1219_v0 }
 0x14a   : > { %v712_v36 = vadd.f32 %v710_v22, %v703_v31 }
 0x14b   : > { %v722_v42 = vadd.f32 %v720_v35, %v713_v25 }
 0x14c   : > { %v721_v40 = vadd.f32 %v719_v32, %v712_v36 }
 0x14d   : > { %v731_v47 = vadd.f32 %v729_v38, %v722_v42 }
 0x14e   : > { %v730_v45 = vadd.f32 %v728_v37, %v721_v40 }
 0x14f   : > { %v740_v52 = vadd.f32 %v738_v44, %v731_v47 }
 0x150   : > { %v739_v19 = vadd.f32 %v737_v14, %v730_v45 }
 0x151   : > { %v749_v56 = vadd.f32 %v747_v48, %v740_v52 }
 0x152   : > { %v748_v54 = vadd.f32 %v746_v15, %v739_v19 }
 0x153   : > { %v758_v58 = vadd.f32 %v756_v39, %v749_v56 }
 0x154   : > { %v757_v57 = vadd.f32 %v755_v49, %v748_v54 }
 0x155   : > { %v768_v43 = vadd.f32 %v766_v23, %v758_v58 }
 0x156   : > { %v767_v61 = vadd.f32 %v765_v55, %v757_v57 }
 0x157   : > { %v777_v5 = vmul.f32 %v1184_v59, %v768_v43 }
 0x158   : > { %v776_v63 = vmul.f32 %v1184_v59, %v767_v61 }
 0x159   : > { %v786_v50 = vadd.f32 %v1185_v62, %v777_v5 }
 0x15a   : > { %v785_v27 = vadd.f32 %v1185_v62, %v776_v63 }
 0x15b   : > { %v1187_v2 = vmul.f32 -1.442695, %v786_v50 }
 0x15c   : > { %v1186_v1 = vmul.f32 -1.442695, %v785_v27 }
 0x15e   : > { %1398 = vpow2.f32 %v1186_v1 }
 0x15f   : > { %1400 = vpow2.f32 %v1187_v2 }
 0x168   : > { %v1399_v53 = vpop.eup %1398 }
 0x169   : > { %v1401_v3 = vpop.eup %1400  ;;  %v793_v60 = vadd.f32 1.0, %v1399_v53 }
 0x16a   : > { %v794_v4 = vadd.f32 1.0, %v1401_v3 }
 0x16b   : > { %1402 = vrcp.f32 %v793_v60 }
 0x16c   : > { %1404 = vrcp.f32 %v794_v4 }
 0x175   : > { %v1403_v7 = vpop.eup %1402 }
 0x176   : > { %v1405_v10 = vpop.eup %1404  ;;  %v799_v16 = vmul.f32 %v1403_v7, %v785_v27 }
 0x177   : > { %v800_v17 = vmul.f32 %v1405_v10, %v786_v50 }
 0x179   : > { %v801_v18 = vpack.c.bf16 %v800_v17, %v799_v16 }
 0x17b   : > { %1253 = vmatmul.mubr.bf16.vlgmr.msra.gmra.mrb[0].mxu0 %v801_v18 }
 0x24e   : > { %v906_v22 = vpop.f32.mrb[0].mxu0 }
 0x24f   : > { %v907_v24 = vadd.f32 %v906_v22, %v823_v21  ;;  %v1254_v28 = vpop.f32.mrb[1].mxu0 }
 0x250   : > { %v909_v31 = vpop.f32.mrb[2].mxu0 }
 0x251   : > { %v910_v32 = vadd.f32 %v909_v31, %v823_v21  ;;  %v1255_v8 = vpop.f32.mrb[3].mxu0  ;;  %v917_v34 = vadd.f32 %v1220_v26, %v907_v24 }
 0x253   : > { %v918_v13 = vadd.f32 %v1221_v29, %v910_v32 }
 0x255   : > { %v1225_v12 = vpack.c.bf16 %v918_v13, %v917_v34 }
 0x257   : > { %1226 = vst [vmem:[%s579_s28] sm:$0xff] %v1225_v12  }
 0x258   : > { %1679 = shalt.err (!%p1676_p10)
}
 0x259   : > { %s1680_s13 = scalar_lea.hbm %s2306_s16, 128  ;;  %s1684_s21 = scalar_lea.hbm %s2446_s29, 256 }
 0x25a   : > { %p1681_p9 = scmp.ne.s32.totalorder %s2306_s16, %s1680_s13  ;;  %p1685_p13 = scmp.lt.u32.totalorder %s2306_s16, %s2446_s29 }
 0x25b   : > { %p1686_p12 = scmp.lt.u32.totalorder %s1684_s21, %s1680_s13  ;;  %p1688_p6 = scmp.lt.u32.totalorder %s1680_s13, %s2306_s16 }
 0x25c   : > { %p1682_p4 = pnand %p1681_p9, %p2447_p11 }
 0x25d   : > { %p1687_p3 = por %p1686_p12, %p1685_p13 }
 0x25e   : > { %p1683_p8 = pneg %p1682_p4 }
 0x25f   : > { %p1689_p0 = por %p1688_p6, %p1687_p3 }
 0x261   : > { %p1690_p2 = pnand %p1689_p0, %p1683_p8 }
 0x263   : > { %1693 = shalt.err (!%p1690_p2)
}
 0x264   : > { %s1784_s10 = smov 64   ;;  %s1785_s24 = smov 4  }
 0x265   : > { %1284 = dma.vmem_to_hbm [thread:$0]  (%p2447_p11), %s2308_s22, 128, %s2306_s16, %s2312_s3, %s1784_s10, %s1784_s10, %s1785_s24  }
 0x266 PF: > { %s2448_s19 = sld [smem:[#allocation26_spill]]  ;;  %s2449_s18 = sld [smem:[#allocation32_spill]] }
 0x267   : > { %p2451_p7 = scmp.ge.s32.totalorder %s1768_s14, 2 }
 0x26c   : > { %s960_s15 = sand.u32 1, %s2448_s19   ;;  %p2450_p5 = scmp.ne.s32.totalorder %s2449_s18, 0 }
 0x26d   : > { %s961_s17 = scalar_lea.sflag [#allocation5], %s960_s15 }
 0x26e   : > { %p1316_p1 = pnand %p2451_p7, %p2450_p5 }
 0x270   : > { %1743 = dma.done.wait (!%p1316_p1), %s961_s17, 128  }
 0x271   : > { %1745 = vsyncadd (!%p1316_p1), %s961_s17, 4294967168  ;;  %s31_s14 = sadd.s32 1, %s1768_s14   ;;  %s2452_s30 = sld [smem:[#allocation27_spill]] }
 0x272   : > { %p28_p10 = scmp.ge.s32.totalorder %s31_s14, 4   ;;  %s2453_s10 = sld [smem:[#allocation28_spill]] }
 0x273   : > { %s2454_s11 = sld [smem:[#allocation35_spill]]  ;;  %s2455_s12 = sld [smem:[#allocation30_spill]] }
 0x274   : > { %s2456_s13 = sld [smem:[#allocation33_spill]]  ;;  %30 = sbr.rel (!%p28_p10) target bundleno = 17 (0x11), region = 172 }
 0x27b   :  { %966 = vsyncpa [#allocation4], 1 }
 0x27c   :  { %968 = vsyncpa [#allocation4 + $0x1], 1 }
 0x27d   :  { %969 = vsyncpa [#allocation7], 1 }
 0x27e   :  { %971 = vsyncpa [#allocation7 + $0x1], 1 }
 0x27f   :  { %972 = vsyncpa [#allocation10], 1 }
 0x280   :  { %973 = vsyncpa [#allocation13], 1 }
 0x281   :  { %974 = vsyncpa [#allocation16], 1 }
 0x282   :  { %975 = vsyncpa [#allocation5], 1 }
 0x283   :  { %977 = vsyncpa [#allocation5 + $0x1], 1 }

// kernel: conformer_forward.59
= control target key start
LH: loop header
LB: loop body
LE: loop exit
PB: predicated region body
PF: predicated region fallthrough
CT: control target
= control target key end

     0   :  { %8 = vsyncpa [#allocation3], 0  ;;  %s989_s0 = inlined_call_operand.hbm [shape: bf16[2,16,128], index: 0, kind: input, shape index: {}]   ;;  %s990_s1 = inlined_call_operand.hbm [shape: bf16[1,128], index: 1, kind: input, shape index: {}]   ;;  %s991_s2 = inlined_call_operand.hbm [shape: bf16[1,128], index: 2, kind: input, shape index: {}]   ;;  %s992_s3 = inlined_call_operand.hbm [shape: bf16[2,16,128], index: 3, kind: output, shape index: {}]  }
   0x1   :  { %10 = vsyncpa [#allocation3 + $0x1], 0 }
   0x2   :  { %11 = vsyncpa [#allocation6], 0 }
   0x3   :  { %12 = vsyncpa [#allocation4], 0 }
   0x4   :  { %14 = vsyncpa [#allocation4 + $0x1], 0  ;;  %s736_s12 = smov 0   ;;  %s738_s13 = smov 0  }
   0x5   :  { %s740_s14 = smov 0   ;;  %s742_s15 = smov 0  }
   0x6   :  { %s744_s16 = smov 0   ;;  %s746_s17 = smov 0  }
   0x7 LB: > { %s409_s18 = sadd.s32 4294967295, %s706_s17   ;;  %s410_s19 = sadd.s32 4294967294, %s706_s17   ;;  %s706_s17 = sphi %s746_s17, %s20_s17   ;;  %s702_s16 = sphi %s744_s16, %s1018_s16   ;;  %s698_s15 = sphi %s742_s15, %s1017_s15   ;;  %s694_s14 = sphi %s740_s14, %s1016_s14   ;;  %s690_s13 = sphi %s738_s13, %s1015_s13   ;;  %s686_s12 = sphi %s736_s12, %s1014_s12  }
   0x8   : > { %s41_s20 = sadd.s32 1, %s694_s14  ;;  %p48_p0 = scmp.ne.s32.totalorder %s694_s14, %s690_s13 }
   0x9   : > { %p49_p1 = scmp.eq.s32.totalorder %s706_s17, 0  ;;  %p54_p2 = scmp.ne.s32.totalorder %s690_s13, %s686_s12 }
   0xa   : > { %p774_p3 = scmp.eq.s32.totalorder %s409_s18, 0  ;;  %p122_p4 = scmp.eq.s32.totalorder %s409_s18, 1 }
   0xb   : > { %p778_p5 = por %p49_p1, %p48_p0  ;;  %p128_p6 = scmp.eq.s32.totalorder %s410_s19, 1 }
   0xc   : > { %s999_s21 = scalar_select %p774_p3, 1, 0 }
   0xd   : > { %p784_p7 = por %p774_p3, %p54_p2  ;;  %p788_p8 = por %p122_p4, %p48_p0 }
   0xe   : > { %p792_p9 = por %p128_p6, %p54_p2  ;;  %p411_p10 = scmp.ge.s32.totalorder %s706_s17, 1 }
   0xf   : > { %s1001_s23 = scalar_select %p784_p7, 1, 0 }
  0x10   : > { %s1002_s24 = scalar_select %p788_p8, 1, 0 }
  0x11   : > { %s1003_s25 = scalar_select %p792_p9, 1, 0 }
  0x12   : > { %p135_p11 = scmp.lt.s32.totalorder %s706_s17, 3  ;;  %s708_s27 = smov [#allocation5]  }
  0x13   : > { %s148_s28 = sshll.u32 %s708_s27, 4  ;;  %p472_p1 = scmp.lt.s32.totalorder %s706_s17, 2  ;;  %s149_s28 = int_to_ptr.vmem [resolvable:$true] %s148_s28 }
  0x14   : > { %p799_p13 = pnand %p411_p10, %p135_p11  ;;  %s709_s30 = smov [#allocation7]  }
  0x15   : > { %p808_p4 = pnand %p472_p1, %p778_p5  ;;  %s159_s4 = sshll.u32 %s709_s30, 4  ;;  %s818_s4 = int_to_ptr.vmem [resolvable:$true] %s159_s4 }
  0x16   : > { %s1004_s26 = scalar_select %p799_p13, 1, 0 }
  0x17   : > { %p455_p0 = pneg %p799_p13  ;;  %s534_s8 = scalar_lea.hbm %s990_s1, 16 }
  0x18   : > { %s1005_s29 = scalar_select %p808_p4, 1, 0 }
  0x19   : > { %p814_p2 = pnand %p455_p0, %p774_p3  ;;  %p535_p5 = scmp.ne.s32.totalorder %s990_s1, %s534_s8 }
  0x1a   : > { %p541_p1 = scmp.lt.u32.totalorder %s534_s8, %s990_s1 }
  0x1b   : > { %p536_p6 = pneg %p814_p2 }
  0x1d   : > { %p537_p10 = pnand %p536_p6, %p535_p5 }
  0x1f   : > { %p538_p11 = pneg %p537_p10 }
  0x21   : > { %p543_p0 = pnand %p541_p1, %p538_p11 }
  0x23   : > { %546 = shalt.err (!%p543_p0)
}
  0x24   : > { %s547_s19 = scalar_lea.vmem %s149_s28, 16  ;;  %s554_s22 = scalar_lea.vmem %s149_s28, 32 }
  0x25   : > { %p548_p12 = scmp.ne.s32.totalorder %s149_s28, %s547_s19  ;;  %p555_p3 = scmp.lt.s32.totalorder %s149_s28, %s149_s28 }
  0x26   : > { %p556_p7 = scmp.lt.s32.totalorder %s554_s22, %s547_s19 }
  0x27   : > { %p550_p9 = pnand %p548_p12, %p536_p6 }
  0x28   : > { %p557_p13 = por %p556_p7, %p555_p3 }
  0x29   : > { %p551_p8 = pneg %p550_p9 }
  0x2b   : > { %p558_p4 = pnand %p557_p13, %p551_p8 }
  0x2d   : > { %561 = shalt.err (!%p558_p4)
}
  0x2e   : > { %458 = dma.hbm_to_vmem [thread:$0]  (!%p814_p2), %s990_s1, 16, %s149_s28, [#allocation6]  }
  0x2f   : > { %s562_s8 = scalar_lea.hbm %s991_s2, 16 }
  0x30   : > { %p563_p9 = scmp.ne.s32.totalorder %s991_s2, %s562_s8  ;;  %p569_p8 = scmp.lt.u32.totalorder %s562_s8, %s991_s2 }
  0x32   : > { %p565_p3 = pnand %p563_p9, %p536_p6 }
  0x34   : > { %p566_p7 = pneg %p565_p3 }
  0x36   : > { %p571_p12 = pnand %p569_p8, %p566_p7 }
  0x38   : > { %574 = shalt.err (!%p571_p12)
}
  0x39   : > { %s575_s28 = scalar_lea.vmem %s818_s4, 16  ;;  %s582_s19 = scalar_lea.vmem %s818_s4, 32 }
  0x3a   : > { %p576_p13 = scmp.ne.s32.totalorder %s818_s4, %s575_s28  ;;  %p583_p10 = scmp.lt.s32.totalorder %s818_s4, %s818_s4 }
  0x3b   : > { %p584_p11 = scmp.lt.s32.totalorder %s582_s19, %s575_s28 }
  0x3c   : > { %p578_p4 = pnand %p576_p13, %p536_p6 }
  0x3d   : > { %p585_p1 = por %p584_p11, %p583_p10 }
  0x3e   : > { %p579_p5 = pneg %p578_p4 }
  0x40   : > { %p586_p0 = pnand %p585_p1, %p579_p5 }
  0x42   : > { %589 = shalt.err (!%p586_p0)
}
  0x43   : > { %461 = dma.hbm_to_vmem [thread:$0]  (!%p814_p2), %s991_s2, 16, %s818_s4, [#allocation6]  }
  0x44   : > { %s32_s30 = sadd.s32 1, %s702_s16  ;;  %s170_s6 = sand.u32 1, %s694_s14  }
  0x45   : > { %p34_p6 = scmp.ge.s32.totalorder %s32_s30, 2  ;;  %s415_s7 = sshll.u32 %s170_s6, 3 }
  0x46   : > { %s430_s8 = sshll.u32 %s702_s16, 7  ;;  %s174_s4 = scalar_lea.vmem [#allocation2], %s415_s7 }
  0x47   : > { %s1020_s30 = smov (%p34_p6, %s32_s30), 0  ;;  %s876_s10 = scalar_lea.hbm %s989_s0, %s430_s8 }
  0x48   : > { %s36_s11 = ssub.s32 %s702_s16, %s1020_s30  ;;  %s183_s18 = sshll.u32 %s174_s4, 4  ;;  %s880_s18 = int_to_ptr.vmem [resolvable:$true] %s183_s18 }
  0x49   : > { %p39_p2 = scmp.eq.s32.totalorder %s36_s11, 0  ;;  %s887_s19 = scalar_lea.sflag [#allocation3], %s170_s6 }
  0x4a   : > { %s590_s22 = scalar_lea.hbm %s876_s10, 128  ;;  %p1007_p3 = scmp.ne.s32.totalorder %s1005_s29, 0 }
  0x4b   : > { %s885_s28 = scalar_select %p39_p2, %s694_s14, %s41_s20  }
  0x4c   : > { %p591_p9 = scmp.ne.s32.totalorder %s876_s10, %s590_s22  ;;  %p592_p7 = pneg %p1007_p3 }
  0x4d   : > { %s595_s7 = scalar_lea.hbm %s989_s0, 256  ;;  %p596_p13 = scmp.lt.u32.totalorder %s876_s10, %s989_s0 }
  0x4e   : > { %p593_p8 = pnand %p592_p7, %p591_p9  ;;  %p597_p4 = scmp.lt.u32.totalorder %s595_s7, %s590_s22 }
  0x4f   : > { %p599_p10 = scmp.lt.u32.totalorder %s590_s22, %s876_s10 }
  0x50   : > { %p594_p12 = pneg %p593_p8  ;;  %p598_p5 = por %p597_p4, %p596_p13 }
  0x52   : > { %p600_p11 = por %p599_p10, %p598_p5 }
  0x54   : > { %p601_p1 = pnand %p600_p11, %p594_p12 }
  0x56   : > { %604 = shalt.err (!%p601_p1)
}
  0x57   : > { %s605_s20 = scalar_lea.vmem %s880_s18, 128  ;;  %s710_s6 = smov [#allocation2]  }
  0x58   : > { %p606_p0 = scmp.ne.s32.totalorder %s880_s18, %s605_s20  ;;  %s610_s11 = sshll.u32 %s710_s6, 4  ;;  %s611_s11 = int_to_ptr.vmem [resolvable:$false] %s610_s11 }
  0x59   : > { %s612_s4 = scalar_lea.vmem %s611_s11, 256  ;;  %p613_p9 = scmp.lt.s32.totalorder %s880_s18, %s611_s11 }
  0x5a   : > { %p608_p6 = pnand %p606_p0, %p592_p7  ;;  %p614_p8 = scmp.lt.s32.totalorder %s612_s4, %s605_s20 }
  0x5c   : > { %p609_p2 = pneg %p608_p6  ;;  %p615_p13 = por %p614_p8, %p613_p9 }
  0x5e   : > { %p616_p4 = pnand %p615_p13, %p609_p2 }
  0x60   : > { %619 = shalt.err (!%p616_p4)
}
  0x61   : > { %s711_s22 = smov 64   ;;  %s712_s27 = smov 4  }
  0x62   : > { %465 = dma.hbm_to_vmem [thread:$0]  (!%p1007_p3), %s876_s10, 128, %s880_s18, %s887_s19, %s711_s22, %s711_s22, %s712_s27  }
  0x63   : > { %p1008_p7 = scmp.ne.s32.totalorder %s1004_s26, 0 }
  0x64   : > { %s918_s8 = sand.u32 (!%p1008_p7), 1, %s690_s13   ;;  %p1009_p12 = scmp.ne.s32.totalorder (!%p1008_p7), %s1001_s23, 0 }
  0x65   : > { %195 = sbr.rel (%p1008_p7) target bundleno = 447 (0x1bf), region = 32  ;;  %s419_s7 = sshll.u32 (!%p1008_p7), %s918_s8, 3 }
  0x66   : > { %s198_s5 = scalar_lea.sflag (!%p1008_p7), [#allocation3], %s918_s8  ;;  %s201_s9 = scalar_lea.vmem (!%p1008_p7), [#allocation2], %s419_s7 }
  0x6c   : > { %673 = dma.done.wait (%p1009_p12), %s198_s5, 128  }
  0x6d   : > { %675 = vsyncadd (%p1009_p12), %s198_s5, 4294967168  ;;  %p1010_p3 = scmp.ne.s32.totalorder %s999_s21, 0 }
  0x6f   : > { %677 = dma.done.wait (%p1010_p3), [#allocation6], 32  }
  0x70   : > { %679 = vsyncadd (%p1010_p3), [#allocation6], 4294967264  ;;  %v435_v0 = vld [vmem:[%s201_s9] sm:$0xff]   ;;  %v265_v14 = vlaneseq  ;;  %v238_v19 = vld [vmem:[#allocation5] sm:$0x1]  ;;  %s433_s21 = sshll.u32 %s698_s15, 7 }
  0x71   : > { %v436_v1 = vunpack.c.l.bf16 %v435_v0  ;;  %v437_v2 = vunpack.c.h.bf16 %v435_v0  ;;  %v239_v20 = vunpack.c.l.bf16 %v238_v19  ;;  %v240_v22 = vld [vmem:[#allocation7] sm:$0x1]  ;;  %s231_s23 = scalar_lea.vmem [#allocation8], %s419_s7  ;;  %s938_s18 = scalar_lea.hbm %s992_s3, %s433_s21 }
  0x72   : > { %v266_v18 = vshrl.u32 %v265_v14, 7  ;;  %v241_v24 = vunpack.c.l.bf16 %v240_v22  ;;  %s303_s26 = sshll.u32 %s231_s23, 4  ;;  %s288_s19 = scalar_lea.sflag [#allocation4], %s918_s8  ;;  %s940_s26 = int_to_ptr.vmem [resolvable:$true] %s303_s26 }
  0x73   : > { %242 = vadd.xlane.f32.xlu0 %v436_v1  ;;  %s620_s20 = scalar_lea.vmem %s940_s26, 128  ;;  %p1011_p10 = scmp.ne.s32.totalorder %s1002_s24, 0 }
  0x74   : > { %v267_v21 = vsub.s32 0, %v266_v18  ;;  %p621_p5 = scmp.ne.s32.totalorder %s940_s26, %s620_s20  ;;  %s713_s15 = smov [#allocation8]  }
  0x75   : > { %s624_s6 = sshll.u32 %s713_s15, 4  ;;  %s625_s6 = int_to_ptr.vmem [resolvable:$false] %s624_s6 }
  0x76   : > { %v268_v25 = vrot.slane %v239_v20, %v267_v21  ;;  %v274_v28 = vrot.slane %v241_v24, %v267_v21  ;;  %p622_p11 = pnand %p621_p5, %p1011_p10  ;;  %s626_s11 = scalar_lea.vmem %s625_s6, 256 }
  0x77   : > { %244 = vadd.xlane.f32.xlu0 %v437_v2  ;;  %p627_p0 = scmp.lt.s32.totalorder %s940_s26, %s625_s6  ;;  %p628_p6 = scmp.lt.s32.totalorder %s626_s11, %s620_s20 }
  0x78   : > { %p623_p1 = pneg %p622_p11 }
  0x79   : > { %p629_p2 = por %p628_p6, %p627_p0 }
  0x7b   : > { %p630_p9 = pnand %p629_p2, %p623_p1 }
 0x100   : > { %v243_v3 = vpop.xlane.xlu0 %242 }
 0x101   : > { %v247_v4 = vmul.f32 0.0078125, %v243_v3 }
 0x103   : > { %v249_v5 = vsub.f32 %v436_v1, %v247_v4 }
 0x104   : > { %v245_v6 = vpop.xlane.xlu0 %244 }
 0x105   : > { %v248_v7 = vmul.f32 0.0078125, %v245_v6  ;;  %v251_v8 = vmul.f32 %v249_v5, %v249_v5 }
 0x107   : > { %v250_v9 = vsub.f32 %v437_v2, %v248_v7  ;;  %253 = vadd.xlane.f32.xlu1 %v251_v8 }
 0x109   : > { %v252_v10 = vmul.f32 %v250_v9, %v250_v9 }
 0x10b   : > { %255 = vadd.xlane.f32.xlu1 %v252_v10 }
 0x194   : > { %v254_v11 = vpop.xlane.xlu1 %253 }
 0x195   : > { %v257_v12 = vmul.f32 0.0078125, %v254_v11 }
 0x197   : > { %v259_v13 = vadd.f32 1e-12, %v257_v12 }
 0x198   : > { %v256_v15 = vpop.xlane.xlu1 %255 }
 0x199   : > { %530 = vrsqrt.f32 %v259_v13  ;;  %v258_v16 = vmul.f32 0.0078125, %v256_v15 }
 0x19b   : > { %v260_v17 = vadd.f32 1e-12, %v258_v16 }
 0x19d   : > { %532 = vrsqrt.f32 %v260_v17 }
 0x1a3   : > { %v531_v23 = vpop.eup %530 }
 0x1a4   : > { %v263_v26 = vmul.f32 %v531_v23, %v249_v5 }
 0x1a6   : > { %v269_v29 = vmul.f32 %v268_v25, %v263_v26 }
 0x1a7   : > { %v533_v27 = vpop.eup %532 }
 0x1a8   : > { %v264_v30 = vmul.f32 %v533_v27, %v250_v9  ;;  %v275_v32 = vadd.f32 %v274_v28, %v269_v29 }
 0x1aa   : > { %v270_v31 = vmul.f32 %v268_v25, %v264_v30 }
 0x1ac   : > { %v276_v33 = vadd.f32 %v274_v28, %v270_v31 }
 0x1ae   : > { %v441_v34 = vpack.c.bf16 %v276_v33, %v275_v32 }
 0x1b0   : > { %442 = vst [vmem:[%s231_s23] sm:$0xff] %v441_v34  }
 0x1b1   : > { %633 = shalt.err (!%p630_p9)
}
 0x1b2   : > { %s634_s4 = scalar_lea.hbm %s938_s18, 128  ;;  %s638_s7 = scalar_lea.hbm %s992_s3, 256 }
 0x1b3   : > { %p635_p8 = scmp.ne.s32.totalorder %s938_s18, %s634_s4  ;;  %p639_p7 = scmp.lt.u32.totalorder %s938_s18, %s992_s3 }
 0x1b4   : > { %p640_p12 = scmp.lt.u32.totalorder %s638_s7, %s634_s4  ;;  %p642_p5 = scmp.lt.u32.totalorder %s634_s4, %s938_s18 }
 0x1b5   : > { %p636_p13 = pnand %p635_p8, %p1011_p10 }
 0x1b6   : > { %p641_p3 = por %p640_p12, %p639_p7 }
 0x1b7   : > { %p637_p4 = pneg %p636_p13 }
 0x1b8   : > { %p643_p11 = por %p642_p5, %p641_p3 }
 0x1ba   : > { %p644_p1 = pnand %p643_p11, %p637_p4 }
 0x1bc   : > { %647 = shalt.err (!%p644_p1)
}
 0x1bd   : > { %s714_s21 = smov 64   ;;  %s715_s23 = smov 4  }
 0x1be   : > { %453 = dma.vmem_to_hbm [thread:$0]  (%p1011_p10), %s940_s26, 128, %s938_s18, %s288_s19, %s714_s21, %s714_s21, %s715_s23  }
 0x1bf PF: > { %s318_s29 = sand.u32 1, %s686_s12   ;;  %p1012_p0 = scmp.ne.s32.totalorder %s1003_s25, 0 }
 0x1c0   : > { %p1013_p6 = scmp.ge.s32.totalorder %s706_s17, 2  ;;  %s319_s10 = scalar_lea.sflag [#allocation4], %s318_s29 }
 0x1c2   : > { %p467_p2 = pnand %p1013_p6, %p1012_p0 }
 0x1c4   : > { %681 = dma.done.wait (!%p467_p2), %s319_s10, 128  }
 0x1c5   : > { %683 = vsyncadd (!%p467_p2), %s319_s10, 4294967168  ;;  %s20_s17 = sadd.s32 1, %s706_s17   ;;  %s1014_s12 = smov %s690_s13 }
 0x1c6   : > { %p17_p9 = scmp.ge.s32.totalorder %s20_s17, 4   ;;  %s1015_s13 = smov %s694_s14 }
 0x1c7   : > { %s1016_s14 = smov %s885_s28  ;;  %s1017_s15 = smov %s702_s16 }
 0x1c8   : > { %s1018_s16 = smov %s1020_s30  ;;  %19 = sbr.rel (!%p17_p9) target bundleno = 7 (0x7), region = 85 }
 0x1cf   :  { %324 = vsyncpa [#allocation3], 1 }
 0x1d0   :  { %326 = vsyncpa [#allocation3 + $0x1], 1 }
 0x1d1   :  { %327 = vsyncpa [#allocation6], 1 }
 0x1d2   :  { %328 = vsyncpa [#allocation4], 1 }
 0x1d3   :  { %330 = vsyncpa [#allocation4 + $0x1], 1 }

// kernel: conformer_forward.37
= control target key start
LH: loop header
LB: loop body
LE: loop exit
PB: predicated region body
PF: predicated region fallthrough
CT: control target
= control target key end

     0   :  { %s2258_s0 = inlined_call_operand.hbm [shape: bf16[2,16,128], index: 0, kind: input, shape index: {}]   ;;  %s2259_s1 = inlined_call_operand.hbm [shape: bf16[1,128], index: 1, kind: input, shape index: {}]   ;;  %s2260_s2 = inlined_call_operand.hbm [shape: bf16[1,128], index: 2, kind: input, shape index: {}]   ;;  %s2261_s3 = inlined_call_operand.hbm [shape: bf16[128,256], index: 3, kind: input, shape index: {}]   ;;  %s2262_s4 = inlined_call_operand.hbm [shape: bf16[1,256], index: 4, kind: input, shape index: {}]   ;;  %s2263_s5 = inlined_call_operand.hbm [shape: bf16[256,128], index: 5, kind: input, shape index: {}]   ;;  %s2264_s6 = inlined_call_operand.hbm [shape: bf16[1,128], index: 6, kind: input, shape index: {}]   ;;  %s2265_s7 = inlined_call_operand.hbm [shape: bf16[1,128], index: 7, kind: input, shape index: {}]   ;;  %s2266_s8 = inlined_call_operand.hbm [shape: bf16[1,128], index: 8, kind: input, shape index: {}]   ;;  %s2267_s9 = inlined_call_operand.hbm [shape: bf16[2,16,128], index: 9, kind: output, shape index: {}]  }
   0x1   :  { %2275 = sst [smem:[#allocation26_spill]] %s2259_s1 }
   0x2   :  { %2276 = sst [smem:[#allocation27_spill]] %s2261_s3 }
   0x3   :  { %2277 = sst [smem:[#allocation28_spill]] %s2267_s9 }
   0x4   :  { %14 = vsyncpa [#allocation3], 0 }
   0x5   :  { %16 = vsyncpa [#allocation3 + $0x1], 0 }
   0x6   :  { %17 = vsyncpa [#allocation6], 0 }
   0x7   :  { %18 = vsyncpa [#allocation9], 0 }
   0x8   :  { %19 = vsyncpa [#allocation12], 0 }
   0x9   :  { %20 = vsyncpa [#allocation15], 0 }
   0xa   :  { %21 = vsyncpa [#allocation4], 0 }
   0xb   :  { %23 = vsyncpa [#allocation4 + $0x1], 0  ;;  %s1855_s30 = smov 0   ;;  %s1857_s10 = smov 0  }
   0xc   :  { %s1859_s11 = smov 0   ;;  %s1861_s12 = smov 0  }
   0xd   :  { %s1863_s13 = smov 0   ;;  %s1865_s14 = smov 0  }
   0xe LB: > { %2278 = sst [smem:[#allocation24_spill]] %s1778_s12  ;;  %s2271_s15 = sadd.s32 4294967295, %s1786_s14   ;;  %s1786_s14 = sphi %s1865_s14, %s29_s14   ;;  %s1782_s13 = sphi %s1863_s13, %s2305_s13   ;;  %s1778_s12 = sphi %s1861_s12, %s2304_s12   ;;  %s1774_s11 = sphi %s1859_s11, %s2303_s11   ;;  %s1770_s10 = sphi %s1857_s10, %s2302_s10   ;;  %s1766_s30 = sphi %s1855_s30, %s2301_s30  }
   0xf   : > { %p1118_p0 = scmp.ge.s32.totalorder %s1786_s14, 1  ;;  %p1889_p1 = scmp.eq.s32.totalorder %s2271_s15, 0 }
  0x10   : > { %p270_p2 = scmp.lt.s32.totalorder %s1786_s14, 3  ;;  %s1788_s18 = smov [#allocation5]  }
  0x11   : > { %s2279_s16 = scalar_select %p1889_p1, 1, 0 }
  0x12   : > { %p1894_p3 = pnand %p1118_p0, %p270_p2  ;;  %s283_s19 = sshll.u32 %s1788_s18, 4  ;;  %s284_s19 = int_to_ptr.vmem [resolvable:$true] %s283_s19 }
  0x13   : > { %s1789_s20 = smov [#allocation8]   ;;  %s1790_s23 = smov [#allocation11]  }
  0x14   : > { %s2280_s17 = scalar_select %p1894_p3, 1, 0 }
  0x15   : > { %p1256_p5 = pneg %p1894_p3  ;;  %s304_s21 = sshll.u32 %s1789_s20, 4  ;;  %s1907_s21 = int_to_ptr.vmem [resolvable:$true] %s304_s21 }
  0x16   : > { %2281 = sst [smem:[#allocation25_spill]] %s2280_s17  ;;  %s1909_s24 = sshll.u32 %s1790_s23, 4  ;;  %s329_s24 = int_to_ptr.vmem [resolvable:$true] %s1909_s24 }
  0x17   : > { %p1903_p6 = pnand %p1256_p5, %p1889_p1  ;;  %s2283_s1 = sld [smem:[#allocation26_spill]] }
  0x19   : > { %p1919_p8 = pneg %p1903_p6 }
  0x1d   : > { %s1434_s27 = scalar_lea.hbm %s2283_s1, 16 }
  0x1e   : > { %p1435_p7 = scmp.ne.s32.totalorder %s2283_s1, %s1434_s27  ;;  %p1441_p11 = scmp.lt.u32.totalorder %s1434_s27, %s2283_s1 }
  0x20   : > { %p1437_p9 = pnand %p1919_p8, %p1435_p7 }
  0x22   : > { %p1438_p10 = pneg %p1437_p9 }
  0x24   : > { %p1443_p12 = pnand %p1441_p11, %p1438_p10 }
  0x26   : > { %1446 = shalt.err (!%p1443_p12)
}
  0x27   : > { %s1447_s25 = scalar_lea.vmem %s284_s19, 16  ;;  %s1454_s26 = scalar_lea.vmem %s284_s19, 32 }
  0x28   : > { %p1448_p13 = scmp.ne.s32.totalorder %s284_s19, %s1447_s25  ;;  %p1455_p5 = scmp.lt.s32.totalorder %s284_s19, %s284_s19 }
  0x29   : > { %p1456_p4 = scmp.lt.s32.totalorder %s1454_s26, %s1447_s25 }
  0x2a   : > { %p1450_p0 = pnand %p1448_p13, %p1919_p8 }
  0x2b   : > { %p1457_p3 = por %p1456_p4, %p1455_p5 }
  0x2c   : > { %p1451_p2 = pneg %p1450_p0 }
  0x2e   : > { %p1458_p1 = pnand %p1457_p3, %p1451_p2 }
  0x30   : > { %1461 = shalt.err (!%p1458_p1)
}
  0x31   : > { %1259 = dma.hbm_to_vmem [thread:$0]  (!%p1903_p6), %s2283_s1, 16, %s284_s19, [#allocation6]  }
  0x32   : > { %s2285_s3 = sld [smem:[#allocation27_spill]] }
  0x38   : > { %s1462_s23 = scalar_lea.hbm %s2285_s3, 2048 }
  0x39   : > { %p1463_p7 = scmp.ne.s32.totalorder %s2285_s3, %s1462_s23  ;;  %p1469_p1 = scmp.lt.u32.totalorder %s1462_s23, %s2285_s3 }
  0x3b   : > { %p1465_p9 = pnand %p1463_p7, %p1919_p8 }
  0x3d   : > { %p1466_p4 = pneg %p1465_p9 }
  0x3f   : > { %p1471_p3 = pnand %p1469_p1, %p1466_p4 }
  0x41   : > { %1474 = shalt.err (!%p1471_p3)
}
  0x42   : > { %s1475_s19 = scalar_lea.vmem %s1907_s21, 2048  ;;  %p1483_p13 = scmp.lt.s32.totalorder %s1907_s21, %s1907_s21 }
  0x43   : > { %p1476_p10 = scmp.ne.s32.totalorder %s1907_s21, %s1475_s19  ;;  %p1484_p0 = scmp.lt.s32.totalorder %s1475_s19, %s1475_s19 }
  0x45   : > { %p1478_p11 = pnand %p1476_p10, %p1919_p8  ;;  %p1485_p2 = por %p1484_p0, %p1483_p13 }
  0x47   : > { %p1479_p12 = pneg %p1478_p11 }
  0x49   : > { %p1486_p5 = pnand %p1485_p2, %p1479_p12 }
  0x4b   : > { %1489 = shalt.err (!%p1486_p5)
}
  0x4c   : > { %s1791_s9 = smov 128   ;;  %s1792_s15 = smov 8  }
  0x4d   : > { %1265 = dma.hbm_to_vmem [thread:$0]  (!%p1903_p6), %s2285_s3, 2048, %s1907_s21, [#allocation9], %s1791_s9, %s1791_s9, %s1792_s15  }
  0x4e   : > { %s1490_s23 = scalar_lea.hbm %s2263_s5, 2048 }
  0x4f   : > { %p1491_p7 = scmp.ne.s32.totalorder %s2263_s5, %s1490_s23  ;;  %p1497_p1 = scmp.lt.u32.totalorder %s1490_s23, %s2263_s5 }
  0x51   : > { %p1493_p9 = pnand %p1491_p7, %p1919_p8 }
  0x53   : > { %p1494_p4 = pneg %p1493_p9 }
  0x55   : > { %p1499_p3 = pnand %p1497_p1, %p1494_p4 }
  0x57   : > { %1502 = shalt.err (!%p1499_p3)
}
  0x58   : > { %s1503_s28 = scalar_lea.vmem %s329_s24, 2048  ;;  %p1511_p13 = scmp.lt.s32.totalorder %s329_s24, %s329_s24 }
  0x59   : > { %p1504_p10 = scmp.ne.s32.totalorder %s329_s24, %s1503_s28  ;;  %p1512_p0 = scmp.lt.s32.totalorder %s1503_s28, %s1503_s28 }
  0x5b   : > { %p1506_p11 = pnand %p1504_p10, %p1919_p8  ;;  %p1513_p2 = por %p1512_p0, %p1511_p13 }
  0x5d   : > { %p1507_p12 = pneg %p1506_p11 }
  0x5f   : > { %p1514_p5 = pnand %p1513_p2, %p1507_p12 }
  0x61   : > { %1517 = shalt.err (!%p1514_p5)
}
  0x62   : > { %s1793_s21 = smov 64   ;;  %s1794_s9 = smov 4  }
  0x63   : > { %1271 = dma.hbm_to_vmem [thread:$0]  (!%p1903_p6), %s2263_s5, 2048, %s329_s24, [#allocation12], %s1793_s21, %s1793_s21, %s1794_s9  }
  0x64   : > { %s1795_s29 = smov [#allocation14]   ;;  %s1796_s20 = smov [#allocation7]  }
  0x65   : > { %s353_s27 = sshll.u32 %s1795_s29, 4  ;;  %s294_s23 = sshll.u32 %s1796_s20, 4  ;;  %s354_s27 = int_to_ptr.vmem [resolvable:$true] %s353_s27  ;;  %s295_s23 = int_to_ptr.vmem [resolvable:$true] %s294_s23 }
  0x66   : > { %s1518_s19 = scalar_lea.hbm %s2265_s7, 16 }
  0x67   : > { %p1519_p7 = scmp.ne.s32.totalorder %s2265_s7, %s1518_s19  ;;  %p1525_p1 = scmp.lt.u32.totalorder %s1518_s19, %s2265_s7 }
  0x69   : > { %p1521_p9 = pnand %p1519_p7, %p1919_p8 }
  0x6b   : > { %p1522_p4 = pneg %p1521_p9 }
  0x6d   : > { %p1527_p3 = pnand %p1525_p1, %p1522_p4 }
  0x6f   : > { %1530 = shalt.err (!%p1527_p3)
}
  0x70   : > { %s1531_s24 = scalar_lea.vmem %s354_s27, 16  ;;  %s1538_s1 = scalar_lea.vmem %s354_s27, 32 }
  0x71   : > { %p1532_p10 = scmp.ne.s32.totalorder %s354_s27, %s1531_s24  ;;  %p1539_p13 = scmp.lt.s32.totalorder %s354_s27, %s354_s27 }
  0x72   : > { %p1540_p0 = scmp.lt.s32.totalorder %s1538_s1, %s1531_s24 }
  0x73   : > { %p1534_p11 = pnand %p1532_p10, %p1919_p8 }
  0x74   : > { %p1541_p2 = por %p1540_p0, %p1539_p13 }
  0x75   : > { %p1535_p12 = pneg %p1534_p11 }
  0x77   : > { %p1542_p5 = pnand %p1541_p2, %p1535_p12 }
  0x79   : > { %1545 = shalt.err (!%p1542_p5)
}
  0x7a   : > { %1277 = dma.hbm_to_vmem [thread:$0]  (!%p1903_p6), %s2265_s7, 16, %s354_s27, [#allocation15]  }
  0x7b   : > { %s1546_s29 = scalar_lea.hbm %s2260_s2, 16 }
  0x7c   : > { %p1547_p7 = scmp.ne.s32.totalorder %s2260_s2, %s1546_s29  ;;  %p1553_p1 = scmp.lt.u32.totalorder %s1546_s29, %s2260_s2 }
  0x7e   : > { %p1549_p9 = pnand %p1547_p7, %p1919_p8 }
  0x80   : > { %p1550_p4 = pneg %p1549_p9 }
  0x82   : > { %p1555_p3 = pnand %p1553_p1, %p1550_p4 }
  0x84   : > { %1558 = shalt.err (!%p1555_p3)
}
  0x85   : > { %s1559_s28 = scalar_lea.vmem %s295_s23, 16  ;;  %s1566_s27 = scalar_lea.vmem %s295_s23, 32 }
  0x86   : > { %p1560_p10 = scmp.ne.s32.totalorder %s295_s23, %s1559_s28  ;;  %p1567_p13 = scmp.lt.s32.totalorder %s295_s23, %s295_s23 }
  0x87   : > { %p1568_p0 = scmp.lt.s32.totalorder %s1566_s27, %s1559_s28 }
  0x88   : > { %p1562_p11 = pnand %p1560_p10, %p1919_p8 }
  0x89   : > { %p1569_p2 = por %p1568_p0, %p1567_p13 }
  0x8a   : > { %p1563_p12 = pneg %p1562_p11 }
  0x8c   : > { %p1570_p5 = pnand %p1569_p2, %p1563_p12 }
  0x8e   : > { %1573 = shalt.err (!%p1570_p5)
}
  0x8f   : > { %1262 = dma.hbm_to_vmem [thread:$0]  (!%p1903_p6), %s2260_s2, 16, %s295_s23, [#allocation6]  }
  0x90   : > { %s1797_s3 = smov [#allocation10]   ;;  %s1798_s12 = smov [#allocation13]  }
  0x91   : > { %s318_s15 = sshll.u32 %s1797_s3, 4  ;;  %s342_s17 = sshll.u32 %s1798_s12, 4  ;;  %s319_s15 = int_to_ptr.vmem [resolvable:$true] %s318_s15  ;;  %s343_s17 = int_to_ptr.vmem [resolvable:$true] %s342_s17 }
  0x92   : > { %s1574_s25 = scalar_lea.hbm %s2262_s4, 32 }
  0x93   : > { %p1575_p7 = scmp.ne.s32.totalorder %s2262_s4, %s1574_s25  ;;  %p1581_p1 = scmp.lt.u32.totalorder %s1574_s25, %s2262_s4 }
  0x95   : > { %p1577_p9 = pnand %p1575_p7, %p1919_p8 }
  0x97   : > { %p1578_p4 = pneg %p1577_p9 }
  0x99   : > { %p1583_p3 = pnand %p1581_p1, %p1578_p4 }
  0x9b   : > { %1586 = shalt.err (!%p1583_p3)
}
  0x9c   : > { %s1587_s23 = scalar_lea.vmem %s319_s15, 32  ;;  %p1595_p13 = scmp.lt.s32.totalorder %s319_s15, %s319_s15 }
  0x9d   : > { %p1588_p10 = scmp.ne.s32.totalorder %s319_s15, %s1587_s23  ;;  %p1596_p0 = scmp.lt.s32.totalorder %s1587_s23, %s1587_s23 }
  0x9f   : > { %p1590_p11 = pnand %p1588_p10, %p1919_p8  ;;  %p1597_p2 = por %p1596_p0, %p1595_p13 }
  0xa1   : > { %p1591_p12 = pneg %p1590_p11 }
  0xa3   : > { %p1598_p5 = pnand %p1597_p2, %p1591_p12 }
  0xa5   : > { %1601 = shalt.err (!%p1598_p5)
}
  0xa6   : > { %1268 = dma.hbm_to_vmem [thread:$0]  (!%p1903_p6), %s2262_s4, 32, %s319_s15, [#allocation9]  }
  0xa7   : > { %s1602_s29 = scalar_lea.hbm %s2264_s6, 16 }
  0xa8   : > { %p1603_p7 = scmp.ne.s32.totalorder %s2264_s6, %s1602_s29  ;;  %p1609_p1 = scmp.lt.u32.totalorder %s1602_s29, %s2264_s6 }
  0xaa   : > { %p1605_p9 = pnand %p1603_p7, %p1919_p8 }
  0xac   : > { %p1606_p4 = pneg %p1605_p9 }
  0xae   : > { %p1611_p3 = pnand %p1609_p1, %p1606_p4 }
  0xb0   : > { %1614 = shalt.err (!%p1611_p3)
}
  0xb1   : > { %s1615_s28 = scalar_lea.vmem %s343_s17, 16  ;;  %s1622_s15 = scalar_lea.vmem %s343_s17, 32 }
  0xb2   : > { %p1616_p10 = scmp.ne.s32.totalorder %s343_s17, %s1615_s28  ;;  %p1623_p13 = scmp.lt.s32.totalorder %s343_s17, %s343_s17 }
  0xb3   : > { %p1624_p0 = scmp.lt.s32.totalorder %s1622_s15, %s1615_s28 }
  0xb4   : > { %p1618_p11 = pnand %p1616_p10, %p1919_p8 }
  0xb5   : > { %p1625_p2 = por %p1624_p0, %p1623_p13 }
  0xb6   : > { %p1619_p12 = pneg %p1618_p11 }
  0xb8   : > { %p1626_p5 = pnand %p1625_p2, %p1619_p12 }
  0xba   : > { %1629 = shalt.err (!%p1626_p5)
}
  0xbb   : > { %1274 = dma.hbm_to_vmem [thread:$0]  (!%p1903_p6), %s2264_s6, 16, %s343_s17, [#allocation12]  }
  0xbc   : > { %s1799_s24 = smov [#allocation16]   ;;  %s1630_s29 = scalar_lea.hbm %s2266_s8, 16 }
  0xbd   : > { %s364_s1 = sshll.u32 %s1799_s24, 4  ;;  %p1631_p7 = scmp.ne.s32.totalorder %s2266_s8, %s1630_s29  ;;  %s365_s1 = int_to_ptr.vmem [resolvable:$true] %s364_s1 }
  0xbe   : > { %p1637_p1 = scmp.lt.u32.totalorder %s1630_s29, %s2266_s8 }
  0xbf   : > { %p1633_p9 = pnand %p1631_p7, %p1919_p8 }
  0xc1   : > { %p1634_p4 = pneg %p1633_p9 }
  0xc3   : > { %p1639_p3 = pnand %p1637_p1, %p1634_p4 }
  0xc5   : > { %1642 = shalt.err (!%p1639_p3)
}
  0xc6   : > { %s1643_s17 = scalar_lea.vmem %s365_s1, 16  ;;  %s1650_s28 = scalar_lea.vmem %s365_s1, 32 }
  0xc7   : > { %p1644_p10 = scmp.ne.s32.totalorder %s365_s1, %s1643_s17  ;;  %p1651_p13 = scmp.lt.s32.totalorder %s365_s1, %s365_s1 }
  0xc8   : > { %p1652_p0 = scmp.lt.s32.totalorder %s1650_s28, %s1643_s17 }
  0xc9   : > { %p1646_p11 = pnand %p1644_p10, %p1919_p8 }
  0xca   : > { %p1653_p2 = por %p1652_p0, %p1651_p13 }
  0xcb   : > { %p1647_p12 = pneg %p1646_p11 }
  0xcd   : > { %p1654_p5 = pnand %p1653_p2, %p1647_p12 }
  0xcf   : > { %1657 = shalt.err (!%p1654_p5)
}
  0xd0   : > { %1280 = dma.hbm_to_vmem [thread:$0]  (!%p1903_p6), %s2266_s8, 16, %s365_s1, [#allocation15]  }
  0xd1   : > { %s1117_s18 = sadd.s32 4294967294, %s1786_s14   ;;  %s41_s23 = sadd.s32 1, %s1782_s13 }
  0xd2   : > { %p43_p8 = scmp.ge.s32.totalorder %s41_s23, 2  ;;  %s50_s22 = sadd.s32 1, %s1774_s11 }
  0xd3   : > { %p57_p7 = scmp.ne.s32.totalorder %s1774_s11, %s1770_s10  ;;  %p58_p9 = scmp.eq.s32.totalorder %s1786_s14, 0 }
  0xd4   : > { %s2307_s23 = smov (%p43_p8, %s41_s23), 0  ;;  %p63_p1 = scmp.ne.s32.totalorder %s1770_s10, %s1766_s30 }
  0xd5   : > { %p2078_p4 = por %p58_p9, %p57_p7  ;;  %s45_s1 = ssub.s32 %s1782_s13, %s2307_s23 }
  0xd6   : > { %s2287_s3 = sadd.s32 4294967295, %s1786_s14   ;;  %p48_p3 = scmp.eq.s32.totalorder %s45_s1, 0 }
  0xd7   : > { %p257_p6 = scmp.eq.s32.totalorder %s2287_s3, 1  ;;  %p2288_p10 = scmp.ne.s32.totalorder %s2279_s16, 0 }
  0xd8   : > { %p263_p13 = scmp.eq.s32.totalorder %s1117_s18, 1  ;;  %p1297_p2 = scmp.lt.s32.totalorder %s1786_s14, 2 }
  0xd9   : > { %p2090_p11 = por %p2288_p10, %p63_p1  ;;  %p2094_p12 = por %p257_p6, %p57_p7 }
  0xda   : > { %s2099_s20 = scalar_select %p48_p3, %s1774_s11, %s50_s22  }
  0xdb   : > { %s2290_s29 = scalar_select %p2094_p12, 1, 0 }
  0xdc   : > { %p2101_p0 = por %p263_p13, %p63_p1  ;;  %s375_s26 = sand.u32 1, %s1774_s11  }
  0xdd   : > { %s1185_s19 = sshll.u32 %s1782_s13, 7  ;;  %s1128_s17 = sshll.u32 %s375_s26, 3 }
  0xde   : > { %s2291_s25 = scalar_select %p2101_p0, 1, 0 }
  0xdf   : > { %s2111_s27 = scalar_lea.hbm %s2258_s0, %s1185_s19  ;;  %s379_s18 = scalar_lea.vmem [#allocation2], %s1128_s17 }
  0xe0   : > { %s388_s22 = sshll.u32 %s379_s18, 4  ;;  %p2115_p5 = pnand %p1297_p2, %p2078_p4  ;;  %s2119_s22 = int_to_ptr.vmem [resolvable:$true] %s388_s22 }
  0xe1   : > { %s2121_s3 = scalar_lea.sflag [#allocation3], %s375_s26  ;;  %s1658_s28 = scalar_lea.hbm %s2111_s27, 128 }
  0xe2   : > { %p1659_p8 = scmp.ne.s32.totalorder %s2111_s27, %s1658_s28  ;;  %p1660_p7 = pneg %p2115_p5 }
  0xe3   : > { %s1663_s17 = scalar_lea.hbm %s2258_s0, 256  ;;  %p1664_p4 = scmp.lt.u32.totalorder %s2111_s27, %s2258_s0 }
  0xe4   : > { %p1661_p9 = pnand %p1660_p7, %p1659_p8  ;;  %p1665_p6 = scmp.lt.u32.totalorder %s1663_s17, %s1658_s28 }
  0xe5   : > { %p1667_p10 = scmp.lt.u32.totalorder %s1658_s28, %s2111_s27 }
  0xe6   : > { %p1662_p1 = pneg %p1661_p9  ;;  %p1666_p3 = por %p1665_p6, %p1664_p4 }
  0xe8   : > { %p1668_p13 = por %p1667_p10, %p1666_p3 }
  0xea   : > { %p1669_p2 = pnand %p1668_p13, %p1662_p1 }
  0xec   : > { %1672 = shalt.err (!%p1669_p2)
}
  0xed   : > { %s1673_s26 = scalar_lea.vmem %s2119_s22, 128  ;;  %s1800_s19 = smov [#allocation2]  }
  0xee   : > { %p1674_p8 = scmp.ne.s32.totalorder %s2119_s22, %s1673_s26  ;;  %s1678_s24 = sshll.u32 %s1800_s19, 4  ;;  %s1679_s24 = int_to_ptr.vmem [resolvable:$false] %s1678_s24 }
  0xef   : > { %s1680_s15 = scalar_lea.vmem %s1679_s24, 256  ;;  %p1681_p12 = scmp.lt.s32.totalorder %s2119_s22, %s1679_s24 }
  0xf0   : > { %p1676_p9 = pnand %p1674_p8, %p1660_p7  ;;  %p1682_p4 = scmp.lt.s32.totalorder %s1680_s15, %s1673_s26 }
  0xf2   : > { %p1677_p0 = pneg %p1676_p9  ;;  %p1683_p6 = por %p1682_p4, %p1681_p12 }
  0xf4   : > { %p1684_p3 = pnand %p1683_p6, %p1677_p0 }
  0xf6   : > { %1687 = shalt.err (!%p1684_p3)
}
  0xf7   : > { %1284 = dma.hbm_to_vmem [thread:$0]  (!%p2115_p5), %s2111_s27, 128, %s2119_s22, %s2121_s3, %s1793_s21, %s1793_s21, %s1794_s9  }
  0xf8   : > { %s2293_s28 = sld [smem:[#allocation25_spill]] }
  0xfe   : > { %p2294_p7 = scmp.ne.s32.totalorder %s2293_s28, 0 }
  0xff   : > { %s2155_s17 = sand.u32 (!%p2294_p7), 1, %s1770_s10  }
 0x100   : > { %400 = sbr.rel (%p2294_p7) target bundleno = 1392 (0x570), region = 56  ;;  %s1132_s18 = sshll.u32 (!%p2294_p7), %s2155_s17, 3 }
 0x101   : > { %s403_s26 = scalar_lea.sflag (!%p2294_p7), [#allocation3], %s2155_s17  ;;  %s406_s1 = scalar_lea.vmem (!%p2294_p7), [#allocation2], %s1132_s18 }
 0x107   : > { %1741 = dma.done.wait (%p2090_p11), %s403_s26, 128  }
 0x108   : > { %1743 = vsyncadd (%p2090_p11), %s403_s26, 4294967168  ;;  %p2295_p12 = scmp.ne.s32.totalorder %s2279_s16, 0 }
 0x10a   : > { %1745 = dma.done.wait (%p2295_p12), [#allocation6], 32  }
 0x10b   : > { %1747 = vsyncadd (%p2295_p12), [#allocation6], 4294967264 }
 0x10c   : > { %1749 = dma.done.wait (%p2295_p12), [#allocation9], 2080  }
 0x10d   : > { %1751 = vsyncadd (%p2295_p12), [#allocation9], 4294965216 }
 0x10e   : > { %1753 = dma.done.wait (%p2295_p12), [#allocation12], 2064  }
 0x10f   : > { %1755 = vsyncadd (%p2295_p12), [#allocation12], 4294965232 }
 0x110   : > { %1757 = dma.done.wait (%p2295_p12), [#allocation15], 32  }
 0x111   : > { %1759 = vsyncadd (%p2295_p12), [#allocation15], 4294967264  ;;  %v1190_v0 = vld [vmem:[%s406_s1] sm:$0xff]   ;;  %v1372_v4 = vld [vmem:[#allocation8] ss:$8 sps:$4 sm:$0xff]   ;;  %v1801_v22 = vmov 0   ;;  %v507_v32 = vlaneseq }
 0x112   : > { %v2181_v1 = vunpack.c.l.bf16 %v1190_v0  ;;  %v2184_v2 = vunpack.c.h.bf16 %v1190_v0  ;;  %v1370_v3 = vld [vmem:[#allocation8 + $0x4] ss:$8 sps:$4 sm:$0xff]   ;;  %v1373_v5 = vld [vmem:[#allocation8 + $0x14] ss:$8 sps:$4 sm:$0xff]   ;;  %v1375_v14 = vld [vmem:[#allocation8 + $0x10] ss:$8 sps:$4 sm:$0xff]   ;;  %669 = vmatprep.mubr.bf16.mxu0 %v1801_v22 }
 0x113   : > { %637 = vmatprep.subr.bf16.mxu0 %v1370_v3  ;;  %v1376_v15 = vld [vmem:[#allocation8 + $0x24] ss:$8 sps:$4 sm:$0xff]   ;;  %v1378_v16 = vld [vmem:[#allocation8 + $0x20] ss:$8 sps:$4 sm:$0xff]   ;;  %v1379_v17 = vld [vmem:[#allocation8 + $0x34] ss:$8 sps:$4 sm:$0xff]  }
 0x114   : > { %484 = vadd.xlane.f32.xlu0 %v2181_v1  ;;  %638 = vmatpush1.bf16.msra.mxu0 %v1372_v4  ;;  %v1381_v18 = vld [vmem:[#allocation8 + $0x30] ss:$8 sps:$4 sm:$0xff]   ;;  %v1382_v19 = vld [vmem:[#allocation8 + $0x44] ss:$8 sps:$4 sm:$0xff]   ;;  %v1384_v20 = vld [vmem:[#allocation8 + $0x40] ss:$8 sps:$4 sm:$0xff]  }
 0x115   : > { %639 = vmatprep.subr.bf16.mxu0 %v1373_v5  ;;  %v1385_v21 = vld [vmem:[#allocation8 + $0x54] ss:$8 sps:$4 sm:$0xff]   ;;  %v1387_v23 = vld [vmem:[#allocation8 + $0x50] ss:$8 sps:$4 sm:$0xff]   ;;  %v1388_v24 = vld [vmem:[#allocation8 + $0x64] ss:$8 sps:$4 sm:$0xff]  }
 0x116   : > { %v1390_v25 = vld [vmem:[#allocation8 + $0x60] ss:$8 sps:$4 sm:$0xff]   ;;  %v1391_v26 = vld [vmem:[#allocation8 + $0x74] ss:$8 sps:$4 sm:$0xff]   ;;  %v1393_v27 = vld [vmem:[#allocation8 + $0x70] ss:$8 sps:$4 sm:$0xff]  }
 0x117   : > { %v508_v35 = vshrl.u32 %v507_v32, 7  ;;  %v480_v36 = vld [vmem:[#allocation5] sm:$0x1]  ;;  %v482_v39 = vld [vmem:[#allocation7] sm:$0x1]  ;;  %v1394_v52 = vld [vmem:[#allocation11 + $0x40] sm:$0xff]  }
 0x118   : > { %486 = vadd.xlane.f32.xlu0 %v2184_v2  ;;  %640 = vmatpush1.bf16.msra.mxu0 %v1375_v14  ;;  %v481_v37 = vunpack.c.l.bf16 %v480_v36  ;;  %v483_v41 = vunpack.c.l.bf16 %v482_v39  ;;  %v1395_v53 = vld [vmem:[#allocation11] sm:$0xff]   ;;  %v1396_v54 = vld [vmem:[#allocation11 + $0x48] sm:$0xff]   ;;  %v1398_v56 = vld [vmem:[#allocation11 + $0x50] sm:$0xff]   ;;  %s2296_s16 = sld [smem:[#allocation24_spill]]  ;;  %s472_s9 = scalar_lea.vmem [#allocation17], %s1132_s18 }
 0x119   : > { %641 = vmatprep.subr.bf16.mxu0 %v1376_v15  ;;  %v2189_v38 = vsub.s32 0, %v508_v35  ;;  %1198 = vmatprep.subr.bf16.mxu1 %v1394_v52  ;;  %v1397_v55 = vld [vmem:[#allocation11 + $0x8] sm:$0xff]   ;;  %v1399_v57 = vld [vmem:[#allocation11 + $0x10] sm:$0xff]   ;;  %v1400_v58 = vld [vmem:[#allocation11 + $0x58] sm:$0xff]   ;;  %s953_s12 = sshll.u32 %s472_s9, 4  ;;  %s2297_s3 = sld [smem:[#allocation28_spill]]  ;;  %s2209_s12 = int_to_ptr.vmem [resolvable:$true] %s953_s12 }
 0x11a   : > { %1199 = vmatpush3.bf16.msra.mxu1 %v1395_v53  ;;  %v1401_v59 = vld [vmem:[#allocation11 + $0x18] sm:$0xff]   ;;  %v1402_v60 = vld [vmem:[#allocation11 + $0x60] sm:$0xff]   ;;  %v1404_v62 = vld [vmem:[#allocation11 + $0x68] sm:$0xff]   ;;  %s938_s24 = scalar_lea.sflag [#allocation4], %s2155_s17  ;;  %s1688_s15 = scalar_lea.vmem %s2209_s12, 128 }
 0x11b   : > { %v510_v43 = vrot.slane %v481_v37, %v2189_v38  ;;  %v516_v47 = vrot.slane %v483_v41, %v2189_v38  ;;  %1200 = vmatprep.subr.bf16.mxu1 %v1396_v54  ;;  %v1403_v61 = vld [vmem:[#allocation11 + $0x20] sm:$0xff]   ;;  %v1405_v63 = vld [vmem:[#allocation11 + $0x28] sm:$0xff]   ;;  %v1406_v0 = vld [vmem:[#allocation11 + $0x70] sm:$0xff]   ;;  %p1689_p11 = scmp.ne.s32.totalorder %s2209_s12, %s1688_s15  ;;  %p2298_p0 = scmp.ne.s32.totalorder %s2290_s29, 0 }
 0x11c   : > { %642 = vmatpush1.bf16.msra.mxu0 %v1378_v16  ;;  %v1407_v3 = vld [vmem:[#allocation11 + $0x30] sm:$0xff]   ;;  %v1408_v4 = vld [vmem:[#allocation11 + $0x78] sm:$0xff]   ;;  %s1802_s28 = smov [#allocation17]  }
 0x11d   : > { %643 = vmatprep.subr.bf16.mxu0 %v1379_v17  ;;  %v1409_v5 = vld [vmem:[#allocation11 + $0x38] sm:$0xff]   ;;  %p1690_p5 = pnand %p1689_p11, %p2298_p0  ;;  %s1692_s18 = sshll.u32 %s1802_s28, 4  ;;  %s1693_s18 = int_to_ptr.vmem [resolvable:$false] %s1692_s18 }
 0x11e   : > { %1201 = vmatpush3.bf16.msra.mxu1 %v1397_v55  ;;  %s1188_s21 = sshll.u32 %s2296_s16, 7  ;;  %s1694_s26 = scalar_lea.vmem %s1693_s18, 256 }
 0x11f   : > { %1202 = vmatprep.subr.bf16.mxu1 %v1398_v56  ;;  %s2207_s19 = scalar_lea.hbm %s2297_s3, %s1188_s21  ;;  %p1691_p1 = pneg %p1690_p5 }
 0x120   : > { %644 = vmatpush1.bf16.msra.mxu0 %v1381_v18  ;;  %p1695_p10 = scmp.lt.s32.totalorder %s2209_s12, %s1693_s18  ;;  %p1696_p13 = scmp.lt.s32.totalorder %s1694_s26, %s1688_s15 }
 0x121   : > { %645 = vmatprep.subr.bf16.mxu0 %v1382_v19 }
 0x122   : > { %1203 = vmatpush3.bf16.msra.mxu1 %v1399_v57  ;;  %p1697_p2 = por %p1696_p13, %p1695_p10 }
 0x123   : > { %1204 = vmatprep.subr.bf16.mxu1 %v1400_v58 }
 0x124   : > { %646 = vmatpush1.bf16.msra.mxu0 %v1384_v20  ;;  %p1698_p8 = pnand %p1697_p2, %p1691_p1 }
 0x125   : > { %647 = vmatprep.subr.bf16.mxu0 %v1385_v21 }
 0x126   : > { %1205 = vmatpush3.bf16.msra.mxu1 %v1401_v59 }
 0x127   : > { %1206 = vmatprep.subr.bf16.mxu1 %v1402_v60 }
 0x128   : > { %648 = vmatpush1.bf16.msra.mxu0 %v1387_v23 }
 0x129   : > { %649 = vmatprep.subr.bf16.mxu0 %v1388_v24 }
 0x12a   : > { %1207 = vmatpush3.bf16.msra.mxu1 %v1403_v61 }
 0x12b   : > { %1208 = vmatprep.subr.bf16.mxu1 %v1404_v62 }
 0x12c   : > { %650 = vmatpush1.bf16.msra.mxu0 %v1390_v25 }
 0x12d   : > { %651 = vmatprep.subr.bf16.mxu0 %v1391_v26 }
 0x12e   : > { %1209 = vmatpush3.bf16.msra.mxu1 %v1405_v63 }
 0x12f   : > { %1210 = vmatprep.subr.bf16.mxu1 %v1406_v0 }
 0x130   : > { %652 = vmatpush1.bf16.msra.mxu0 %v1393_v27 }
 0x132   : > { %1211 = vmatpush3.bf16.msra.mxu1 %v1407_v3 }
 0x133   : > { %1212 = vmatprep.subr.bf16.mxu1 %v1408_v4 }
 0x136   : > { %1213 = vmatpush3.bf16.msra.mxu1 %v1409_v5 }
 0x1a1   : > { %v485_v6 = vpop.xlane.xlu0 %484 }
 0x1a2   : > { %v489_v7 = vmul.f32 0.0078125, %v485_v6  ;;  %v536_v6 = vld [vmem:[#allocation10] sm:$0x3] }
 0x1a4   : > { %v491_v8 = vsub.f32 %v2181_v1, %v489_v7  ;;  %v537_v7 = vunpack.c.l.bf16 %v536_v6 }
 0x1a5   : > { %v487_v9 = vpop.xlane.xlu0 %486 }
 0x1a6   : > { %v490_v10 = vmul.f32 0.0078125, %v487_v9  ;;  %v493_v11 = vmul.f32 %v491_v8, %v491_v8  ;;  %v542_v9 = vrot.slane %v537_v7, %v2189_v38 }
 0x1a8   : > { %v492_v12 = vsub.f32 %v2184_v2, %v490_v10  ;;  %495 = vadd.xlane.f32.xlu1 %v493_v11  ;;  %v552_v11 = vrot.slane %v542_v9, %v2189_v38 }
 0x1aa   : > { %v494_v13 = vmul.f32 %v492_v12, %v492_v12 }
 0x1ac   : > { %497 = vadd.xlane.f32.xlu1 %v494_v13 }
 0x235   : > { %v496_v28 = vpop.xlane.xlu1 %495 }
 0x236   : > { %v499_v29 = vmul.f32 0.0078125, %v496_v28 }
 0x238   : > { %v501_v30 = vadd.f32 1e-12, %v499_v29 }
 0x239   : > { %v498_v31 = vpop.xlane.xlu1 %497 }
 0x23a   : > { %1410 = vrsqrt.f32 %v501_v30  ;;  %v500_v33 = vmul.f32 0.0078125, %v498_v31 }
 0x23c   : > { %v502_v34 = vadd.f32 1e-12, %v500_v33 }
 0x23e   : > { %1412 = vrsqrt.f32 %v502_v34 }
 0x244   : > { %v1411_v40 = vpop.eup %1410 }
 0x245   : > { %v505_v42 = vmul.f32 %v1411_v40, %v491_v8  ;;  %v545_v8 = vsub.s32 2, %v508_v35 }
 0x247   : > { %v511_v46 = vmul.f32 %v510_v43, %v505_v42  ;;  %v546_v10 = vrot.slane %v537_v7, %v545_v8 }
 0x248   : > { %v1413_v44 = vpop.eup %1412 }
 0x249   : > { %v506_v45 = vmul.f32 %v1413_v44, %v492_v12  ;;  %v517_v49 = vadd.f32 %v516_v47, %v511_v46  ;;  %v556_v12 = vrot.slane %v546_v10, %v2189_v38  ;;  %v742_v44 = vld [vmem:[#allocation13] sm:$0x1] }
 0x24b   : > { %v512_v48 = vmul.f32 %v510_v43, %v506_v45  ;;  %v743_v45 = vunpack.c.l.bf16 %v742_v44 }
 0x24d   : > { %v518_v50 = vadd.f32 %v516_v47, %v512_v48  ;;  %v747_v47 = vrot.slane %v743_v45, %v2189_v38 }
 0x24f   : > { %v519_v51 = vpack.c.bf16 %v518_v50, %v517_v49 }
 0x251   : > { %670 = vmatmul.mubr.bf16.vlgmr.msra.gmra.mrb[0].mxu0 %v519_v51 }
 0x324   : > { %v671_v13 = vpop.f32.mrb[0].mxu0 }
 0x325   : > { %v672_v14 = vadd.f32 %v671_v13, %v552_v11  ;;  %v673_v15 = vpop.f32.mrb[1].mxu0 }
 0x326   : > { %v674_v16 = vadd.f32 %v673_v15, %v556_v12  ;;  %v675_v17 = vpop.f32.mrb[2].mxu0 }
 0x327   : > { %v1158_v18 = vmul.f32 -1.442695, %v672_v14  ;;  %v676_v19 = vadd.f32 %v675_v17, %v552_v11  ;;  %v677_v20 = vpop.f32.mrb[3].mxu0  ;;  %v891_v11 = vld [vmem:[#allocation16] sm:$0x1] }
 0x328   : > { %v1159_v21 = vmul.f32 -1.442695, %v674_v16  ;;  %v678_v22 = vadd.f32 %v677_v20, %v556_v12  ;;  %v892_v12 = vunpack.c.l.bf16 %v891_v11 }
 0x329   : > { %1414 = vpow2.f32 %v1158_v18  ;;  %v1160_v23 = vmul.f32 -1.442695, %v676_v19 }
 0x32a   : > { %1416 = vpow2.f32 %v1159_v21  ;;  %v1161_v24 = vmul.f32 -1.442695, %v678_v22  ;;  %v924_v17 = vrot.slane %v892_v12, %v2189_v38 }
 0x32b   : > { %1418 = vpow2.f32 %v1160_v23 }
 0x32c   : > { %1420 = vpow2.f32 %v1161_v24 }
 0x333   : > { %v1415_v25 = vpop.eup %1414 }
 0x334   : > { %v1417_v26 = vpop.eup %1416  ;;  %v692_v27 = vadd.f32 1.0, %v1415_v25 }
 0x335   : > { %v1419_v28 = vpop.eup %1418  ;;  %v693_v29 = vadd.f32 1.0, %v1417_v26 }
 0x336   : > { %v1421_v30 = vpop.eup %1420  ;;  %1422 = vrcp.f32 %v692_v27  ;;  %v694_v31 = vadd.f32 1.0, %v1419_v28 }
 0x337   : > { %1424 = vrcp.f32 %v693_v29  ;;  %v695_v32 = vadd.f32 1.0, %v1421_v30 }
 0x338   : > { %1426 = vrcp.f32 %v694_v31 }
 0x339   : > { %1428 = vrcp.f32 %v695_v32 }
 0x340   : > { %v1423_v33 = vpop.eup %1422 }
 0x341   : > { %v1425_v34 = vpop.eup %1424  ;;  %v704_v37 = vmul.f32 %v1423_v33, %v672_v14 }
 0x342   : > { %v1427_v35 = vpop.eup %1426  ;;  %v705_v40 = vmul.f32 %v1425_v34, %v674_v16 }
 0x343   : > { %v1429_v36 = vpop.eup %1428  ;;  %v706_v39 = vmul.f32 %v1427_v35, %v676_v19 }
 0x344   : > { %v707_v41 = vmul.f32 %v1429_v36, %v678_v22 }
 0x345   : > { %v708_v42 = vpack.c.bf16 %v706_v39, %v704_v37 }
 0x346   : > { %v709_v43 = vpack.c.bf16 %v707_v41, %v705_v40 }
 0x348   : > { %876 = vmatprep.mubr.bf16.mxu1 %v709_v43 }
 0x349   : > { %877 = vmatmul.mubr.bf16.vlgmr.msra.gmra.mrb[0].mxu1 %v708_v42 }
 0x41c   : > { %v1214_v46 = vpop.f32.mrb[0].mxu1 }
 0x41d   : > { %v1215_v48 = vpop.f32.mrb[1].mxu1 }
 0x41e   : > { %v1216_v49 = vadd.f32 %v1215_v48, %v1214_v46  ;;  %v1217_v50 = vpop.f32.mrb[2].mxu1 }
 0x41f   : > { %v1218_v51 = vpop.f32.mrb[3].mxu1 }
 0x420   : > { %v879_v52 = vadd.f32 %v1216_v49, %v747_v47  ;;  %v1219_v53 = vadd.f32 %v1218_v51, %v1217_v50 }
 0x422   : > { %v885_v54 = vmul.f32 0.5, %v879_v52  ;;  %v882_v55 = vadd.f32 %v1219_v53, %v747_v47 }
 0x424   : > { %v886_v56 = vmul.f32 0.5, %v882_v55  ;;  %v887_v57 = vadd.f32 %v2181_v1, %v885_v54 }
 0x426   : > { %893 = vadd.xlane.f32.xlu0 %v887_v57  ;;  %v888_v58 = vadd.f32 %v2184_v2, %v886_v56  ;;  %v889_v2 = vld [vmem:[#allocation14] sm:$0x1] }
 0x427   : > { %v890_v10 = vunpack.c.l.bf16 %v889_v2 }
 0x428   : > { %895 = vadd.xlane.f32.xlu1 %v888_v58 }
 0x429   : > { %v918_v13 = vrot.slane %v890_v10, %v2189_v38 }
 0x4b3   : > { %v894_v59 = vpop.xlane.xlu0 %893 }
 0x4b4   : > { %v897_v60 = vmul.f32 0.0078125, %v894_v59 }
 0x4b5   : > { %v896_v61 = vpop.xlane.xlu1 %895 }
 0x4b6   : > { %v899_v62 = vsub.f32 %v887_v57, %v897_v60  ;;  %v898_v63 = vmul.f32 0.0078125, %v896_v61 }
 0x4b8   : > { %v900_v0 = vsub.f32 %v888_v58, %v898_v63  ;;  %v901_v3 = vmul.f32 %v899_v62, %v899_v62 }
 0x4ba   : > { %903 = vadd.xlane.f32.xlu0 %v901_v3  ;;  %v902_v4 = vmul.f32 %v900_v0, %v900_v0 }
 0x4bc   : > { %905 = vadd.xlane.f32.xlu1 %v902_v4 }
 0x547   : > { %v904_v5 = vpop.xlane.xlu0 %903 }
 0x548   : > { %v907_v6 = vmul.f32 0.0078125, %v904_v5 }
 0x549   : > { %v906_v7 = vpop.xlane.xlu1 %905 }
 0x54a   : > { %v909_v8 = vadd.f32 1e-12, %v907_v6  ;;  %v908_v9 = vmul.f32 0.0078125, %v906_v7 }
 0x54c   : > { %1430 = vrsqrt.f32 %v909_v8  ;;  %v910_v1 = vadd.f32 1e-12, %v908_v9 }
 0x54e   : > { %1432 = vrsqrt.f32 %v910_v1 }
 0x556   : > { %v1431_v14 = vpop.eup %1430 }
 0x557   : > { %v913_v15 = vmul.f32 %v1431_v14, %v899_v62 }
 0x558   : > { %v1433_v16 = vpop.eup %1432 }
 0x559   : > { %v919_v18 = vmul.f32 %v918_v13, %v913_v15  ;;  %v914_v19 = vmul.f32 %v1433_v16, %v900_v0 }
 0x55b   : > { %v920_v20 = vmul.f32 %v918_v13, %v914_v19  ;;  %v925_v21 = vadd.f32 %v924_v17, %v919_v18 }
 0x55d   : > { %v926_v22 = vadd.f32 %v924_v17, %v920_v20 }
 0x55f   : > { %v1196_v38 = vpack.c.bf16 %v926_v22, %v925_v21 }
 0x561   : > { %1197 = vst [vmem:[%s472_s9] sm:$0xff] %v1196_v38  }
 0x562   : > { %1701 = shalt.err (!%p1698_p8)
}
 0x563   : > { %s1702_s1 = scalar_lea.hbm %s2207_s19, 128  ;;  %s1706_s9 = scalar_lea.hbm %s2297_s3, 256 }
 0x564   : > { %p1703_p9 = scmp.ne.s32.totalorder %s2207_s19, %s1702_s1  ;;  %p1707_p3 = scmp.lt.u32.totalorder %s2207_s19, %s2297_s3 }
 0x565   : > { %p1708_p7 = scmp.lt.u32.totalorder %s1706_s9, %s1702_s1  ;;  %p1710_p11 = scmp.lt.u32.totalorder %s1702_s1, %s2207_s19 }
 0x566   : > { %p1704_p4 = pnand %p1703_p9, %p2298_p0 }
 0x567   : > { %p1709_p12 = por %p1708_p7, %p1707_p3 }
 0x568   : > { %p1705_p6 = pneg %p1704_p4 }
 0x569   : > { %p1711_p5 = por %p1710_p11, %p1709_p12 }
 0x56b   : > { %p1712_p1 = pnand %p1711_p5, %p1705_p6 }
 0x56d   : > { %1715 = shalt.err (!%p1712_p1)
}
 0x56e   : > { %s1803_s15 = smov 64   ;;  %s1804_s28 = smov 4  }
 0x56f   : > { %1254 = dma.vmem_to_hbm [thread:$0]  (%p2298_p0), %s2209_s12, 128, %s2207_s19, %s938_s24, %s1803_s15, %s1803_s15, %s1804_s28  }
 0x570 PF: > { %s968_s18 = sand.u32 1, %s1766_s30   ;;  %p2299_p10 = scmp.ne.s32.totalorder %s2291_s25, 0 }
 0x571   : > { %p2300_p13 = scmp.ge.s32.totalorder %s1786_s14, 2  ;;  %s969_s26 = scalar_lea.sflag [#allocation4], %s968_s18 }
 0x573   : > { %p1286_p2 = pnand %p2300_p13, %p2299_p10 }
 0x575   : > { %1761 = dma.done.wait (!%p1286_p2), %s969_s26, 128  }
 0x576   : > { %1763 = vsyncadd (!%p1286_p2), %s969_s26, 4294967168  ;;  %s29_s14 = sadd.s32 1, %s1786_s14   ;;  %s2301_s30 = smov %s1770_s10 }
 0x577   : > { %p26_p8 = scmp.ge.s32.totalorder %s29_s14, 4   ;;  %s2302_s10 = smov %s1774_s11 }
 0x578   : > { %s2303_s11 = smov %s2099_s20  ;;  %s2304_s12 = smov %s1782_s13 }
 0x579   : > { %s2305_s13 = smov %s2307_s23  ;;  %28 = sbr.rel (!%p26_p8) target bundleno = 14 (0xe), region = 133 }
 0x580   :  { %974 = vsyncpa [#allocation3], 1 }
 0x581   :  { %976 = vsyncpa [#allocation3 + $0x1], 1 }
 0x582   :  { %977 = vsyncpa [#allocation6], 1 }
 0x583   :  { %978 = vsyncpa [#allocation9], 1 }
 0x584   :  { %979 = vsyncpa [#allocation12], 1 }
 0x585   :  { %980 = vsyncpa [#allocation15], 1 }
 0x586   :  { %981 = vsyncpa [#allocation4], 1 }
 0x587   :  { %983 = vsyncpa [#allocation4 + $0x1], 1 }

</bundles_post_ra>
